<compile_context>
chip_gen: v7x
topology: tpu7x:2x2x1
jax: 0.10.0
libtpu: 0.0.40
codegen_flags: <defaults>
</compile_context>

<pallas_src>
import jax
import jax.numpy as jnp
from jax.experimental import pallas as pl
from jax.experimental.pallas import tpu as pltpu

EPS = 1e-5
_LAYER_ORDER = ("m1c1", "m1c2", "m2c1", "m2c2", "r1c1", "r1c2")


# ------------------------- in-kernel building blocks -------------------------

def _conv3x3_in(pad_ref, w_ref, *, Hp, Wp, stride, relu):
    """3x3 conv over a reflect-padded, flattened (Hp*Wp, Cin) VMEM ref, followed
    by InstanceNorm2d(affine=False, eps=1e-5) and optional ReLU.

    Implemented as 9 shifted-window matmul-accumulations on the MXU (operands
    in w_ref.dtype, f32 accumulation).  Returns an f32 value of shape
    (L, Cout); valid output rows live at index oh*Wp + ow (oh<Ho, ow<Wo), the
    remaining rows are halo garbage that is masked out of the IN statistics
    and never read downstream.
    """
    Ho = (Hp - 3) // stride + 1
    Wo = (Wp - 3) // stride + 1
    L = (Ho - 1) * Wp + Wo

    acc = None
    for kh in range(3):
        for kw in range(3):
            base = kh * Wp + kw
            if stride == 1:
                win = pad_ref[base:base + L, :]
            else:
                win = pad_ref[pl.ds(base, L, stride=stride), :]
            part = jnp.dot(win.astype(w_ref.dtype), w_ref[kh * 3 + kw],
                           preferred_element_type=jnp.float32)
            acc = part if acc is None else acc + part

    # InstanceNorm2d (biased variance) over the Ho*Wo valid rows, per channel.
    row = jax.lax.broadcasted_iota(jnp.int32, (L, 1), 0)
    valid = (row % Wp) < Wo
    inv_n = 1.0 / float(Ho * Wo)
    mean = jnp.sum(jnp.where(valid, acc, 0.0), axis=0, keepdims=True) * inv_n
    cent = jnp.where(valid, acc - mean, 0.0)
    var = jnp.sum(cent * cent, axis=0, keepdims=True) * inv_n
    y = (acc - mean) * jax.lax.rsqrt(var + EPS)
    if relu:
        y = jnp.maximum(y, 0.0)
    return y, Ho, Wo


def _store_reflect_pad(dst_ref, y, Ho, Wo, Wp_src):
    """Scatter the valid rows of y ((L, C) value, valid at oh*Wp_src+ow) into
    dst_ref, the flattened reflect-padded ((Ho+2)*(Wo+2), C) VMEM buffer
    consumed by the next conv layer (ReflectionPad2d(1) semantics)."""
    Wp_dst = Wo + 2
    for oh in range(Ho):
        rowv = y[oh * Wp_src:oh * Wp_src + Wo, :].astype(dst_ref.dtype)
        dst_rows = [oh + 1]
        if oh == 1:
            dst_rows.append(0)            # top reflected row
        if oh == Ho - 2:
            dst_rows.append(Ho + 1)       # bottom reflected row
        for hp in dst_rows:
            off = hp * Wp_dst
            dst_ref[off + 1:off + 1 + Wo, :] = rowv
            dst_ref[off:off + 1, :] = rowv[1:2, :]                    # left
            dst_ref[off + Wo + 1:off + Wo + 2, :] = rowv[Wo - 2:Wo - 1, :]


def _build_encoder_kernel(H, W):
    H2, W2, H4, W4 = H // 2, W // 2, H // 4, W // 4
    # (Hp_in, Wp_in, stride, relu) per conv layer, in _LAYER_ORDER order.
    plan = (
        (H + 2,  W + 2,  2, True),    # model1: 3x3 s2   Cin   -> d
        (H2 + 2, W2 + 2, 1, True),    # model1: 3x3 s1   d     -> 2d
        (H2 + 2, W2 + 2, 1, True),    # model2: 3x3 s1   2d    -> 2d
        (H2 + 2, W2 + 2, 2, True),    # model2: 3x3 s2   2d    -> 4d
        (H4 + 2, W4 + 2, 1, True),    # ResBlock conv1   4d    -> 4d
        (H4 + 2, W4 + 2, 1, False),   # ResBlock conv2   4d    -> 4d
    )

    def kernel(x_ref, w1, w2, w3, w4, w5, w6, o_ref, p1, p2, p3, p4, p5):
        w_refs = (w1, w2, w3, w4, w5, w6)
        pad_refs = (x_ref, p1, p2, p3, p4, p5)
        y = None
        y_res = None
        res_wp = None
        for li, (Hp, Wp, stride, relu) in enumerate(plan):
            y, Ho, Wo = _conv3x3_in(pad_refs[li], w_refs[li],
                                    Hp=Hp, Wp=Wp, stride=stride, relu=relu)
            if li == 3:                 # ResBlock input -> residual (kept f32)
                y_res, res_wp = y, Wp
            if li < 5:
                _store_reflect_pad(pad_refs[li + 1], y, Ho, Wo, Wp)
        # Final: ResBlock conv2 output (no activation) + residual.
        wp6 = W4 + 2
        for oh in range(H4):
            rows = (y[oh * wp6:oh * wp6 + W4, :] +
                    y_res[oh * res_wp:oh * res_wp + W4, :])
            o_ref[oh * W4:(oh + 1) * W4, :] = rows.astype(o_ref.dtype)

    return kernel


# ------------------------------ pallas wrapper -------------------------------

def _encoder_pallas(xpad_flat, packed_ws, H, W):
    B, _, cin = xpad_flat.shape
    d = packed_ws["m1c1"].shape[-1]
    assert H % 4 == 0 and W % 4 == 0 and H >= 8 and W >= 8
    H2, W2, H4, W4 = H // 2, W // 2, H // 4, W // 4
    c_out = 4 * d
    n_out = H4 * W4

    kernel = _build_encoder_kernel(H, W)

    in_specs = [pl.BlockSpec((None, (H + 2) * (W + 2), cin),
                             lambda b: (b, 0, 0))]
    for name in _LAYER_ORDER:
        shp = packed_ws[name].shape
        in_specs.append(pl.BlockSpec(shp, lambda b: (0, 0, 0)))

    scratch = [
        pltpu.VMEM(((H2 + 2) * (W2 + 2), d), jnp.float32),
        pltpu.VMEM(((H2 + 2) * (W2 + 2), 2 * d), jnp.float32),
        pltpu.VMEM(((H2 + 2) * (W2 + 2), 2 * d), jnp.float32),
        pltpu.VMEM(((H4 + 2) * (W4 + 2), 4 * d), jnp.float32),
        pltpu.VMEM(((H4 + 2) * (W4 + 2), 4 * d), jnp.float32),
    ]

    return pl.pallas_call(
        kernel,
        out_shape=jax.ShapeDtypeStruct((B, n_out, c_out), jnp.float32),
        grid=(B,),
        in_specs=in_specs,
        out_specs=pl.BlockSpec((None, n_out, c_out), lambda b: (b, 0, 0)),
        scratch_shapes=scratch,
        compiler_params=pltpu.CompilerParams(
            dimension_semantics=("parallel",)),
    )(xpad_flat, *(packed_ws[n] for n in _LAYER_ORDER))


@jax.jit
def residual_encoder_forward(x_nchw, packed_ws):
    B, Cin, H, W = x_nchw.shape
    d = packed_ws["m1c1"].shape[-1]
    x = jnp.transpose(x_nchw, (0, 2, 3, 1))                      # NCHW -> NHWC
    xp = jnp.pad(x, ((0, 0), (1, 1), (1, 1), (0, 0)), mode="reflect")
    xpad_flat = xp.reshape(B, (H + 2) * (W + 2), Cin)            # halo only
    y = _encoder_pallas(xpad_flat, packed_ws, H, W)              # (B, N, 4d)
    y = y.reshape(B, H // 4, W // 4, 4 * d)
    return jnp.transpose(y, (0, 3, 1, 2))                        # NHWC -> NCHW


# ------------------------------ parameters -----------------------------------

def _conv_params(key, cin, cout, k=3):
    k_w, k_b = jax.random.split(key)
    fan_in = cin * k * k
    w = jax.random.normal(k_w, (cout, cin, k, k), jnp.float32) * jnp.sqrt(
        2.0 / fan_in)
    b = jax.random.normal(k_b, (cout,), jnp.float32) * 0.1
    return w, b


def init_params(key, input_dim, d):
    # TODO(synk): reference applies weights_init('kaiming') (helper not in the
    # provided source); a deterministic kaiming-normal-style init is used.
    ks = jax.random.split(key, 6)
    return {
        "m1c1": _conv_params(ks[0], input_dim, d),
        "m1c2": _conv_params(ks[1], d, 2 * d),
        "m2c1": _conv_params(ks[2], 2 * d, 2 * d),
        "m2c2": _conv_params(ks[3], 2 * d, 4 * d),
        "r1c1": _conv_params(ks[4], 4 * d, 4 * d),
        "r1c2": _conv_params(ks[5], 4 * d, 4 * d),
    }


def pack_weights(params, compute_dtype):
    """torch (Cout, Cin, 3, 3) -> (9, Cin, Cout), tap index kh*3+kw.
    Conv biases are intentionally NOT packed: under InstanceNorm2d(affine=False)
    the per-channel bias is exactly cancelled by the mean subtraction."""
    packed = {}
    for name, (w, _b) in params.items():
        cout, cin, k, _ = w.shape
        packed[name] = (jnp.transpose(w, (2, 3, 1, 0))
                        .reshape(k * k, cin, cout).astype(compute_dtype))
    return packed


# ---------------------------- pure-JAX reference -----------------------------

def _ref_block(x, w, b, *, stride, relu, compute_dtype, residual=None):
    xp = jnp.pad(x, ((0, 0), (1, 1), (1, 1), (0, 0)), mode="reflect")
    wh = jnp.transpose(w, (2, 3, 1, 0))                          # HWIO
    y = jax.lax.conv_general_dilated(
        xp.astype(compute_dtype), wh.astype(compute_dtype),
        window_strides=(stride, stride), padding="VALID",
        dimension_numbers=("NHWC", "HWIO", "NHWC"),
        preferred_element_type=jnp.float32)
    y = y + b[None, None, None, :]           # cancelled exactly by IN below
    mean = jnp.mean(y, axis=(1, 2), keepdims=True)
    var = jnp.mean((y - mean) ** 2, axis=(1, 2), keepdims=True)
    y = (y - mean) * jax.lax.rsqrt(var + EPS)
    if residual is not None:
        y = y + residual
    if relu:
        y = jnp.maximum(y, 0.0)
    return y


def ref_forward(x_nchw, params, compute_dtype):
    x = jnp.transpose(x_nchw, (0, 2, 3, 1))
    def blk(z, name, **kw):
        return _ref_block(z, *params[name], compute_dtype=compute_dtype, **kw)
    x = blk(x, "m1c1", stride=2, relu=True)
    x = blk(x, "m1c2", stride=1, relu=True)
    x = blk(x, "m2c1", stride=1, relu=True)
    x = blk(x, "m2c2", stride=2, relu=True)
    res = x
    h = blk(x, "r1c1", stride=1, relu=True)
    x = blk(h, "r1c2", stride=1, relu=False, residual=res)
    return jnp.transpose(x, (0, 3, 1, 2))


# ----------------------------------- main -------------------------------------

if __name__ == "__main__":
    B, Cin, H, W = 2, 4, 16, 16
    d = 8                                    # bottleneck_dim; output_dim = 4*d

    x = jax.random.normal(jax.random.PRNGKey(0), (B, Cin, H, W), jnp.float32)
    params = init_params(jax.random.PRNGKey(1), Cin, d)

    # Perf path: bf16 MXU matmuls, f32 accumulation / InstanceNorm.
    out = jax.block_until_ready(
        residual_encoder_forward(x, pack_weights(params, jnp.bfloat16)))
    assert out.shape == (B, 4 * d, H // 4, W // 4), out.shape

    # Tight structural correctness check: f32 matmuls vs the pure-JAX module
    # reference (catches any layout / tap-ordering / reflect-pad regression).
    out_f32 = jax.block_until_ready(
        residual_encoder_forward(x, pack_weights(params, jnp.float32)))
    ref_f32 = jax.block_until_ready(ref_forward(x, params, jnp.float32))
    err_f32 = float(jnp.max(jnp.abs(out_f32 - ref_f32)))
    assert err_f32 < 1e-3, f"f32 mismatch vs reference: {err_f32}"

    # Mixed-precision path vs a reference using the same bf16-matmul policy.
    ref_bf16 = jax.block_until_ready(ref_forward(x, params, jnp.bfloat16))
    err_bf16 = float(jnp.max(jnp.abs(out - ref_bf16)))
    assert err_bf16 < 2e-2, f"bf16 mismatch vs reference: {err_bf16}"

    print("KERNEL_OK")
</pallas_src>

<mosaic_0001>
module attributes {stable_mosaic.version = 11 : i64} {
  func.func @kernel(%arg0: i32, %arg1: memref<1x324x4xf32, #tpu.memory_space<vmem>>, %arg2: memref<9x4x8xbf16, #tpu.memory_space<vmem>>, %arg3: memref<9x8x16xbf16, #tpu.memory_space<vmem>>, %arg4: memref<9x16x16xbf16, #tpu.memory_space<vmem>>, %arg5: memref<9x16x32xbf16, #tpu.memory_space<vmem>>, %arg6: memref<9x32x32xbf16, #tpu.memory_space<vmem>>, %arg7: memref<9x32x32xbf16, #tpu.memory_space<vmem>>, %arg8: memref<1x16x32xf32, #tpu.memory_space<vmem>>, %arg9: memref<100x8xf32, #tpu.memory_space<vmem>>, %arg10: memref<100x16xf32, #tpu.memory_space<vmem>>, %arg11: memref<100x16xf32, #tpu.memory_space<vmem>>, %arg12: memref<36x32xf32, #tpu.memory_space<vmem>>, %arg13: memref<36x32xf32, #tpu.memory_space<vmem>>) attributes {dimension_semantics = [#tpu.dimension_semantics<parallel>], iteration_bounds = array<i64: 2>, scalar_prefetch = 0 : i64, scratch_operands = 5 : i64, tpu.core_type = #tpu.core_type<tc>, window_params = [{transform_indices = @transform_0, window_bounds = array<i64: 1, 324, 4>}, {pipeline_mode = #tpu.pipeline_mode<synchronous>, transform_indices = @transform_1, window_bounds = array<i64: 9, 4, 8>}, {pipeline_mode = #tpu.pipeline_mode<synchronous>, transform_indices = @transform_2, window_bounds = array<i64: 9, 8, 16>}, {pipeline_mode = #tpu.pipeline_mode<synchronous>, transform_indices = @transform_3, window_bounds = array<i64: 9, 16, 16>}, {pipeline_mode = #tpu.pipeline_mode<synchronous>, transform_indices = @transform_4, window_bounds = array<i64: 9, 16, 32>}, {pipeline_mode = #tpu.pipeline_mode<synchronous>, transform_indices = @transform_5, window_bounds = array<i64: 9, 32, 32>}, {pipeline_mode = #tpu.pipeline_mode<synchronous>, transform_indices = @transform_6, window_bounds = array<i64: 9, 32, 32>}, {transform_indices = @transform_7, window_bounds = array<i64: 1, 16, 32>}]} {
    %c0 = arith.constant 0 : index
    %c0_0 = arith.constant 0 : index
    %c0_1 = arith.constant 0 : index
    %0 = tpu.strided_load %arg1[%c0, %c0_0, %c0_1] {strides = array<i32: 1, 2, 1>} : memref<1x324x4xf32, #tpu.memory_space<vmem>>, vector<1x134x4xf32>
    %1 = vector.shape_cast %0 : vector<1x134x4xf32> to vector<134x4xf32>
    %2 = arith.truncf %1 : vector<134x4xf32> to vector<134x4xbf16>
    %c0_2 = arith.constant 0 : index
    %c0_3 = arith.constant 0 : index
    %c0_4 = arith.constant 0 : index
    %3 = vector.load %arg2[%c0_2, %c0_3, %c0_4] : memref<9x4x8xbf16, #tpu.memory_space<vmem>>, vector<1x4x8xbf16>
    %4 = vector.shape_cast %3 : vector<1x4x8xbf16> to vector<4x8xbf16>
    %cst = arith.constant dense<0.000000e+00> : vector<134x8xf32>
    %5 = tpu.matmul %2, %4, %cst {dimension_numbers = #tpu.dot_dimension_numbers<[1], [0], [0], [1], [0, 0, 1, 1], [], []>} : vector<134x4xbf16>, vector<4x8xbf16>, vector<134x8xf32> -> vector<134x8xf32>
    %c0_5 = arith.constant 0 : index
    %c1 = arith.constant 1 : index
    %c0_6 = arith.constant 0 : index
    %6 = tpu.strided_load %arg1[%c0_5, %c1, %c0_6] {strides = array<i32: 1, 2, 1>} : memref<1x324x4xf32, #tpu.memory_space<vmem>>, vector<1x134x4xf32>
    %7 = vector.shape_cast %6 : vector<1x134x4xf32> to vector<134x4xf32>
    %8 = arith.truncf %7 : vector<134x4xf32> to vector<134x4xbf16>
    %c1_7 = arith.constant 1 : index
    %c0_8 = arith.constant 0 : index
    %c0_9 = arith.constant 0 : index
    %9 = vector.load %arg2[%c1_7, %c0_8, %c0_9] : memref<9x4x8xbf16, #tpu.memory_space<vmem>>, vector<1x4x8xbf16>
    %10 = vector.shape_cast %9 : vector<1x4x8xbf16> to vector<4x8xbf16>
    %cst_10 = arith.constant dense<0.000000e+00> : vector<134x8xf32>
    %11 = tpu.matmul %8, %10, %cst_10 {dimension_numbers = #tpu.dot_dimension_numbers<[1], [0], [0], [1], [0, 0, 1, 1], [], []>} : vector<134x4xbf16>, vector<4x8xbf16>, vector<134x8xf32> -> vector<134x8xf32>
    %12 = arith.addf %5, %11 : vector<134x8xf32>
    %c0_11 = arith.constant 0 : index
    %c2 = arith.constant 2 : index
    %c0_12 = arith.constant 0 : index
    %13 = tpu.strided_load %arg1[%c0_11, %c2, %c0_12] {strides = array<i32: 1, 2, 1>} : memref<1x324x4xf32, #tpu.memory_space<vmem>>, vector<1x134x4xf32>
    %14 = vector.shape_cast %13 : vector<1x134x4xf32> to vector<134x4xf32>
    %15 = arith.truncf %14 : vector<134x4xf32> to vector<134x4xbf16>
    %c2_13 = arith.constant 2 : index
    %c0_14 = arith.constant 0 : index
    %c0_15 = arith.constant 0 : index
    %16 = vector.load %arg2[%c2_13, %c0_14, %c0_15] : memref<9x4x8xbf16, #tpu.memory_space<vmem>>, vector<1x4x8xbf16>
    %17 = vector.shape_cast %16 : vector<1x4x8xbf16> to vector<4x8xbf16>
    %cst_16 = arith.constant dense<0.000000e+00> : vector<134x8xf32>
    %18 = tpu.matmul %15, %17, %cst_16 {dimension_numbers = #tpu.dot_dimension_numbers<[1], [0], [0], [1], [0, 0, 1, 1], [], []>} : vector<134x4xbf16>, vector<4x8xbf16>, vector<134x8xf32> -> vector<134x8xf32>
    %19 = arith.addf %12, %18 : vector<134x8xf32>
    %c0_17 = arith.constant 0 : index
    %c18 = arith.constant 18 : index
    %c0_18 = arith.constant 0 : index
    %20 = tpu.strided_load %arg1[%c0_17, %c18, %c0_18] {strides = array<i32: 1, 2, 1>} : memref<1x324x4xf32, #tpu.memory_space<vmem>>, vector<1x134x4xf32>
    %21 = vector.shape_cast %20 : vector<1x134x4xf32> to vector<134x4xf32>
    %22 = arith.truncf %21 : vector<134x4xf32> to vector<134x4xbf16>
    %c3 = arith.constant 3 : index
    %c0_19 = arith.constant 0 : index
    %c0_20 = arith.constant 0 : index
    %23 = vector.load %arg2[%c3, %c0_19, %c0_20] : memref<9x4x8xbf16, #tpu.memory_space<vmem>>, vector<1x4x8xbf16>
    %24 = vector.shape_cast %23 : vector<1x4x8xbf16> to vector<4x8xbf16>
    %cst_21 = arith.constant dense<0.000000e+00> : vector<134x8xf32>
    %25 = tpu.matmul %22, %24, %cst_21 {dimension_numbers = #tpu.dot_dimension_numbers<[1], [0], [0], [1], [0, 0, 1, 1], [], []>} : vector<134x4xbf16>, vector<4x8xbf16>, vector<134x8xf32> -> vector<134x8xf32>
    %26 = arith.addf %19, %25 : vector<134x8xf32>
    %c0_22 = arith.constant 0 : index
    %c19 = arith.constant 19 : index
    %c0_23 = arith.constant 0 : index
    %27 = tpu.strided_load %arg1[%c0_22, %c19, %c0_23] {strides = array<i32: 1, 2, 1>} : memref<1x324x4xf32, #tpu.memory_space<vmem>>, vector<1x134x4xf32>
    %28 = vector.shape_cast %27 : vector<1x134x4xf32> to vector<134x4xf32>
    %29 = arith.truncf %28 : vector<134x4xf32> to vector<134x4xbf16>
    %c4 = arith.constant 4 : index
    %c0_24 = arith.constant 0 : index
    %c0_25 = arith.constant 0 : index
    %30 = vector.load %arg2[%c4, %c0_24, %c0_25] : memref<9x4x8xbf16, #tpu.memory_space<vmem>>, vector<1x4x8xbf16>
    %31 = vector.shape_cast %30 : vector<1x4x8xbf16> to vector<4x8xbf16>
    %cst_26 = arith.constant dense<0.000000e+00> : vector<134x8xf32>
    %32 = tpu.matmul %29, %31, %cst_26 {dimension_numbers = #tpu.dot_dimension_numbers<[1], [0], [0], [1], [0, 0, 1, 1], [], []>} : vector<134x4xbf16>, vector<4x8xbf16>, vector<134x8xf32> -> vector<134x8xf32>
    %33 = arith.addf %26, %32 : vector<134x8xf32>
    %c0_27 = arith.constant 0 : index
    %c20 = arith.constant 20 : index
    %c0_28 = arith.constant 0 : index
    %34 = tpu.strided_load %arg1[%c0_27, %c20, %c0_28] {strides = array<i32: 1, 2, 1>} : memref<1x324x4xf32, #tpu.memory_space<vmem>>, vector<1x134x4xf32>
    %35 = vector.shape_cast %34 : vector<1x134x4xf32> to vector<134x4xf32>
    %36 = arith.truncf %35 : vector<134x4xf32> to vector<134x4xbf16>
    %c5 = arith.constant 5 : index
    %c0_29 = arith.constant 0 : index
    %c0_30 = arith.constant 0 : index
    %37 = vector.load %arg2[%c5, %c0_29, %c0_30] : memref<9x4x8xbf16, #tpu.memory_space<vmem>>, vector<1x4x8xbf16>
    %38 = vector.shape_cast %37 : vector<1x4x8xbf16> to vector<4x8xbf16>
    %cst_31 = arith.constant dense<0.000000e+00> : vector<134x8xf32>
    %39 = tpu.matmul %36, %38, %cst_31 {dimension_numbers = #tpu.dot_dimension_numbers<[1], [0], [0], [1], [0, 0, 1, 1], [], []>} : vector<134x4xbf16>, vector<4x8xbf16>, vector<134x8xf32> -> vector<134x8xf32>
    %40 = arith.addf %33, %39 : vector<134x8xf32>
    %c0_32 = arith.constant 0 : index
    %c36 = arith.constant 36 : index
    %c0_33 = arith.constant 0 : index
    %41 = tpu.strided_load %arg1[%c0_32, %c36, %c0_33] {strides = array<i32: 1, 2, 1>} : memref<1x324x4xf32, #tpu.memory_space<vmem>>, vector<1x134x4xf32>
    %42 = vector.shape_cast %41 : vector<1x134x4xf32> to vector<134x4xf32>
    %43 = arith.truncf %42 : vector<134x4xf32> to vector<134x4xbf16>
    %c6 = arith.constant 6 : index
    %c0_34 = arith.constant 0 : index
    %c0_35 = arith.constant 0 : index
    %44 = vector.load %arg2[%c6, %c0_34, %c0_35] : memref<9x4x8xbf16, #tpu.memory_space<vmem>>, vector<1x4x8xbf16>
    %45 = vector.shape_cast %44 : vector<1x4x8xbf16> to vector<4x8xbf16>
    %cst_36 = arith.constant dense<0.000000e+00> : vector<134x8xf32>
    %46 = tpu.matmul %43, %45, %cst_36 {dimension_numbers = #tpu.dot_dimension_numbers<[1], [0], [0], [1], [0, 0, 1, 1], [], []>} : vector<134x4xbf16>, vector<4x8xbf16>, vector<134x8xf32> -> vector<134x8xf32>
    %47 = arith.addf %40, %46 : vector<134x8xf32>
    %c0_37 = arith.constant 0 : index
    %c37 = arith.constant 37 : index
    %c0_38 = arith.constant 0 : index
    %48 = tpu.strided_load %arg1[%c0_37, %c37, %c0_38] {strides = array<i32: 1, 2, 1>} : memref<1x324x4xf32, #tpu.memory_space<vmem>>, vector<1x134x4xf32>
    %49 = vector.shape_cast %48 : vector<1x134x4xf32> to vector<134x4xf32>
    %50 = arith.truncf %49 : vector<134x4xf32> to vector<134x4xbf16>
    %c7 = arith.constant 7 : index
    %c0_39 = arith.constant 0 : index
    %c0_40 = arith.constant 0 : index
    %51 = vector.load %arg2[%c7, %c0_39, %c0_40] : memref<9x4x8xbf16, #tpu.memory_space<vmem>>, vector<1x4x8xbf16>
    %52 = vector.shape_cast %51 : vector<1x4x8xbf16> to vector<4x8xbf16>
    %cst_41 = arith.constant dense<0.000000e+00> : vector<134x8xf32>
    %53 = tpu.matmul %50, %52, %cst_41 {dimension_numbers = #tpu.dot_dimension_numbers<[1], [0], [0], [1], [0, 0, 1, 1], [], []>} : vector<134x4xbf16>, vector<4x8xbf16>, vector<134x8xf32> -> vector<134x8xf32>
    %54 = arith.addf %47, %53 : vector<134x8xf32>
    %c0_42 = arith.constant 0 : index
    %c38 = arith.constant 38 : index
    %c0_43 = arith.constant 0 : index
    %55 = tpu.strided_load %arg1[%c0_42, %c38, %c0_43] {strides = array<i32: 1, 2, 1>} : memref<1x324x4xf32, #tpu.memory_space<vmem>>, vector<1x134x4xf32>
    %56 = vector.shape_cast %55 : vector<1x134x4xf32> to vector<134x4xf32>
    %57 = arith.truncf %56 : vector<134x4xf32> to vector<134x4xbf16>
    %c8 = arith.constant 8 : index
    %c0_44 = arith.constant 0 : index
    %c0_45 = arith.constant 0 : index
    %58 = vector.load %arg2[%c8, %c0_44, %c0_45] : memref<9x4x8xbf16, #tpu.memory_space<vmem>>, vector<1x4x8xbf16>
    %59 = vector.shape_cast %58 : vector<1x4x8xbf16> to vector<4x8xbf16>
    %cst_46 = arith.constant dense<0.000000e+00> : vector<134x8xf32>
    %60 = tpu.matmul %57, %59, %cst_46 {dimension_numbers = #tpu.dot_dimension_numbers<[1], [0], [0], [1], [0, 0, 1, 1], [], []>} : vector<134x4xbf16>, vector<4x8xbf16>, vector<134x8xf32> -> vector<134x8xf32>
    %61 = arith.addf %54, %60 : vector<134x8xf32>
    %62 = tpu.iota {dimensions = array<i32: 0>} : vector<134x1xi32>
    %c18_i32 = arith.constant 18 : i32
    %c0_i32 = arith.constant 0 : i32
    %63 = arith.cmpi eq, %c18_i32, %c0_i32 : i32
    %c1_i32 = arith.constant 1 : i32
    %64 = arith.select %63, %c1_i32, %c18_i32 : i32
    %65 = vector.broadcast %64 : i32 to vector<134x1xi32>
    %66 = arith.remsi %62, %65 : vector<134x1xi32>
    %c0_i32_47 = arith.constant 0 : i32
    %67 = vector.broadcast %c0_i32_47 : i32 to vector<134x1xi32>
    %68 = arith.cmpi ne, %66, %67 : vector<134x1xi32>
    %c0_i32_48 = arith.constant 0 : i32
    %69 = vector.broadcast %c0_i32_48 : i32 to vector<134x1xi32>
    %70 = arith.cmpi slt, %66, %69 : vector<134x1xi32>
    %c0_i32_49 = arith.constant 0 : i32
    %71 = arith.cmpi slt, %64, %c0_i32_49 : i32
    %72 = vector.broadcast %71 : i1 to vector<134x1xi1>
    %73 = vector.broadcast %72 : vector<134x1xi1> to vector<134x1xi1>
    %74 = arith.xori %70, %73 : vector<134x1xi1>
    %75 = arith.andi %74, %68 : vector<134x1xi1>
    %76 = vector.broadcast %64 : i32 to vector<134x1xi32>
    %77 = arith.addi %66, %76 : vector<134x1xi32>
    %78 = arith.select %75, %77, %66 : vector<134x1xi1>, vector<134x1xi32>
    %c8_i32 = arith.constant 8 : i32
    %79 = vector.broadcast %c8_i32 : i32 to vector<134x1xi32>
    %80 = arith.cmpi slt, %78, %79 : vector<134x1xi32>
    %cst_50 = arith.constant 0.000000e+00 : f32
    %81 = vector.shape_cast %80 : vector<134x1xi1> to vector<134x1xi1>
    %82 = vector.broadcast %81 : vector<134x1xi1> to vector<134x8xi1>
    %83 = vector.broadcast %cst_50 : f32 to vector<134x8xf32>
    %84 = arith.select %82, %61, %83 : vector<134x8xi1>, vector<134x8xf32>
    %cst_51 = arith.constant dense<0.000000e+00> : vector<8xf32>
    %85 = vector.multi_reduction <add>, %84, %cst_51 [0] : vector<134x8xf32> to vector<8xf32>
    %86 = vector.shape_cast %85 : vector<8xf32> to vector<1x8xf32>
    %cst_52 = arith.constant 1.562500e-02 : f32
    %87 = vector.broadcast %cst_52 : f32 to vector<1x8xf32>
    %88 = arith.mulf %86, %87 : vector<1x8xf32>
    %89 = vector.broadcast %88 : vector<1x8xf32> to vector<134x8xf32>
    %90 = arith.subf %61, %89 : vector<134x8xf32>
    %cst_53 = arith.constant 0.000000e+00 : f32
    %91 = vector.shape_cast %80 : vector<134x1xi1> to vector<134x1xi1>
    %92 = vector.broadcast %91 : vector<134x1xi1> to vector<134x8xi1>
    %93 = vector.broadcast %cst_53 : f32 to vector<134x8xf32>
    %94 = arith.select %92, %90, %93 : vector<134x8xi1>, vector<134x8xf32>
    %95 = arith.mulf %94, %94 : vector<134x8xf32>
    %cst_54 = arith.constant dense<0.000000e+00> : vector<8xf32>
    %96 = vector.multi_reduction <add>, %95, %cst_54 [0] : vector<134x8xf32> to vector<8xf32>
    %97 = vector.shape_cast %96 : vector<8xf32> to vector<1x8xf32>
    %cst_55 = arith.constant 1.562500e-02 : f32
    %98 = vector.broadcast %cst_55 : f32 to vector<1x8xf32>
    %99 = arith.mulf %97, %98 : vector<1x8xf32>
    %100 = vector.broadcast %88 : vector<1x8xf32> to vector<134x8xf32>
    %101 = arith.subf %61, %100 : vector<134x8xf32>
    %cst_56 = arith.constant 9.99999974E-6 : f32
    %102 = vector.broadcast %cst_56 : f32 to vector<1x8xf32>
    %103 = arith.addf %99, %102 : vector<1x8xf32>
    %104 = math.rsqrt %103 : vector<1x8xf32>
    %105 = vector.broadcast %104 : vector<1x8xf32> to vector<134x8xf32>
    %106 = arith.mulf %101, %105 : vector<134x8xf32>
    %cst_57 = arith.constant 0.000000e+00 : f32
    %107 = vector.broadcast %cst_57 : f32 to vector<134x8xf32>
    %108 = arith.maximumf %106, %107 : vector<134x8xf32>
    %109 = vector.extract_strided_slice %108 {offsets = [0, 0], sizes = [8, 8], strides = [1, 1]} : vector<134x8xf32> to vector<8x8xf32>
    %c11 = arith.constant 11 : index
    %c0_58 = arith.constant 0 : index
    %110 = vector.load %arg9[%c11, %c0_58] : memref<100x8xf32, #tpu.memory_space<vmem>>, vector<8x8xf32>
    tpu.vector_store %arg9[%c11, %c0_58], %109 {strides = array<i32>} : memref<100x8xf32, #tpu.memory_space<vmem>>, vector<8x8xf32>,
    %111 = vector.extract_strided_slice %109 {offsets = [1, 0], sizes = [1, 8], strides = [1, 1]} : vector<8x8xf32> to vector<1x8xf32>
    %c10 = arith.constant 10 : index
    %c0_59 = arith.constant 0 : index
    %112 = vector.load %arg9[%c10, %c0_59] : memref<100x8xf32, #tpu.memory_space<vmem>>, vector<1x8xf32>
    tpu.vector_store %arg9[%c10, %c0_59], %111 {strides = array<i32>} : memref<100x8xf32, #tpu.memory_space<vmem>>, vector<1x8xf32>,
    %113 = vector.extract_strided_slice %109 {offsets = [6, 0], sizes = [1, 8], strides = [1, 1]} : vector<8x8xf32> to vector<1x8xf32>
    %c19_60 = arith.constant 19 : index
    %c0_61 = arith.constant 0 : index
    %114 = vector.load %arg9[%c19_60, %c0_61] : memref<100x8xf32, #tpu.memory_space<vmem>>, vector<1x8xf32>
    tpu.vector_store %arg9[%c19_60, %c0_61], %113 {strides = array<i32>} : memref<100x8xf32, #tpu.memory_space<vmem>>, vector<1x8xf32>,
    %115 = vector.extract_strided_slice %108 {offsets = [18, 0], sizes = [8, 8], strides = [1, 1]} : vector<134x8xf32> to vector<8x8xf32>
    %c21 = arith.constant 21 : index
    %c0_62 = arith.constant 0 : index
    %116 = vector.load %arg9[%c21, %c0_62] : memref<100x8xf32, #tpu.memory_space<vmem>>, vector<8x8xf32>
    tpu.vector_store %arg9[%c21, %c0_62], %115 {strides = array<i32>} : memref<100x8xf32, #tpu.memory_space<vmem>>, vector<8x8xf32>,
    %117 = vector.extract_strided_slice %115 {offsets = [1, 0], sizes = [1, 8], strides = [1, 1]} : vector<8x8xf32> to vector<1x8xf32>
    %c20_63 = arith.constant 20 : index
    %c0_64 = arith.constant 0 : index
    %118 = vector.load %arg9[%c20_63, %c0_64] : memref<100x8xf32, #tpu.memory_space<vmem>>, vector<1x8xf32>
    tpu.vector_store %arg9[%c20_63, %c0_64], %117 {strides = array<i32>} : memref<100x8xf32, #tpu.memory_space<vmem>>, vector<1x8xf32>,
    %119 = vector.extract_strided_slice %115 {offsets = [6, 0], sizes = [1, 8], strides = [1, 1]} : vector<8x8xf32> to vector<1x8xf32>
    %c29 = arith.constant 29 : index
    %c0_65 = arith.constant 0 : index
    %120 = vector.load %arg9[%c29, %c0_65] : memref<100x8xf32, #tpu.memory_space<vmem>>, vector<1x8xf32>
    tpu.vector_store %arg9[%c29, %c0_65], %119 {strides = array<i32>} : memref<100x8xf32, #tpu.memory_space<vmem>>, vector<1x8xf32>,
    %c1_66 = arith.constant 1 : index
    %c0_67 = arith.constant 0 : index
    %121 = vector.load %arg9[%c1_66, %c0_67] : memref<100x8xf32, #tpu.memory_space<vmem>>, vector<8x8xf32>
    tpu.vector_store %arg9[%c1_66, %c0_67], %115 {strides = array<i32>} : memref<100x8xf32, #tpu.memory_space<vmem>>, vector<8x8xf32>,
    %122 = vector.extract_strided_slice %115 {offsets = [1, 0], sizes = [1, 8], strides = [1, 1]} : vector<8x8xf32> to vector<1x8xf32>
    %c0_68 = arith.constant 0 : index
    %c0_69 = arith.constant 0 : index
    %123 = vector.load %arg9[%c0_68, %c0_69] : memref<100x8xf32, #tpu.memory_space<vmem>>, vector<1x8xf32>
    tpu.vector_store %arg9[%c0_68, %c0_69], %122 {strides = array<i32>} : memref<100x8xf32, #tpu.memory_space<vmem>>, vector<1x8xf32>,
    %124 = vector.extract_strided_slice %115 {offsets = [6, 0], sizes = [1, 8], strides = [1, 1]} : vector<8x8xf32> to vector<1x8xf32>
    %c9 = arith.constant 9 : index
    %c0_70 = arith.constant 0 : index
    %125 = vector.load %arg9[%c9, %c0_70] : memref<100x8xf32, #tpu.memory_space<vmem>>, vector<1x8xf32>
    tpu.vector_store %arg9[%c9, %c0_70], %124 {strides = array<i32>} : memref<100x8xf32, #tpu.memory_space<vmem>>, vector<1x8xf32>,
    %126 = vector.extract_strided_slice %108 {offsets = [36, 0], sizes = [8, 8], strides = [1, 1]} : vector<134x8xf32> to vector<8x8xf32>
    %c31 = arith.constant 31 : index
    %c0_71 = arith.constant 0 : index
    %127 = vector.load %arg9[%c31, %c0_71] : memref<100x8xf32, #tpu.memory_space<vmem>>, vector<8x8xf32>
    tpu.vector_store %arg9[%c31, %c0_71], %126 {strides = array<i32>} : memref<100x8xf32, #tpu.memory_space<vmem>>, vector<8x8xf32>,
    %128 = vector.extract_strided_slice %126 {offsets = [1, 0], sizes = [1, 8], strides = [1, 1]} : vector<8x8xf32> to vector<1x8xf32>
    %c30 = arith.constant 30 : index
    %c0_72 = arith.constant 0 : index
    %129 = vector.load %arg9[%c30, %c0_72] : memref<100x8xf32, #tpu.memory_space<vmem>>, vector<1x8xf32>
    tpu.vector_store %arg9[%c30, %c0_72], %128 {strides = array<i32>} : memref<100x8xf32, #tpu.memory_space<vmem>>, vector<1x8xf32>,
    %130 = vector.extract_strided_slice %126 {offsets = [6, 0], sizes = [1, 8], strides = [1, 1]} : vector<8x8xf32> to vector<1x8xf32>
    %c39 = arith.constant 39 : index
    %c0_73 = arith.constant 0 : index
    %131 = vector.load %arg9[%c39, %c0_73] : memref<100x8xf32, #tpu.memory_space<vmem>>, vector<1x8xf32>
    tpu.vector_store %arg9[%c39, %c0_73], %130 {strides = array<i32>} : memref<100x8xf32, #tpu.memory_space<vmem>>, vector<1x8xf32>,
    %132 = vector.extract_strided_slice %108 {offsets = [54, 0], sizes = [8, 8], strides = [1, 1]} : vector<134x8xf32> to vector<8x8xf32>
    %c41 = arith.constant 41 : index
    %c0_74 = arith.constant 0 : index
    %133 = vector.load %arg9[%c41, %c0_74] : memref<100x8xf32, #tpu.memory_space<vmem>>, vector<8x8xf32>
    tpu.vector_store %arg9[%c41, %c0_74], %132 {strides = array<i32>} : memref<100x8xf32, #tpu.memory_space<vmem>>, vector<8x8xf32>,
    %134 = vector.extract_strided_slice %132 {offsets = [1, 0], sizes = [1, 8], strides = [1, 1]} : vector<8x8xf32> to vector<1x8xf32>
    %c40 = arith.constant 40 : index
    %c0_75 = arith.constant 0 : index
    %135 = vector.load %arg9[%c40, %c0_75] : memref<100x8xf32, #tpu.memory_space<vmem>>, vector<1x8xf32>
    tpu.vector_store %arg9[%c40, %c0_75], %134 {strides = array<i32>} : memref<100x8xf32, #tpu.memory_space<vmem>>, vector<1x8xf32>,
    %136 = vector.extract_strided_slice %132 {offsets = [6, 0], sizes = [1, 8], strides = [1, 1]} : vector<8x8xf32> to vector<1x8xf32>
    %c49 = arith.constant 49 : index
    %c0_76 = arith.constant 0 : index
    %137 = vector.load %arg9[%c49, %c0_76] : memref<100x8xf32, #tpu.memory_space<vmem>>, vector<1x8xf32>
    tpu.vector_store %arg9[%c49, %c0_76], %136 {strides = array<i32>} : memref<100x8xf32, #tpu.memory_space<vmem>>, vector<1x8xf32>,
    %138 = vector.extract_strided_slice %108 {offsets = [72, 0], sizes = [8, 8], strides = [1, 1]} : vector<134x8xf32> to vector<8x8xf32>
    %c51 = arith.constant 51 : index
    %c0_77 = arith.constant 0 : index
    %139 = vector.load %arg9[%c51, %c0_77] : memref<100x8xf32, #tpu.memory_space<vmem>>, vector<8x8xf32>
    tpu.vector_store %arg9[%c51, %c0_77], %138 {strides = array<i32>} : memref<100x8xf32, #tpu.memory_space<vmem>>, vector<8x8xf32>,
    %140 = vector.extract_strided_slice %138 {offsets = [1, 0], sizes = [1, 8], strides = [1, 1]} : vector<8x8xf32> to vector<1x8xf32>
    %c50 = arith.constant 50 : index
    %c0_78 = arith.constant 0 : index
    %141 = vector.load %arg9[%c50, %c0_78] : memref<100x8xf32, #tpu.memory_space<vmem>>, vector<1x8xf32>
    tpu.vector_store %arg9[%c50, %c0_78], %140 {strides = array<i32>} : memref<100x8xf32, #tpu.memory_space<vmem>>, vector<1x8xf32>,
    %142 = vector.extract_strided_slice %138 {offsets = [6, 0], sizes = [1, 8], strides = [1, 1]} : vector<8x8xf32> to vector<1x8xf32>
    %c59 = arith.constant 59 : index
    %c0_79 = arith.constant 0 : index
    %143 = vector.load %arg9[%c59, %c0_79] : memref<100x8xf32, #tpu.memory_space<vmem>>, vector<1x8xf32>
    tpu.vector_store %arg9[%c59, %c0_79], %142 {strides = array<i32>} : memref<100x8xf32, #tpu.memory_space<vmem>>, vector<1x8xf32>,
    %144 = vector.extract_strided_slice %108 {offsets = [90, 0], sizes = [8, 8], strides = [1, 1]} : vector<134x8xf32> to vector<8x8xf32>
    %c61 = arith.constant 61 : index
    %c0_80 = arith.constant 0 : index
    %145 = vector.load %arg9[%c61, %c0_80] : memref<100x8xf32, #tpu.memory_space<vmem>>, vector<8x8xf32>
    tpu.vector_store %arg9[%c61, %c0_80], %144 {strides = array<i32>} : memref<100x8xf32, #tpu.memory_space<vmem>>, vector<8x8xf32>,
    %146 = vector.extract_strided_slice %144 {offsets = [1, 0], sizes = [1, 8], strides = [1, 1]} : vector<8x8xf32> to vector<1x8xf32>
    %c60 = arith.constant 60 : index
    %c0_81 = arith.constant 0 : index
    %147 = vector.load %arg9[%c60, %c0_81] : memref<100x8xf32, #tpu.memory_space<vmem>>, vector<1x8xf32>
    tpu.vector_store %arg9[%c60, %c0_81], %146 {strides = array<i32>} : memref<100x8xf32, #tpu.memory_space<vmem>>, vector<1x8xf32>,
    %148 = vector.extract_strided_slice %144 {offsets = [6, 0], sizes = [1, 8], strides = [1, 1]} : vector<8x8xf32> to vector<1x8xf32>
    %c69 = arith.constant 69 : index
    %c0_82 = arith.constant 0 : index
    %149 = vector.load %arg9[%c69, %c0_82] : memref<100x8xf32, #tpu.memory_space<vmem>>, vector<1x8xf32>
    tpu.vector_store %arg9[%c69, %c0_82], %148 {strides = array<i32>} : memref<100x8xf32, #tpu.memory_space<vmem>>, vector<1x8xf32>,
    %150 = vector.extract_strided_slice %108 {offsets = [108, 0], sizes = [8, 8], strides = [1, 1]} : vector<134x8xf32> to vector<8x8xf32>
    %c71 = arith.constant 71 : index
    %c0_83 = arith.constant 0 : index
    %151 = vector.load %arg9[%c71, %c0_83] : memref<100x8xf32, #tpu.memory_space<vmem>>, vector<8x8xf32>
    tpu.vector_store %arg9[%c71, %c0_83], %150 {strides = array<i32>} : memref<100x8xf32, #tpu.memory_space<vmem>>, vector<8x8xf32>,
    %152 = vector.extract_strided_slice %150 {offsets = [1, 0], sizes = [1, 8], strides = [1, 1]} : vector<8x8xf32> to vector<1x8xf32>
    %c70 = arith.constant 70 : index
    %c0_84 = arith.constant 0 : index
    %153 = vector.load %arg9[%c70, %c0_84] : memref<100x8xf32, #tpu.memory_space<vmem>>, vector<1x8xf32>
    tpu.vector_store %arg9[%c70, %c0_84], %152 {strides = array<i32>} : memref<100x8xf32, #tpu.memory_space<vmem>>, vector<1x8xf32>,
    %154 = vector.extract_strided_slice %150 {offsets = [6, 0], sizes = [1, 8], strides = [1, 1]} : vector<8x8xf32> to vector<1x8xf32>
    %c79 = arith.constant 79 : index
    %c0_85 = arith.constant 0 : index
    %155 = vector.load %arg9[%c79, %c0_85] : memref<100x8xf32, #tpu.memory_space<vmem>>, vector<1x8xf32>
    tpu.vector_store %arg9[%c79, %c0_85], %154 {strides = array<i32>} : memref<100x8xf32, #tpu.memory_space<vmem>>, vector<1x8xf32>,
    %c91 = arith.constant 91 : index
    %c0_86 = arith.constant 0 : index
    %156 = vector.load %arg9[%c91, %c0_86] : memref<100x8xf32, #tpu.memory_space<vmem>>, vector<8x8xf32>
    tpu.vector_store %arg9[%c91, %c0_86], %150 {strides = array<i32>} : memref<100x8xf32, #tpu.memory_space<vmem>>, vector<8x8xf32>,
    %157 = vector.extract_strided_slice %150 {offsets = [1, 0], sizes = [1, 8], strides = [1, 1]} : vector<8x8xf32> to vector<1x8xf32>
    %c90 = arith.constant 90 : index
    %c0_87 = arith.constant 0 : index
    %158 = vector.load %arg9[%c90, %c0_87] : memref<100x8xf32, #tpu.memory_space<vmem>>, vector<1x8xf32>
    tpu.vector_store %arg9[%c90, %c0_87], %157 {strides = array<i32>} : memref<100x8xf32, #tpu.memory_space<vmem>>, vector<1x8xf32>,
    %159 = vector.extract_strided_slice %150 {offsets = [6, 0], sizes = [1, 8], strides = [1, 1]} : vector<8x8xf32> to vector<1x8xf32>
    %c99 = arith.constant 99 : index
    %c0_88 = arith.constant 0 : index
    %160 = vector.load %arg9[%c99, %c0_88] : memref<100x8xf32, #tpu.memory_space<vmem>>, vector<1x8xf32>
    tpu.vector_store %arg9[%c99, %c0_88], %159 {strides = array<i32>} : memref<100x8xf32, #tpu.memory_space<vmem>>, vector<1x8xf32>,
    %161 = vector.extract_strided_slice %108 {offsets = [126, 0], sizes = [8, 8], strides = [1, 1]} : vector<134x8xf32> to vector<8x8xf32>
    %c81 = arith.constant 81 : index
    %c0_89 = arith.constant 0 : index
    %162 = vector.load %arg9[%c81, %c0_89] : memref<100x8xf32, #tpu.memory_space<vmem>>, vector<8x8xf32>
    tpu.vector_store %arg9[%c81, %c0_89], %161 {strides = array<i32>} : memref<100x8xf32, #tpu.memory_space<vmem>>, vector<8x8xf32>,
    %163 = vector.extract_strided_slice %161 {offsets = [1, 0], sizes = [1, 8], strides = [1, 1]} : vector<8x8xf32> to vector<1x8xf32>
    %c80 = arith.constant 80 : index
    %c0_90 = arith.constant 0 : index
    %164 = vector.load %arg9[%c80, %c0_90] : memref<100x8xf32, #tpu.memory_space<vmem>>, vector<1x8xf32>
    tpu.vector_store %arg9[%c80, %c0_90], %163 {strides = array<i32>} : memref<100x8xf32, #tpu.memory_space<vmem>>, vector<1x8xf32>,
    %165 = vector.extract_strided_slice %161 {offsets = [6, 0], sizes = [1, 8], strides = [1, 1]} : vector<8x8xf32> to vector<1x8xf32>
    %c89 = arith.constant 89 : index
    %c0_91 = arith.constant 0 : index
    %166 = vector.load %arg9[%c89, %c0_91] : memref<100x8xf32, #tpu.memory_space<vmem>>, vector<1x8xf32>
    tpu.vector_store %arg9[%c89, %c0_91], %165 {strides = array<i32>} : memref<100x8xf32, #tpu.memory_space<vmem>>, vector<1x8xf32>,
    %c0_92 = arith.constant 0 : index
    %c0_93 = arith.constant 0 : index
    %167 = vector.load %arg9[%c0_92, %c0_93] : memref<100x8xf32, #tpu.memory_space<vmem>>, vector<78x8xf32>
    %168 = arith.truncf %167 : vector<78x8xf32> to vector<78x8xbf16>
    %c0_94 = arith.constant 0 : index
    %c0_95 = arith.constant 0 : index
    %c0_96 = arith.constant 0 : index
    %169 = vector.load %arg3[%c0_94, %c0_95, %c0_96] : memref<9x8x16xbf16, #tpu.memory_space<vmem>>, vector<1x8x16xbf16>
    %170 = vector.shape_cast %169 : vector<1x8x16xbf16> to vector<8x16xbf16>
    %cst_97 = arith.constant dense<0.000000e+00> : vector<78x16xf32>
    %171 = tpu.matmul %168, %170, %cst_97 {dimension_numbers = #tpu.dot_dimension_numbers<[1], [0], [0], [1], [0, 0, 1, 1], [], []>} : vector<78x8xbf16>, vector<8x16xbf16>, vector<78x16xf32> -> vector<78x16xf32>
    %c1_98 = arith.constant 1 : index
    %c0_99 = arith.constant 0 : index
    %172 = vector.load %arg9[%c1_98, %c0_99] : memref<100x8xf32, #tpu.memory_space<vmem>>, vector<78x8xf32>
    %173 = arith.truncf %172 : vector<78x8xf32> to vector<78x8xbf16>
    %c1_100 = arith.constant 1 : index
    %c0_101 = arith.constant 0 : index
    %c0_102 = arith.constant 0 : index
    %174 = vector.load %arg3[%c1_100, %c0_101, %c0_102] : memref<9x8x16xbf16, #tpu.memory_space<vmem>>, vector<1x8x16xbf16>
    %175 = vector.shape_cast %174 : vector<1x8x16xbf16> to vector<8x16xbf16>
    %cst_103 = arith.constant dense<0.000000e+00> : vector<78x16xf32>
    %176 = tpu.matmul %173, %175, %cst_103 {dimension_numbers = #tpu.dot_dimension_numbers<[1], [0], [0], [1], [0, 0, 1, 1], [], []>} : vector<78x8xbf16>, vector<8x16xbf16>, vector<78x16xf32> -> vector<78x16xf32>
    %177 = arith.addf %171, %176 : vector<78x16xf32>
    %c2_104 = arith.constant 2 : index
    %c0_105 = arith.constant 0 : index
    %178 = vector.load %arg9[%c2_104, %c0_105] : memref<100x8xf32, #tpu.memory_space<vmem>>, vector<78x8xf32>
    %179 = arith.truncf %178 : vector<78x8xf32> to vector<78x8xbf16>
    %c2_106 = arith.constant 2 : index
    %c0_107 = arith.constant 0 : index
    %c0_108 = arith.constant 0 : index
    %180 = vector.load %arg3[%c2_106, %c0_107, %c0_108] : memref<9x8x16xbf16, #tpu.memory_space<vmem>>, vector<1x8x16xbf16>
    %181 = vector.shape_cast %180 : vector<1x8x16xbf16> to vector<8x16xbf16>
    %cst_109 = arith.constant dense<0.000000e+00> : vector<78x16xf32>
    %182 = tpu.matmul %179, %181, %cst_109 {dimension_numbers = #tpu.dot_dimension_numbers<[1], [0], [0], [1], [0, 0, 1, 1], [], []>} : vector<78x8xbf16>, vector<8x16xbf16>, vector<78x16xf32> -> vector<78x16xf32>
    %183 = arith.addf %177, %182 : vector<78x16xf32>
    %c10_110 = arith.constant 10 : index
    %c0_111 = arith.constant 0 : index
    %184 = vector.load %arg9[%c10_110, %c0_111] : memref<100x8xf32, #tpu.memory_space<vmem>>, vector<78x8xf32>
    %185 = arith.truncf %184 : vector<78x8xf32> to vector<78x8xbf16>
    %c3_112 = arith.constant 3 : index
    %c0_113 = arith.constant 0 : index
    %c0_114 = arith.constant 0 : index
    %186 = vector.load %arg3[%c3_112, %c0_113, %c0_114] : memref<9x8x16xbf16, #tpu.memory_space<vmem>>, vector<1x8x16xbf16>
    %187 = vector.shape_cast %186 : vector<1x8x16xbf16> to vector<8x16xbf16>
    %cst_115 = arith.constant dense<0.000000e+00> : vector<78x16xf32>
    %188 = tpu.matmul %185, %187, %cst_115 {dimension_numbers = #tpu.dot_dimension_numbers<[1], [0], [0], [1], [0, 0, 1, 1], [], []>} : vector<78x8xbf16>, vector<8x16xbf16>, vector<78x16xf32> -> vector<78x16xf32>
    %189 = arith.addf %183, %188 : vector<78x16xf32>
    %c11_116 = arith.constant 11 : index
    %c0_117 = arith.constant 0 : index
    %190 = vector.load %arg9[%c11_116, %c0_117] : memref<100x8xf32, #tpu.memory_space<vmem>>, vector<78x8xf32>
    %191 = arith.truncf %190 : vector<78x8xf32> to vector<78x8xbf16>
    %c4_118 = arith.constant 4 : index
    %c0_119 = arith.constant 0 : index
    %c0_120 = arith.constant 0 : index
    %192 = vector.load %arg3[%c4_118, %c0_119, %c0_120] : memref<9x8x16xbf16, #tpu.memory_space<vmem>>, vector<1x8x16xbf16>
    %193 = vector.shape_cast %192 : vector<1x8x16xbf16> to vector<8x16xbf16>
    %cst_121 = arith.constant dense<0.000000e+00> : vector<78x16xf32>
    %194 = tpu.matmul %191, %193, %cst_121 {dimension_numbers = #tpu.dot_dimension_numbers<[1], [0], [0], [1], [0, 0, 1, 1], [], []>} : vector<78x8xbf16>, vector<8x16xbf16>, vector<78x16xf32> -> vector<78x16xf32>
    %195 = arith.addf %189, %194 : vector<78x16xf32>
    %c12 = arith.constant 12 : index
    %c0_122 = arith.constant 0 : index
    %196 = vector.load %arg9[%c12, %c0_122] : memref<100x8xf32, #tpu.memory_space<vmem>>, vector<78x8xf32>
    %197 = arith.truncf %196 : vector<78x8xf32> to vector<78x8xbf16>
    %c5_123 = arith.constant 5 : index
    %c0_124 = arith.constant 0 : index
    %c0_125 = arith.constant 0 : index
    %198 = vector.load %arg3[%c5_123, %c0_124, %c0_125] : memref<9x8x16xbf16, #tpu.memory_space<vmem>>, vector<1x8x16xbf16>
    %199 = vector.shape_cast %198 : vector<1x8x16xbf16> to vector<8x16xbf16>
    %cst_126 = arith.constant dense<0.000000e+00> : vector<78x16xf32>
    %200 = tpu.matmul %197, %199, %cst_126 {dimension_numbers = #tpu.dot_dimension_numbers<[1], [0], [0], [1], [0, 0, 1, 1], [], []>} : vector<78x8xbf16>, vector<8x16xbf16>, vector<78x16xf32> -> vector<78x16xf32>
    %201 = arith.addf %195, %200 : vector<78x16xf32>
    %c20_127 = arith.constant 20 : index
    %c0_128 = arith.constant 0 : index
    %202 = vector.load %arg9[%c20_127, %c0_128] : memref<100x8xf32, #tpu.memory_space<vmem>>, vector<78x8xf32>
    %203 = arith.truncf %202 : vector<78x8xf32> to vector<78x8xbf16>
    %c6_129 = arith.constant 6 : index
    %c0_130 = arith.constant 0 : index
    %c0_131 = arith.constant 0 : index
    %204 = vector.load %arg3[%c6_129, %c0_130, %c0_131] : memref<9x8x16xbf16, #tpu.memory_space<vmem>>, vector<1x8x16xbf16>
    %205 = vector.shape_cast %204 : vector<1x8x16xbf16> to vector<8x16xbf16>
    %cst_132 = arith.constant dense<0.000000e+00> : vector<78x16xf32>
    %206 = tpu.matmul %203, %205, %cst_132 {dimension_numbers = #tpu.dot_dimension_numbers<[1], [0], [0], [1], [0, 0, 1, 1], [], []>} : vector<78x8xbf16>, vector<8x16xbf16>, vector<78x16xf32> -> vector<78x16xf32>
    %207 = arith.addf %201, %206 : vector<78x16xf32>
    %c21_133 = arith.constant 21 : index
    %c0_134 = arith.constant 0 : index
    %208 = vector.load %arg9[%c21_133, %c0_134] : memref<100x8xf32, #tpu.memory_space<vmem>>, vector<78x8xf32>
    %209 = arith.truncf %208 : vector<78x8xf32> to vector<78x8xbf16>
    %c7_135 = arith.constant 7 : index
    %c0_136 = arith.constant 0 : index
    %c0_137 = arith.constant 0 : index
    %210 = vector.load %arg3[%c7_135, %c0_136, %c0_137] : memref<9x8x16xbf16, #tpu.memory_space<vmem>>, vector<1x8x16xbf16>
    %211 = vector.shape_cast %210 : vector<1x8x16xbf16> to vector<8x16xbf16>
    %cst_138 = arith.constant dense<0.000000e+00> : vector<78x16xf32>
    %212 = tpu.matmul %209, %211, %cst_138 {dimension_numbers = #tpu.dot_dimension_numbers<[1], [0], [0], [1], [0, 0, 1, 1], [], []>} : vector<78x8xbf16>, vector<8x16xbf16>, vector<78x16xf32> -> vector<78x16xf32>
    %213 = arith.addf %207, %212 : vector<78x16xf32>
    %c22 = arith.constant 22 : index
    %c0_139 = arith.constant 0 : index
    %214 = vector.load %arg9[%c22, %c0_139] : memref<100x8xf32, #tpu.memory_space<vmem>>, vector<78x8xf32>
    %215 = arith.truncf %214 : vector<78x8xf32> to vector<78x8xbf16>
    %c8_140 = arith.constant 8 : index
    %c0_141 = arith.constant 0 : index
    %c0_142 = arith.constant 0 : index
    %216 = vector.load %arg3[%c8_140, %c0_141, %c0_142] : memref<9x8x16xbf16, #tpu.memory_space<vmem>>, vector<1x8x16xbf16>
    %217 = vector.shape_cast %216 : vector<1x8x16xbf16> to vector<8x16xbf16>
    %cst_143 = arith.constant dense<0.000000e+00> : vector<78x16xf32>
    %218 = tpu.matmul %215, %217, %cst_143 {dimension_numbers = #tpu.dot_dimension_numbers<[1], [0], [0], [1], [0, 0, 1, 1], [], []>} : vector<78x8xbf16>, vector<8x16xbf16>, vector<78x16xf32> -> vector<78x16xf32>
    %219 = arith.addf %213, %218 : vector<78x16xf32>
    %220 = tpu.iota {dimensions = array<i32: 0>} : vector<78x1xi32>
    %c10_i32 = arith.constant 10 : i32
    %c0_i32_144 = arith.constant 0 : i32
    %221 = arith.cmpi eq, %c10_i32, %c0_i32_144 : i32
    %c1_i32_145 = arith.constant 1 : i32
    %222 = arith.select %221, %c1_i32_145, %c10_i32 : i32
    %223 = vector.broadcast %222 : i32 to vector<78x1xi32>
    %224 = arith.remsi %220, %223 : vector<78x1xi32>
    %c0_i32_146 = arith.constant 0 : i32
    %225 = vector.broadcast %c0_i32_146 : i32 to vector<78x1xi32>
    %226 = arith.cmpi ne, %224, %225 : vector<78x1xi32>
    %c0_i32_147 = arith.constant 0 : i32
    %227 = vector.broadcast %c0_i32_147 : i32 to vector<78x1xi32>
    %228 = arith.cmpi slt, %224, %227 : vector<78x1xi32>
    %c0_i32_148 = arith.constant 0 : i32
    %229 = arith.cmpi slt, %222, %c0_i32_148 : i32
    %230 = vector.broadcast %229 : i1 to vector<78x1xi1>
    %231 = vector.broadcast %230 : vector<78x1xi1> to vector<78x1xi1>
    %232 = arith.xori %228, %231 : vector<78x1xi1>
    %233 = arith.andi %232, %226 : vector<78x1xi1>
    %234 = vector.broadcast %222 : i32 to vector<78x1xi32>
    %235 = arith.addi %224, %234 : vector<78x1xi32>
    %236 = arith.select %233, %235, %224 : vector<78x1xi1>, vector<78x1xi32>
    %c8_i32_149 = arith.constant 8 : i32
    %237 = vector.broadcast %c8_i32_149 : i32 to vector<78x1xi32>
    %238 = arith.cmpi slt, %236, %237 : vector<78x1xi32>
    %cst_150 = arith.constant 0.000000e+00 : f32
    %239 = vector.shape_cast %238 : vector<78x1xi1> to vector<78x1xi1>
    %240 = vector.broadcast %239 : vector<78x1xi1> to vector<78x16xi1>
    %241 = vector.broadcast %cst_150 : f32 to vector<78x16xf32>
    %242 = arith.select %240, %219, %241 : vector<78x16xi1>, vector<78x16xf32>
    %cst_151 = arith.constant dense<0.000000e+00> : vector<16xf32>
    %243 = vector.multi_reduction <add>, %242, %cst_151 [0] : vector<78x16xf32> to vector<16xf32>
    %244 = vector.shape_cast %243 : vector<16xf32> to vector<1x16xf32>
    %cst_152 = arith.constant 1.562500e-02 : f32
    %245 = vector.broadcast %cst_152 : f32 to vector<1x16xf32>
    %246 = arith.mulf %244, %245 : vector<1x16xf32>
    %247 = vector.broadcast %246 : vector<1x16xf32> to vector<78x16xf32>
    %248 = arith.subf %219, %247 : vector<78x16xf32>
    %cst_153 = arith.constant 0.000000e+00 : f32
    %249 = vector.shape_cast %238 : vector<78x1xi1> to vector<78x1xi1>
    %250 = vector.broadcast %249 : vector<78x1xi1> to vector<78x16xi1>
    %251 = vector.broadcast %cst_153 : f32 to vector<78x16xf32>
    %252 = arith.select %250, %248, %251 : vector<78x16xi1>, vector<78x16xf32>
    %253 = arith.mulf %252, %252 : vector<78x16xf32>
    %cst_154 = arith.constant dense<0.000000e+00> : vector<16xf32>
    %254 = vector.multi_reduction <add>, %253, %cst_154 [0] : vector<78x16xf32> to vector<16xf32>
    %255 = vector.shape_cast %254 : vector<16xf32> to vector<1x16xf32>
    %cst_155 = arith.constant 1.562500e-02 : f32
    %256 = vector.broadcast %cst_155 : f32 to vector<1x16xf32>
    %257 = arith.mulf %255, %256 : vector<1x16xf32>
    %258 = vector.broadcast %246 : vector<1x16xf32> to vector<78x16xf32>
    %259 = arith.subf %219, %258 : vector<78x16xf32>
    %cst_156 = arith.constant 9.99999974E-6 : f32
    %260 = vector.broadcast %cst_156 : f32 to vector<1x16xf32>
    %261 = arith.addf %257, %260 : vector<1x16xf32>
    %262 = math.rsqrt %261 : vector<1x16xf32>
    %263 = vector.broadcast %262 : vector<1x16xf32> to vector<78x16xf32>
    %264 = arith.mulf %259, %263 : vector<78x16xf32>
    %cst_157 = arith.constant 0.000000e+00 : f32
    %265 = vector.broadcast %cst_157 : f32 to vector<78x16xf32>
    %266 = arith.maximumf %264, %265 : vector<78x16xf32>
    %267 = vector.extract_strided_slice %266 {offsets = [0, 0], sizes = [8, 16], strides = [1, 1]} : vector<78x16xf32> to vector<8x16xf32>
    %c11_158 = arith.constant 11 : index
    %c0_159 = arith.constant 0 : index
    %268 = vector.load %arg10[%c11_158, %c0_159] : memref<100x16xf32, #tpu.memory_space<vmem>>, vector<8x16xf32>
    tpu.vector_store %arg10[%c11_158, %c0_159], %267 {strides = array<i32>} : memref<100x16xf32, #tpu.memory_space<vmem>>, vector<8x16xf32>,
    %269 = vector.extract_strided_slice %267 {offsets = [1, 0], sizes = [1, 16], strides = [1, 1]} : vector<8x16xf32> to vector<1x16xf32>
    %c10_160 = arith.constant 10 : index
    %c0_161 = arith.constant 0 : index
    %270 = vector.load %arg10[%c10_160, %c0_161] : memref<100x16xf32, #tpu.memory_space<vmem>>, vector<1x16xf32>
    tpu.vector_store %arg10[%c10_160, %c0_161], %269 {strides = array<i32>} : memref<100x16xf32, #tpu.memory_space<vmem>>, vector<1x16xf32>,
    %271 = vector.extract_strided_slice %267 {offsets = [6, 0], sizes = [1, 16], strides = [1, 1]} : vector<8x16xf32> to vector<1x16xf32>
    %c19_162 = arith.constant 19 : index
    %c0_163 = arith.constant 0 : index
    %272 = vector.load %arg10[%c19_162, %c0_163] : memref<100x16xf32, #tpu.memory_space<vmem>>, vector<1x16xf32>
    tpu.vector_store %arg10[%c19_162, %c0_163], %271 {strides = array<i32>} : memref<100x16xf32, #tpu.memory_space<vmem>>, vector<1x16xf32>,
    %273 = vector.extract_strided_slice %266 {offsets = [10, 0], sizes = [8, 16], strides = [1, 1]} : vector<78x16xf32> to vector<8x16xf32>
    %c21_164 = arith.constant 21 : index
    %c0_165 = arith.constant 0 : index
    %274 = vector.load %arg10[%c21_164, %c0_165] : memref<100x16xf32, #tpu.memory_space<vmem>>, vector<8x16xf32>
    tpu.vector_store %arg10[%c21_164, %c0_165], %273 {strides = array<i32>} : memref<100x16xf32, #tpu.memory_space<vmem>>, vector<8x16xf32>,
    %275 = vector.extract_strided_slice %273 {offsets = [1, 0], sizes = [1, 16], strides = [1, 1]} : vector<8x16xf32> to vector<1x16xf32>
    %c20_166 = arith.constant 20 : index
    %c0_167 = arith.constant 0 : index
    %276 = vector.load %arg10[%c20_166, %c0_167] : memref<100x16xf32, #tpu.memory_space<vmem>>, vector<1x16xf32>
    tpu.vector_store %arg10[%c20_166, %c0_167], %275 {strides = array<i32>} : memref<100x16xf32, #tpu.memory_space<vmem>>, vector<1x16xf32>,
    %277 = vector.extract_strided_slice %273 {offsets = [6, 0], sizes = [1, 16], strides = [1, 1]} : vector<8x16xf32> to vector<1x16xf32>
    %c29_168 = arith.constant 29 : index
    %c0_169 = arith.constant 0 : index
    %278 = vector.load %arg10[%c29_168, %c0_169] : memref<100x16xf32, #tpu.memory_space<vmem>>, vector<1x16xf32>
    tpu.vector_store %arg10[%c29_168, %c0_169], %277 {strides = array<i32>} : memref<100x16xf32, #tpu.memory_space<vmem>>, vector<1x16xf32>,
    %c1_170 = arith.constant 1 : index
    %c0_171 = arith.constant 0 : index
    %279 = vector.load %arg10[%c1_170, %c0_171] : memref<100x16xf32, #tpu.memory_space<vmem>>, vector<8x16xf32>
    tpu.vector_store %arg10[%c1_170, %c0_171], %273 {strides = array<i32>} : memref<100x16xf32, #tpu.memory_space<vmem>>, vector<8x16xf32>,
    %280 = vector.extract_strided_slice %273 {offsets = [1, 0], sizes = [1, 16], strides = [1, 1]} : vector<8x16xf32> to vector<1x16xf32>
    %c0_172 = arith.constant 0 : index
    %c0_173 = arith.constant 0 : index
    %281 = vector.load %arg10[%c0_172, %c0_173] : memref<100x16xf32, #tpu.memory_space<vmem>>, vector<1x16xf32>
    tpu.vector_store %arg10[%c0_172, %c0_173], %280 {strides = array<i32>} : memref<100x16xf32, #tpu.memory_space<vmem>>, vector<1x16xf32>,
    %282 = vector.extract_strided_slice %273 {offsets = [6, 0], sizes = [1, 16], strides = [1, 1]} : vector<8x16xf32> to vector<1x16xf32>
    %c9_174 = arith.constant 9 : index
    %c0_175 = arith.constant 0 : index
    %283 = vector.load %arg10[%c9_174, %c0_175] : memref<100x16xf32, #tpu.memory_space<vmem>>, vector<1x16xf32>
    tpu.vector_store %arg10[%c9_174, %c0_175], %282 {strides = array<i32>} : memref<100x16xf32, #tpu.memory_space<vmem>>, vector<1x16xf32>,
    %284 = vector.extract_strided_slice %266 {offsets = [20, 0], sizes = [8, 16], strides = [1, 1]} : vector<78x16xf32> to vector<8x16xf32>
    %c31_176 = arith.constant 31 : index
    %c0_177 = arith.constant 0 : index
    %285 = vector.load %arg10[%c31_176, %c0_177] : memref<100x16xf32, #tpu.memory_space<vmem>>, vector<8x16xf32>
    tpu.vector_store %arg10[%c31_176, %c0_177], %284 {strides = array<i32>} : memref<100x16xf32, #tpu.memory_space<vmem>>, vector<8x16xf32>,
    %286 = vector.extract_strided_slice %284 {offsets = [1, 0], sizes = [1, 16], strides = [1, 1]} : vector<8x16xf32> to vector<1x16xf32>
    %c30_178 = arith.constant 30 : index
    %c0_179 = arith.constant 0 : index
    %287 = vector.load %arg10[%c30_178, %c0_179] : memref<100x16xf32, #tpu.memory_space<vmem>>, vector<1x16xf32>
    tpu.vector_store %arg10[%c30_178, %c0_179], %286 {strides = array<i32>} : memref<100x16xf32, #tpu.memory_space<vmem>>, vector<1x16xf32>,
    %288 = vector.extract_strided_slice %284 {offsets = [6, 0], sizes = [1, 16], strides = [1, 1]} : vector<8x16xf32> to vector<1x16xf32>
    %c39_180 = arith.constant 39 : index
    %c0_181 = arith.constant 0 : index
    %289 = vector.load %arg10[%c39_180, %c0_181] : memref<100x16xf32, #tpu.memory_space<vmem>>, vector<1x16xf32>
    tpu.vector_store %arg10[%c39_180, %c0_181], %288 {strides = array<i32>} : memref<100x16xf32, #tpu.memory_space<vmem>>, vector<1x16xf32>,
    %290 = vector.extract_strided_slice %266 {offsets = [30, 0], sizes = [8, 16], strides = [1, 1]} : vector<78x16xf32> to vector<8x16xf32>
    %c41_182 = arith.constant 41 : index
    %c0_183 = arith.constant 0 : index
    %291 = vector.load %arg10[%c41_182, %c0_183] : memref<100x16xf32, #tpu.memory_space<vmem>>, vector<8x16xf32>
    tpu.vector_store %arg10[%c41_182, %c0_183], %290 {strides = array<i32>} : memref<100x16xf32, #tpu.memory_space<vmem>>, vector<8x16xf32>,
    %292 = vector.extract_strided_slice %290 {offsets = [1, 0], sizes = [1, 16], strides = [1, 1]} : vector<8x16xf32> to vector<1x16xf32>
    %c40_184 = arith.constant 40 : index
    %c0_185 = arith.constant 0 : index
    %293 = vector.load %arg10[%c40_184, %c0_185] : memref<100x16xf32, #tpu.memory_space<vmem>>, vector<1x16xf32>
    tpu.vector_store %arg10[%c40_184, %c0_185], %292 {strides = array<i32>} : memref<100x16xf32, #tpu.memory_space<vmem>>, vector<1x16xf32>,
    %294 = vector.extract_strided_slice %290 {offsets = [6, 0], sizes = [1, 16], strides = [1, 1]} : vector<8x16xf32> to vector<1x16xf32>
    %c49_186 = arith.constant 49 : index
    %c0_187 = arith.constant 0 : index
    %295 = vector.load %arg10[%c49_186, %c0_187] : memref<100x16xf32, #tpu.memory_space<vmem>>, vector<1x16xf32>
    tpu.vector_store %arg10[%c49_186, %c0_187], %294 {strides = array<i32>} : memref<100x16xf32, #tpu.memory_space<vmem>>, vector<1x16xf32>,
    %296 = vector.extract_strided_slice %266 {offsets = [40, 0], sizes = [8, 16], strides = [1, 1]} : vector<78x16xf32> to vector<8x16xf32>
    %c51_188 = arith.constant 51 : index
    %c0_189 = arith.constant 0 : index
    %297 = vector.load %arg10[%c51_188, %c0_189] : memref<100x16xf32, #tpu.memory_space<vmem>>, vector<8x16xf32>
    tpu.vector_store %arg10[%c51_188, %c0_189], %296 {strides = array<i32>} : memref<100x16xf32, #tpu.memory_space<vmem>>, vector<8x16xf32>,
    %298 = vector.extract_strided_slice %296 {offsets = [1, 0], sizes = [1, 16], strides = [1, 1]} : vector<8x16xf32> to vector<1x16xf32>
    %c50_190 = arith.constant 50 : index
    %c0_191 = arith.constant 0 : index
    %299 = vector.load %arg10[%c50_190, %c0_191] : memref<100x16xf32, #tpu.memory_space<vmem>>, vector<1x16xf32>
    tpu.vector_store %arg10[%c50_190, %c0_191], %298 {strides = array<i32>} : memref<100x16xf32, #tpu.memory_space<vmem>>, vector<1x16xf32>,
    %300 = vector.extract_strided_slice %296 {offsets = [6, 0], sizes = [1, 16], strides = [1, 1]} : vector<8x16xf32> to vector<1x16xf32>
    %c59_192 = arith.constant 59 : index
    %c0_193 = arith.constant 0 : index
    %301 = vector.load %arg10[%c59_192, %c0_193] : memref<100x16xf32, #tpu.memory_space<vmem>>, vector<1x16xf32>
    tpu.vector_store %arg10[%c59_192, %c0_193], %300 {strides = array<i32>} : memref<100x16xf32, #tpu.memory_space<vmem>>, vector<1x16xf32>,
    %302 = vector.extract_strided_slice %266 {offsets = [50, 0], sizes = [8, 16], strides = [1, 1]} : vector<78x16xf32> to vector<8x16xf32>
    %c61_194 = arith.constant 61 : index
    %c0_195 = arith.constant 0 : index
    %303 = vector.load %arg10[%c61_194, %c0_195] : memref<100x16xf32, #tpu.memory_space<vmem>>, vector<8x16xf32>
    tpu.vector_store %arg10[%c61_194, %c0_195], %302 {strides = array<i32>} : memref<100x16xf32, #tpu.memory_space<vmem>>, vector<8x16xf32>,
    %304 = vector.extract_strided_slice %302 {offsets = [1, 0], sizes = [1, 16], strides = [1, 1]} : vector<8x16xf32> to vector<1x16xf32>
    %c60_196 = arith.constant 60 : index
    %c0_197 = arith.constant 0 : index
    %305 = vector.load %arg10[%c60_196, %c0_197] : memref<100x16xf32, #tpu.memory_space<vmem>>, vector<1x16xf32>
    tpu.vector_store %arg10[%c60_196, %c0_197], %304 {strides = array<i32>} : memref<100x16xf32, #tpu.memory_space<vmem>>, vector<1x16xf32>,
    %306 = vector.extract_strided_slice %302 {offsets = [6, 0], sizes = [1, 16], strides = [1, 1]} : vector<8x16xf32> to vector<1x16xf32>
    %c69_198 = arith.constant 69 : index
    %c0_199 = arith.constant 0 : index
    %307 = vector.load %arg10[%c69_198, %c0_199] : memref<100x16xf32, #tpu.memory_space<vmem>>, vector<1x16xf32>
    tpu.vector_store %arg10[%c69_198, %c0_199], %306 {strides = array<i32>} : memref<100x16xf32, #tpu.memory_space<vmem>>, vector<1x16xf32>,
    %308 = vector.extract_strided_slice %266 {offsets = [60, 0], sizes = [8, 16], strides = [1, 1]} : vector<78x16xf32> to vector<8x16xf32>
    %c71_200 = arith.constant 71 : index
    %c0_201 = arith.constant 0 : index
    %309 = vector.load %arg10[%c71_200, %c0_201] : memref<100x16xf32, #tpu.memory_space<vmem>>, vector<8x16xf32>
    tpu.vector_store %arg10[%c71_200, %c0_201], %308 {strides = array<i32>} : memref<100x16xf32, #tpu.memory_space<vmem>>, vector<8x16xf32>,
    %310 = vector.extract_strided_slice %308 {offsets = [1, 0], sizes = [1, 16], strides = [1, 1]} : vector<8x16xf32> to vector<1x16xf32>
    %c70_202 = arith.constant 70 : index
    %c0_203 = arith.constant 0 : index
    %311 = vector.load %arg10[%c70_202, %c0_203] : memref<100x16xf32, #tpu.memory_space<vmem>>, vector<1x16xf32>
    tpu.vector_store %arg10[%c70_202, %c0_203], %310 {strides = array<i32>} : memref<100x16xf32, #tpu.memory_space<vmem>>, vector<1x16xf32>,
    %312 = vector.extract_strided_slice %308 {offsets = [6, 0], sizes = [1, 16], strides = [1, 1]} : vector<8x16xf32> to vector<1x16xf32>
    %c79_204 = arith.constant 79 : index
    %c0_205 = arith.constant 0 : index
    %313 = vector.load %arg10[%c79_204, %c0_205] : memref<100x16xf32, #tpu.memory_space<vmem>>, vector<1x16xf32>
    tpu.vector_store %arg10[%c79_204, %c0_205], %312 {strides = array<i32>} : memref<100x16xf32, #tpu.memory_space<vmem>>, vector<1x16xf32>,
    %c91_206 = arith.constant 91 : index
    %c0_207 = arith.constant 0 : index
    %314 = vector.load %arg10[%c91_206, %c0_207] : memref<100x16xf32, #tpu.memory_space<vmem>>, vector<8x16xf32>
    tpu.vector_store %arg10[%c91_206, %c0_207], %308 {strides = array<i32>} : memref<100x16xf32, #tpu.memory_space<vmem>>, vector<8x16xf32>,
    %315 = vector.extract_strided_slice %308 {offsets = [1, 0], sizes = [1, 16], strides = [1, 1]} : vector<8x16xf32> to vector<1x16xf32>
    %c90_208 = arith.constant 90 : index
    %c0_209 = arith.constant 0 : index
    %316 = vector.load %arg10[%c90_208, %c0_209] : memref<100x16xf32, #tpu.memory_space<vmem>>, vector<1x16xf32>
    tpu.vector_store %arg10[%c90_208, %c0_209], %315 {strides = array<i32>} : memref<100x16xf32, #tpu.memory_space<vmem>>, vector<1x16xf32>,
    %317 = vector.extract_strided_slice %308 {offsets = [6, 0], sizes = [1, 16], strides = [1, 1]} : vector<8x16xf32> to vector<1x16xf32>
    %c99_210 = arith.constant 99 : index
    %c0_211 = arith.constant 0 : index
    %318 = vector.load %arg10[%c99_210, %c0_211] : memref<100x16xf32, #tpu.memory_space<vmem>>, vector<1x16xf32>
    tpu.vector_store %arg10[%c99_210, %c0_211], %317 {strides = array<i32>} : memref<100x16xf32, #tpu.memory_space<vmem>>, vector<1x16xf32>,
    %319 = vector.extract_strided_slice %266 {offsets = [70, 0], sizes = [8, 16], strides = [1, 1]} : vector<78x16xf32> to vector<8x16xf32>
    %c81_212 = arith.constant 81 : index
    %c0_213 = arith.constant 0 : index
    %320 = vector.load %arg10[%c81_212, %c0_213] : memref<100x16xf32, #tpu.memory_space<vmem>>, vector<8x16xf32>
    tpu.vector_store %arg10[%c81_212, %c0_213], %319 {strides = array<i32>} : memref<100x16xf32, #tpu.memory_space<vmem>>, vector<8x16xf32>,
    %321 = vector.extract_strided_slice %319 {offsets = [1, 0], sizes = [1, 16], strides = [1, 1]} : vector<8x16xf32> to vector<1x16xf32>
    %c80_214 = arith.constant 80 : index
    %c0_215 = arith.constant 0 : index
    %322 = vector.load %arg10[%c80_214, %c0_215] : memref<100x16xf32, #tpu.memory_space<vmem>>, vector<1x16xf32>
    tpu.vector_store %arg10[%c80_214, %c0_215], %321 {strides = array<i32>} : memref<100x16xf32, #tpu.memory_space<vmem>>, vector<1x16xf32>,
    %323 = vector.extract_strided_slice %319 {offsets = [6, 0], sizes = [1, 16], strides = [1, 1]} : vector<8x16xf32> to vector<1x16xf32>
    %c89_216 = arith.constant 89 : index
    %c0_217 = arith.constant 0 : index
    %324 = vector.load %arg10[%c89_216, %c0_217] : memref<100x16xf32, #tpu.memory_space<vmem>>, vector<1x16xf32>
    tpu.vector_store %arg10[%c89_216, %c0_217], %323 {strides = array<i32>} : memref<100x16xf32, #tpu.memory_space<vmem>>, vector<1x16xf32>,
    %c0_218 = arith.constant 0 : index
    %c0_219 = arith.constant 0 : index
    %325 = vector.load %arg10[%c0_218, %c0_219] : memref<100x16xf32, #tpu.memory_space<vmem>>, vector<78x16xf32>
    %326 = arith.truncf %325 : vector<78x16xf32> to vector<78x16xbf16>
    %c0_220 = arith.constant 0 : index
    %c0_221 = arith.constant 0 : index
    %c0_222 = arith.constant 0 : index
    %327 = vector.load %arg4[%c0_220, %c0_221, %c0_222] : memref<9x16x16xbf16, #tpu.memory_space<vmem>>, vector<1x16x16xbf16>
    %328 = vector.shape_cast %327 : vector<1x16x16xbf16> to vector<16x16xbf16>
    %cst_223 = arith.constant dense<0.000000e+00> : vector<78x16xf32>
    %329 = tpu.matmul %326, %328, %cst_223 {dimension_numbers = #tpu.dot_dimension_numbers<[1], [0], [0], [1], [0, 0, 1, 1], [], []>} : vector<78x16xbf16>, vector<16x16xbf16>, vector<78x16xf32> -> vector<78x16xf32>
    %c1_224 = arith.constant 1 : index
    %c0_225 = arith.constant 0 : index
    %330 = vector.load %arg10[%c1_224, %c0_225] : memref<100x16xf32, #tpu.memory_space<vmem>>, vector<78x16xf32>
    %331 = arith.truncf %330 : vector<78x16xf32> to vector<78x16xbf16>
    %c1_226 = arith.constant 1 : index
    %c0_227 = arith.constant 0 : index
    %c0_228 = arith.constant 0 : index
    %332 = vector.load %arg4[%c1_226, %c0_227, %c0_228] : memref<9x16x16xbf16, #tpu.memory_space<vmem>>, vector<1x16x16xbf16>
    %333 = vector.shape_cast %332 : vector<1x16x16xbf16> to vector<16x16xbf16>
    %cst_229 = arith.constant dense<0.000000e+00> : vector<78x16xf32>
    %334 = tpu.matmul %331, %333, %cst_229 {dimension_numbers = #tpu.dot_dimension_numbers<[1], [0], [0], [1], [0, 0, 1, 1], [], []>} : vector<78x16xbf16>, vector<16x16xbf16>, vector<78x16xf32> -> vector<78x16xf32>
    %335 = arith.addf %329, %334 : vector<78x16xf32>
    %c2_230 = arith.constant 2 : index
    %c0_231 = arith.constant 0 : index
    %336 = vector.load %arg10[%c2_230, %c0_231] : memref<100x16xf32, #tpu.memory_space<vmem>>, vector<78x16xf32>
    %337 = arith.truncf %336 : vector<78x16xf32> to vector<78x16xbf16>
    %c2_232 = arith.constant 2 : index
    %c0_233 = arith.constant 0 : index
    %c0_234 = arith.constant 0 : index
    %338 = vector.load %arg4[%c2_232, %c0_233, %c0_234] : memref<9x16x16xbf16, #tpu.memory_space<vmem>>, vector<1x16x16xbf16>
    %339 = vector.shape_cast %338 : vector<1x16x16xbf16> to vector<16x16xbf16>
    %cst_235 = arith.constant dense<0.000000e+00> : vector<78x16xf32>
    %340 = tpu.matmul %337, %339, %cst_235 {dimension_numbers = #tpu.dot_dimension_numbers<[1], [0], [0], [1], [0, 0, 1, 1], [], []>} : vector<78x16xbf16>, vector<16x16xbf16>, vector<78x16xf32> -> vector<78x16xf32>
    %341 = arith.addf %335, %340 : vector<78x16xf32>
    %c10_236 = arith.constant 10 : index
    %c0_237 = arith.constant 0 : index
    %342 = vector.load %arg10[%c10_236, %c0_237] : memref<100x16xf32, #tpu.memory_space<vmem>>, vector<78x16xf32>
    %343 = arith.truncf %342 : vector<78x16xf32> to vector<78x16xbf16>
    %c3_238 = arith.constant 3 : index
    %c0_239 = arith.constant 0 : index
    %c0_240 = arith.constant 0 : index
    %344 = vector.load %arg4[%c3_238, %c0_239, %c0_240] : memref<9x16x16xbf16, #tpu.memory_space<vmem>>, vector<1x16x16xbf16>
    %345 = vector.shape_cast %344 : vector<1x16x16xbf16> to vector<16x16xbf16>
    %cst_241 = arith.constant dense<0.000000e+00> : vector<78x16xf32>
    %346 = tpu.matmul %343, %345, %cst_241 {dimension_numbers = #tpu.dot_dimension_numbers<[1], [0], [0], [1], [0, 0, 1, 1], [], []>} : vector<78x16xbf16>, vector<16x16xbf16>, vector<78x16xf32> -> vector<78x16xf32>
    %347 = arith.addf %341, %346 : vector<78x16xf32>
    %c11_242 = arith.constant 11 : index
    %c0_243 = arith.constant 0 : index
    %348 = vector.load %arg10[%c11_242, %c0_243] : memref<100x16xf32, #tpu.memory_space<vmem>>, vector<78x16xf32>
    %349 = arith.truncf %348 : vector<78x16xf32> to vector<78x16xbf16>
    %c4_244 = arith.constant 4 : index
    %c0_245 = arith.constant 0 : index
    %c0_246 = arith.constant 0 : index
    %350 = vector.load %arg4[%c4_244, %c0_245, %c0_246] : memref<9x16x16xbf16, #tpu.memory_space<vmem>>, vector<1x16x16xbf16>
    %351 = vector.shape_cast %350 : vector<1x16x16xbf16> to vector<16x16xbf16>
    %cst_247 = arith.constant dense<0.000000e+00> : vector<78x16xf32>
    %352 = tpu.matmul %349, %351, %cst_247 {dimension_numbers = #tpu.dot_dimension_numbers<[1], [0], [0], [1], [0, 0, 1, 1], [], []>} : vector<78x16xbf16>, vector<16x16xbf16>, vector<78x16xf32> -> vector<78x16xf32>
    %353 = arith.addf %347, %352 : vector<78x16xf32>
    %c12_248 = arith.constant 12 : index
    %c0_249 = arith.constant 0 : index
    %354 = vector.load %arg10[%c12_248, %c0_249] : memref<100x16xf32, #tpu.memory_space<vmem>>, vector<78x16xf32>
    %355 = arith.truncf %354 : vector<78x16xf32> to vector<78x16xbf16>
    %c5_250 = arith.constant 5 : index
    %c0_251 = arith.constant 0 : index
    %c0_252 = arith.constant 0 : index
    %356 = vector.load %arg4[%c5_250, %c0_251, %c0_252] : memref<9x16x16xbf16, #tpu.memory_space<vmem>>, vector<1x16x16xbf16>
    %357 = vector.shape_cast %356 : vector<1x16x16xbf16> to vector<16x16xbf16>
    %cst_253 = arith.constant dense<0.000000e+00> : vector<78x16xf32>
    %358 = tpu.matmul %355, %357, %cst_253 {dimension_numbers = #tpu.dot_dimension_numbers<[1], [0], [0], [1], [0, 0, 1, 1], [], []>} : vector<78x16xbf16>, vector<16x16xbf16>, vector<78x16xf32> -> vector<78x16xf32>
    %359 = arith.addf %353, %358 : vector<78x16xf32>
    %c20_254 = arith.constant 20 : index
    %c0_255 = arith.constant 0 : index
    %360 = vector.load %arg10[%c20_254, %c0_255] : memref<100x16xf32, #tpu.memory_space<vmem>>, vector<78x16xf32>
    %361 = arith.truncf %360 : vector<78x16xf32> to vector<78x16xbf16>
    %c6_256 = arith.constant 6 : index
    %c0_257 = arith.constant 0 : index
    %c0_258 = arith.constant 0 : index
    %362 = vector.load %arg4[%c6_256, %c0_257, %c0_258] : memref<9x16x16xbf16, #tpu.memory_space<vmem>>, vector<1x16x16xbf16>
    %363 = vector.shape_cast %362 : vector<1x16x16xbf16> to vector<16x16xbf16>
    %cst_259 = arith.constant dense<0.000000e+00> : vector<78x16xf32>
    %364 = tpu.matmul %361, %363, %cst_259 {dimension_numbers = #tpu.dot_dimension_numbers<[1], [0], [0], [1], [0, 0, 1, 1], [], []>} : vector<78x16xbf16>, vector<16x16xbf16>, vector<78x16xf32> -> vector<78x16xf32>
    %365 = arith.addf %359, %364 : vector<78x16xf32>
    %c21_260 = arith.constant 21 : index
    %c0_261 = arith.constant 0 : index
    %366 = vector.load %arg10[%c21_260, %c0_261] : memref<100x16xf32, #tpu.memory_space<vmem>>, vector<78x16xf32>
    %367 = arith.truncf %366 : vector<78x16xf32> to vector<78x16xbf16>
    %c7_262 = arith.constant 7 : index
    %c0_263 = arith.constant 0 : index
    %c0_264 = arith.constant 0 : index
    %368 = vector.load %arg4[%c7_262, %c0_263, %c0_264] : memref<9x16x16xbf16, #tpu.memory_space<vmem>>, vector<1x16x16xbf16>
    %369 = vector.shape_cast %368 : vector<1x16x16xbf16> to vector<16x16xbf16>
    %cst_265 = arith.constant dense<0.000000e+00> : vector<78x16xf32>
    %370 = tpu.matmul %367, %369, %cst_265 {dimension_numbers = #tpu.dot_dimension_numbers<[1], [0], [0], [1], [0, 0, 1, 1], [], []>} : vector<78x16xbf16>, vector<16x16xbf16>, vector<78x16xf32> -> vector<78x16xf32>
    %371 = arith.addf %365, %370 : vector<78x16xf32>
    %c22_266 = arith.constant 22 : index
    %c0_267 = arith.constant 0 : index
    %372 = vector.load %arg10[%c22_266, %c0_267] : memref<100x16xf32, #tpu.memory_space<vmem>>, vector<78x16xf32>
    %373 = arith.truncf %372 : vector<78x16xf32> to vector<78x16xbf16>
    %c8_268 = arith.constant 8 : index
    %c0_269 = arith.constant 0 : index
    %c0_270 = arith.constant 0 : index
    %374 = vector.load %arg4[%c8_268, %c0_269, %c0_270] : memref<9x16x16xbf16, #tpu.memory_space<vmem>>, vector<1x16x16xbf16>
    %375 = vector.shape_cast %374 : vector<1x16x16xbf16> to vector<16x16xbf16>
    %cst_271 = arith.constant dense<0.000000e+00> : vector<78x16xf32>
    %376 = tpu.matmul %373, %375, %cst_271 {dimension_numbers = #tpu.dot_dimension_numbers<[1], [0], [0], [1], [0, 0, 1, 1], [], []>} : vector<78x16xbf16>, vector<16x16xbf16>, vector<78x16xf32> -> vector<78x16xf32>
    %377 = arith.addf %371, %376 : vector<78x16xf32>
    %378 = tpu.iota {dimensions = array<i32: 0>} : vector<78x1xi32>
    %c10_i32_272 = arith.constant 10 : i32
    %c0_i32_273 = arith.constant 0 : i32
    %379 = arith.cmpi eq, %c10_i32_272, %c0_i32_273 : i32
    %c1_i32_274 = arith.constant 1 : i32
    %380 = arith.select %379, %c1_i32_274, %c10_i32_272 : i32
    %381 = vector.broadcast %380 : i32 to vector<78x1xi32>
    %382 = arith.remsi %378, %381 : vector<78x1xi32>
    %c0_i32_275 = arith.constant 0 : i32
    %383 = vector.broadcast %c0_i32_275 : i32 to vector<78x1xi32>
    %384 = arith.cmpi ne, %382, %383 : vector<78x1xi32>
    %c0_i32_276 = arith.constant 0 : i32
    %385 = vector.broadcast %c0_i32_276 : i32 to vector<78x1xi32>
    %386 = arith.cmpi slt, %382, %385 : vector<78x1xi32>
    %c0_i32_277 = arith.constant 0 : i32
    %387 = arith.cmpi slt, %380, %c0_i32_277 : i32
    %388 = vector.broadcast %387 : i1 to vector<78x1xi1>
    %389 = vector.broadcast %388 : vector<78x1xi1> to vector<78x1xi1>
    %390 = arith.xori %386, %389 : vector<78x1xi1>
    %391 = arith.andi %390, %384 : vector<78x1xi1>
    %392 = vector.broadcast %380 : i32 to vector<78x1xi32>
    %393 = arith.addi %382, %392 : vector<78x1xi32>
    %394 = arith.select %391, %393, %382 : vector<78x1xi1>, vector<78x1xi32>
    %c8_i32_278 = arith.constant 8 : i32
    %395 = vector.broadcast %c8_i32_278 : i32 to vector<78x1xi32>
    %396 = arith.cmpi slt, %394, %395 : vector<78x1xi32>
    %cst_279 = arith.constant 0.000000e+00 : f32
    %397 = vector.shape_cast %396 : vector<78x1xi1> to vector<78x1xi1>
    %398 = vector.broadcast %397 : vector<78x1xi1> to vector<78x16xi1>
    %399 = vector.broadcast %cst_279 : f32 to vector<78x16xf32>
    %400 = arith.select %398, %377, %399 : vector<78x16xi1>, vector<78x16xf32>
    %cst_280 = arith.constant dense<0.000000e+00> : vector<16xf32>
    %401 = vector.multi_reduction <add>, %400, %cst_280 [0] : vector<78x16xf32> to vector<16xf32>
    %402 = vector.shape_cast %401 : vector<16xf32> to vector<1x16xf32>
    %cst_281 = arith.constant 1.562500e-02 : f32
    %403 = vector.broadcast %cst_281 : f32 to vector<1x16xf32>
    %404 = arith.mulf %402, %403 : vector<1x16xf32>
    %405 = vector.broadcast %404 : vector<1x16xf32> to vector<78x16xf32>
    %406 = arith.subf %377, %405 : vector<78x16xf32>
    %cst_282 = arith.constant 0.000000e+00 : f32
    %407 = vector.shape_cast %396 : vector<78x1xi1> to vector<78x1xi1>
    %408 = vector.broadcast %407 : vector<78x1xi1> to vector<78x16xi1>
    %409 = vector.broadcast %cst_282 : f32 to vector<78x16xf32>
    %410 = arith.select %408, %406, %409 : vector<78x16xi1>, vector<78x16xf32>
    %411 = arith.mulf %410, %410 : vector<78x16xf32>
    %cst_283 = arith.constant dense<0.000000e+00> : vector<16xf32>
    %412 = vector.multi_reduction <add>, %411, %cst_283 [0] : vector<78x16xf32> to vector<16xf32>
    %413 = vector.shape_cast %412 : vector<16xf32> to vector<1x16xf32>
    %cst_284 = arith.constant 1.562500e-02 : f32
    %414 = vector.broadcast %cst_284 : f32 to vector<1x16xf32>
    %415 = arith.mulf %413, %414 : vector<1x16xf32>
    %416 = vector.broadcast %404 : vector<1x16xf32> to vector<78x16xf32>
    %417 = arith.subf %377, %416 : vector<78x16xf32>
    %cst_285 = arith.constant 9.99999974E-6 : f32
    %418 = vector.broadcast %cst_285 : f32 to vector<1x16xf32>
    %419 = arith.addf %415, %418 : vector<1x16xf32>
    %420 = math.rsqrt %419 : vector<1x16xf32>
    %421 = vector.broadcast %420 : vector<1x16xf32> to vector<78x16xf32>
    %422 = arith.mulf %417, %421 : vector<78x16xf32>
    %cst_286 = arith.constant 0.000000e+00 : f32
    %423 = vector.broadcast %cst_286 : f32 to vector<78x16xf32>
    %424 = arith.maximumf %422, %423 : vector<78x16xf32>
    %425 = vector.extract_strided_slice %424 {offsets = [0, 0], sizes = [8, 16], strides = [1, 1]} : vector<78x16xf32> to vector<8x16xf32>
    %c11_287 = arith.constant 11 : index
    %c0_288 = arith.constant 0 : index
    %426 = vector.load %arg11[%c11_287, %c0_288] : memref<100x16xf32, #tpu.memory_space<vmem>>, vector<8x16xf32>
    tpu.vector_store %arg11[%c11_287, %c0_288], %425 {strides = array<i32>} : memref<100x16xf32, #tpu.memory_space<vmem>>, vector<8x16xf32>,
    %427 = vector.extract_strided_slice %425 {offsets = [1, 0], sizes = [1, 16], strides = [1, 1]} : vector<8x16xf32> to vector<1x16xf32>
    %c10_289 = arith.constant 10 : index
    %c0_290 = arith.constant 0 : index
    %428 = vector.load %arg11[%c10_289, %c0_290] : memref<100x16xf32, #tpu.memory_space<vmem>>, vector<1x16xf32>
    tpu.vector_store %arg11[%c10_289, %c0_290], %427 {strides = array<i32>} : memref<100x16xf32, #tpu.memory_space<vmem>>, vector<1x16xf32>,
    %429 = vector.extract_strided_slice %425 {offsets = [6, 0], sizes = [1, 16], strides = [1, 1]} : vector<8x16xf32> to vector<1x16xf32>
    %c19_291 = arith.constant 19 : index
    %c0_292 = arith.constant 0 : index
    %430 = vector.load %arg11[%c19_291, %c0_292] : memref<100x16xf32, #tpu.memory_space<vmem>>, vector<1x16xf32>
    tpu.vector_store %arg11[%c19_291, %c0_292], %429 {strides = array<i32>} : memref<100x16xf32, #tpu.memory_space<vmem>>, vector<1x16xf32>,
    %431 = vector.extract_strided_slice %424 {offsets = [10, 0], sizes = [8, 16], strides = [1, 1]} : vector<78x16xf32> to vector<8x16xf32>
    %c21_293 = arith.constant 21 : index
    %c0_294 = arith.constant 0 : index
    %432 = vector.load %arg11[%c21_293, %c0_294] : memref<100x16xf32, #tpu.memory_space<vmem>>, vector<8x16xf32>
    tpu.vector_store %arg11[%c21_293, %c0_294], %431 {strides = array<i32>} : memref<100x16xf32, #tpu.memory_space<vmem>>, vector<8x16xf32>,
    %433 = vector.extract_strided_slice %431 {offsets = [1, 0], sizes = [1, 16], strides = [1, 1]} : vector<8x16xf32> to vector<1x16xf32>
    %c20_295 = arith.constant 20 : index
    %c0_296 = arith.constant 0 : index
    %434 = vector.load %arg11[%c20_295, %c0_296] : memref<100x16xf32, #tpu.memory_space<vmem>>, vector<1x16xf32>
    tpu.vector_store %arg11[%c20_295, %c0_296], %433 {strides = array<i32>} : memref<100x16xf32, #tpu.memory_space<vmem>>, vector<1x16xf32>,
    %435 = vector.extract_strided_slice %431 {offsets = [6, 0], sizes = [1, 16], strides = [1, 1]} : vector<8x16xf32> to vector<1x16xf32>
    %c29_297 = arith.constant 29 : index
    %c0_298 = arith.constant 0 : index
    %436 = vector.load %arg11[%c29_297, %c0_298] : memref<100x16xf32, #tpu.memory_space<vmem>>, vector<1x16xf32>
    tpu.vector_store %arg11[%c29_297, %c0_298], %435 {strides = array<i32>} : memref<100x16xf32, #tpu.memory_space<vmem>>, vector<1x16xf32>,
    %c1_299 = arith.constant 1 : index
    %c0_300 = arith.constant 0 : index
    %437 = vector.load %arg11[%c1_299, %c0_300] : memref<100x16xf32, #tpu.memory_space<vmem>>, vector<8x16xf32>
    tpu.vector_store %arg11[%c1_299, %c0_300], %431 {strides = array<i32>} : memref<100x16xf32, #tpu.memory_space<vmem>>, vector<8x16xf32>,
    %438 = vector.extract_strided_slice %431 {offsets = [1, 0], sizes = [1, 16], strides = [1, 1]} : vector<8x16xf32> to vector<1x16xf32>
    %c0_301 = arith.constant 0 : index
    %c0_302 = arith.constant 0 : index
    %439 = vector.load %arg11[%c0_301, %c0_302] : memref<100x16xf32, #tpu.memory_space<vmem>>, vector<1x16xf32>
    tpu.vector_store %arg11[%c0_301, %c0_302], %438 {strides = array<i32>} : memref<100x16xf32, #tpu.memory_space<vmem>>, vector<1x16xf32>,
    %440 = vector.extract_strided_slice %431 {offsets = [6, 0], sizes = [1, 16], strides = [1, 1]} : vector<8x16xf32> to vector<1x16xf32>
    %c9_303 = arith.constant 9 : index
    %c0_304 = arith.constant 0 : index
    %441 = vector.load %arg11[%c9_303, %c0_304] : memref<100x16xf32, #tpu.memory_space<vmem>>, vector<1x16xf32>
    tpu.vector_store %arg11[%c9_303, %c0_304], %440 {strides = array<i32>} : memref<100x16xf32, #tpu.memory_space<vmem>>, vector<1x16xf32>,
    %442 = vector.extract_strided_slice %424 {offsets = [20, 0], sizes = [8, 16], strides = [1, 1]} : vector<78x16xf32> to vector<8x16xf32>
    %c31_305 = arith.constant 31 : index
    %c0_306 = arith.constant 0 : index
    %443 = vector.load %arg11[%c31_305, %c0_306] : memref<100x16xf32, #tpu.memory_space<vmem>>, vector<8x16xf32>
    tpu.vector_store %arg11[%c31_305, %c0_306], %442 {strides = array<i32>} : memref<100x16xf32, #tpu.memory_space<vmem>>, vector<8x16xf32>,
    %444 = vector.extract_strided_slice %442 {offsets = [1, 0], sizes = [1, 16], strides = [1, 1]} : vector<8x16xf32> to vector<1x16xf32>
    %c30_307 = arith.constant 30 : index
    %c0_308 = arith.constant 0 : index
    %445 = vector.load %arg11[%c30_307, %c0_308] : memref<100x16xf32, #tpu.memory_space<vmem>>, vector<1x16xf32>
    tpu.vector_store %arg11[%c30_307, %c0_308], %444 {strides = array<i32>} : memref<100x16xf32, #tpu.memory_space<vmem>>, vector<1x16xf32>,
    %446 = vector.extract_strided_slice %442 {offsets = [6, 0], sizes = [1, 16], strides = [1, 1]} : vector<8x16xf32> to vector<1x16xf32>
    %c39_309 = arith.constant 39 : index
    %c0_310 = arith.constant 0 : index
    %447 = vector.load %arg11[%c39_309, %c0_310] : memref<100x16xf32, #tpu.memory_space<vmem>>, vector<1x16xf32>
    tpu.vector_store %arg11[%c39_309, %c0_310], %446 {strides = array<i32>} : memref<100x16xf32, #tpu.memory_space<vmem>>, vector<1x16xf32>,
    %448 = vector.extract_strided_slice %424 {offsets = [30, 0], sizes = [8, 16], strides = [1, 1]} : vector<78x16xf32> to vector<8x16xf32>
    %c41_311 = arith.constant 41 : index
    %c0_312 = arith.constant 0 : index
    %449 = vector.load %arg11[%c41_311, %c0_312] : memref<100x16xf32, #tpu.memory_space<vmem>>, vector<8x16xf32>
    tpu.vector_store %arg11[%c41_311, %c0_312], %448 {strides = array<i32>} : memref<100x16xf32, #tpu.memory_space<vmem>>, vector<8x16xf32>,
    %450 = vector.extract_strided_slice %448 {offsets = [1, 0], sizes = [1, 16], strides = [1, 1]} : vector<8x16xf32> to vector<1x16xf32>
    %c40_313 = arith.constant 40 : index
    %c0_314 = arith.constant 0 : index
    %451 = vector.load %arg11[%c40_313, %c0_314] : memref<100x16xf32, #tpu.memory_space<vmem>>, vector<1x16xf32>
    tpu.vector_store %arg11[%c40_313, %c0_314], %450 {strides = array<i32>} : memref<100x16xf32, #tpu.memory_space<vmem>>, vector<1x16xf32>,
    %452 = vector.extract_strided_slice %448 {offsets = [6, 0], sizes = [1, 16], strides = [1, 1]} : vector<8x16xf32> to vector<1x16xf32>
    %c49_315 = arith.constant 49 : index
    %c0_316 = arith.constant 0 : index
    %453 = vector.load %arg11[%c49_315, %c0_316] : memref<100x16xf32, #tpu.memory_space<vmem>>, vector<1x16xf32>
    tpu.vector_store %arg11[%c49_315, %c0_316], %452 {strides = array<i32>} : memref<100x16xf32, #tpu.memory_space<vmem>>, vector<1x16xf32>,
    %454 = vector.extract_strided_slice %424 {offsets = [40, 0], sizes = [8, 16], strides = [1, 1]} : vector<78x16xf32> to vector<8x16xf32>
    %c51_317 = arith.constant 51 : index
    %c0_318 = arith.constant 0 : index
    %455 = vector.load %arg11[%c51_317, %c0_318] : memref<100x16xf32, #tpu.memory_space<vmem>>, vector<8x16xf32>
    tpu.vector_store %arg11[%c51_317, %c0_318], %454 {strides = array<i32>} : memref<100x16xf32, #tpu.memory_space<vmem>>, vector<8x16xf32>,
    %456 = vector.extract_strided_slice %454 {offsets = [1, 0], sizes = [1, 16], strides = [1, 1]} : vector<8x16xf32> to vector<1x16xf32>
    %c50_319 = arith.constant 50 : index
    %c0_320 = arith.constant 0 : index
    %457 = vector.load %arg11[%c50_319, %c0_320] : memref<100x16xf32, #tpu.memory_space<vmem>>, vector<1x16xf32>
    tpu.vector_store %arg11[%c50_319, %c0_320], %456 {strides = array<i32>} : memref<100x16xf32, #tpu.memory_space<vmem>>, vector<1x16xf32>,
    %458 = vector.extract_strided_slice %454 {offsets = [6, 0], sizes = [1, 16], strides = [1, 1]} : vector<8x16xf32> to vector<1x16xf32>
    %c59_321 = arith.constant 59 : index
    %c0_322 = arith.constant 0 : index
    %459 = vector.load %arg11[%c59_321, %c0_322] : memref<100x16xf32, #tpu.memory_space<vmem>>, vector<1x16xf32>
    tpu.vector_store %arg11[%c59_321, %c0_322], %458 {strides = array<i32>} : memref<100x16xf32, #tpu.memory_space<vmem>>, vector<1x16xf32>,
    %460 = vector.extract_strided_slice %424 {offsets = [50, 0], sizes = [8, 16], strides = [1, 1]} : vector<78x16xf32> to vector<8x16xf32>
    %c61_323 = arith.constant 61 : index
    %c0_324 = arith.constant 0 : index
    %461 = vector.load %arg11[%c61_323, %c0_324] : memref<100x16xf32, #tpu.memory_space<vmem>>, vector<8x16xf32>
    tpu.vector_store %arg11[%c61_323, %c0_324], %460 {strides = array<i32>} : memref<100x16xf32, #tpu.memory_space<vmem>>, vector<8x16xf32>,
    %462 = vector.extract_strided_slice %460 {offsets = [1, 0], sizes = [1, 16], strides = [1, 1]} : vector<8x16xf32> to vector<1x16xf32>
    %c60_325 = arith.constant 60 : index
    %c0_326 = arith.constant 0 : index
    %463 = vector.load %arg11[%c60_325, %c0_326] : memref<100x16xf32, #tpu.memory_space<vmem>>, vector<1x16xf32>
    tpu.vector_store %arg11[%c60_325, %c0_326], %462 {strides = array<i32>} : memref<100x16xf32, #tpu.memory_space<vmem>>, vector<1x16xf32>,
    %464 = vector.extract_strided_slice %460 {offsets = [6, 0], sizes = [1, 16], strides = [1, 1]} : vector<8x16xf32> to vector<1x16xf32>
    %c69_327 = arith.constant 69 : index
    %c0_328 = arith.constant 0 : index
    %465 = vector.load %arg11[%c69_327, %c0_328] : memref<100x16xf32, #tpu.memory_space<vmem>>, vector<1x16xf32>
    tpu.vector_store %arg11[%c69_327, %c0_328], %464 {strides = array<i32>} : memref<100x16xf32, #tpu.memory_space<vmem>>, vector<1x16xf32>,
    %466 = vector.extract_strided_slice %424 {offsets = [60, 0], sizes = [8, 16], strides = [1, 1]} : vector<78x16xf32> to vector<8x16xf32>
    %c71_329 = arith.constant 71 : index
    %c0_330 = arith.constant 0 : index
    %467 = vector.load %arg11[%c71_329, %c0_330] : memref<100x16xf32, #tpu.memory_space<vmem>>, vector<8x16xf32>
    tpu.vector_store %arg11[%c71_329, %c0_330], %466 {strides = array<i32>} : memref<100x16xf32, #tpu.memory_space<vmem>>, vector<8x16xf32>,
    %468 = vector.extract_strided_slice %466 {offsets = [1, 0], sizes = [1, 16], strides = [1, 1]} : vector<8x16xf32> to vector<1x16xf32>
    %c70_331 = arith.constant 70 : index
    %c0_332 = arith.constant 0 : index
    %469 = vector.load %arg11[%c70_331, %c0_332] : memref<100x16xf32, #tpu.memory_space<vmem>>, vector<1x16xf32>
    tpu.vector_store %arg11[%c70_331, %c0_332], %468 {strides = array<i32>} : memref<100x16xf32, #tpu.memory_space<vmem>>, vector<1x16xf32>,
    %470 = vector.extract_strided_slice %466 {offsets = [6, 0], sizes = [1, 16], strides = [1, 1]} : vector<8x16xf32> to vector<1x16xf32>
    %c79_333 = arith.constant 79 : index
    %c0_334 = arith.constant 0 : index
    %471 = vector.load %arg11[%c79_333, %c0_334] : memref<100x16xf32, #tpu.memory_space<vmem>>, vector<1x16xf32>
    tpu.vector_store %arg11[%c79_333, %c0_334], %470 {strides = array<i32>} : memref<100x16xf32, #tpu.memory_space<vmem>>, vector<1x16xf32>,
    %c91_335 = arith.constant 91 : index
    %c0_336 = arith.constant 0 : index
    %472 = vector.load %arg11[%c91_335, %c0_336] : memref<100x16xf32, #tpu.memory_space<vmem>>, vector<8x16xf32>
    tpu.vector_store %arg11[%c91_335, %c0_336], %466 {strides = array<i32>} : memref<100x16xf32, #tpu.memory_space<vmem>>, vector<8x16xf32>,
    %473 = vector.extract_strided_slice %466 {offsets = [1, 0], sizes = [1, 16], strides = [1, 1]} : vector<8x16xf32> to vector<1x16xf32>
    %c90_337 = arith.constant 90 : index
    %c0_338 = arith.constant 0 : index
    %474 = vector.load %arg11[%c90_337, %c0_338] : memref<100x16xf32, #tpu.memory_space<vmem>>, vector<1x16xf32>
    tpu.vector_store %arg11[%c90_337, %c0_338], %473 {strides = array<i32>} : memref<100x16xf32, #tpu.memory_space<vmem>>, vector<1x16xf32>,
    %475 = vector.extract_strided_slice %466 {offsets = [6, 0], sizes = [1, 16], strides = [1, 1]} : vector<8x16xf32> to vector<1x16xf32>
    %c99_339 = arith.constant 99 : index
    %c0_340 = arith.constant 0 : index
    %476 = vector.load %arg11[%c99_339, %c0_340] : memref<100x16xf32, #tpu.memory_space<vmem>>, vector<1x16xf32>
    tpu.vector_store %arg11[%c99_339, %c0_340], %475 {strides = array<i32>} : memref<100x16xf32, #tpu.memory_space<vmem>>, vector<1x16xf32>,
    %477 = vector.extract_strided_slice %424 {offsets = [70, 0], sizes = [8, 16], strides = [1, 1]} : vector<78x16xf32> to vector<8x16xf32>
    %c81_341 = arith.constant 81 : index
    %c0_342 = arith.constant 0 : index
    %478 = vector.load %arg11[%c81_341, %c0_342] : memref<100x16xf32, #tpu.memory_space<vmem>>, vector<8x16xf32>
    tpu.vector_store %arg11[%c81_341, %c0_342], %477 {strides = array<i32>} : memref<100x16xf32, #tpu.memory_space<vmem>>, vector<8x16xf32>,
    %479 = vector.extract_strided_slice %477 {offsets = [1, 0], sizes = [1, 16], strides = [1, 1]} : vector<8x16xf32> to vector<1x16xf32>
    %c80_343 = arith.constant 80 : index
    %c0_344 = arith.constant 0 : index
    %480 = vector.load %arg11[%c80_343, %c0_344] : memref<100x16xf32, #tpu.memory_space<vmem>>, vector<1x16xf32>
    tpu.vector_store %arg11[%c80_343, %c0_344], %479 {strides = array<i32>} : memref<100x16xf32, #tpu.memory_space<vmem>>, vector<1x16xf32>,
    %481 = vector.extract_strided_slice %477 {offsets = [6, 0], sizes = [1, 16], strides = [1, 1]} : vector<8x16xf32> to vector<1x16xf32>
    %c89_345 = arith.constant 89 : index
    %c0_346 = arith.constant 0 : index
    %482 = vector.load %arg11[%c89_345, %c0_346] : memref<100x16xf32, #tpu.memory_space<vmem>>, vector<1x16xf32>
    tpu.vector_store %arg11[%c89_345, %c0_346], %481 {strides = array<i32>} : memref<100x16xf32, #tpu.memory_space<vmem>>, vector<1x16xf32>,
    %c0_347 = arith.constant 0 : index
    %c0_348 = arith.constant 0 : index
    %483 = tpu.strided_load %arg11[%c0_347, %c0_348] {strides = array<i32: 2, 1>} : memref<100x16xf32, #tpu.memory_space<vmem>>, vector<34x16xf32>
    %484 = arith.truncf %483 : vector<34x16xf32> to vector<34x16xbf16>
    %c0_349 = arith.constant 0 : index
    %c0_350 = arith.constant 0 : index
    %c0_351 = arith.constant 0 : index
    %485 = vector.load %arg5[%c0_349, %c0_350, %c0_351] : memref<9x16x32xbf16, #tpu.memory_space<vmem>>, vector<1x16x32xbf16>
    %486 = vector.shape_cast %485 : vector<1x16x32xbf16> to vector<16x32xbf16>
    %cst_352 = arith.constant dense<0.000000e+00> : vector<34x32xf32>
    %487 = tpu.matmul %484, %486, %cst_352 {dimension_numbers = #tpu.dot_dimension_numbers<[1], [0], [0], [1], [0, 0, 1, 1], [], []>} : vector<34x16xbf16>, vector<16x32xbf16>, vector<34x32xf32> -> vector<34x32xf32>
    %c1_353 = arith.constant 1 : index
    %c0_354 = arith.constant 0 : index
    %488 = tpu.strided_load %arg11[%c1_353, %c0_354] {strides = array<i32: 2, 1>} : memref<100x16xf32, #tpu.memory_space<vmem>>, vector<34x16xf32>
    %489 = arith.truncf %488 : vector<34x16xf32> to vector<34x16xbf16>
    %c1_355 = arith.constant 1 : index
    %c0_356 = arith.constant 0 : index
    %c0_357 = arith.constant 0 : index
    %490 = vector.load %arg5[%c1_355, %c0_356, %c0_357] : memref<9x16x32xbf16, #tpu.memory_space<vmem>>, vector<1x16x32xbf16>
    %491 = vector.shape_cast %490 : vector<1x16x32xbf16> to vector<16x32xbf16>
    %cst_358 = arith.constant dense<0.000000e+00> : vector<34x32xf32>
    %492 = tpu.matmul %489, %491, %cst_358 {dimension_numbers = #tpu.dot_dimension_numbers<[1], [0], [0], [1], [0, 0, 1, 1], [], []>} : vector<34x16xbf16>, vector<16x32xbf16>, vector<34x32xf32> -> vector<34x32xf32>
    %493 = arith.addf %487, %492 : vector<34x32xf32>
    %c2_359 = arith.constant 2 : index
    %c0_360 = arith.constant 0 : index
    %494 = tpu.strided_load %arg11[%c2_359, %c0_360] {strides = array<i32: 2, 1>} : memref<100x16xf32, #tpu.memory_space<vmem>>, vector<34x16xf32>
    %495 = arith.truncf %494 : vector<34x16xf32> to vector<34x16xbf16>
    %c2_361 = arith.constant 2 : index
    %c0_362 = arith.constant 0 : index
    %c0_363 = arith.constant 0 : index
    %496 = vector.load %arg5[%c2_361, %c0_362, %c0_363] : memref<9x16x32xbf16, #tpu.memory_space<vmem>>, vector<1x16x32xbf16>
    %497 = vector.shape_cast %496 : vector<1x16x32xbf16> to vector<16x32xbf16>
    %cst_364 = arith.constant dense<0.000000e+00> : vector<34x32xf32>
    %498 = tpu.matmul %495, %497, %cst_364 {dimension_numbers = #tpu.dot_dimension_numbers<[1], [0], [0], [1], [0, 0, 1, 1], [], []>} : vector<34x16xbf16>, vector<16x32xbf16>, vector<34x32xf32> -> vector<34x32xf32>
    %499 = arith.addf %493, %498 : vector<34x32xf32>
    %c10_365 = arith.constant 10 : index
    %c0_366 = arith.constant 0 : index
    %500 = tpu.strided_load %arg11[%c10_365, %c0_366] {strides = array<i32: 2, 1>} : memref<100x16xf32, #tpu.memory_space<vmem>>, vector<34x16xf32>
    %501 = arith.truncf %500 : vector<34x16xf32> to vector<34x16xbf16>
    %c3_367 = arith.constant 3 : index
    %c0_368 = arith.constant 0 : index
    %c0_369 = arith.constant 0 : index
    %502 = vector.load %arg5[%c3_367, %c0_368, %c0_369] : memref<9x16x32xbf16, #tpu.memory_space<vmem>>, vector<1x16x32xbf16>
    %503 = vector.shape_cast %502 : vector<1x16x32xbf16> to vector<16x32xbf16>
    %cst_370 = arith.constant dense<0.000000e+00> : vector<34x32xf32>
    %504 = tpu.matmul %501, %503, %cst_370 {dimension_numbers = #tpu.dot_dimension_numbers<[1], [0], [0], [1], [0, 0, 1, 1], [], []>} : vector<34x16xbf16>, vector<16x32xbf16>, vector<34x32xf32> -> vector<34x32xf32>
    %505 = arith.addf %499, %504 : vector<34x32xf32>
    %c11_371 = arith.constant 11 : index
    %c0_372 = arith.constant 0 : index
    %506 = tpu.strided_load %arg11[%c11_371, %c0_372] {strides = array<i32: 2, 1>} : memref<100x16xf32, #tpu.memory_space<vmem>>, vector<34x16xf32>
    %507 = arith.truncf %506 : vector<34x16xf32> to vector<34x16xbf16>
    %c4_373 = arith.constant 4 : index
    %c0_374 = arith.constant 0 : index
    %c0_375 = arith.constant 0 : index
    %508 = vector.load %arg5[%c4_373, %c0_374, %c0_375] : memref<9x16x32xbf16, #tpu.memory_space<vmem>>, vector<1x16x32xbf16>
    %509 = vector.shape_cast %508 : vector<1x16x32xbf16> to vector<16x32xbf16>
    %cst_376 = arith.constant dense<0.000000e+00> : vector<34x32xf32>
    %510 = tpu.matmul %507, %509, %cst_376 {dimension_numbers = #tpu.dot_dimension_numbers<[1], [0], [0], [1], [0, 0, 1, 1], [], []>} : vector<34x16xbf16>, vector<16x32xbf16>, vector<34x32xf32> -> vector<34x32xf32>
    %511 = arith.addf %505, %510 : vector<34x32xf32>
    %c12_377 = arith.constant 12 : index
    %c0_378 = arith.constant 0 : index
    %512 = tpu.strided_load %arg11[%c12_377, %c0_378] {strides = array<i32: 2, 1>} : memref<100x16xf32, #tpu.memory_space<vmem>>, vector<34x16xf32>
    %513 = arith.truncf %512 : vector<34x16xf32> to vector<34x16xbf16>
    %c5_379 = arith.constant 5 : index
    %c0_380 = arith.constant 0 : index
    %c0_381 = arith.constant 0 : index
    %514 = vector.load %arg5[%c5_379, %c0_380, %c0_381] : memref<9x16x32xbf16, #tpu.memory_space<vmem>>, vector<1x16x32xbf16>
    %515 = vector.shape_cast %514 : vector<1x16x32xbf16> to vector<16x32xbf16>
    %cst_382 = arith.constant dense<0.000000e+00> : vector<34x32xf32>
    %516 = tpu.matmul %513, %515, %cst_382 {dimension_numbers = #tpu.dot_dimension_numbers<[1], [0], [0], [1], [0, 0, 1, 1], [], []>} : vector<34x16xbf16>, vector<16x32xbf16>, vector<34x32xf32> -> vector<34x32xf32>
    %517 = arith.addf %511, %516 : vector<34x32xf32>
    %c20_383 = arith.constant 20 : index
    %c0_384 = arith.constant 0 : index
    %518 = tpu.strided_load %arg11[%c20_383, %c0_384] {strides = array<i32: 2, 1>} : memref<100x16xf32, #tpu.memory_space<vmem>>, vector<34x16xf32>
    %519 = arith.truncf %518 : vector<34x16xf32> to vector<34x16xbf16>
    %c6_385 = arith.constant 6 : index
    %c0_386 = arith.constant 0 : index
    %c0_387 = arith.constant 0 : index
    %520 = vector.load %arg5[%c6_385, %c0_386, %c0_387] : memref<9x16x32xbf16, #tpu.memory_space<vmem>>, vector<1x16x32xbf16>
    %521 = vector.shape_cast %520 : vector<1x16x32xbf16> to vector<16x32xbf16>
    %cst_388 = arith.constant dense<0.000000e+00> : vector<34x32xf32>
    %522 = tpu.matmul %519, %521, %cst_388 {dimension_numbers = #tpu.dot_dimension_numbers<[1], [0], [0], [1], [0, 0, 1, 1], [], []>} : vector<34x16xbf16>, vector<16x32xbf16>, vector<34x32xf32> -> vector<34x32xf32>
    %523 = arith.addf %517, %522 : vector<34x32xf32>
    %c21_389 = arith.constant 21 : index
    %c0_390 = arith.constant 0 : index
    %524 = tpu.strided_load %arg11[%c21_389, %c0_390] {strides = array<i32: 2, 1>} : memref<100x16xf32, #tpu.memory_space<vmem>>, vector<34x16xf32>
    %525 = arith.truncf %524 : vector<34x16xf32> to vector<34x16xbf16>
    %c7_391 = arith.constant 7 : index
    %c0_392 = arith.constant 0 : index
    %c0_393 = arith.constant 0 : index
    %526 = vector.load %arg5[%c7_391, %c0_392, %c0_393] : memref<9x16x32xbf16, #tpu.memory_space<vmem>>, vector<1x16x32xbf16>
    %527 = vector.shape_cast %526 : vector<1x16x32xbf16> to vector<16x32xbf16>
    %cst_394 = arith.constant dense<0.000000e+00> : vector<34x32xf32>
    %528 = tpu.matmul %525, %527, %cst_394 {dimension_numbers = #tpu.dot_dimension_numbers<[1], [0], [0], [1], [0, 0, 1, 1], [], []>} : vector<34x16xbf16>, vector<16x32xbf16>, vector<34x32xf32> -> vector<34x32xf32>
    %529 = arith.addf %523, %528 : vector<34x32xf32>
    %c22_395 = arith.constant 22 : index
    %c0_396 = arith.constant 0 : index
    %530 = tpu.strided_load %arg11[%c22_395, %c0_396] {strides = array<i32: 2, 1>} : memref<100x16xf32, #tpu.memory_space<vmem>>, vector<34x16xf32>
    %531 = arith.truncf %530 : vector<34x16xf32> to vector<34x16xbf16>
    %c8_397 = arith.constant 8 : index
    %c0_398 = arith.constant 0 : index
    %c0_399 = arith.constant 0 : index
    %532 = vector.load %arg5[%c8_397, %c0_398, %c0_399] : memref<9x16x32xbf16, #tpu.memory_space<vmem>>, vector<1x16x32xbf16>
    %533 = vector.shape_cast %532 : vector<1x16x32xbf16> to vector<16x32xbf16>
    %cst_400 = arith.constant dense<0.000000e+00> : vector<34x32xf32>
    %534 = tpu.matmul %531, %533, %cst_400 {dimension_numbers = #tpu.dot_dimension_numbers<[1], [0], [0], [1], [0, 0, 1, 1], [], []>} : vector<34x16xbf16>, vector<16x32xbf16>, vector<34x32xf32> -> vector<34x32xf32>
    %535 = arith.addf %529, %534 : vector<34x32xf32>
    %536 = tpu.iota {dimensions = array<i32: 0>} : vector<34x1xi32>
    %c10_i32_401 = arith.constant 10 : i32
    %c0_i32_402 = arith.constant 0 : i32
    %537 = arith.cmpi eq, %c10_i32_401, %c0_i32_402 : i32
    %c1_i32_403 = arith.constant 1 : i32
    %538 = arith.select %537, %c1_i32_403, %c10_i32_401 : i32
    %539 = vector.broadcast %538 : i32 to vector<34x1xi32>
    %540 = arith.remsi %536, %539 : vector<34x1xi32>
    %c0_i32_404 = arith.constant 0 : i32
    %541 = vector.broadcast %c0_i32_404 : i32 to vector<34x1xi32>
    %542 = arith.cmpi ne, %540, %541 : vector<34x1xi32>
    %c0_i32_405 = arith.constant 0 : i32
    %543 = vector.broadcast %c0_i32_405 : i32 to vector<34x1xi32>
    %544 = arith.cmpi slt, %540, %543 : vector<34x1xi32>
    %c0_i32_406 = arith.constant 0 : i32
    %545 = arith.cmpi slt, %538, %c0_i32_406 : i32
    %546 = vector.broadcast %545 : i1 to vector<34x1xi1>
    %547 = vector.broadcast %546 : vector<34x1xi1> to vector<34x1xi1>
    %548 = arith.xori %544, %547 : vector<34x1xi1>
    %549 = arith.andi %548, %542 : vector<34x1xi1>
    %550 = vector.broadcast %538 : i32 to vector<34x1xi32>
    %551 = arith.addi %540, %550 : vector<34x1xi32>
    %552 = arith.select %549, %551, %540 : vector<34x1xi1>, vector<34x1xi32>
    %c4_i32 = arith.constant 4 : i32
    %553 = vector.broadcast %c4_i32 : i32 to vector<34x1xi32>
    %554 = arith.cmpi slt, %552, %553 : vector<34x1xi32>
    %cst_407 = arith.constant 0.000000e+00 : f32
    %555 = vector.shape_cast %554 : vector<34x1xi1> to vector<34x1xi1>
    %556 = vector.broadcast %555 : vector<34x1xi1> to vector<34x32xi1>
    %557 = vector.broadcast %cst_407 : f32 to vector<34x32xf32>
    %558 = arith.select %556, %535, %557 : vector<34x32xi1>, vector<34x32xf32>
    %cst_408 = arith.constant dense<0.000000e+00> : vector<32xf32>
    %559 = vector.multi_reduction <add>, %558, %cst_408 [0] : vector<34x32xf32> to vector<32xf32>
    %560 = vector.shape_cast %559 : vector<32xf32> to vector<1x32xf32>
    %cst_409 = arith.constant 6.250000e-02 : f32
    %561 = vector.broadcast %cst_409 : f32 to vector<1x32xf32>
    %562 = arith.mulf %560, %561 : vector<1x32xf32>
    %563 = vector.broadcast %562 : vector<1x32xf32> to vector<34x32xf32>
    %564 = arith.subf %535, %563 : vector<34x32xf32>
    %cst_410 = arith.constant 0.000000e+00 : f32
    %565 = vector.shape_cast %554 : vector<34x1xi1> to vector<34x1xi1>
    %566 = vector.broadcast %565 : vector<34x1xi1> to vector<34x32xi1>
    %567 = vector.broadcast %cst_410 : f32 to vector<34x32xf32>
    %568 = arith.select %566, %564, %567 : vector<34x32xi1>, vector<34x32xf32>
    %569 = arith.mulf %568, %568 : vector<34x32xf32>
    %cst_411 = arith.constant dense<0.000000e+00> : vector<32xf32>
    %570 = vector.multi_reduction <add>, %569, %cst_411 [0] : vector<34x32xf32> to vector<32xf32>
    %571 = vector.shape_cast %570 : vector<32xf32> to vector<1x32xf32>
    %cst_412 = arith.constant 6.250000e-02 : f32
    %572 = vector.broadcast %cst_412 : f32 to vector<1x32xf32>
    %573 = arith.mulf %571, %572 : vector<1x32xf32>
    %574 = vector.broadcast %562 : vector<1x32xf32> to vector<34x32xf32>
    %575 = arith.subf %535, %574 : vector<34x32xf32>
    %cst_413 = arith.constant 9.99999974E-6 : f32
    %576 = vector.broadcast %cst_413 : f32 to vector<1x32xf32>
    %577 = arith.addf %573, %576 : vector<1x32xf32>
    %578 = math.rsqrt %577 : vector<1x32xf32>
    %579 = vector.broadcast %578 : vector<1x32xf32> to vector<34x32xf32>
    %580 = arith.mulf %575, %579 : vector<34x32xf32>
    %cst_414 = arith.constant 0.000000e+00 : f32
    %581 = vector.broadcast %cst_414 : f32 to vector<34x32xf32>
    %582 = arith.maximumf %580, %581 : vector<34x32xf32>
    %583 = vector.extract_strided_slice %582 {offsets = [0, 0], sizes = [4, 32], strides = [1, 1]} : vector<34x32xf32> to vector<4x32xf32>
    %c7_415 = arith.constant 7 : index
    %c0_416 = arith.constant 0 : index
    %584 = vector.load %arg12[%c7_415, %c0_416] : memref<36x32xf32, #tpu.memory_space<vmem>>, vector<4x32xf32>
    tpu.vector_store %arg12[%c7_415, %c0_416], %583 {strides = array<i32>} : memref<36x32xf32, #tpu.memory_space<vmem>>, vector<4x32xf32>,
    %585 = vector.extract_strided_slice %583 {offsets = [1, 0], sizes = [1, 32], strides = [1, 1]} : vector<4x32xf32> to vector<1x32xf32>
    %c6_417 = arith.constant 6 : index
    %c0_418 = arith.constant 0 : index
    %586 = vector.load %arg12[%c6_417, %c0_418] : memref<36x32xf32, #tpu.memory_space<vmem>>, vector<1x32xf32>
    tpu.vector_store %arg12[%c6_417, %c0_418], %585 {strides = array<i32>} : memref<36x32xf32, #tpu.memory_space<vmem>>, vector<1x32xf32>,
    %587 = vector.extract_strided_slice %583 {offsets = [2, 0], sizes = [1, 32], strides = [1, 1]} : vector<4x32xf32> to vector<1x32xf32>
    %c11_419 = arith.constant 11 : index
    %c0_420 = arith.constant 0 : index
    %588 = vector.load %arg12[%c11_419, %c0_420] : memref<36x32xf32, #tpu.memory_space<vmem>>, vector<1x32xf32>
    tpu.vector_store %arg12[%c11_419, %c0_420], %587 {strides = array<i32>} : memref<36x32xf32, #tpu.memory_space<vmem>>, vector<1x32xf32>,
    %589 = vector.extract_strided_slice %582 {offsets = [10, 0], sizes = [4, 32], strides = [1, 1]} : vector<34x32xf32> to vector<4x32xf32>
    %c13 = arith.constant 13 : index
    %c0_421 = arith.constant 0 : index
    %590 = vector.load %arg12[%c13, %c0_421] : memref<36x32xf32, #tpu.memory_space<vmem>>, vector<4x32xf32>
    tpu.vector_store %arg12[%c13, %c0_421], %589 {strides = array<i32>} : memref<36x32xf32, #tpu.memory_space<vmem>>, vector<4x32xf32>,
    %591 = vector.extract_strided_slice %589 {offsets = [1, 0], sizes = [1, 32], strides = [1, 1]} : vector<4x32xf32> to vector<1x32xf32>
    %c12_422 = arith.constant 12 : index
    %c0_423 = arith.constant 0 : index
    %592 = vector.load %arg12[%c12_422, %c0_423] : memref<36x32xf32, #tpu.memory_space<vmem>>, vector<1x32xf32>
    tpu.vector_store %arg12[%c12_422, %c0_423], %591 {strides = array<i32>} : memref<36x32xf32, #tpu.memory_space<vmem>>, vector<1x32xf32>,
    %593 = vector.extract_strided_slice %589 {offsets = [2, 0], sizes = [1, 32], strides = [1, 1]} : vector<4x32xf32> to vector<1x32xf32>
    %c17 = arith.constant 17 : index
    %c0_424 = arith.constant 0 : index
    %594 = vector.load %arg12[%c17, %c0_424] : memref<36x32xf32, #tpu.memory_space<vmem>>, vector<1x32xf32>
    tpu.vector_store %arg12[%c17, %c0_424], %593 {strides = array<i32>} : memref<36x32xf32, #tpu.memory_space<vmem>>, vector<1x32xf32>,
    %c1_425 = arith.constant 1 : index
    %c0_426 = arith.constant 0 : index
    %595 = vector.load %arg12[%c1_425, %c0_426] : memref<36x32xf32, #tpu.memory_space<vmem>>, vector<4x32xf32>
    tpu.vector_store %arg12[%c1_425, %c0_426], %589 {strides = array<i32>} : memref<36x32xf32, #tpu.memory_space<vmem>>, vector<4x32xf32>,
    %596 = vector.extract_strided_slice %589 {offsets = [1, 0], sizes = [1, 32], strides = [1, 1]} : vector<4x32xf32> to vector<1x32xf32>
    %c0_427 = arith.constant 0 : index
    %c0_428 = arith.constant 0 : index
    %597 = vector.load %arg12[%c0_427, %c0_428] : memref<36x32xf32, #tpu.memory_space<vmem>>, vector<1x32xf32>
    tpu.vector_store %arg12[%c0_427, %c0_428], %596 {strides = array<i32>} : memref<36x32xf32, #tpu.memory_space<vmem>>, vector<1x32xf32>,
    %598 = vector.extract_strided_slice %589 {offsets = [2, 0], sizes = [1, 32], strides = [1, 1]} : vector<4x32xf32> to vector<1x32xf32>
    %c5_429 = arith.constant 5 : index
    %c0_430 = arith.constant 0 : index
    %599 = vector.load %arg12[%c5_429, %c0_430] : memref<36x32xf32, #tpu.memory_space<vmem>>, vector<1x32xf32>
    tpu.vector_store %arg12[%c5_429, %c0_430], %598 {strides = array<i32>} : memref<36x32xf32, #tpu.memory_space<vmem>>, vector<1x32xf32>,
    %600 = vector.extract_strided_slice %582 {offsets = [20, 0], sizes = [4, 32], strides = [1, 1]} : vector<34x32xf32> to vector<4x32xf32>
    %c19_431 = arith.constant 19 : index
    %c0_432 = arith.constant 0 : index
    %601 = vector.load %arg12[%c19_431, %c0_432] : memref<36x32xf32, #tpu.memory_space<vmem>>, vector<4x32xf32>
    tpu.vector_store %arg12[%c19_431, %c0_432], %600 {strides = array<i32>} : memref<36x32xf32, #tpu.memory_space<vmem>>, vector<4x32xf32>,
    %602 = vector.extract_strided_slice %600 {offsets = [1, 0], sizes = [1, 32], strides = [1, 1]} : vector<4x32xf32> to vector<1x32xf32>
    %c18_433 = arith.constant 18 : index
    %c0_434 = arith.constant 0 : index
    %603 = vector.load %arg12[%c18_433, %c0_434] : memref<36x32xf32, #tpu.memory_space<vmem>>, vector<1x32xf32>
    tpu.vector_store %arg12[%c18_433, %c0_434], %602 {strides = array<i32>} : memref<36x32xf32, #tpu.memory_space<vmem>>, vector<1x32xf32>,
    %604 = vector.extract_strided_slice %600 {offsets = [2, 0], sizes = [1, 32], strides = [1, 1]} : vector<4x32xf32> to vector<1x32xf32>
    %c23 = arith.constant 23 : index
    %c0_435 = arith.constant 0 : index
    %605 = vector.load %arg12[%c23, %c0_435] : memref<36x32xf32, #tpu.memory_space<vmem>>, vector<1x32xf32>
    tpu.vector_store %arg12[%c23, %c0_435], %604 {strides = array<i32>} : memref<36x32xf32, #tpu.memory_space<vmem>>, vector<1x32xf32>,
    %c31_436 = arith.constant 31 : index
    %c0_437 = arith.constant 0 : index
    %606 = vector.load %arg12[%c31_436, %c0_437] : memref<36x32xf32, #tpu.memory_space<vmem>>, vector<4x32xf32>
    tpu.vector_store %arg12[%c31_436, %c0_437], %600 {strides = array<i32>} : memref<36x32xf32, #tpu.memory_space<vmem>>, vector<4x32xf32>,
    %607 = vector.extract_strided_slice %600 {offsets = [1, 0], sizes = [1, 32], strides = [1, 1]} : vector<4x32xf32> to vector<1x32xf32>
    %c30_438 = arith.constant 30 : index
    %c0_439 = arith.constant 0 : index
    %608 = vector.load %arg12[%c30_438, %c0_439] : memref<36x32xf32, #tpu.memory_space<vmem>>, vector<1x32xf32>
    tpu.vector_store %arg12[%c30_438, %c0_439], %607 {strides = array<i32>} : memref<36x32xf32, #tpu.memory_space<vmem>>, vector<1x32xf32>,
    %609 = vector.extract_strided_slice %600 {offsets = [2, 0], sizes = [1, 32], strides = [1, 1]} : vector<4x32xf32> to vector<1x32xf32>
    %c35 = arith.constant 35 : index
    %c0_440 = arith.constant 0 : index
    %610 = vector.load %arg12[%c35, %c0_440] : memref<36x32xf32, #tpu.memory_space<vmem>>, vector<1x32xf32>
    tpu.vector_store %arg12[%c35, %c0_440], %609 {strides = array<i32>} : memref<36x32xf32, #tpu.memory_space<vmem>>, vector<1x32xf32>,
    %611 = vector.extract_strided_slice %582 {offsets = [30, 0], sizes = [4, 32], strides = [1, 1]} : vector<34x32xf32> to vector<4x32xf32>
    %c25 = arith.constant 25 : index
    %c0_441 = arith.constant 0 : index
    %612 = vector.load %arg12[%c25, %c0_441] : memref<36x32xf32, #tpu.memory_space<vmem>>, vector<4x32xf32>
    tpu.vector_store %arg12[%c25, %c0_441], %611 {strides = array<i32>} : memref<36x32xf32, #tpu.memory_space<vmem>>, vector<4x32xf32>,
    %613 = vector.extract_strided_slice %611 {offsets = [1, 0], sizes = [1, 32], strides = [1, 1]} : vector<4x32xf32> to vector<1x32xf32>
    %c24 = arith.constant 24 : index
    %c0_442 = arith.constant 0 : index
    %614 = vector.load %arg12[%c24, %c0_442] : memref<36x32xf32, #tpu.memory_space<vmem>>, vector<1x32xf32>
    tpu.vector_store %arg12[%c24, %c0_442], %613 {strides = array<i32>} : memref<36x32xf32, #tpu.memory_space<vmem>>, vector<1x32xf32>,
    %615 = vector.extract_strided_slice %611 {offsets = [2, 0], sizes = [1, 32], strides = [1, 1]} : vector<4x32xf32> to vector<1x32xf32>
    %c29_443 = arith.constant 29 : index
    %c0_444 = arith.constant 0 : index
    %616 = vector.load %arg12[%c29_443, %c0_444] : memref<36x32xf32, #tpu.memory_space<vmem>>, vector<1x32xf32>
    tpu.vector_store %arg12[%c29_443, %c0_444], %615 {strides = array<i32>} : memref<36x32xf32, #tpu.memory_space<vmem>>, vector<1x32xf32>,
    %c0_445 = arith.constant 0 : index
    %c0_446 = arith.constant 0 : index
    %617 = vector.load %arg12[%c0_445, %c0_446] : memref<36x32xf32, #tpu.memory_space<vmem>>, vector<22x32xf32>
    %618 = arith.truncf %617 : vector<22x32xf32> to vector<22x32xbf16>
    %c0_447 = arith.constant 0 : index
    %c0_448 = arith.constant 0 : index
    %c0_449 = arith.constant 0 : index
    %619 = vector.load %arg6[%c0_447, %c0_448, %c0_449] : memref<9x32x32xbf16, #tpu.memory_space<vmem>>, vector<1x32x32xbf16>
    %620 = vector.shape_cast %619 : vector<1x32x32xbf16> to vector<32x32xbf16>
    %cst_450 = arith.constant dense<0.000000e+00> : vector<22x32xf32>
    %621 = tpu.matmul %618, %620, %cst_450 {dimension_numbers = #tpu.dot_dimension_numbers<[1], [0], [0], [1], [0, 0, 1, 1], [], []>} : vector<22x32xbf16>, vector<32x32xbf16>, vector<22x32xf32> -> vector<22x32xf32>
    %c1_451 = arith.constant 1 : index
    %c0_452 = arith.constant 0 : index
    %622 = vector.load %arg12[%c1_451, %c0_452] : memref<36x32xf32, #tpu.memory_space<vmem>>, vector<22x32xf32>
    %623 = arith.truncf %622 : vector<22x32xf32> to vector<22x32xbf16>
    %c1_453 = arith.constant 1 : index
    %c0_454 = arith.constant 0 : index
    %c0_455 = arith.constant 0 : index
    %624 = vector.load %arg6[%c1_453, %c0_454, %c0_455] : memref<9x32x32xbf16, #tpu.memory_space<vmem>>, vector<1x32x32xbf16>
    %625 = vector.shape_cast %624 : vector<1x32x32xbf16> to vector<32x32xbf16>
    %cst_456 = arith.constant dense<0.000000e+00> : vector<22x32xf32>
    %626 = tpu.matmul %623, %625, %cst_456 {dimension_numbers = #tpu.dot_dimension_numbers<[1], [0], [0], [1], [0, 0, 1, 1], [], []>} : vector<22x32xbf16>, vector<32x32xbf16>, vector<22x32xf32> -> vector<22x32xf32>
    %627 = arith.addf %621, %626 : vector<22x32xf32>
    %c2_457 = arith.constant 2 : index
    %c0_458 = arith.constant 0 : index
    %628 = vector.load %arg12[%c2_457, %c0_458] : memref<36x32xf32, #tpu.memory_space<vmem>>, vector<22x32xf32>
    %629 = arith.truncf %628 : vector<22x32xf32> to vector<22x32xbf16>
    %c2_459 = arith.constant 2 : index
    %c0_460 = arith.constant 0 : index
    %c0_461 = arith.constant 0 : index
    %630 = vector.load %arg6[%c2_459, %c0_460, %c0_461] : memref<9x32x32xbf16, #tpu.memory_space<vmem>>, vector<1x32x32xbf16>
    %631 = vector.shape_cast %630 : vector<1x32x32xbf16> to vector<32x32xbf16>
    %cst_462 = arith.constant dense<0.000000e+00> : vector<22x32xf32>
    %632 = tpu.matmul %629, %631, %cst_462 {dimension_numbers = #tpu.dot_dimension_numbers<[1], [0], [0], [1], [0, 0, 1, 1], [], []>} : vector<22x32xbf16>, vector<32x32xbf16>, vector<22x32xf32> -> vector<22x32xf32>
    %633 = arith.addf %627, %632 : vector<22x32xf32>
    %c6_463 = arith.constant 6 : index
    %c0_464 = arith.constant 0 : index
    %634 = vector.load %arg12[%c6_463, %c0_464] : memref<36x32xf32, #tpu.memory_space<vmem>>, vector<22x32xf32>
    %635 = arith.truncf %634 : vector<22x32xf32> to vector<22x32xbf16>
    %c3_465 = arith.constant 3 : index
    %c0_466 = arith.constant 0 : index
    %c0_467 = arith.constant 0 : index
    %636 = vector.load %arg6[%c3_465, %c0_466, %c0_467] : memref<9x32x32xbf16, #tpu.memory_space<vmem>>, vector<1x32x32xbf16>
    %637 = vector.shape_cast %636 : vector<1x32x32xbf16> to vector<32x32xbf16>
    %cst_468 = arith.constant dense<0.000000e+00> : vector<22x32xf32>
    %638 = tpu.matmul %635, %637, %cst_468 {dimension_numbers = #tpu.dot_dimension_numbers<[1], [0], [0], [1], [0, 0, 1, 1], [], []>} : vector<22x32xbf16>, vector<32x32xbf16>, vector<22x32xf32> -> vector<22x32xf32>
    %639 = arith.addf %633, %638 : vector<22x32xf32>
    %c7_469 = arith.constant 7 : index
    %c0_470 = arith.constant 0 : index
    %640 = vector.load %arg12[%c7_469, %c0_470] : memref<36x32xf32, #tpu.memory_space<vmem>>, vector<22x32xf32>
    %641 = arith.truncf %640 : vector<22x32xf32> to vector<22x32xbf16>
    %c4_471 = arith.constant 4 : index
    %c0_472 = arith.constant 0 : index
    %c0_473 = arith.constant 0 : index
    %642 = vector.load %arg6[%c4_471, %c0_472, %c0_473] : memref<9x32x32xbf16, #tpu.memory_space<vmem>>, vector<1x32x32xbf16>
    %643 = vector.shape_cast %642 : vector<1x32x32xbf16> to vector<32x32xbf16>
    %cst_474 = arith.constant dense<0.000000e+00> : vector<22x32xf32>
    %644 = tpu.matmul %641, %643, %cst_474 {dimension_numbers = #tpu.dot_dimension_numbers<[1], [0], [0], [1], [0, 0, 1, 1], [], []>} : vector<22x32xbf16>, vector<32x32xbf16>, vector<22x32xf32> -> vector<22x32xf32>
    %645 = arith.addf %639, %644 : vector<22x32xf32>
    %c8_475 = arith.constant 8 : index
    %c0_476 = arith.constant 0 : index
    %646 = vector.load %arg12[%c8_475, %c0_476] : memref<36x32xf32, #tpu.memory_space<vmem>>, vector<22x32xf32>
    %647 = arith.truncf %646 : vector<22x32xf32> to vector<22x32xbf16>
    %c5_477 = arith.constant 5 : index
    %c0_478 = arith.constant 0 : index
    %c0_479 = arith.constant 0 : index
    %648 = vector.load %arg6[%c5_477, %c0_478, %c0_479] : memref<9x32x32xbf16, #tpu.memory_space<vmem>>, vector<1x32x32xbf16>
    %649 = vector.shape_cast %648 : vector<1x32x32xbf16> to vector<32x32xbf16>
    %cst_480 = arith.constant dense<0.000000e+00> : vector<22x32xf32>
    %650 = tpu.matmul %647, %649, %cst_480 {dimension_numbers = #tpu.dot_dimension_numbers<[1], [0], [0], [1], [0, 0, 1, 1], [], []>} : vector<22x32xbf16>, vector<32x32xbf16>, vector<22x32xf32> -> vector<22x32xf32>
    %651 = arith.addf %645, %650 : vector<22x32xf32>
    %c12_481 = arith.constant 12 : index
    %c0_482 = arith.constant 0 : index
    %652 = vector.load %arg12[%c12_481, %c0_482] : memref<36x32xf32, #tpu.memory_space<vmem>>, vector<22x32xf32>
    %653 = arith.truncf %652 : vector<22x32xf32> to vector<22x32xbf16>
    %c6_483 = arith.constant 6 : index
    %c0_484 = arith.constant 0 : index
    %c0_485 = arith.constant 0 : index
    %654 = vector.load %arg6[%c6_483, %c0_484, %c0_485] : memref<9x32x32xbf16, #tpu.memory_space<vmem>>, vector<1x32x32xbf16>
    %655 = vector.shape_cast %654 : vector<1x32x32xbf16> to vector<32x32xbf16>
    %cst_486 = arith.constant dense<0.000000e+00> : vector<22x32xf32>
    %656 = tpu.matmul %653, %655, %cst_486 {dimension_numbers = #tpu.dot_dimension_numbers<[1], [0], [0], [1], [0, 0, 1, 1], [], []>} : vector<22x32xbf16>, vector<32x32xbf16>, vector<22x32xf32> -> vector<22x32xf32>
    %657 = arith.addf %651, %656 : vector<22x32xf32>
    %c13_487 = arith.constant 13 : index
    %c0_488 = arith.constant 0 : index
    %658 = vector.load %arg12[%c13_487, %c0_488] : memref<36x32xf32, #tpu.memory_space<vmem>>, vector<22x32xf32>
    %659 = arith.truncf %658 : vector<22x32xf32> to vector<22x32xbf16>
    %c7_489 = arith.constant 7 : index
    %c0_490 = arith.constant 0 : index
    %c0_491 = arith.constant 0 : index
    %660 = vector.load %arg6[%c7_489, %c0_490, %c0_491] : memref<9x32x32xbf16, #tpu.memory_space<vmem>>, vector<1x32x32xbf16>
    %661 = vector.shape_cast %660 : vector<1x32x32xbf16> to vector<32x32xbf16>
    %cst_492 = arith.constant dense<0.000000e+00> : vector<22x32xf32>
    %662 = tpu.matmul %659, %661, %cst_492 {dimension_numbers = #tpu.dot_dimension_numbers<[1], [0], [0], [1], [0, 0, 1, 1], [], []>} : vector<22x32xbf16>, vector<32x32xbf16>, vector<22x32xf32> -> vector<22x32xf32>
    %663 = arith.addf %657, %662 : vector<22x32xf32>
    %c14 = arith.constant 14 : index
    %c0_493 = arith.constant 0 : index
    %664 = vector.load %arg12[%c14, %c0_493] : memref<36x32xf32, #tpu.memory_space<vmem>>, vector<22x32xf32>
    %665 = arith.truncf %664 : vector<22x32xf32> to vector<22x32xbf16>
    %c8_494 = arith.constant 8 : index
    %c0_495 = arith.constant 0 : index
    %c0_496 = arith.constant 0 : index
    %666 = vector.load %arg6[%c8_494, %c0_495, %c0_496] : memref<9x32x32xbf16, #tpu.memory_space<vmem>>, vector<1x32x32xbf16>
    %667 = vector.shape_cast %666 : vector<1x32x32xbf16> to vector<32x32xbf16>
    %cst_497 = arith.constant dense<0.000000e+00> : vector<22x32xf32>
    %668 = tpu.matmul %665, %667, %cst_497 {dimension_numbers = #tpu.dot_dimension_numbers<[1], [0], [0], [1], [0, 0, 1, 1], [], []>} : vector<22x32xbf16>, vector<32x32xbf16>, vector<22x32xf32> -> vector<22x32xf32>
    %669 = arith.addf %663, %668 : vector<22x32xf32>
    %670 = tpu.iota {dimensions = array<i32: 0>} : vector<22x1xi32>
    %c6_i32 = arith.constant 6 : i32
    %c0_i32_498 = arith.constant 0 : i32
    %671 = arith.cmpi eq, %c6_i32, %c0_i32_498 : i32
    %c1_i32_499 = arith.constant 1 : i32
    %672 = arith.select %671, %c1_i32_499, %c6_i32 : i32
    %673 = vector.broadcast %672 : i32 to vector<22x1xi32>
    %674 = arith.remsi %670, %673 : vector<22x1xi32>
    %c0_i32_500 = arith.constant 0 : i32
    %675 = vector.broadcast %c0_i32_500 : i32 to vector<22x1xi32>
    %676 = arith.cmpi ne, %674, %675 : vector<22x1xi32>
    %c0_i32_501 = arith.constant 0 : i32
    %677 = vector.broadcast %c0_i32_501 : i32 to vector<22x1xi32>
    %678 = arith.cmpi slt, %674, %677 : vector<22x1xi32>
    %c0_i32_502 = arith.constant 0 : i32
    %679 = arith.cmpi slt, %672, %c0_i32_502 : i32
    %680 = vector.broadcast %679 : i1 to vector<22x1xi1>
    %681 = vector.broadcast %680 : vector<22x1xi1> to vector<22x1xi1>
    %682 = arith.xori %678, %681 : vector<22x1xi1>
    %683 = arith.andi %682, %676 : vector<22x1xi1>
    %684 = vector.broadcast %672 : i32 to vector<22x1xi32>
    %685 = arith.addi %674, %684 : vector<22x1xi32>
    %686 = arith.select %683, %685, %674 : vector<22x1xi1>, vector<22x1xi32>
    %c4_i32_503 = arith.constant 4 : i32
    %687 = vector.broadcast %c4_i32_503 : i32 to vector<22x1xi32>
    %688 = arith.cmpi slt, %686, %687 : vector<22x1xi32>
    %cst_504 = arith.constant 0.000000e+00 : f32
    %689 = vector.shape_cast %688 : vector<22x1xi1> to vector<22x1xi1>
    %690 = vector.broadcast %689 : vector<22x1xi1> to vector<22x32xi1>
    %691 = vector.broadcast %cst_504 : f32 to vector<22x32xf32>
    %692 = arith.select %690, %669, %691 : vector<22x32xi1>, vector<22x32xf32>
    %cst_505 = arith.constant dense<0.000000e+00> : vector<32xf32>
    %693 = vector.multi_reduction <add>, %692, %cst_505 [0] : vector<22x32xf32> to vector<32xf32>
    %694 = vector.shape_cast %693 : vector<32xf32> to vector<1x32xf32>
    %cst_506 = arith.constant 6.250000e-02 : f32
    %695 = vector.broadcast %cst_506 : f32 to vector<1x32xf32>
    %696 = arith.mulf %694, %695 : vector<1x32xf32>
    %697 = vector.broadcast %696 : vector<1x32xf32> to vector<22x32xf32>
    %698 = arith.subf %669, %697 : vector<22x32xf32>
    %cst_507 = arith.constant 0.000000e+00 : f32
    %699 = vector.shape_cast %688 : vector<22x1xi1> to vector<22x1xi1>
    %700 = vector.broadcast %699 : vector<22x1xi1> to vector<22x32xi1>
    %701 = vector.broadcast %cst_507 : f32 to vector<22x32xf32>
    %702 = arith.select %700, %698, %701 : vector<22x32xi1>, vector<22x32xf32>
    %703 = arith.mulf %702, %702 : vector<22x32xf32>
    %cst_508 = arith.constant dense<0.000000e+00> : vector<32xf32>
    %704 = vector.multi_reduction <add>, %703, %cst_508 [0] : vector<22x32xf32> to vector<32xf32>
    %705 = vector.shape_cast %704 : vector<32xf32> to vector<1x32xf32>
    %cst_509 = arith.constant 6.250000e-02 : f32
    %706 = vector.broadcast %cst_509 : f32 to vector<1x32xf32>
    %707 = arith.mulf %705, %706 : vector<1x32xf32>
    %708 = vector.broadcast %696 : vector<1x32xf32> to vector<22x32xf32>
    %709 = arith.subf %669, %708 : vector<22x32xf32>
    %cst_510 = arith.constant 9.99999974E-6 : f32
    %710 = vector.broadcast %cst_510 : f32 to vector<1x32xf32>
    %711 = arith.addf %707, %710 : vector<1x32xf32>
    %712 = math.rsqrt %711 : vector<1x32xf32>
    %713 = vector.broadcast %712 : vector<1x32xf32> to vector<22x32xf32>
    %714 = arith.mulf %709, %713 : vector<22x32xf32>
    %cst_511 = arith.constant 0.000000e+00 : f32
    %715 = vector.broadcast %cst_511 : f32 to vector<22x32xf32>
    %716 = arith.maximumf %714, %715 : vector<22x32xf32>
    %717 = vector.extract_strided_slice %716 {offsets = [0, 0], sizes = [4, 32], strides = [1, 1]} : vector<22x32xf32> to vector<4x32xf32>
    %c7_512 = arith.constant 7 : index
    %c0_513 = arith.constant 0 : index
    %718 = vector.load %arg13[%c7_512, %c0_513] : memref<36x32xf32, #tpu.memory_space<vmem>>, vector<4x32xf32>
    tpu.vector_store %arg13[%c7_512, %c0_513], %717 {strides = array<i32>} : memref<36x32xf32, #tpu.memory_space<vmem>>, vector<4x32xf32>,
    %719 = vector.extract_strided_slice %717 {offsets = [1, 0], sizes = [1, 32], strides = [1, 1]} : vector<4x32xf32> to vector<1x32xf32>
    %c6_514 = arith.constant 6 : index
    %c0_515 = arith.constant 0 : index
    %720 = vector.load %arg13[%c6_514, %c0_515] : memref<36x32xf32, #tpu.memory_space<vmem>>, vector<1x32xf32>
    tpu.vector_store %arg13[%c6_514, %c0_515], %719 {strides = array<i32>} : memref<36x32xf32, #tpu.memory_space<vmem>>, vector<1x32xf32>,
    %721 = vector.extract_strided_slice %717 {offsets = [2, 0], sizes = [1, 32], strides = [1, 1]} : vector<4x32xf32> to vector<1x32xf32>
    %c11_516 = arith.constant 11 : index
    %c0_517 = arith.constant 0 : index
    %722 = vector.load %arg13[%c11_516, %c0_517] : memref<36x32xf32, #tpu.memory_space<vmem>>, vector<1x32xf32>
    tpu.vector_store %arg13[%c11_516, %c0_517], %721 {strides = array<i32>} : memref<36x32xf32, #tpu.memory_space<vmem>>, vector<1x32xf32>,
    %723 = vector.extract_strided_slice %716 {offsets = [6, 0], sizes = [4, 32], strides = [1, 1]} : vector<22x32xf32> to vector<4x32xf32>
    %c13_518 = arith.constant 13 : index
    %c0_519 = arith.constant 0 : index
    %724 = vector.load %arg13[%c13_518, %c0_519] : memref<36x32xf32, #tpu.memory_space<vmem>>, vector<4x32xf32>
    tpu.vector_store %arg13[%c13_518, %c0_519], %723 {strides = array<i32>} : memref<36x32xf32, #tpu.memory_space<vmem>>, vector<4x32xf32>,
    %725 = vector.extract_strided_slice %723 {offsets = [1, 0], sizes = [1, 32], strides = [1, 1]} : vector<4x32xf32> to vector<1x32xf32>
    %c12_520 = arith.constant 12 : index
    %c0_521 = arith.constant 0 : index
    %726 = vector.load %arg13[%c12_520, %c0_521] : memref<36x32xf32, #tpu.memory_space<vmem>>, vector<1x32xf32>
    tpu.vector_store %arg13[%c12_520, %c0_521], %725 {strides = array<i32>} : memref<36x32xf32, #tpu.memory_space<vmem>>, vector<1x32xf32>,
    %727 = vector.extract_strided_slice %723 {offsets = [2, 0], sizes = [1, 32], strides = [1, 1]} : vector<4x32xf32> to vector<1x32xf32>
    %c17_522 = arith.constant 17 : index
    %c0_523 = arith.constant 0 : index
    %728 = vector.load %arg13[%c17_522, %c0_523] : memref<36x32xf32, #tpu.memory_space<vmem>>, vector<1x32xf32>
    tpu.vector_store %arg13[%c17_522, %c0_523], %727 {strides = array<i32>} : memref<36x32xf32, #tpu.memory_space<vmem>>, vector<1x32xf32>,
    %c1_524 = arith.constant 1 : index
    %c0_525 = arith.constant 0 : index
    %729 = vector.load %arg13[%c1_524, %c0_525] : memref<36x32xf32, #tpu.memory_space<vmem>>, vector<4x32xf32>
    tpu.vector_store %arg13[%c1_524, %c0_525], %723 {strides = array<i32>} : memref<36x32xf32, #tpu.memory_space<vmem>>, vector<4x32xf32>,
    %730 = vector.extract_strided_slice %723 {offsets = [1, 0], sizes = [1, 32], strides = [1, 1]} : vector<4x32xf32> to vector<1x32xf32>
    %c0_526 = arith.constant 0 : index
    %c0_527 = arith.constant 0 : index
    %731 = vector.load %arg13[%c0_526, %c0_527] : memref<36x32xf32, #tpu.memory_space<vmem>>, vector<1x32xf32>
    tpu.vector_store %arg13[%c0_526, %c0_527], %730 {strides = array<i32>} : memref<36x32xf32, #tpu.memory_space<vmem>>, vector<1x32xf32>,
    %732 = vector.extract_strided_slice %723 {offsets = [2, 0], sizes = [1, 32], strides = [1, 1]} : vector<4x32xf32> to vector<1x32xf32>
    %c5_528 = arith.constant 5 : index
    %c0_529 = arith.constant 0 : index
    %733 = vector.load %arg13[%c5_528, %c0_529] : memref<36x32xf32, #tpu.memory_space<vmem>>, vector<1x32xf32>
    tpu.vector_store %arg13[%c5_528, %c0_529], %732 {strides = array<i32>} : memref<36x32xf32, #tpu.memory_space<vmem>>, vector<1x32xf32>,
    %734 = vector.extract_strided_slice %716 {offsets = [12, 0], sizes = [4, 32], strides = [1, 1]} : vector<22x32xf32> to vector<4x32xf32>
    %c19_530 = arith.constant 19 : index
    %c0_531 = arith.constant 0 : index
    %735 = vector.load %arg13[%c19_530, %c0_531] : memref<36x32xf32, #tpu.memory_space<vmem>>, vector<4x32xf32>
    tpu.vector_store %arg13[%c19_530, %c0_531], %734 {strides = array<i32>} : memref<36x32xf32, #tpu.memory_space<vmem>>, vector<4x32xf32>,
    %736 = vector.extract_strided_slice %734 {offsets = [1, 0], sizes = [1, 32], strides = [1, 1]} : vector<4x32xf32> to vector<1x32xf32>
    %c18_532 = arith.constant 18 : index
    %c0_533 = arith.constant 0 : index
    %737 = vector.load %arg13[%c18_532, %c0_533] : memref<36x32xf32, #tpu.memory_space<vmem>>, vector<1x32xf32>
    tpu.vector_store %arg13[%c18_532, %c0_533], %736 {strides = array<i32>} : memref<36x32xf32, #tpu.memory_space<vmem>>, vector<1x32xf32>,
    %738 = vector.extract_strided_slice %734 {offsets = [2, 0], sizes = [1, 32], strides = [1, 1]} : vector<4x32xf32> to vector<1x32xf32>
    %c23_534 = arith.constant 23 : index
    %c0_535 = arith.constant 0 : index
    %739 = vector.load %arg13[%c23_534, %c0_535] : memref<36x32xf32, #tpu.memory_space<vmem>>, vector<1x32xf32>
    tpu.vector_store %arg13[%c23_534, %c0_535], %738 {strides = array<i32>} : memref<36x32xf32, #tpu.memory_space<vmem>>, vector<1x32xf32>,
    %c31_536 = arith.constant 31 : index
    %c0_537 = arith.constant 0 : index
    %740 = vector.load %arg13[%c31_536, %c0_537] : memref<36x32xf32, #tpu.memory_space<vmem>>, vector<4x32xf32>
    tpu.vector_store %arg13[%c31_536, %c0_537], %734 {strides = array<i32>} : memref<36x32xf32, #tpu.memory_space<vmem>>, vector<4x32xf32>,
    %741 = vector.extract_strided_slice %734 {offsets = [1, 0], sizes = [1, 32], strides = [1, 1]} : vector<4x32xf32> to vector<1x32xf32>
    %c30_538 = arith.constant 30 : index
    %c0_539 = arith.constant 0 : index
    %742 = vector.load %arg13[%c30_538, %c0_539] : memref<36x32xf32, #tpu.memory_space<vmem>>, vector<1x32xf32>
    tpu.vector_store %arg13[%c30_538, %c0_539], %741 {strides = array<i32>} : memref<36x32xf32, #tpu.memory_space<vmem>>, vector<1x32xf32>,
    %743 = vector.extract_strided_slice %734 {offsets = [2, 0], sizes = [1, 32], strides = [1, 1]} : vector<4x32xf32> to vector<1x32xf32>
    %c35_540 = arith.constant 35 : index
    %c0_541 = arith.constant 0 : index
    %744 = vector.load %arg13[%c35_540, %c0_541] : memref<36x32xf32, #tpu.memory_space<vmem>>, vector<1x32xf32>
    tpu.vector_store %arg13[%c35_540, %c0_541], %743 {strides = array<i32>} : memref<36x32xf32, #tpu.memory_space<vmem>>, vector<1x32xf32>,
    %745 = vector.extract_strided_slice %716 {offsets = [18, 0], sizes = [4, 32], strides = [1, 1]} : vector<22x32xf32> to vector<4x32xf32>
    %c25_542 = arith.constant 25 : index
    %c0_543 = arith.constant 0 : index
    %746 = vector.load %arg13[%c25_542, %c0_543] : memref<36x32xf32, #tpu.memory_space<vmem>>, vector<4x32xf32>
    tpu.vector_store %arg13[%c25_542, %c0_543], %745 {strides = array<i32>} : memref<36x32xf32, #tpu.memory_space<vmem>>, vector<4x32xf32>,
    %747 = vector.extract_strided_slice %745 {offsets = [1, 0], sizes = [1, 32], strides = [1, 1]} : vector<4x32xf32> to vector<1x32xf32>
    %c24_544 = arith.constant 24 : index
    %c0_545 = arith.constant 0 : index
    %748 = vector.load %arg13[%c24_544, %c0_545] : memref<36x32xf32, #tpu.memory_space<vmem>>, vector<1x32xf32>
    tpu.vector_store %arg13[%c24_544, %c0_545], %747 {strides = array<i32>} : memref<36x32xf32, #tpu.memory_space<vmem>>, vector<1x32xf32>,
    %749 = vector.extract_strided_slice %745 {offsets = [2, 0], sizes = [1, 32], strides = [1, 1]} : vector<4x32xf32> to vector<1x32xf32>
    %c29_546 = arith.constant 29 : index
    %c0_547 = arith.constant 0 : index
    %750 = vector.load %arg13[%c29_546, %c0_547] : memref<36x32xf32, #tpu.memory_space<vmem>>, vector<1x32xf32>
    tpu.vector_store %arg13[%c29_546, %c0_547], %749 {strides = array<i32>} : memref<36x32xf32, #tpu.memory_space<vmem>>, vector<1x32xf32>,
    %c0_548 = arith.constant 0 : index
    %c0_549 = arith.constant 0 : index
    %751 = vector.load %arg13[%c0_548, %c0_549] : memref<36x32xf32, #tpu.memory_space<vmem>>, vector<22x32xf32>
    %752 = arith.truncf %751 : vector<22x32xf32> to vector<22x32xbf16>
    %c0_550 = arith.constant 0 : index
    %c0_551 = arith.constant 0 : index
    %c0_552 = arith.constant 0 : index
    %753 = vector.load %arg7[%c0_550, %c0_551, %c0_552] : memref<9x32x32xbf16, #tpu.memory_space<vmem>>, vector<1x32x32xbf16>
    %754 = vector.shape_cast %753 : vector<1x32x32xbf16> to vector<32x32xbf16>
    %cst_553 = arith.constant dense<0.000000e+00> : vector<22x32xf32>
    %755 = tpu.matmul %752, %754, %cst_553 {dimension_numbers = #tpu.dot_dimension_numbers<[1], [0], [0], [1], [0, 0, 1, 1], [], []>} : vector<22x32xbf16>, vector<32x32xbf16>, vector<22x32xf32> -> vector<22x32xf32>
    %c1_554 = arith.constant 1 : index
    %c0_555 = arith.constant 0 : index
    %756 = vector.load %arg13[%c1_554, %c0_555] : memref<36x32xf32, #tpu.memory_space<vmem>>, vector<22x32xf32>
    %757 = arith.truncf %756 : vector<22x32xf32> to vector<22x32xbf16>
    %c1_556 = arith.constant 1 : index
    %c0_557 = arith.constant 0 : index
    %c0_558 = arith.constant 0 : index
    %758 = vector.load %arg7[%c1_556, %c0_557, %c0_558] : memref<9x32x32xbf16, #tpu.memory_space<vmem>>, vector<1x32x32xbf16>
    %759 = vector.shape_cast %758 : vector<1x32x32xbf16> to vector<32x32xbf16>
    %cst_559 = arith.constant dense<0.000000e+00> : vector<22x32xf32>
    %760 = tpu.matmul %757, %759, %cst_559 {dimension_numbers = #tpu.dot_dimension_numbers<[1], [0], [0], [1], [0, 0, 1, 1], [], []>} : vector<22x32xbf16>, vector<32x32xbf16>, vector<22x32xf32> -> vector<22x32xf32>
    %761 = arith.addf %755, %760 : vector<22x32xf32>
    %c2_560 = arith.constant 2 : index
    %c0_561 = arith.constant 0 : index
    %762 = vector.load %arg13[%c2_560, %c0_561] : memref<36x32xf32, #tpu.memory_space<vmem>>, vector<22x32xf32>
    %763 = arith.truncf %762 : vector<22x32xf32> to vector<22x32xbf16>
    %c2_562 = arith.constant 2 : index
    %c0_563 = arith.constant 0 : index
    %c0_564 = arith.constant 0 : index
    %764 = vector.load %arg7[%c2_562, %c0_563, %c0_564] : memref<9x32x32xbf16, #tpu.memory_space<vmem>>, vector<1x32x32xbf16>
    %765 = vector.shape_cast %764 : vector<1x32x32xbf16> to vector<32x32xbf16>
    %cst_565 = arith.constant dense<0.000000e+00> : vector<22x32xf32>
    %766 = tpu.matmul %763, %765, %cst_565 {dimension_numbers = #tpu.dot_dimension_numbers<[1], [0], [0], [1], [0, 0, 1, 1], [], []>} : vector<22x32xbf16>, vector<32x32xbf16>, vector<22x32xf32> -> vector<22x32xf32>
    %767 = arith.addf %761, %766 : vector<22x32xf32>
    %c6_566 = arith.constant 6 : index
    %c0_567 = arith.constant 0 : index
    %768 = vector.load %arg13[%c6_566, %c0_567] : memref<36x32xf32, #tpu.memory_space<vmem>>, vector<22x32xf32>
    %769 = arith.truncf %768 : vector<22x32xf32> to vector<22x32xbf16>
    %c3_568 = arith.constant 3 : index
    %c0_569 = arith.constant 0 : index
    %c0_570 = arith.constant 0 : index
    %770 = vector.load %arg7[%c3_568, %c0_569, %c0_570] : memref<9x32x32xbf16, #tpu.memory_space<vmem>>, vector<1x32x32xbf16>
    %771 = vector.shape_cast %770 : vector<1x32x32xbf16> to vector<32x32xbf16>
    %cst_571 = arith.constant dense<0.000000e+00> : vector<22x32xf32>
    %772 = tpu.matmul %769, %771, %cst_571 {dimension_numbers = #tpu.dot_dimension_numbers<[1], [0], [0], [1], [0, 0, 1, 1], [], []>} : vector<22x32xbf16>, vector<32x32xbf16>, vector<22x32xf32> -> vector<22x32xf32>
    %773 = arith.addf %767, %772 : vector<22x32xf32>
    %c7_572 = arith.constant 7 : index
    %c0_573 = arith.constant 0 : index
    %774 = vector.load %arg13[%c7_572, %c0_573] : memref<36x32xf32, #tpu.memory_space<vmem>>, vector<22x32xf32>
    %775 = arith.truncf %774 : vector<22x32xf32> to vector<22x32xbf16>
    %c4_574 = arith.constant 4 : index
    %c0_575 = arith.constant 0 : index
    %c0_576 = arith.constant 0 : index
    %776 = vector.load %arg7[%c4_574, %c0_575, %c0_576] : memref<9x32x32xbf16, #tpu.memory_space<vmem>>, vector<1x32x32xbf16>
    %777 = vector.shape_cast %776 : vector<1x32x32xbf16> to vector<32x32xbf16>
    %cst_577 = arith.constant dense<0.000000e+00> : vector<22x32xf32>
    %778 = tpu.matmul %775, %777, %cst_577 {dimension_numbers = #tpu.dot_dimension_numbers<[1], [0], [0], [1], [0, 0, 1, 1], [], []>} : vector<22x32xbf16>, vector<32x32xbf16>, vector<22x32xf32> -> vector<22x32xf32>
    %779 = arith.addf %773, %778 : vector<22x32xf32>
    %c8_578 = arith.constant 8 : index
    %c0_579 = arith.constant 0 : index
    %780 = vector.load %arg13[%c8_578, %c0_579] : memref<36x32xf32, #tpu.memory_space<vmem>>, vector<22x32xf32>
    %781 = arith.truncf %780 : vector<22x32xf32> to vector<22x32xbf16>
    %c5_580 = arith.constant 5 : index
    %c0_581 = arith.constant 0 : index
    %c0_582 = arith.constant 0 : index
    %782 = vector.load %arg7[%c5_580, %c0_581, %c0_582] : memref<9x32x32xbf16, #tpu.memory_space<vmem>>, vector<1x32x32xbf16>
    %783 = vector.shape_cast %782 : vector<1x32x32xbf16> to vector<32x32xbf16>
    %cst_583 = arith.constant dense<0.000000e+00> : vector<22x32xf32>
    %784 = tpu.matmul %781, %783, %cst_583 {dimension_numbers = #tpu.dot_dimension_numbers<[1], [0], [0], [1], [0, 0, 1, 1], [], []>} : vector<22x32xbf16>, vector<32x32xbf16>, vector<22x32xf32> -> vector<22x32xf32>
    %785 = arith.addf %779, %784 : vector<22x32xf32>
    %c12_584 = arith.constant 12 : index
    %c0_585 = arith.constant 0 : index
    %786 = vector.load %arg13[%c12_584, %c0_585] : memref<36x32xf32, #tpu.memory_space<vmem>>, vector<22x32xf32>
    %787 = arith.truncf %786 : vector<22x32xf32> to vector<22x32xbf16>
    %c6_586 = arith.constant 6 : index
    %c0_587 = arith.constant 0 : index
    %c0_588 = arith.constant 0 : index
    %788 = vector.load %arg7[%c6_586, %c0_587, %c0_588] : memref<9x32x32xbf16, #tpu.memory_space<vmem>>, vector<1x32x32xbf16>
    %789 = vector.shape_cast %788 : vector<1x32x32xbf16> to vector<32x32xbf16>
    %cst_589 = arith.constant dense<0.000000e+00> : vector<22x32xf32>
    %790 = tpu.matmul %787, %789, %cst_589 {dimension_numbers = #tpu.dot_dimension_numbers<[1], [0], [0], [1], [0, 0, 1, 1], [], []>} : vector<22x32xbf16>, vector<32x32xbf16>, vector<22x32xf32> -> vector<22x32xf32>
    %791 = arith.addf %785, %790 : vector<22x32xf32>
    %c13_590 = arith.constant 13 : index
    %c0_591 = arith.constant 0 : index
    %792 = vector.load %arg13[%c13_590, %c0_591] : memref<36x32xf32, #tpu.memory_space<vmem>>, vector<22x32xf32>
    %793 = arith.truncf %792 : vector<22x32xf32> to vector<22x32xbf16>
    %c7_592 = arith.constant 7 : index
    %c0_593 = arith.constant 0 : index
    %c0_594 = arith.constant 0 : index
    %794 = vector.load %arg7[%c7_592, %c0_593, %c0_594] : memref<9x32x32xbf16, #tpu.memory_space<vmem>>, vector<1x32x32xbf16>
    %795 = vector.shape_cast %794 : vector<1x32x32xbf16> to vector<32x32xbf16>
    %cst_595 = arith.constant dense<0.000000e+00> : vector<22x32xf32>
    %796 = tpu.matmul %793, %795, %cst_595 {dimension_numbers = #tpu.dot_dimension_numbers<[1], [0], [0], [1], [0, 0, 1, 1], [], []>} : vector<22x32xbf16>, vector<32x32xbf16>, vector<22x32xf32> -> vector<22x32xf32>
    %797 = arith.addf %791, %796 : vector<22x32xf32>
    %c14_596 = arith.constant 14 : index
    %c0_597 = arith.constant 0 : index
    %798 = vector.load %arg13[%c14_596, %c0_597] : memref<36x32xf32, #tpu.memory_space<vmem>>, vector<22x32xf32>
    %799 = arith.truncf %798 : vector<22x32xf32> to vector<22x32xbf16>
    %c8_598 = arith.constant 8 : index
    %c0_599 = arith.constant 0 : index
    %c0_600 = arith.constant 0 : index
    %800 = vector.load %arg7[%c8_598, %c0_599, %c0_600] : memref<9x32x32xbf16, #tpu.memory_space<vmem>>, vector<1x32x32xbf16>
    %801 = vector.shape_cast %800 : vector<1x32x32xbf16> to vector<32x32xbf16>
    %cst_601 = arith.constant dense<0.000000e+00> : vector<22x32xf32>
    %802 = tpu.matmul %799, %801, %cst_601 {dimension_numbers = #tpu.dot_dimension_numbers<[1], [0], [0], [1], [0, 0, 1, 1], [], []>} : vector<22x32xbf16>, vector<32x32xbf16>, vector<22x32xf32> -> vector<22x32xf32>
    %803 = arith.addf %797, %802 : vector<22x32xf32>
    %804 = tpu.iota {dimensions = array<i32: 0>} : vector<22x1xi32>
    %c6_i32_602 = arith.constant 6 : i32
    %c0_i32_603 = arith.constant 0 : i32
    %805 = arith.cmpi eq, %c6_i32_602, %c0_i32_603 : i32
    %c1_i32_604 = arith.constant 1 : i32
    %806 = arith.select %805, %c1_i32_604, %c6_i32_602 : i32
    %807 = vector.broadcast %806 : i32 to vector<22x1xi32>
    %808 = arith.remsi %804, %807 : vector<22x1xi32>
    %c0_i32_605 = arith.constant 0 : i32
    %809 = vector.broadcast %c0_i32_605 : i32 to vector<22x1xi32>
    %810 = arith.cmpi ne, %808, %809 : vector<22x1xi32>
    %c0_i32_606 = arith.constant 0 : i32
    %811 = vector.broadcast %c0_i32_606 : i32 to vector<22x1xi32>
    %812 = arith.cmpi slt, %808, %811 : vector<22x1xi32>
    %c0_i32_607 = arith.constant 0 : i32
    %813 = arith.cmpi slt, %806, %c0_i32_607 : i32
    %814 = vector.broadcast %813 : i1 to vector<22x1xi1>
    %815 = vector.broadcast %814 : vector<22x1xi1> to vector<22x1xi1>
    %816 = arith.xori %812, %815 : vector<22x1xi1>
    %817 = arith.andi %816, %810 : vector<22x1xi1>
    %818 = vector.broadcast %806 : i32 to vector<22x1xi32>
    %819 = arith.addi %808, %818 : vector<22x1xi32>
    %820 = arith.select %817, %819, %808 : vector<22x1xi1>, vector<22x1xi32>
    %c4_i32_608 = arith.constant 4 : i32
    %821 = vector.broadcast %c4_i32_608 : i32 to vector<22x1xi32>
    %822 = arith.cmpi slt, %820, %821 : vector<22x1xi32>
    %cst_609 = arith.constant 0.000000e+00 : f32
    %823 = vector.shape_cast %822 : vector<22x1xi1> to vector<22x1xi1>
    %824 = vector.broadcast %823 : vector<22x1xi1> to vector<22x32xi1>
    %825 = vector.broadcast %cst_609 : f32 to vector<22x32xf32>
    %826 = arith.select %824, %803, %825 : vector<22x32xi1>, vector<22x32xf32>
    %cst_610 = arith.constant dense<0.000000e+00> : vector<32xf32>
    %827 = vector.multi_reduction <add>, %826, %cst_610 [0] : vector<22x32xf32> to vector<32xf32>
    %828 = vector.shape_cast %827 : vector<32xf32> to vector<1x32xf32>
    %cst_611 = arith.constant 6.250000e-02 : f32
    %829 = vector.broadcast %cst_611 : f32 to vector<1x32xf32>
    %830 = arith.mulf %828, %829 : vector<1x32xf32>
    %831 = vector.broadcast %830 : vector<1x32xf32> to vector<22x32xf32>
    %832 = arith.subf %803, %831 : vector<22x32xf32>
    %cst_612 = arith.constant 0.000000e+00 : f32
    %833 = vector.shape_cast %822 : vector<22x1xi1> to vector<22x1xi1>
    %834 = vector.broadcast %833 : vector<22x1xi1> to vector<22x32xi1>
    %835 = vector.broadcast %cst_612 : f32 to vector<22x32xf32>
    %836 = arith.select %834, %832, %835 : vector<22x32xi1>, vector<22x32xf32>
    %837 = arith.mulf %836, %836 : vector<22x32xf32>
    %cst_613 = arith.constant dense<0.000000e+00> : vector<32xf32>
    %838 = vector.multi_reduction <add>, %837, %cst_613 [0] : vector<22x32xf32> to vector<32xf32>
    %839 = vector.shape_cast %838 : vector<32xf32> to vector<1x32xf32>
    %cst_614 = arith.constant 6.250000e-02 : f32
    %840 = vector.broadcast %cst_614 : f32 to vector<1x32xf32>
    %841 = arith.mulf %839, %840 : vector<1x32xf32>
    %842 = vector.broadcast %830 : vector<1x32xf32> to vector<22x32xf32>
    %843 = arith.subf %803, %842 : vector<22x32xf32>
    %cst_615 = arith.constant 9.99999974E-6 : f32
    %844 = vector.broadcast %cst_615 : f32 to vector<1x32xf32>
    %845 = arith.addf %841, %844 : vector<1x32xf32>
    %846 = math.rsqrt %845 : vector<1x32xf32>
    %847 = vector.broadcast %846 : vector<1x32xf32> to vector<22x32xf32>
    %848 = arith.mulf %843, %847 : vector<22x32xf32>
    %849 = vector.extract_strided_slice %848 {offsets = [0, 0], sizes = [4, 32], strides = [1, 1]} : vector<22x32xf32> to vector<4x32xf32>
    %850 = vector.extract_strided_slice %582 {offsets = [0, 0], sizes = [4, 32], strides = [1, 1]} : vector<34x32xf32> to vector<4x32xf32>
    %851 = arith.addf %849, %850 : vector<4x32xf32>
    %c0_616 = arith.constant 0 : index
    %c0_617 = arith.constant 0 : index
    %c0_618 = arith.constant 0 : index
    %852 = vector.load %arg8[%c0_616, %c0_617, %c0_618] : memref<1x16x32xf32, #tpu.memory_space<vmem>>, vector<1x4x32xf32>
    %853 = vector.shape_cast %852 : vector<1x4x32xf32> to vector<4x32xf32>
    %854 = vector.shape_cast %851 : vector<4x32xf32> to vector<1x4x32xf32>
    tpu.vector_store %arg8[%c0_616, %c0_617, %c0_618], %854 {strides = array<i32>} : memref<1x16x32xf32, #tpu.memory_space<vmem>>, vector<1x4x32xf32>,
    %855 = vector.extract_strided_slice %848 {offsets = [6, 0], sizes = [4, 32], strides = [1, 1]} : vector<22x32xf32> to vector<4x32xf32>
    %856 = vector.extract_strided_slice %582 {offsets = [10, 0], sizes = [4, 32], strides = [1, 1]} : vector<34x32xf32> to vector<4x32xf32>
    %857 = arith.addf %855, %856 : vector<4x32xf32>
    %c0_619 = arith.constant 0 : index
    %c4_620 = arith.constant 4 : index
    %c0_621 = arith.constant 0 : index
    %858 = vector.load %arg8[%c0_619, %c4_620, %c0_621] : memref<1x16x32xf32, #tpu.memory_space<vmem>>, vector<1x4x32xf32>
    %859 = vector.shape_cast %858 : vector<1x4x32xf32> to vector<4x32xf32>
    %860 = vector.shape_cast %857 : vector<4x32xf32> to vector<1x4x32xf32>
    tpu.vector_store %arg8[%c0_619, %c4_620, %c0_621], %860 {strides = array<i32>} : memref<1x16x32xf32, #tpu.memory_space<vmem>>, vector<1x4x32xf32>,
    %861 = vector.extract_strided_slice %848 {offsets = [12, 0], sizes = [4, 32], strides = [1, 1]} : vector<22x32xf32> to vector<4x32xf32>
    %862 = vector.extract_strided_slice %582 {offsets = [20, 0], sizes = [4, 32], strides = [1, 1]} : vector<34x32xf32> to vector<4x32xf32>
    %863 = arith.addf %861, %862 : vector<4x32xf32>
    %c0_622 = arith.constant 0 : index
    %c8_623 = arith.constant 8 : index
    %c0_624 = arith.constant 0 : index
    %864 = vector.load %arg8[%c0_622, %c8_623, %c0_624] : memref<1x16x32xf32, #tpu.memory_space<vmem>>, vector<1x4x32xf32>
    %865 = vector.shape_cast %864 : vector<1x4x32xf32> to vector<4x32xf32>
    %866 = vector.shape_cast %863 : vector<4x32xf32> to vector<1x4x32xf32>
    tpu.vector_store %arg8[%c0_622, %c8_623, %c0_624], %866 {strides = array<i32>} : memref<1x16x32xf32, #tpu.memory_space<vmem>>, vector<1x4x32xf32>,
    %867 = vector.extract_strided_slice %848 {offsets = [18, 0], sizes = [4, 32], strides = [1, 1]} : vector<22x32xf32> to vector<4x32xf32>
    %868 = vector.extract_strided_slice %582 {offsets = [30, 0], sizes = [4, 32], strides = [1, 1]} : vector<34x32xf32> to vector<4x32xf32>
    %869 = arith.addf %867, %868 : vector<4x32xf32>
    %c0_625 = arith.constant 0 : index
    %c12_626 = arith.constant 12 : index
    %c0_627 = arith.constant 0 : index
    %870 = vector.load %arg8[%c0_625, %c12_626, %c0_627] : memref<1x16x32xf32, #tpu.memory_space<vmem>>, vector<1x4x32xf32>
    %871 = vector.shape_cast %870 : vector<1x4x32xf32> to vector<4x32xf32>
    %872 = vector.shape_cast %869 : vector<4x32xf32> to vector<1x4x32xf32>
    tpu.vector_store %arg8[%c0_625, %c12_626, %c0_627], %872 {strides = array<i32>} : memref<1x16x32xf32, #tpu.memory_space<vmem>>, vector<1x4x32xf32>,
    return
  }
  func.func @transform_0(%arg0: i32) -> (i32, i32, i32) {
    %c0_i32 = arith.constant 0 : i32
    %c0_i32_0 = arith.constant 0 : i32
    %c0_i32_1 = arith.constant 0 : i32
    return %arg0, %c0_i32, %c0_i32_0 : i32, i32, i32
  }
  func.func @transform_1(%arg0: i32) -> (i32, i32, i32) {
    %c0_i32 = arith.constant 0 : i32
    %c0_i32_0 = arith.constant 0 : i32
    %c0_i32_1 = arith.constant 0 : i32
    %c0_i32_2 = arith.constant 0 : i32
    return %c0_i32, %c0_i32_0, %c0_i32_1 : i32, i32, i32
  }
  func.func @transform_2(%arg0: i32) -> (i32, i32, i32) {
    %c0_i32 = arith.constant 0 : i32
    %c0_i32_0 = arith.constant 0 : i32
    %c0_i32_1 = arith.constant 0 : i32
    %c0_i32_2 = arith.constant 0 : i32
    return %c0_i32, %c0_i32_0, %c0_i32_1 : i32, i32, i32
  }
  func.func @transform_3(%arg0: i32) -> (i32, i32, i32) {
    %c0_i32 = arith.constant 0 : i32
    %c0_i32_0 = arith.constant 0 : i32
    %c0_i32_1 = arith.constant 0 : i32
    %c0_i32_2 = arith.constant 0 : i32
    return %c0_i32, %c0_i32_0, %c0_i32_1 : i32, i32, i32
  }
  func.func @transform_4(%arg0: i32) -> (i32, i32, i32) {
    %c0_i32 = arith.constant 0 : i32
    %c0_i32_0 = arith.constant 0 : i32
    %c0_i32_1 = arith.constant 0 : i32
    %c0_i32_2 = arith.constant 0 : i32
    return %c0_i32, %c0_i32_0, %c0_i32_1 : i32, i32, i32
  }
  func.func @transform_5(%arg0: i32) -> (i32, i32, i32) {
    %c0_i32 = arith.constant 0 : i32
    %c0_i32_0 = arith.constant 0 : i32
    %c0_i32_1 = arith.constant 0 : i32
    %c0_i32_2 = arith.constant 0 : i32
    return %c0_i32, %c0_i32_0, %c0_i32_1 : i32, i32, i32
  }
  func.func @transform_6(%arg0: i32) -> (i32, i32, i32) {
    %c0_i32 = arith.constant 0 : i32
    %c0_i32_0 = arith.constant 0 : i32
    %c0_i32_1 = arith.constant 0 : i32
    %c0_i32_2 = arith.constant 0 : i32
    return %c0_i32, %c0_i32_0, %c0_i32_1 : i32, i32, i32
  }
  func.func @transform_7(%arg0: i32) -> (i32, i32, i32) {
    %c0_i32 = arith.constant 0 : i32
    %c0_i32_0 = arith.constant 0 : i32
    %c0_i32_1 = arith.constant 0 : i32
    return %arg0, %c0_i32, %c0_i32_0 : i32, i32, i32
  }
}

</mosaic_0001>

<bundles_post_ra>
// kernel: residual_encoder_forward.1
= control target key start
LH: loop header
LB: loop body
LE: loop exit
PB: predicated region body
PF: predicated region fallthrough
CT: control target
= control target key end

     0   :  { %12 = vsyncpa [#allocation8], 0  ;;  %s12974_s0 = inlined_call_operand.vmem [shape: f32[2,324,4], index: 0, kind: input, shape index: {}]   ;;  %s12975_s1 = inlined_call_operand.vmem [shape: bf16[9,4,8], index: 1, kind: input, shape index: {}]   ;;  %s12976_s2 = inlined_call_operand.vmem [shape: bf16[9,8,16], index: 2, kind: input, shape index: {}]   ;;  %s12977_s3 = inlined_call_operand.vmem [shape: bf16[9,16,16], index: 3, kind: input, shape index: {}]   ;;  %s12978_s4 = inlined_call_operand.vmem [shape: bf16[9,16,32], index: 4, kind: input, shape index: {}]   ;;  %s12979_s5 = inlined_call_operand.vmem [shape: bf16[9,32,32], index: 5, kind: input, shape index: {}]   ;;  %s12980_s6 = inlined_call_operand.vmem [shape: bf16[9,32,32], index: 6, kind: input, shape index: {}]   ;;  %s12981_s7 = inlined_call_operand.hbm [shape: f32[2,16,32], index: 7, kind: output, shape index: {}]  }
   0x1   :  { %14 = vsyncpa [#allocation8 + $0x1], 0  ;;  %s10695_s24 = smov 0   ;;  %s10697_s25 = smov 0  }
   0x2   :  { %s10699_s26 = smov 0   ;;  %s10701_s27 = smov 0  }
   0x3 LB: > { %s10716_s28 = sadd.s32 4294967295, %s10648_s27   ;;  %s7770_s29 = sadd.s32 4294967294, %s10648_s27   ;;  %s10648_s27 = sphi %s10701_s27, %s13353_s27   ;;  %s10644_s26 = sphi %s10699_s26, %s13352_s26   ;;  %s10640_s25 = sphi %s10697_s25, %s13351_s25   ;;  %s10636_s24 = sphi %s10695_s24, %s13350_s24  }
   0x4   : > { %s10720_s30 = sadd.s32 1, %s10648_s27   ;;  %s179_s8 = sadd.s32 1, %s10644_s26 }
   0x5   : > { %s176_s9 = ssub.s32 %s10648_s27, %s10720_s30  ;;  %p189_p0 = scmp.ne.s32.totalorder %s10644_s26, %s10640_s25 }
   0x6   : > { %p177_p1 = scmp.eq.s32.totalorder %s176_s9, 0  ;;  %p190_p2 = scmp.eq.s32.totalorder %s10716_s28, 1 }
   0x7   : > { %p195_p3 = scmp.ne.s32.totalorder %s10640_s25, %s10636_s24  ;;  %p196_p4 = scmp.eq.s32.totalorder %s7770_s29, 1 }
   0x8   : > { %s10731_s10 = scalar_select %p177_p1, %s10644_s26, %s179_s8  }
   0x9   : > { %p10733_p5 = por %p190_p2, %p189_p0  ;;  %p10737_p6 = por %p196_p4, %p195_p3 }
   0xa   : > { %p7773_p7 = scmp.ge.s32.totalorder %s10648_s27, 1  ;;  %p240_p8 = scmp.lt.s32.totalorder %s10648_s27, 3 }
   0xc   : > { %p241_p9 = pnand %p7773_p7, %p240_p8 }
   0xd   : > { %v7809_v0 = vld [vmem:[%s12975_s1 + $0x2] sm:$0x3] (!%p241_p9)  ;;  %vm394_vm0 = vcmask (!%p241_p9), 1041408   ;;  %p272_p10 = scmp.lt.s32.totalorder (!%p241_p9), %s10716_s28, 1  ;;  %v10650_v1 = vmov (!%p241_p9), 0.0   ;;  %vm12982_vm1 = vmmov (!%p241_p9), 0  }
   0xe   : > { %244 = sbr.rel (%p241_p9) target bundleno = 3607 (0xe17), region = 48  ;;  %8640 = vmatprep.subr.bf16.mxu0 (!%p241_p9), %v10650_v1  ;;  %v396_v2 = vsel (!%p241_p9), %vm394_vm0, %v7809_v0, 0  ;;  %8642 = vmatprep.mubr.msk.bf16.mxu0 (!%p241_p9), %vm12982_vm1, %v10650_v1  ;;  %v320_v3 = vld [vmem:[%s12975_s1] sm:$0x3] (!%p241_p9)  ;;  %vm366_vm2 = vcmask (!%p241_p9), 31744   ;;  %vm12984_vm14 = vcmask (!%p241_p9), 64512  }
   0xf   : > { %8641 = vmatpush3.bf16.msra.mxu0 (!%p241_p9), %v396_v2  ;;  %8982 = vmatprep.subr.bf16.mxu1 (!%p241_p9), %v10650_v1  ;;  %v530_v7 = vsel (!%p241_p9), %vm394_vm0, %v320_v3, 0  ;;  %v7845_v33 = vld [vmem:[%s12975_s1 + $0x4] sm:$0x3] (!%p241_p9)  ;;  %v7872_v61 = vld [vmem:[%s12975_s1 + $0x6] sm:$0x3] (!%p241_p9)  ;;  %s8333_s29 = sshll.u32 (!%p241_p9), %s10716_s28, 8 }
  0x10   : > { %8678 = vmatprep.subr.bf16.mxu0 (!%p241_p9), %v10650_v1  ;;  %8984 = vmatprep.mubr.msk.bf16.mxu1 (!%p241_p9), %vm12982_vm1, %v10650_v1  ;;  %v709_v35 = vsel (!%p241_p9), %vm394_vm0, %v7845_v33, 0  ;;  %v889_v63 = vsel (!%p241_p9), %vm394_vm0, %v7872_v61, 0  ;;  %s10652_s17 = smov (!%p241_p9), [#allocation7]  }
  0x15   : > { %s273_s15 = scalar_select %p272_p10, %s10716_s28, 1 }
  0x17   : > { %s10416_s18 = smul.u32 328, %s273_s15  ;;  %s12923_s15 = scalar_lea.hbm %s12981_s7, %s8333_s29 }
  0x19   : > { %s10762_s21 = scalar_lea.vmem %s12974_s0, %s10416_s18  ;;  %s10590_s18 = sshll.u32 %s10652_s17, 4  ;;  %s10591_s18 = int_to_ptr.vmem [resolvable:$false] %s10590_s18 }
  0x1a   : > { %v7792_v4 = vld [vmem:[%s10762_s21 + $0x1] ss:$2 sm:$0xff]  ;;  %v7793_v5 = vld [vmem:[%s10762_s21 + $0x11] ss:$2 sm:$0xff]  ;;  %v278_v31 = vld [vmem:[%s10762_s21] ss:$2 sm:$0xff] }
  0x1b   : > { %v355_v6 = vpack.c.bf16 %v7793_v5, %v7792_v4  ;;  %v7794_v8 = vld [vmem:[%s10762_s21 + $0x21] ss:$2 sm:$0xff]  ;;  %v7795_v9 = vld [vmem:[%s10762_s21 + $0x31] ss:$2 sm:$0xff]  ;;  %v7776_v32 = vld [vmem:[%s10762_s21 + $0x10] ss:$2 sm:$0xff] }
  0x1c   : > { %v356_v10 = vpack.c.bf16 %v7795_v9, %v7794_v8  ;;  %v7796_v11 = vld [vmem:[%s10762_s21 + $0x41] ss:$2 sm:$0xff]  ;;  %v7797_v12 = vld [vmem:[%s10762_s21 + $0x51] ss:$2 sm:$0xff]  ;;  %v311_v34 = vpack.c.bf16 %v7776_v32, %v278_v31  ;;  %v7777_v36 = vld [vmem:[%s10762_s21 + $0x20] ss:$2 sm:$0xff] }
  0x1d   : > { %8643 = vmatmul.mubr.msk.bf16.vlgmr.msra.gmra.mrb[0].mxu0 %vm366_vm2, %v355_v6  ;;  %v357_v13 = vpack.c.bf16 %v7797_v12, %v7796_v11  ;;  %v7798_v14 = vld [vmem:[%s10762_s21 + $0x61] ss:$2 sm:$0xff]  ;;  %v7799_v15 = vld [vmem:[%s10762_s21 + $0x71] ss:$2 sm:$0xff]  ;;  %v7778_v37 = vld [vmem:[%s10762_s21 + $0x30] ss:$2 sm:$0xff] }
  0x1e   : > { %8679 = vmatpush3.bf16.msra.mxu0 %v530_v7  ;;  %8646 = vmatprep.mubr.msk.bf16.mxu0 %vm12982_vm1, %v10650_v1  ;;  %v358_v16 = vpack.c.bf16 %v7799_v15, %v7798_v14  ;;  %v7800_v17 = vld [vmem:[%s10762_s21 + $0x81] ss:$2 sm:$0xff]  ;;  %v7801_v18 = vld [vmem:[%s10762_s21 + $0x91] ss:$2 sm:$0xff]  ;;  %v312_v38 = vpack.c.bf16 %v7778_v37, %v7777_v36  ;;  %v7779_v39 = vld [vmem:[%s10762_s21 + $0x40] ss:$2 sm:$0xff] }
  0x1f   : > { %8716 = vmatprep.subr.bf16.mxu0 %v10650_v1  ;;  %v359_v19 = vpack.c.bf16 %v7801_v18, %v7800_v17  ;;  %v7802_v20 = vld [vmem:[%s10762_s21 + $0xa1] ss:$2 sm:$0xff]  ;;  %v7803_v21 = vld [vmem:[%s10762_s21 + $0xb1] ss:$2 sm:$0xff]  ;;  %v7780_v40 = vld [vmem:[%s10762_s21 + $0x50] ss:$2 sm:$0xff] }
  0x20   : > { %v360_v22 = vpack.c.bf16 %v7803_v21, %v7802_v20  ;;  %v7804_v23 = vld [vmem:[%s10762_s21 + $0xc1] ss:$2 sm:$0xff]  ;;  %v7805_v24 = vld [vmem:[%s10762_s21 + $0xd1] ss:$2 sm:$0xff]  ;;  %v313_v41 = vpack.c.bf16 %v7780_v40, %v7779_v39  ;;  %v7781_v42 = vld [vmem:[%s10762_s21 + $0x60] ss:$2 sm:$0xff] }
  0x21   : > { %v361_v25 = vpack.c.bf16 %v7805_v24, %v7804_v23  ;;  %v7806_v26 = vld [vmem:[%s10762_s21 + $0xe1] ss:$2 sm:$0xff]  ;;  %v7807_v27 = vld [vmem:[%s10762_s21 + $0xf1] ss:$2 sm:$0xff]  ;;  %v7782_v43 = vld [vmem:[%s10762_s21 + $0x70] ss:$2 sm:$0xff] }
  0x22   : > { %v362_v28 = vpack.c.bf16 %v7807_v27, %v7806_v26  ;;  %v7808_v29 = vld [vmem:[%s10762_s21 + $0x101] ss:$2 sm:$0x3f]  ;;  %v314_v44 = vpack.c.bf16 %v7782_v43, %v7781_v42  ;;  %v7783_v45 = vld [vmem:[%s10762_s21 + $0x80] ss:$2 sm:$0xff]  ;;  %s10592_s19 = scalar_lea.vmem %s10591_s18, 512 }
  0x23   : > { %v363_v30 = vpack.c.bf16 %v7808_v29, %v7808_v29  ;;  %v7784_v46 = vld [vmem:[%s10762_s21 + $0x90] ss:$2 sm:$0xff]  ;;  %v7785_v48 = vld [vmem:[%s10762_s21 + $0xa0] ss:$2 sm:$0xff]  ;;  %v7887_v61 = vld [vmem:[%s10762_s21 + $0x63] ss:$2 sm:$0xff] }
  0x24   : > { %v315_v47 = vpack.c.bf16 %v7784_v46, %v7783_v45  ;;  %v7786_v49 = vld [vmem:[%s10762_s21 + $0xb0] ss:$2 sm:$0xff]  ;;  %v7787_v51 = vld [vmem:[%s10762_s21 + $0xc0] ss:$2 sm:$0xff] }
  0x25   : > { %8647 = vmatmul.mubr.msk.bf16.gmra.mrb[4].mxu0 %vm366_vm2, %v356_v10  ;;  %v316_v50 = vpack.c.bf16 %v7786_v49, %v7785_v48  ;;  %v7788_v52 = vld [vmem:[%s10762_s21 + $0xd0] ss:$2 sm:$0xff]  ;;  %v7789_v54 = vld [vmem:[%s10762_s21 + $0xe0] ss:$2 sm:$0xff] }
  0x26   : > { %8650 = vmatprep.mubr.msk.bf16.mxu0 %vm12982_vm1, %v10650_v1  ;;  %v317_v53 = vpack.c.bf16 %v7788_v52, %v7787_v51  ;;  %v7790_v55 = vld [vmem:[%s10762_s21 + $0xf0] ss:$2 sm:$0xff]  ;;  %v7791_v57 = vld [vmem:[%s10762_s21 + $0x100] ss:$2 sm:$0x3f] }
  0x27   : > { %v318_v56 = vpack.c.bf16 %v7790_v55, %v7789_v54  ;;  %v319_v58 = vpack.c.bf16 %v7791_v57, %v7791_v57  ;;  %v7828_v59 = vld [vmem:[%s10762_s21 + $0x2] ss:$2 sm:$0xff]  ;;  %v7829_v60 = vld [vmem:[%s10762_s21 + $0x12] ss:$2 sm:$0xff]  ;;  %v7882_v52 = vld [vmem:[%s10762_s21 + $0x13] ss:$2 sm:$0xff] }
  0x28   : > { %v670_v62 = vpack.c.bf16 %v7829_v60, %v7828_v59  ;;  %v7830_v0 = vld [vmem:[%s10762_s21 + $0x22] ss:$2 sm:$0xff]  ;;  %v7831_v2 = vld [vmem:[%s10762_s21 + $0x32] ss:$2 sm:$0xff]  ;;  %v7884_v57 = vld [vmem:[%s10762_s21 + $0x33] ss:$2 sm:$0xff] }
  0x29   : > { %v671_v3 = vpack.c.bf16 %v7831_v2, %v7830_v0  ;;  %v7832_v4 = vld [vmem:[%s10762_s21 + $0x42] ss:$2 sm:$0xff]  ;;  %v7833_v5 = vld [vmem:[%s10762_s21 + $0x52] ss:$2 sm:$0xff]  ;;  %v7886_v60 = vld [vmem:[%s10762_s21 + $0x53] ss:$2 sm:$0xff] }
  0x2a   : > { %v672_v6 = vpack.c.bf16 %v7833_v5, %v7832_v4  ;;  %v7834_v7 = vld [vmem:[%s10762_s21 + $0x62] ss:$2 sm:$0xff]  ;;  %v7835_v8 = vld [vmem:[%s10762_s21 + $0x72] ss:$2 sm:$0xff]  ;;  %v7889_v0 = vld [vmem:[%s10762_s21 + $0x83] ss:$2 sm:$0xff] }
  0x2b   : > { %v673_v9 = vpack.c.bf16 %v7835_v8, %v7834_v7  ;;  %v7836_v10 = vld [vmem:[%s10762_s21 + $0x82] ss:$2 sm:$0xff]  ;;  %v7837_v11 = vld [vmem:[%s10762_s21 + $0x92] ss:$2 sm:$0xff]  ;;  %v7891_v4 = vld [vmem:[%s10762_s21 + $0xa3] ss:$2 sm:$0xff] }
  0x2c   : > { %v674_v12 = vpack.c.bf16 %v7837_v11, %v7836_v10  ;;  %v7839_v14 = vld [vmem:[%s10762_s21 + $0xb2] ss:$2 sm:$0xff]  ;;  %v7899_v26 = vld [vmem:[%s12975_s1 + $0x8] sm:$0x3]  ;;  %v7926_v54 = vld [vmem:[%s12975_s1 + $0xa] sm:$0x3] }
  0x2d   : > { %8651 = vmatmul.mubr.msk.bf16.gmra.mrb[8].mxu0 %vm366_vm2, %v357_v13  ;;  %v7838_v13 = vld [vmem:[%s10762_s21 + $0xa2] ss:$2 sm:$0xff]  ;;  %v7841_v17 = vld [vmem:[%s10762_s21 + $0xd2] ss:$2 sm:$0xff]  ;;  %v7893_v7 = vld [vmem:[%s10762_s21 + $0xc3] ss:$2 sm:$0xff] }
  0x2e   : > { %8654 = vmatprep.mubr.msk.bf16.mxu0 %vm12982_vm1, %v10650_v1  ;;  %v675_v15 = vpack.c.bf16 %v7839_v14, %v7838_v13  ;;  %v7843_v20 = vld [vmem:[%s10762_s21 + $0xf2] ss:$2 sm:$0xff]  ;;  %v7860_v33 = vld [vmem:[%s10762_s21 + $0x62] ss:$2 sm:$0xff]  ;;  %v7895_v10 = vld [vmem:[%s10762_s21 + $0xe3] ss:$2 sm:$0xff] }
  0x2f   : > { %v7855_v24 = vld [vmem:[%s10762_s21 + $0x12] ss:$2 sm:$0xff]  ;;  %v7862_v36 = vld [vmem:[%s10762_s21 + $0x82] ss:$2 sm:$0xff]  ;;  %v7897_v13 = vld [vmem:[%s10762_s21 + $0x103] ss:$2 sm:$0xff] }
  0x30   : > { %v7857_v29 = vld [vmem:[%s10762_s21 + $0x32] ss:$2 sm:$0xff]  ;;  %v7864_v39 = vld [vmem:[%s10762_s21 + $0xa2] ss:$2 sm:$0xff] }
  0x31   : > { %v7859_v32 = vld [vmem:[%s10762_s21 + $0x52] ss:$2 sm:$0xff]  ;;  %v7866_v42 = vld [vmem:[%s10762_s21 + $0xc2] ss:$2 sm:$0xff] }
  0x32   : > { %v7868_v45 = vld [vmem:[%s10762_s21 + $0xe2] ss:$2 sm:$0xff] }
  0x33   : > { %v7870_v48 = vld [vmem:[%s10762_s21 + $0x102] ss:$2 sm:$0xff] }
  0x35   : > { %8655 = vmatmul.mubr.msk.bf16.gmra.mrb[12].mxu0 %vm366_vm2, %v358_v16  ;;  %v7840_v16 = vld [vmem:[%s10762_s21 + $0xc2] ss:$2 sm:$0xff] }
  0x36   : > { %8658 = vmatprep.mubr.msk.bf16.mxu0 %vm12982_vm1, %v10650_v1  ;;  %v676_v18 = vpack.c.bf16 %v7841_v17, %v7840_v16  ;;  %v7909_v17 = vld [vmem:[%s10762_s21 + $0x14] ss:$2 sm:$0xff] }
  0x3d   : > { %8659 = vmatmul.mubr.msk.bf16.gmra.mrb[16].mxu0 %vm366_vm2, %v359_v19  ;;  %v7842_v19 = vld [vmem:[%s10762_s21 + $0xe2] ss:$2 sm:$0xff] }
  0x3e   : > { %8662 = vmatprep.mubr.msk.bf16.mxu0 %vm12982_vm1, %v10650_v1  ;;  %v677_v21 = vpack.c.bf16 %v7843_v20, %v7842_v19  ;;  %v7953_v19 = vld [vmem:[%s12975_s1 + $0xc] sm:$0x3] }
  0x45   : > { %8663 = vmatmul.mubr.msk.bf16.gmra.mrb[20].mxu0 %vm366_vm2, %v360_v22  ;;  %v7844_v22 = vld [vmem:[%s10762_s21 + $0x102] ss:$2 sm:$0x3f] }
  0x46   : > { %8666 = vmatprep.mubr.msk.bf16.mxu0 %vm12982_vm1, %v10650_v1  ;;  %v678_v23 = vpack.c.bf16 %v7844_v22, %v7844_v22  ;;  %v7911_v22 = vld [vmem:[%s10762_s21 + $0x34] ss:$2 sm:$0xff] }
  0x4d   : > { %8667 = vmatmul.mubr.msk.bf16.gmra.mrb[24].mxu0 %vm366_vm2, %v361_v25  ;;  %v7856_v25 = vld [vmem:[%s10762_s21 + $0x22] ss:$2 sm:$0xff] }
  0x4e   : > { %8670 = vmatprep.mubr.msk.bf16.mxu0 %vm12982_vm1, %v10650_v1  ;;  %v850_v27 = vpack.c.bf16 %v7856_v25, %v7855_v24  ;;  %v7913_v25 = vld [vmem:[%s10762_s21 + $0x54] ss:$2 sm:$0xff] }
  0x55   : > { %8671 = vmatmul.mubr.msk.bf16.gmra.mrb[28].mxu0 %vm366_vm2, %v362_v28  ;;  %v1085_v28 = vsel %vm394_vm0, %v7899_v26, 0  ;;  %v7914_v26 = vld [vmem:[%s10762_s21 + $0x64] ss:$2 sm:$0xff] }
  0x56   : > { %8674 = vmatprep.mubr.msk.bf16.mxu0 %vm12982_vm1, %v10650_v1 }
  0x5d   : > { %8675 = vmatmul.mubr.msk.bf16.gmra.mrb[32].mxu0 %vm366_vm2, %v363_v30  ;;  %v7858_v30 = vld [vmem:[%s10762_s21 + $0x42] ss:$2 sm:$0xff] }
  0x5e   : > { %8680 = vmatprep.mubr.msk.bf16.mxu0 %vm12982_vm1, %v10650_v1  ;;  %v851_v31 = vpack.c.bf16 %v7858_v30, %v7857_v29  ;;  %v7916_v29 = vld [vmem:[%s10762_s21 + $0x84] ss:$2 sm:$0xff] }
  0x65   : > { %8681 = vmatmul.mubr.msk.bf16.vlgmr.msra.gmra.mrb[0].mxu0 %vm366_vm2, %v311_v34  ;;  %v852_v34 = vpack.c.bf16 %v7860_v33, %v7859_v32  ;;  %v7918_v32 = vld [vmem:[%s10762_s21 + $0xa4] ss:$2 sm:$0xff] }
  0x66   : > { %8717 = vmatpush3.bf16.msra.mxu0 %v709_v35  ;;  %8684 = vmatprep.mubr.msk.bf16.mxu0 %vm12982_vm1, %v10650_v1  ;;  %v7861_v35 = vld [vmem:[%s10762_s21 + $0x72] ss:$2 sm:$0xff] }
  0x67   : > { %8754 = vmatprep.subr.bf16.mxu0 %v10650_v1  ;;  %v853_v37 = vpack.c.bf16 %v7862_v36, %v7861_v35  ;;  %v7920_v35 = vld [vmem:[%s10762_s21 + $0xc4] ss:$2 sm:$0xff] }
  0x6d   : > { %8685 = vmatmul.mubr.msk.bf16.gmra.mrb[4].mxu0 %vm366_vm2, %v312_v38  ;;  %v7863_v38 = vld [vmem:[%s10762_s21 + $0x92] ss:$2 sm:$0xff] }
  0x6e   : > { %8688 = vmatprep.mubr.msk.bf16.mxu0 %vm12982_vm1, %v10650_v1  ;;  %v854_v40 = vpack.c.bf16 %v7864_v39, %v7863_v38  ;;  %v7922_v38 = vld [vmem:[%s10762_s21 + $0xe4] ss:$2 sm:$0xff] }
  0x75   : > { %8689 = vmatmul.mubr.msk.bf16.gmra.mrb[8].mxu0 %vm366_vm2, %v313_v41  ;;  %v7865_v41 = vld [vmem:[%s10762_s21 + $0xb2] ss:$2 sm:$0xff] }
  0x76   : > { %8692 = vmatprep.mubr.msk.bf16.mxu0 %vm12982_vm1, %v10650_v1  ;;  %v855_v43 = vpack.c.bf16 %v7866_v42, %v7865_v41  ;;  %v7924_v41 = vld [vmem:[%s10762_s21 + $0x104] ss:$2 sm:$0xff] }
  0x7d   : > { %8693 = vmatmul.mubr.msk.bf16.gmra.mrb[12].mxu0 %vm366_vm2, %v314_v44  ;;  %v7867_v44 = vld [vmem:[%s10762_s21 + $0xd2] ss:$2 sm:$0xff] }
  0x7e   : > { %8696 = vmatprep.mubr.msk.bf16.mxu0 %vm12982_vm1, %v10650_v1  ;;  %v856_v46 = vpack.c.bf16 %v7868_v45, %v7867_v44  ;;  %v7936_v45 = vld [vmem:[%s10762_s21 + $0x24] ss:$2 sm:$0xff] }
  0x85   : > { %8697 = vmatmul.mubr.msk.bf16.gmra.mrb[16].mxu0 %vm366_vm2, %v315_v47  ;;  %v7869_v47 = vld [vmem:[%s10762_s21 + $0xf2] ss:$2 sm:$0xff] }
  0x86   : > { %8700 = vmatprep.mubr.msk.bf16.mxu0 %vm12982_vm1, %v10650_v1  ;;  %v857_v49 = vpack.c.bf16 %v7870_v48, %v7869_v47  ;;  %v7980_v47 = vld [vmem:[%s12975_s1 + $0xe] sm:$0x3] }
  0x8d   : > { %8701 = vmatmul.mubr.msk.bf16.gmra.mrb[20].mxu0 %vm366_vm2, %v316_v50  ;;  %v7871_v50 = vld [vmem:[%s10762_s21 + $0x112] ss:$2 sm:$0x3f] }
  0x8e   : > { %8704 = vmatprep.mubr.msk.bf16.mxu0 %vm12982_vm1, %v10650_v1  ;;  %v858_v51 = vpack.c.bf16 %v7871_v50, %v7871_v50  ;;  %v7938_v50 = vld [vmem:[%s10762_s21 + $0x44] ss:$2 sm:$0xff] }
  0x95   : > { %8705 = vmatmul.mubr.msk.bf16.gmra.mrb[24].mxu0 %vm366_vm2, %v317_v53  ;;  %v7883_v53 = vld [vmem:[%s10762_s21 + $0x23] ss:$2 sm:$0xff] }
  0x96   : > { %8708 = vmatprep.mubr.msk.bf16.mxu0 %vm12982_vm1, %v10650_v1  ;;  %v1046_v55 = vpack.c.bf16 %v7883_v53, %v7882_v52  ;;  %v7940_v53 = vld [vmem:[%s10762_s21 + $0x64] ss:$2 sm:$0xff] }
  0x9d   : > { %8709 = vmatmul.mubr.msk.bf16.gmra.mrb[28].mxu0 %vm366_vm2, %v318_v56  ;;  %v1281_v56 = vsel %vm394_vm0, %v7926_v54, 0  ;;  %v7941_v54 = vld [vmem:[%s10762_s21 + $0x74] ss:$2 sm:$0xff] }
  0x9e   : > { %8712 = vmatprep.mubr.msk.bf16.mxu0 %vm12982_vm1, %v10650_v1 }
  0xa5   : > { %8713 = vmatmul.mubr.msk.bf16.gmra.mrb[32].mxu0 %vm366_vm2, %v319_v58  ;;  %v7885_v58 = vld [vmem:[%s10762_s21 + $0x43] ss:$2 sm:$0xff] }
  0xa6   : > { %8718 = vmatprep.mubr.msk.bf16.mxu0 %vm12982_vm1, %v10650_v1  ;;  %v1047_v59 = vpack.c.bf16 %v7885_v58, %v7884_v57  ;;  %v7943_v57 = vld [vmem:[%s10762_s21 + $0x94] ss:$2 sm:$0xff] }
  0xad   : > { %8719 = vmatmul.mubr.msk.bf16.vlgmr.msra.gmra.mrb[0].mxu0 %vm366_vm2, %v670_v62  ;;  %v1048_v62 = vpack.c.bf16 %v7887_v61, %v7886_v60  ;;  %v7945_v60 = vld [vmem:[%s10762_s21 + $0xb4] ss:$2 sm:$0xff] }
  0xae   : > { %8755 = vmatpush3.bf16.msra.mxu0 %v889_v63  ;;  %8722 = vmatprep.mubr.msk.bf16.mxu0 %vm12982_vm1, %v10650_v1  ;;  %v7888_v63 = vld [vmem:[%s10762_s21 + $0x73] ss:$2 sm:$0xff] }
  0xaf   : > { %8792 = vmatprep.subr.bf16.mxu0 %v10650_v1  ;;  %v1049_v2 = vpack.c.bf16 %v7889_v0, %v7888_v63  ;;  %v7947_v63 = vld [vmem:[%s10762_s21 + $0xd4] ss:$2 sm:$0xff] }
  0xb5   : > { %8723 = vmatmul.mubr.msk.bf16.gmra.mrb[4].mxu0 %vm366_vm2, %v671_v3  ;;  %v7890_v3 = vld [vmem:[%s10762_s21 + $0x93] ss:$2 sm:$0xff] }
  0xb6   : > { %8726 = vmatprep.mubr.msk.bf16.mxu0 %vm12982_vm1, %v10650_v1  ;;  %v1050_v5 = vpack.c.bf16 %v7891_v4, %v7890_v3  ;;  %v7949_v3 = vld [vmem:[%s10762_s21 + $0xf4] ss:$2 sm:$0xff] }
  0xbd   : > { %8727 = vmatmul.mubr.msk.bf16.gmra.mrb[8].mxu0 %vm366_vm2, %v672_v6  ;;  %v7892_v6 = vld [vmem:[%s10762_s21 + $0xb3] ss:$2 sm:$0xff] }
  0xbe   : > { %8730 = vmatprep.mubr.msk.bf16.mxu0 %vm12982_vm1, %v10650_v1  ;;  %v1051_v8 = vpack.c.bf16 %v7893_v7, %v7892_v6  ;;  %v7951_v6 = vld [vmem:[%s10762_s21 + $0x114] ss:$2 sm:$0xff] }
  0xc5   : > { %8731 = vmatmul.mubr.msk.bf16.gmra.mrb[12].mxu0 %vm366_vm2, %v673_v9  ;;  %v7894_v9 = vld [vmem:[%s10762_s21 + $0xd3] ss:$2 sm:$0xff] }
  0xc6   : > { %8734 = vmatprep.mubr.msk.bf16.mxu0 %vm12982_vm1, %v10650_v1  ;;  %v1052_v11 = vpack.c.bf16 %v7895_v10, %v7894_v9  ;;  %v7963_v10 = vld [vmem:[%s10762_s21 + $0x25] ss:$2 sm:$0xff] }
  0xcd   : > { %8735 = vmatmul.mubr.msk.bf16.gmra.mrb[16].mxu0 %vm366_vm2, %v674_v12  ;;  %v7896_v12 = vld [vmem:[%s10762_s21 + $0xf3] ss:$2 sm:$0xff] }
  0xce   : > { %8738 = vmatprep.mubr.msk.bf16.mxu0 %vm12982_vm1, %v10650_v1  ;;  %v1053_v14 = vpack.c.bf16 %v7897_v13, %v7896_v12  ;;  %v8007_v12 = vld [vmem:[%s12975_s1 + $0x10] sm:$0x3] }
  0xd5   : > { %8739 = vmatmul.mubr.msk.bf16.gmra.mrb[20].mxu0 %vm366_vm2, %v675_v15  ;;  %v7898_v15 = vld [vmem:[%s10762_s21 + $0x113] ss:$2 sm:$0x3f] }
  0xd6   : > { %8742 = vmatprep.mubr.msk.bf16.mxu0 %vm12982_vm1, %v10650_v1  ;;  %v1054_v16 = vpack.c.bf16 %v7898_v15, %v7898_v15  ;;  %v7965_v15 = vld [vmem:[%s10762_s21 + $0x45] ss:$2 sm:$0xff] }
  0xdd   : > { %8743 = vmatmul.mubr.msk.bf16.gmra.mrb[24].mxu0 %vm366_vm2, %v676_v18  ;;  %v7910_v18 = vld [vmem:[%s10762_s21 + $0x24] ss:$2 sm:$0xff] }
  0xde   : > { %8746 = vmatprep.mubr.msk.bf16.mxu0 %vm12982_vm1, %v10650_v1  ;;  %v1242_v20 = vpack.c.bf16 %v7910_v18, %v7909_v17  ;;  %v7967_v18 = vld [vmem:[%s10762_s21 + $0x65] ss:$2 sm:$0xff] }
  0xe5   : > { %8747 = vmatmul.mubr.msk.bf16.gmra.mrb[28].mxu0 %vm366_vm2, %v677_v21  ;;  %v1461_v21 = vsel %vm394_vm0, %v7953_v19, 0  ;;  %v7968_v19 = vld [vmem:[%s10762_s21 + $0x75] ss:$2 sm:$0xff] }
  0xe6   : > { %8750 = vmatprep.mubr.msk.bf16.mxu0 %vm12982_vm1, %v10650_v1 }
  0xed   : > { %8751 = vmatmul.mubr.msk.bf16.gmra.mrb[32].mxu0 %vm366_vm2, %v678_v23  ;;  %v7912_v23 = vld [vmem:[%s10762_s21 + $0x44] ss:$2 sm:$0xff] }
  0xee   : > { %8756 = vmatprep.mubr.msk.bf16.mxu0 %vm12982_vm1, %v10650_v1  ;;  %v1243_v24 = vpack.c.bf16 %v7912_v23, %v7911_v22  ;;  %v7970_v22 = vld [vmem:[%s10762_s21 + $0x95] ss:$2 sm:$0xff] }
  0xf5   : > { %8757 = vmatmul.mubr.msk.bf16.vlgmr.msra.gmra.mrb[0].mxu0 %vm366_vm2, %v850_v27  ;;  %v1244_v27 = vpack.c.bf16 %v7914_v26, %v7913_v25  ;;  %v7972_v25 = vld [vmem:[%s10762_s21 + $0xb5] ss:$2 sm:$0xff] }
  0xf6   : > { %8793 = vmatpush3.bf16.msra.mxu0 %v1085_v28  ;;  %8760 = vmatprep.mubr.msk.bf16.mxu0 %vm12982_vm1, %v10650_v1  ;;  %v7915_v28 = vld [vmem:[%s10762_s21 + $0x74] ss:$2 sm:$0xff] }
  0xf7   : > { %8830 = vmatprep.subr.bf16.mxu0 %v10650_v1  ;;  %v1245_v30 = vpack.c.bf16 %v7916_v29, %v7915_v28  ;;  %v7974_v28 = vld [vmem:[%s10762_s21 + $0xd5] ss:$2 sm:$0xff] }
  0xfd   : > { %8761 = vmatmul.mubr.msk.bf16.gmra.mrb[4].mxu0 %vm366_vm2, %v851_v31  ;;  %v7917_v31 = vld [vmem:[%s10762_s21 + $0x94] ss:$2 sm:$0xff] }
  0xfe   : > { %8764 = vmatprep.mubr.msk.bf16.mxu0 %vm12982_vm1, %v10650_v1  ;;  %v1246_v33 = vpack.c.bf16 %v7918_v32, %v7917_v31  ;;  %v7976_v31 = vld [vmem:[%s10762_s21 + $0xf5] ss:$2 sm:$0xff] }
 0x105   : > { %8765 = vmatmul.mubr.msk.bf16.gmra.mrb[8].mxu0 %vm366_vm2, %v852_v34  ;;  %v7919_v34 = vld [vmem:[%s10762_s21 + $0xb4] ss:$2 sm:$0xff] }
 0x106   : > { %8768 = vmatprep.mubr.msk.bf16.mxu0 %vm12982_vm1, %v10650_v1  ;;  %v1247_v36 = vpack.c.bf16 %v7920_v35, %v7919_v34  ;;  %v7978_v34 = vld [vmem:[%s10762_s21 + $0x115] ss:$2 sm:$0xff] }
 0x10d   : > { %8769 = vmatmul.mubr.msk.bf16.gmra.mrb[12].mxu0 %vm366_vm2, %v853_v37  ;;  %v7921_v37 = vld [vmem:[%s10762_s21 + $0xd4] ss:$2 sm:$0xff] }
 0x10e   : > { %8772 = vmatprep.mubr.msk.bf16.mxu0 %vm12982_vm1, %v10650_v1  ;;  %v1248_v39 = vpack.c.bf16 %v7922_v38, %v7921_v37  ;;  %v7990_v38 = vld [vmem:[%s10762_s21 + $0x26] ss:$2 sm:$0xff] }
 0x115   : > { %8773 = vmatmul.mubr.msk.bf16.gmra.mrb[16].mxu0 %vm366_vm2, %v854_v40  ;;  %v7923_v40 = vld [vmem:[%s10762_s21 + $0xf4] ss:$2 sm:$0xff] }
 0x116   : > { %8776 = vmatprep.mubr.msk.bf16.mxu0 %vm12982_vm1, %v10650_v1  ;;  %v1249_v42 = vpack.c.bf16 %v7924_v41, %v7923_v40  ;;  %v7992_v41 = vld [vmem:[%s10762_s21 + $0x46] ss:$2 sm:$0xff] }
 0x11d   : > { %8777 = vmatmul.mubr.msk.bf16.gmra.mrb[20].mxu0 %vm366_vm2, %v855_v43  ;;  %v7925_v43 = vld [vmem:[%s10762_s21 + $0x114] ss:$2 sm:$0x3f] }
 0x11e   : > { %8780 = vmatprep.mubr.msk.bf16.mxu0 %vm12982_vm1, %v10650_v1  ;;  %v1250_v44 = vpack.c.bf16 %v7925_v43, %v7925_v43 }
 0x125   : > { %8781 = vmatmul.mubr.msk.bf16.gmra.mrb[24].mxu0 %vm366_vm2, %v856_v46  ;;  %v7937_v46 = vld [vmem:[%s10762_s21 + $0x34] ss:$2 sm:$0xff] }
 0x126   : > { %8784 = vmatprep.mubr.msk.bf16.mxu0 %vm12982_vm1, %v10650_v1  ;;  %v1422_v48 = vpack.c.bf16 %v7937_v46, %v7936_v45  ;;  %v7995_v45 = vld [vmem:[%s10762_s21 + $0x76] ss:$2 sm:$0xff] }
 0x12d   : > { %8785 = vmatmul.mubr.msk.bf16.gmra.mrb[28].mxu0 %vm366_vm2, %v857_v49  ;;  %v1657_v49 = vsel %vm394_vm0, %v7980_v47, 0  ;;  %v7996_v47 = vld [vmem:[%s10762_s21 + $0x86] ss:$2 sm:$0xff] }
 0x12e   : > { %8788 = vmatprep.mubr.msk.bf16.mxu0 %vm12982_vm1, %v10650_v1 }
 0x135   : > { %8789 = vmatmul.mubr.msk.bf16.gmra.mrb[32].mxu0 %vm366_vm2, %v858_v51  ;;  %v7939_v51 = vld [vmem:[%s10762_s21 + $0x54] ss:$2 sm:$0xff] }
 0x136   : > { %8794 = vmatprep.mubr.msk.bf16.mxu0 %vm12982_vm1, %v10650_v1  ;;  %v1423_v52 = vpack.c.bf16 %v7939_v51, %v7938_v50  ;;  %v7998_v50 = vld [vmem:[%s10762_s21 + $0xa6] ss:$2 sm:$0xff]  ;;  %v7999_v51 = vld [vmem:[%s10762_s21 + $0xb6] ss:$2 sm:$0xff] }
 0x13d   : > { %8795 = vmatmul.mubr.msk.bf16.vlgmr.msra.gmra.mrb[0].mxu0 %vm366_vm2, %v1046_v55  ;;  %v1424_v55 = vpack.c.bf16 %v7941_v54, %v7940_v53  ;;  %v8000_v53 = vld [vmem:[%s10762_s21 + $0xc6] ss:$2 sm:$0xff]  ;;  %v8001_v54 = vld [vmem:[%s10762_s21 + $0xd6] ss:$2 sm:$0xff] }
 0x13e   : > { %8831 = vmatpush3.bf16.msra.mxu0 %v1281_v56  ;;  %8798 = vmatprep.mubr.msk.bf16.mxu0 %vm12982_vm1, %v10650_v1  ;;  %v7942_v56 = vld [vmem:[%s10762_s21 + $0x84] ss:$2 sm:$0xff] }
 0x13f   : > { %8868 = vmatprep.subr.bf16.mxu0 %v10650_v1  ;;  %v1425_v58 = vpack.c.bf16 %v7943_v57, %v7942_v56  ;;  %v8002_v56 = vld [vmem:[%s10762_s21 + $0xe6] ss:$2 sm:$0xff]  ;;  %v8003_v57 = vld [vmem:[%s10762_s21 + $0xf6] ss:$2 sm:$0xff] }
 0x145   : > { %8799 = vmatmul.mubr.msk.bf16.gmra.mrb[4].mxu0 %vm366_vm2, %v1047_v59  ;;  %v7944_v59 = vld [vmem:[%s10762_s21 + $0xa4] ss:$2 sm:$0xff] }
 0x146   : > { %8802 = vmatprep.mubr.msk.bf16.mxu0 %vm12982_vm1, %v10650_v1  ;;  %v1426_v61 = vpack.c.bf16 %v7945_v60, %v7944_v59  ;;  %v8004_v59 = vld [vmem:[%s10762_s21 + $0x106] ss:$2 sm:$0xff]  ;;  %v8005_v60 = vld [vmem:[%s10762_s21 + $0x116] ss:$2 sm:$0xff] }
 0x14d   : > { %8803 = vmatmul.mubr.msk.bf16.gmra.mrb[8].mxu0 %vm366_vm2, %v1048_v62  ;;  %v7946_v62 = vld [vmem:[%s10762_s21 + $0xc4] ss:$2 sm:$0xff] }
 0x14e   : > { %8806 = vmatprep.mubr.msk.bf16.mxu0 %vm12982_vm1, %v10650_v1  ;;  %v1427_v0 = vpack.c.bf16 %v7947_v63, %v7946_v62  ;;  %v8006_v62 = vld [vmem:[%s10762_s21 + $0x126] ss:$2 sm:$0x3f] }
 0x14f   : > { %v1822_v63 = vpack.c.bf16 %v8006_v62, %v8006_v62 }
 0x155   : > { %8807 = vmatmul.mubr.msk.bf16.gmra.mrb[12].mxu0 %vm366_vm2, %v1049_v2  ;;  %v7948_v2 = vld [vmem:[%s10762_s21 + $0xe4] ss:$2 sm:$0xff] }
 0x156   : > { %8810 = vmatprep.mubr.msk.bf16.mxu0 %vm12982_vm1, %v10650_v1  ;;  %v1428_v4 = vpack.c.bf16 %v7949_v3, %v7948_v2 }
 0x15d   : > { %8811 = vmatmul.mubr.msk.bf16.gmra.mrb[16].mxu0 %vm366_vm2, %v1050_v5  ;;  %v7950_v5 = vld [vmem:[%s10762_s21 + $0x104] ss:$2 sm:$0xff] }
 0x15e   : > { %8814 = vmatprep.mubr.msk.bf16.mxu0 %vm12982_vm1, %v10650_v1  ;;  %v1429_v7 = vpack.c.bf16 %v7951_v6, %v7950_v5 }
 0x165   : > { %8815 = vmatmul.mubr.msk.bf16.gmra.mrb[20].mxu0 %vm366_vm2, %v1051_v8  ;;  %v7952_v8 = vld [vmem:[%s10762_s21 + $0x124] ss:$2 sm:$0x3f] }
 0x166   : > { %8818 = vmatprep.mubr.msk.bf16.mxu0 %vm12982_vm1, %v10650_v1  ;;  %v1430_v9 = vpack.c.bf16 %v7952_v8, %v7952_v8 }
 0x16d   : > { %8819 = vmatmul.mubr.msk.bf16.gmra.mrb[24].mxu0 %vm366_vm2, %v1052_v11  ;;  %v7964_v11 = vld [vmem:[%s10762_s21 + $0x35] ss:$2 sm:$0xff] }
 0x16e   : > { %8822 = vmatprep.mubr.msk.bf16.mxu0 %vm12982_vm1, %v10650_v1  ;;  %v1618_v13 = vpack.c.bf16 %v7964_v11, %v7963_v10 }
 0x175   : > { %8823 = vmatmul.mubr.msk.bf16.gmra.mrb[28].mxu0 %vm366_vm2, %v1053_v14  ;;  %v1853_v14 = vsel %vm394_vm0, %v8007_v12, 0 }
 0x176   : > { %8826 = vmatprep.mubr.msk.bf16.mxu0 %vm12982_vm1, %v10650_v1 }
 0x17d   : > { %8827 = vmatmul.mubr.msk.bf16.gmra.mrb[32].mxu0 %vm366_vm2, %v1054_v16  ;;  %v7966_v16 = vld [vmem:[%s10762_s21 + $0x55] ss:$2 sm:$0xff] }
 0x17e   : > { %8832 = vmatprep.mubr.msk.bf16.mxu0 %vm12982_vm1, %v10650_v1  ;;  %v1619_v17 = vpack.c.bf16 %v7966_v16, %v7965_v15 }
 0x185   : > { %8833 = vmatmul.mubr.msk.bf16.vlgmr.msra.gmra.mrb[0].mxu0 %vm366_vm2, %v1242_v20  ;;  %v1620_v20 = vpack.c.bf16 %v7968_v19, %v7967_v18 }
 0x186   : > { %8869 = vmatpush3.bf16.msra.mxu0 %v1461_v21  ;;  %8836 = vmatprep.mubr.msk.bf16.mxu0 %vm12982_vm1, %v10650_v1  ;;  %v7969_v21 = vld [vmem:[%s10762_s21 + $0x85] ss:$2 sm:$0xff] }
 0x187   : > { %8906 = vmatprep.subr.bf16.mxu0 %v10650_v1  ;;  %v1621_v23 = vpack.c.bf16 %v7970_v22, %v7969_v21 }
 0x18d   : > { %8837 = vmatmul.mubr.msk.bf16.gmra.mrb[4].mxu0 %vm366_vm2, %v1243_v24  ;;  %v7971_v24 = vld [vmem:[%s10762_s21 + $0xa5] ss:$2 sm:$0xff] }
 0x18e   : > { %8840 = vmatprep.mubr.msk.bf16.mxu0 %vm12982_vm1, %v10650_v1  ;;  %v1622_v26 = vpack.c.bf16 %v7972_v25, %v7971_v24 }
 0x195   : > { %8841 = vmatmul.mubr.msk.bf16.gmra.mrb[8].mxu0 %vm366_vm2, %v1244_v27  ;;  %v7973_v27 = vld [vmem:[%s10762_s21 + $0xc5] ss:$2 sm:$0xff] }
 0x196   : > { %8844 = vmatprep.mubr.msk.bf16.mxu0 %vm12982_vm1, %v10650_v1  ;;  %v1623_v29 = vpack.c.bf16 %v7974_v28, %v7973_v27 }
 0x19d   : > { %8845 = vmatmul.mubr.msk.bf16.gmra.mrb[12].mxu0 %vm366_vm2, %v1245_v30  ;;  %v7975_v30 = vld [vmem:[%s10762_s21 + $0xe5] ss:$2 sm:$0xff] }
 0x19e   : > { %8848 = vmatprep.mubr.msk.bf16.mxu0 %vm12982_vm1, %v10650_v1  ;;  %v1624_v32 = vpack.c.bf16 %v7976_v31, %v7975_v30 }
 0x1a5   : > { %8849 = vmatmul.mubr.msk.bf16.gmra.mrb[16].mxu0 %vm366_vm2, %v1246_v33  ;;  %v7977_v33 = vld [vmem:[%s10762_s21 + $0x105] ss:$2 sm:$0xff] }
 0x1a6   : > { %8852 = vmatprep.mubr.msk.bf16.mxu0 %vm12982_vm1, %v10650_v1  ;;  %v1625_v35 = vpack.c.bf16 %v7978_v34, %v7977_v33 }
 0x1ad   : > { %8853 = vmatmul.mubr.msk.bf16.gmra.mrb[20].mxu0 %vm366_vm2, %v1247_v36  ;;  %v7979_v36 = vld [vmem:[%s10762_s21 + $0x125] ss:$2 sm:$0x3f] }
 0x1ae   : > { %8856 = vmatprep.mubr.msk.bf16.mxu0 %vm12982_vm1, %v10650_v1  ;;  %v1626_v37 = vpack.c.bf16 %v7979_v36, %v7979_v36 }
 0x1b5   : > { %8857 = vmatmul.mubr.msk.bf16.gmra.mrb[24].mxu0 %vm366_vm2, %v1248_v39  ;;  %v7991_v39 = vld [vmem:[%s10762_s21 + $0x36] ss:$2 sm:$0xff] }
 0x1b6   : > { %8860 = vmatprep.mubr.msk.bf16.mxu0 %vm12982_vm1, %v10650_v1  ;;  %v1814_v40 = vpack.c.bf16 %v7991_v39, %v7990_v38 }
 0x1bd   : > { %8861 = vmatmul.mubr.msk.bf16.gmra.mrb[28].mxu0 %vm366_vm2, %v1249_v42  ;;  %v7993_v42 = vld [vmem:[%s10762_s21 + $0x56] ss:$2 sm:$0xff] }
 0x1be   : > { %8864 = vmatprep.mubr.msk.bf16.mxu0 %vm12982_vm1, %v10650_v1  ;;  %v1815_v43 = vpack.c.bf16 %v7993_v42, %v7992_v41 }
 0x1c5   : > { %8865 = vmatmul.mubr.msk.bf16.gmra.mrb[32].mxu0 %vm366_vm2, %v1250_v44  ;;  %v7994_v44 = vld [vmem:[%s10762_s21 + $0x66] ss:$2 sm:$0xff] }
 0x1c6   : > { %8870 = vmatprep.mubr.msk.bf16.mxu0 %vm12982_vm1, %v10650_v1  ;;  %v1816_v46 = vpack.c.bf16 %v7995_v45, %v7994_v44 }
 0x1cd   : > { %8871 = vmatmul.mubr.msk.bf16.vlgmr.msra.gmra.mrb[0].mxu0 %vm366_vm2, %v1422_v48  ;;  %v7997_v48 = vld [vmem:[%s10762_s21 + $0x96] ss:$2 sm:$0xff]  ;;  %s269_s21 = sand.u32 1, %s10640_s25  }
 0x1ce   : > { %8907 = vmatpush3.bf16.msra.mxu0 %v1657_v49  ;;  %8874 = vmatprep.mubr.msk.bf16.mxu0 %vm12982_vm1, %v10650_v1  ;;  %v1817_v49 = vpack.c.bf16 %v7997_v48, %v7996_v47  ;;  %s7774_s23 = sshll.u32 %s269_s21, 4  ;;  %s12933_s28 = scalar_lea.sflag [#allocation8], %s269_s21 }
 0x1cf   : > { %8944 = vmatprep.subr.bf16.mxu0 %v10650_v1  ;;  %s271_s8 = scalar_lea.vmem [#allocation7], %s7774_s23 }
 0x1d0   : > { %s7708_s9 = sshll.u32 %s271_s8, 4  ;;  %s12925_s9 = int_to_ptr.vmem [resolvable:$true] %s7708_s9 }
 0x1d1   : > { %s10586_s16 = scalar_lea.vmem %s12925_s9, 256  ;;  %p10593_p0 = scmp.lt.s32.totalorder %s12925_s9, %s10591_s18 }
 0x1d2   : > { %p10587_p11 = scmp.ne.s32.totalorder %s12925_s9, %s10586_s16  ;;  %p10594_p1 = scmp.lt.s32.totalorder %s10592_s19, %s10586_s16 }
 0x1d4   : > { %p10588_p12 = pnand %p10587_p11, %p10733_p5  ;;  %p10595_p2 = por %p10594_p1, %p10593_p0 }
 0x1d5   : > { %8875 = vmatmul.mubr.msk.bf16.gmra.mrb[4].mxu0 %vm366_vm2, %v1423_v52  ;;  %v1818_v52 = vpack.c.bf16 %v7999_v51, %v7998_v50 }
 0x1d6   : > { %8878 = vmatprep.mubr.msk.bf16.mxu0 %vm12982_vm1, %v10650_v1  ;;  %p10589_p13 = pneg %p10588_p12 }
 0x1d8   : > { %p10596_p3 = pnand %p10595_p2, %p10589_p13 }
 0x1dd   : > { %8879 = vmatmul.mubr.msk.bf16.gmra.mrb[8].mxu0 %vm366_vm2, %v1424_v55  ;;  %v1819_v55 = vpack.c.bf16 %v8001_v54, %v8000_v53 }
 0x1de   : > { %8882 = vmatprep.mubr.msk.bf16.mxu0 %vm12982_vm1, %v10650_v1 }
 0x1e5   : > { %8883 = vmatmul.mubr.msk.bf16.gmra.mrb[12].mxu0 %vm366_vm2, %v1425_v58  ;;  %v1820_v58 = vpack.c.bf16 %v8003_v57, %v8002_v56 }
 0x1e6   : > { %8886 = vmatprep.mubr.msk.bf16.mxu0 %vm12982_vm1, %v10650_v1 }
 0x1ed   : > { %8887 = vmatmul.mubr.msk.bf16.gmra.mrb[16].mxu0 %vm366_vm2, %v1426_v61  ;;  %v1821_v61 = vpack.c.bf16 %v8005_v60, %v8004_v59 }
 0x1ee   : > { %8890 = vmatprep.mubr.msk.bf16.mxu0 %vm12982_vm1, %v10650_v1 }
 0x1f5   : > { %8891 = vmatmul.mubr.msk.bf16.gmra.mrb[20].mxu0 %vm366_vm2, %v1427_v0  ;;  %v1976_v0 = vlaneseq }
 0x1f6   : > { %8894 = vmatprep.mubr.msk.bf16.mxu0 %vm12982_vm1, %v10650_v1 }
 0x1f7   : > { %v11197_v2 = vshrl.u32 %v1976_v0, 7 }
 0x1f9   : > { %v11200_v3 = vadd.s32 8, %v11197_v2  ;;  %v11211_v8 = vadd.s32 16, %v11197_v2  ;;  %v11227_v16 = vadd.s32 32, %v11197_v2  ;;  %v11230_v19 = vadd.s32 40, %v11197_v2 }
 0x1fa   : > { %v11239_v24 = vadd.s32 48, %v11197_v2  ;;  %v11276_v48 = vadd.s32 64, %v11197_v2  ;;  %v11279_v50 = vadd.s32 72, %v11197_v2 }
 0x1fb   : > { %v11218_v11 = vmul.u32.u64.low 3817748708, %v11211_v8  ;;  %v11219_v12 = vmul.u32.u64.high 3817748708, %v11211_v8, %v11218_v11  ;;  %v11244_v27 = vmul.u32.u64.low 3817748708, %v11230_v19  ;;  %v11245_v28 = vmul.u32.u64.high 3817748708, %v11230_v19, %v11244_v27 }
 0x1fc   : > { %v11248_v30 = vmul.u32.u64.low 3817748708, %v11239_v24  ;;  %v11249_v31 = vmul.u32.u64.high 3817748708, %v11239_v24, %v11248_v30 }
 0x1fd   : > { %8895 = vmatmul.mubr.msk.bf16.gmra.mrb[24].mxu0 %vm366_vm2, %v1428_v4  ;;  %v11203_v4 = vmul.u32.u64.low 3817748708, %v11197_v2  ;;  %v11204_v5 = vmul.u32.u64.high 3817748708, %v11197_v2, %v11203_v4  ;;  %v2055_v41 = vshrl.u32 %v11245_v28, 4 }
 0x1fe   : > { %8898 = vmatprep.mubr.msk.bf16.mxu0 %vm12982_vm1, %v10650_v1  ;;  %v2066_v47 = vshrl.u32 %v11249_v31, 4 }
 0x1ff   : > { %v2000_v10 = vshrl.u32 %v11204_v5, 4  ;;  %v11311_v4 = vmul.u32.u64.low 3817748708, %v11279_v50  ;;  %v11312_v5 = vmul.u32.u64.high 3817748708, %v11279_v50, %v11311_v4 }
 0x200   : > { %v2067_v59 = vmul.u32 18, %v2066_v47 }
 0x205   : > { %8899 = vmatmul.mubr.msk.bf16.gmra.mrb[28].mxu0 %vm366_vm2, %v1429_v7  ;;  %v11207_v6 = vmul.u32.u64.low 3817748708, %v11200_v3  ;;  %v11208_v7 = vmul.u32.u64.high 3817748708, %v11200_v3, %v11207_v6 }
 0x206   : > { %8902 = vmatprep.mubr.msk.bf16.mxu0 %vm12982_vm1, %v10650_v1 }
 0x20d   : > { %8903 = vmatmul.mubr.msk.bf16.gmra.mrb[32].mxu0 %vm366_vm2, %v1430_v9  ;;  %v11214_v9 = vadd.s32 24, %v11197_v2 }
 0x20e   : > { %8908 = vmatprep.mubr.msk.bf16.mxu0 %vm12982_vm1, %v10650_v1 }
 0x215   : > { %8909 = vmatmul.mubr.msk.bf16.vlgmr.msra.gmra.mrb[0].mxu0 %vm366_vm2, %v1618_v13  ;;  %v2011_v13 = vshrl.u32 %v11208_v7, 4 }
 0x216   : > { %8945 = vmatpush3.bf16.msra.mxu0 %v1853_v14  ;;  %8912 = vmatprep.mubr.msk.bf16.mxu0 %vm12982_vm1, %v10650_v1  ;;  %v11223_v14 = vmul.u32.u64.low 3817748708, %v11214_v9  ;;  %v11224_v15 = vmul.u32.u64.high 3817748708, %v11214_v9, %v11223_v14 }
 0x217   : > { %9378 = vmatprep.subr.bf16.mxu0 %v10650_v1  ;;  %v2012_v18 = vmul.u32 18, %v2011_v13 }
 0x219   : > { %v2013_v25 = vsub.s32 %v11200_v3, %v2012_v18  ;;  %v11330_v18 = vsub.s32 %v11239_v24, %v2067_v59 }
 0x21b   : > { %vm2182_vm5 = vcmp.ne.s32.totalorder %v2013_v25, 0  ;;  %vm2199_vm6 = vcmp.lt.s32.totalorder %v2013_v25, 0  ;;  %v2233_v36 = vadd.s32 18, %v2013_v25 }
 0x21c   : > { %vm11259_vm8 = vmand %vm2199_vm6, %vm2182_vm5 }
 0x21d   : > { %8913 = vmatmul.mubr.msk.bf16.gmra.mrb[4].mxu0 %vm366_vm2, %v1619_v17  ;;  %v2001_v17 = vmul.u32 18, %v2000_v10  ;;  %v2250_v44 = vsel %vm11259_vm8, %v2233_v36, %v2013_v25  ;;  %v11344_v25 = vadd.s32 88, %v11197_v2 }
 0x21e   : > { %8916 = vmatprep.mubr.msk.bf16.mxu0 %vm12982_vm1, %v10650_v1  ;;  %vm11294_vm0 = vcmp.lt.s32.totalorder %v2250_v44, 8 }
 0x21f   : > { %v2002_v22 = vsub.s32 %v11197_v2, %v2001_v17 }
 0x221   : > { %vm2181_vm3 = vcmp.ne.s32.totalorder %v2002_v22, 0  ;;  %vm2198_vm4 = vcmp.lt.s32.totalorder %v2002_v22, 0 }
 0x222   : > { %vm11252_vm7 = vmand %vm2198_vm4, %vm2181_vm3 }
 0x225   : > { %8917 = vmatmul.mubr.msk.bf16.gmra.mrb[8].mxu0 %vm366_vm2, %v1620_v20  ;;  %v11233_v20 = vmul.u32.u64.low 3817748708, %v11227_v16  ;;  %v11234_v21 = vmul.u32.u64.high 3817748708, %v11227_v16, %v11233_v20 }
 0x226   : > { %8920 = vmatprep.mubr.msk.bf16.mxu0 %vm12982_vm1, %v10650_v1 }
 0x227   : > { %v2044_v33 = vshrl.u32 %v11234_v21, 4 }
 0x229   : > { %v2045_v42 = vmul.u32 18, %v2044_v33 }
 0x22d   : > { %8921 = vmatmul.mubr.msk.bf16.gmra.mrb[12].mxu0 %vm366_vm2, %v1621_v23  ;;  %v2022_v23 = vshrl.u32 %v11219_v12, 4 }
 0x22e   : > { %8924 = vmatprep.mubr.msk.bf16.mxu0 %vm12982_vm1, %v10650_v1 }
 0x235   : > { %8925 = vmatmul.mubr.msk.bf16.gmra.mrb[16].mxu0 %vm366_vm2, %v1622_v26  ;;  %v2033_v26 = vshrl.u32 %v11224_v15, 4 }
 0x236   : > { %8928 = vmatprep.mubr.msk.bf16.mxu0 %vm12982_vm1, %v10650_v1 }
 0x23d   : > { %8929 = vmatmul.mubr.msk.bf16.gmra.mrb[20].mxu0 %vm366_vm2, %v1623_v29  ;;  %v2023_v29 = vmul.u32 18, %v2022_v23 }
 0x23e   : > { %8932 = vmatprep.mubr.msk.bf16.mxu0 %vm12982_vm1, %v10650_v1 }
 0x23f   : > { %v2024_v39 = vsub.s32 %v11211_v8, %v2023_v29 }
 0x241   : > { %vm2183_vm9 = vcmp.ne.s32.totalorder %v2024_v39, 0  ;;  %vm2200_vm10 = vcmp.lt.s32.totalorder %v2024_v39, 0  ;;  %v2234_v54 = vadd.s32 18, %v2024_v39 }
 0x242   : > { %vm11288_vm15 = vmand %vm2200_vm10, %vm2183_vm9 }
 0x243   : > { %v2251_v11 = vsel %vm11288_vm15, %v2234_v54, %v2024_v39  ;;  %v11386_v54 = vadd.s32 96, %v11197_v2 }
 0x244   : > { %vm11339_vm8 = vcmp.lt.s32.totalorder %v2251_v11, 8 }
 0x245   : > { %8933 = vmatmul.mubr.msk.bf16.gmra.mrb[24].mxu0 %vm366_vm2, %v1624_v32  ;;  %v2034_v32 = vmul.u32 18, %v2033_v26 }
 0x246   : > { %8936 = vmatprep.mubr.msk.bf16.mxu0 %vm12982_vm1, %v10650_v1 }
 0x24d   : > { %8937 = vmatmul.mubr.msk.bf16.gmra.mrb[28].mxu0 %vm366_vm2, %v1625_v35  ;;  %v2232_v35 = vadd.s32 18, %v2002_v22 }
 0x24e   : > { %8940 = vmatprep.mubr.msk.bf16.mxu0 %vm12982_vm1, %v10650_v1 }
 0x255   : > { %8941 = vmatmul.mubr.msk.bf16.gmra.mrb[32].mxu0 %vm366_vm2, %v1626_v37  ;;  %v11257_v37 = vadd.s32 56, %v11197_v2 }
 0x256   : > { %8946 = vmatprep.mubr.msk.bf16.mxu0 %vm12982_vm1, %v10650_v1 }
 0x25d   : > { %8947 = vmatmul.mubr.msk.bf16.vlgmr.msra.gmra.mrb[0].mxu0 %vm366_vm2, %v1814_v40  ;;  %v2035_v40 = vsub.s32 %v11214_v9, %v2034_v32 }
 0x25e   : > { %8950 = vmatprep.mubr.msk.bf16.mxu0 %vm12982_vm1, %v10650_v1 }
 0x25f   : > { %vm2184_vm11 = vcmp.ne.s32.totalorder %v2035_v40, 0  ;;  %vm2201_vm12 = vcmp.lt.s32.totalorder %v2035_v40, 0 }
 0x265   : > { %8951 = vmatmul.mubr.msk.bf16.gmra.mrb[4].mxu0 %vm366_vm2, %v1815_v43  ;;  %v2249_v43 = vsel %vm11252_vm7, %v2232_v35, %v2002_v22  ;;  %v11337_v22 = vadd.s32 80, %v11197_v2  ;;  %v2099_v35 = vshrl.u32 %v11312_v5, 4 }
 0x266   : > { %8954 = vmatprep.mubr.msk.bf16.mxu0 %vm12982_vm1, %v10650_v1  ;;  %vm11281_vm13 = vcmp.lt.s32.totalorder %v2249_v43, 8 }
 0x267   : > { %v11366_v36 = vmul.u32.u64.low 3817748708, %v11337_v22  ;;  %v11367_v38 = vmul.u32.u64.high 3817748708, %v11337_v22, %v11366_v36  ;;  %v2100_v59 = vmul.u32 18, %v2099_v35 }
 0x26d   : > { %8955 = vmatmul.mubr.msk.bf16.gmra.mrb[8].mxu0 %vm366_vm2, %v1816_v46  ;;  %v11271_v45 = vmul.u32.u64.low 3817748708, %v11257_v37  ;;  %v11272_v46 = vmul.u32.u64.high 3817748708, %v11257_v37, %v11271_v45 }
 0x26e   : > { %8958 = vmatprep.mubr.msk.bf16.mxu0 %vm12982_vm1, %v10650_v1 }
 0x26f   : > { %v2077_v13 = vshrl.u32 %v11272_v46, 4 }
 0x271   : > { %v2078_v27 = vmul.u32 18, %v2077_v13  ;;  %v2101_v13 = vsub.s32 %v11279_v50, %v2100_v59 }
 0x273   : > { %v2079_v47 = vsub.s32 %v11257_v37, %v2078_v27 }
 0x275   : > { %8959 = vmatmul.mubr.msk.bf16.gmra.mrb[12].mxu0 %vm366_vm2, %v1817_v49  ;;  %v2056_v49 = vmul.u32 18, %v2055_v41 }
 0x276   : > { %8962 = vmatprep.mubr.msk.bf16.mxu0 %vm12982_vm1, %v10650_v1 }
 0x277   : > { %v2057_v0 = vsub.s32 %v11230_v19, %v2056_v49 }
 0x279   : > { %vm2186_vm6 = vcmp.ne.s32.totalorder %v2057_v0, 0  ;;  %vm2203_vm7 = vcmp.lt.s32.totalorder %v2057_v0, 0  ;;  %v2237_v26 = vadd.s32 18, %v2057_v0 }
 0x27a   : > { %vm11355_vm10 = vmand %vm2203_vm7, %vm2186_vm6 }
 0x27b   : > { %v2254_v46 = vsel %vm11355_vm10, %v2237_v26, %v2057_v0 }
 0x27d   : > { %8963 = vmatmul.mubr.msk.bf16.gmra.mrb[16].mxu0 %vm366_vm2, %v1818_v52  ;;  %v11286_v52 = vsub.s32 %v11227_v16, %v2045_v42  ;;  %v11374_v41 = vmul.u32.u64.low 3817748708, %v11344_v25  ;;  %v11375_v42 = vmul.u32.u64.high 3817748708, %v11344_v25, %v11374_v41 }
 0x27e   : > { %8966 = vmatprep.mubr.msk.bf16.mxu0 %vm12982_vm1, %v10650_v1 }
 0x27f   : > { %vm2185_vm3 = vcmp.ne.s32.totalorder %v11286_v52, 0  ;;  %vm2202_vm4 = vcmp.lt.s32.totalorder %v11286_v52, 0  ;;  %v2236_v17 = vadd.s32 18, %v11286_v52 }
 0x280   : > { %vm11332_vm5 = vmand %vm2202_vm4, %vm2185_vm3  ;;  %vm11401_vm3 = vcmp.lt.s32.totalorder %v2254_v46, 8  ;;  %vm2188_vm4 = vcmp.ne.s32.totalorder %v2079_v47, 0  ;;  %v2241_v46 = vadd.s32 18, %v2101_v13 }
 0x281   : > { %v2253_v30 = vsel %vm11332_vm5, %v2236_v17, %v11286_v52  ;;  %v2238_v52 = vadd.s32 18, %v11330_v18  ;;  %vm2205_vm5 = vcmp.lt.s32.totalorder %v2079_v47, 0 }
 0x282   : > { %vm11423_vm6 = vmand %vm2205_vm5, %vm2188_vm4 }
 0x285   : > { %8967 = vmatmul.mubr.msk.bf16.gmra.mrb[20].mxu0 %vm366_vm2, %v1819_v55  ;;  %v2235_v55 = vadd.s32 18, %v2035_v40 }
 0x286   : > { %8970 = vmatprep.mubr.msk.bf16.mxu0 %vm12982_vm1, %v10650_v1 }
 0x28d   : > { %8971 = vmatmul.mubr.msk.bf16.gmra.mrb[24].mxu0 %vm366_vm2, %v1820_v58 }
 0x28e   : > { %8974 = vmatprep.mubr.msk.bf16.mxu0 %vm12982_vm1, %v10650_v1 }
 0x295   : > { %8975 = vmatmul.mubr.msk.bf16.gmra.mrb[28].mxu0 %vm366_vm2, %v1821_v61  ;;  %v11303_v60 = vmul.u32.u64.low 3817748708, %v11276_v48  ;;  %v11304_v61 = vmul.u32.u64.high 3817748708, %v11276_v48, %v11303_v60 }
 0x296   : > { %8978 = vmatprep.mubr.msk.bf16.mxu0 %vm12982_vm1, %v10650_v1 }
 0x297   : > { %v2088_v32 = vshrl.u32 %v11304_v61, 4  ;;  %v11399_v61 = vadd.s32 104, %v11197_v2 }
 0x299   : > { %v2089_v53 = vmul.u32 18, %v2088_v32  ;;  %v11429_v21 = vmul.u32.u64.low 3817748708, %v11399_v61  ;;  %v11430_v26 = vmul.u32.u64.high 3817748708, %v11399_v61, %v11429_v21 }
 0x29b   : > { %v2090_v4 = vsub.s32 %v11276_v48, %v2089_v53 }
 0x29d   : > { %8979 = vmatmul.mubr.msk.bf16.gmra.mrb[32].mxu0 %vm366_vm2, %v1822_v63  ;;  %vm11298_vm2 = vmand %vm2201_vm12, %vm2184_vm11  ;;  %vm2187_vm11 = vcmp.ne.s32.totalorder %v11330_v18, 0  ;;  %vm2204_vm12 = vcmp.lt.s32.totalorder %v11330_v18, 0  ;;  %vm2189_vm10 = vcmp.ne.s32.totalorder %v2090_v4, 0 }
 0x29e   : > { %9380 = vmatprep.mubr.msk.bf16.mxu0 %vm12982_vm1, %v10650_v1  ;;  %v2252_v12 = vsel %vm11298_vm2, %v2235_v55, %v2035_v40  ;;  %vm11390_vm15 = vmand %vm2204_vm12, %vm2187_vm11  ;;  %vm11394_vm2 = vcmp.lt.s32.totalorder %v2253_v30, 8  ;;  %vm2206_vm11 = vcmp.lt.s32.totalorder %v2090_v4, 0  ;;  %vm2190_vm12 = vcmp.ne.s32.totalorder %v2101_v13, 0 }
 0x29f   : > { %vm11348_vm9 = vcmp.lt.s32.totalorder %v2252_v12, 8  ;;  %v2255_v0 = vsel %vm11390_vm15, %v2238_v52, %v11330_v18  ;;  %v2239_v12 = vadd.s32 18, %v2079_v47  ;;  %vm2207_vm15 = vcmp.lt.s32.totalorder %v2101_v13, 0  ;;  %vm11445_vm4 = vmand %vm2206_vm11, %vm2189_vm10 }
 0x2a0   : > { %vm11436_vm7 = vcmp.lt.s32.totalorder %v2255_v0, 8 }
 0x2a1   : > { %v2256_v35 = vsel %vm11423_vm6, %v2239_v12, %v2079_v47  ;;  %vm11462_vm6 = vmand %vm2207_vm15, %vm2190_vm12 }
 0x2a2   : > { %vm11454_vm5 = vcmp.lt.s32.totalorder %v2256_v35, 8  ;;  %v2258_v21 = vsel %vm11462_vm6, %v2241_v46, %v2101_v13 }
 0x2a3   : > { %vm11497_vm1 = vcmp.lt.s32.totalorder %v2258_v21, 8 }
 0x330   : > { %v11292_v56 = vpop.f32.mrb[0].mxu0 }
 0x331   : > { %v2317_v62 = vsel %vm11281_vm13, %v11292_v56, 0.0  ;;  %v8948_v63 = vpop.f32.mrb[1].mxu0 }
 0x332   : > { %v11314_v6 = vpop.f32.mrb[2].mxu0  ;;  %v2335_v14 = vsel %vm12984_vm14, %v2317_v62, 0.0 }
 0x333   : > { %v2318_v7 = vsel %vm11294_vm0, %v11314_v6, 0.0  ;;  %v8949_v10 = vpop.f32.mrb[3].mxu0 }
 0x334   : > { %v2336_v15 = vsel %vm12984_vm14, %v2318_v7, 0.0  ;;  %v11412_v5 = vmul.u32.u64.low 3817748708, %v11386_v54  ;;  %v11413_v7 = vmul.u32.u64.high 3817748708, %v11386_v54, %v11412_v5 }
 0x335   : > { %v2337_v20 = vadd.f32 %v2336_v15, %v2335_v14  ;;  %v2110_v14 = vshrl.u32 %v11367_v38, 4  ;;  %v11443_v38 = vadd.s32 112, %v11197_v2 }
 0x336   : > { %v2132_v47 = vshrl.u32 %v11413_v7, 4 }
 0x337   : > { %v2111_v36 = vmul.u32 18, %v2110_v14  ;;  %v11468_v58 = vmul.u32.u64.low 3817748708, %v11443_v38  ;;  %v11469_v59 = vmul.u32.u64.high 3817748708, %v11443_v38, %v11468_v58 }
 0x338   : > { %v11346_v28 = vpop.f32.mrb[4].mxu0 }
 0x339   : > { %v2319_v33 = vsel %vm11339_vm8, %v11346_v28, 0.0  ;;  %v8952_v34 = vpop.f32.mrb[5].mxu0  ;;  %v2154_v46 = vshrl.u32 %v11469_v59, 4 }
 0x33a   : > { %v2338_v39 = vsel %vm12984_vm14, %v2319_v33, 0.0  ;;  %v11370_v40 = vpop.f32.mrb[6].mxu0  ;;  %v13055_v33 = vmov 0 }
 0x33b   : > { %v2339_v43 = vadd.f32 %v2338_v39, %v2337_v20  ;;  %v2320_v44 = vsel %vm11348_vm9, %v11370_v40, 0.0  ;;  %v8953_v45 = vpop.f32.mrb[7].mxu0  ;;  %v2121_v20 = vshrl.u32 %v11375_v42, 4  ;;  %v13056_v33 = vsel %vm11436_vm7, 4294967295, %v13055_v33 }
 0x33c   : > { %v2340_v49 = vsel %vm12984_vm14, %v2320_v44, 0.0  ;;  %v2240_v39 = vadd.s32 18, %v2090_v4  ;;  %v13059_v45 = vmov 0 }
 0x33d   : > { %v2341_v55 = vadd.f32 %v2340_v49, %v2339_v43  ;;  %v2122_v41 = vmul.u32 18, %v2121_v20  ;;  %v11450_v43 = vadd.s32 120, %v11197_v2  ;;  %v13060_v45 = vsel %vm11454_vm5, 4294967295, %v13059_v45 }
 0x33e   : > { %v2257_v7 = vsel %vm11445_vm4, %v2240_v39, %v2090_v4  ;;  %v2133_v4 = vmul.u32 18, %v2132_v47 }
 0x33f   : > { %vm11491_vm12 = vcmp.lt.s32.totalorder %v2257_v7, 8 }
 0x340   : > { %v11405_v63 = vpop.f32.mrb[8].mxu0 }
 0x341   : > { %v2321_v10 = vsel %vm11394_vm2, %v11405_v63, 0.0  ;;  %v8956_v11 = vpop.f32.mrb[9].mxu0 }
 0x342   : > { %v2342_v15 = vsel %vm12984_vm14, %v2321_v10, 0.0  ;;  %v11421_v17 = vpop.f32.mrb[10].mxu0  ;;  %v2123_v10 = vsub.s32 %v11344_v25, %v2122_v41  ;;  %v2143_v11 = vshrl.u32 %v11430_v26, 4  ;;  %v11489_v25 = vadd.s32 128, %v11197_v2 }
 0x343   : > { %v2343_v27 = vadd.f32 %v2342_v15, %v2341_v55  ;;  %v2322_v30 = vsel %vm11401_vm3, %v11421_v17, 0.0  ;;  %v8957_v31 = vpop.f32.mrb[11].mxu0  ;;  %v2112_v55 = vsub.s32 %v11337_v22, %v2111_v36  ;;  %v13063_v26 = vmov 0 }
 0x344   : > { %v2344_v32 = vsel %vm12984_vm14, %v2322_v30, 0.0  ;;  %v11482_v15 = vmul.u32.u64.low 3817748708, %v11450_v43  ;;  %v11483_v18 = vmul.u32.u64.high 3817748708, %v11450_v43, %v11482_v15  ;;  %v13064_v26 = vsel %vm11491_vm12, 4294967295, %v13063_v26 }
 0x345   : > { %v2345_v34 = vadd.f32 %v2344_v32, %v2343_v27  ;;  %vm2191_vm10 = vcmp.ne.s32.totalorder %v2112_v55, 0  ;;  %vm2208_vm11 = vcmp.lt.s32.totalorder %v2112_v55, 0  ;;  %vm2192_vm15 = vcmp.ne.s32.totalorder %v2123_v10, 0 }
 0x346   : > { %vm2209_vm4 = vcmp.lt.s32.totalorder %v2123_v10, 0  ;;  %v2144_v30 = vmul.u32 18, %v2143_v11  ;;  %v2242_v31 = vadd.s32 18, %v2112_v55  ;;  %vm11501_vm6 = vmand %vm2208_vm11, %vm2191_vm10  ;;  %v2243_v35 = vadd.s32 18, %v2123_v10 }
 0x347   : > { %v2134_v36 = vsub.s32 %v11386_v54, %v2133_v4  ;;  %vm13071_vm10 = vcmask 64512   ;;  %v2165_v59 = vshrl.u32 %v11483_v18, 4  ;;  %v2155_v15 = vmul.u32 18, %v2154_v46 }
 0x348   : > { %v11452_v44 = vpop.f32.mrb[12].mxu0  ;;  %v2145_v54 = vsub.s32 %v11399_v61, %v2144_v30  ;;  %v2259_v11 = vsel %vm11501_vm6, %v2242_v31, %v2112_v55  ;;  %vm13072_vm11 = vmmov %vm13071_vm10  ;;  %v8017_v61 = vld [vmem:[%s12976_s2 + $0x4] sm:$0xf]  ;;  %v13075_v4 = vmov 0 }
 0x349   : > { %v2323_v49 = vsel %vm11436_vm7, %v11452_v44, 0.0  ;;  %v8960_v52 = vpop.f32.mrb[13].mxu0  ;;  %v2244_v55 = vadd.s32 18, %v2134_v36  ;;  %v2166_v18 = vmul.u32 18, %v2165_v59 }
 0x34a   : > { %v2346_v0 = vsel %vm12984_vm14, %v2323_v49, 0.0  ;;  %v11472_v5 = vpop.f32.mrb[14].mxu0  ;;  %v11515_v47 = vmul.u32.u64.low 3817748708, %v11489_v25  ;;  %v11516_v49 = vmul.u32.u64.high 3817748708, %v11489_v25, %v11515_v47  ;;  %vm2194_vm6 = vcmp.ne.s32.totalorder %v2145_v54, 0 }
 0x34b   : > { %v2347_v12 = vadd.f32 %v2346_v0, %v2345_v34  ;;  %v2324_v22 = vsel %vm11454_vm5, %v11472_v5, 0.0  ;;  %v8961_v14 = vpop.f32.mrb[15].mxu0  ;;  %v13065_v34 = vmov 0  ;;  %v2245_v30 = vadd.s32 18, %v2145_v54 }
 0x34c   : > { %v2348_v20 = vsel %vm12984_vm14, %v2324_v22, 0.0  ;;  %v13066_v34 = vsel %vm11497_vm1, 4294967295, %v13065_v34  ;;  %vm11509_vm14 = vmand %vm2209_vm4, %vm2192_vm15  ;;  %vm2193_vm15 = vcmp.ne.s32.totalorder %v2134_v36, 0  ;;  %vm2210_vm4 = vcmp.lt.s32.totalorder %v2134_v36, 0 }
 0x34d   : > { %v2349_v27 = vadd.f32 %v2348_v20, %v2347_v12  ;;  %v2260_v22 = vsel %vm11509_vm14, %v2243_v35, %v2123_v10  ;;  %v13073_v20 = vmov 0 }
 0x34e   : > { %vm11541_vm14 = vcmp.lt.s32.totalorder %v2260_v22, 8 }
 0x34f   : > { %v13076_v4 = vsel %vm11541_vm14, 4294967295, %v13075_v4 }
 0x350   : > { %v11495_v32 = vpop.f32.mrb[16].mxu0 }
 0x351   : > { %v2325_v39 = vsel %vm11491_vm12, %v11495_v32, 0.0  ;;  %v8964_v41 = vpop.f32.mrb[17].mxu0  ;;  %vm12988_vm12 = vcmask 1043456  }
 0x352   : > { %v2350_v52 = vsel %vm13071_vm10, %v2325_v39, 0.0  ;;  %v11519_v53 = vpop.f32.mrb[18].mxu0  ;;  %vm11534_vm10 = vcmp.lt.s32.totalorder %v2259_v11, 8  ;;  %v2598_v21 = vsel %vm12988_vm12, %v8017_v61, 0  ;;  %v2156_v39 = vsub.s32 %v11443_v38, %v2155_v15 }
 0x353   : > { %v2351_v58 = vadd.f32 %v2350_v52, %v2349_v27  ;;  %v2326_v0 = vsel %vm11497_vm1, %v11519_v53, 0.0  ;;  %v8965_v7 = vpop.f32.mrb[19].mxu0  ;;  %v13074_v20 = vsel %vm11534_vm10, 4294967295, %v13073_v20  ;;  %vm2211_vm1 = vcmp.lt.s32.totalorder %v2145_v54, 0  ;;  %8983 = vmatpush3.bf16.msra.mxu1 %v2598_v21 }
 0x354   : > { %v2352_v12 = vsel %vm13072_vm11, %v2326_v0, 0.0  ;;  %vm11545_vm11 = vmand %vm2210_vm4, %vm2193_vm15  ;;  %v2176_v41 = vshrl.u32 %v11516_v49, 4  ;;  %9004 = vmatprep.subr.bf16.mxu1 %v10650_v1  ;;  %vm13081_vm15 = vcmask 64512   ;;  %v2167_v7 = vsub.s32 %v11450_v43, %v2166_v18 }
 0x355   : > { %v2353_v14 = vadd.f32 %v2352_v12, %v2351_v58  ;;  %vm11552_vm5 = vmand %vm2211_vm1, %vm2194_vm6  ;;  %v2261_v0 = vsel %vm11545_vm11, %v2244_v55, %v2134_v36  ;;  %vm2195_vm4 = vcmp.ne.s32.totalorder %v2156_v39, 0  ;;  %vm2212_vm6 = vcmp.lt.s32.totalorder %v2156_v39, 0 }
 0x356   : > { %vm13082_vm1 = vmmov %vm13081_vm15  ;;  %v2262_v49 = vsel %vm11552_vm5, %v2245_v30, %v2145_v54  ;;  %v2177_v59 = vmul.u32 18, %v2176_v41  ;;  %v13083_v12 = vmov 0  ;;  %v2246_v22 = vadd.s32 18, %v2156_v39 }
 0x357   : > { %vm2196_vm12 = vcmp.ne.s32.totalorder %v2167_v7, 0  ;;  %vm11575_vm11 = vcmp.lt.s32.totalorder %v2262_v49, 8  ;;  %v2247_v15 = vadd.s32 18, %v2167_v7  ;;  %vm13089_vm5 = vcmask 64512  }
 0x358   : > { %v11539_v10 = vpop.f32.mrb[20].mxu0  ;;  %v2178_v55 = vsub.s32 %v11489_v25, %v2177_v59 }
 0x359   : > { %v2327_v31 = vsel %vm11534_vm10, %v11539_v10, 0.0  ;;  %v8968_v13 = vpop.f32.mrb[21].mxu0 }
 0x35a   : > { %v2354_v42 = vsel %vm13081_vm15, %v2327_v31, 0.0  ;;  %v11560_v46 = vpop.f32.mrb[22].mxu0  ;;  %vm11571_vm15 = vcmp.lt.s32.totalorder %v2261_v0, 8 }
 0x35b   : > { %v2355_v47 = vadd.f32 %v2354_v42, %v2353_v14  ;;  %v2328_v52 = vsel %vm11541_vm14, %v11560_v46, 0.0  ;;  %v8969_v58 = vpop.f32.mrb[23].mxu0  ;;  %v13084_v12 = vsel %vm11571_vm15, 4294967295, %v13083_v12  ;;  %vm2213_vm14 = vcmp.lt.s32.totalorder %v2167_v7, 0 }
 0x35c   : > { %v2356_v38 = vsel %vm13082_vm1, %v2328_v52, 0.0  ;;  %vm11579_vm1 = vmand %vm2212_vm6, %vm2195_vm4  ;;  %vm2197_vm6 = vcmp.ne.s32.totalorder %v2178_v55, 0 }
 0x35d   : > { %v2357_v11 = vadd.f32 %v2356_v38, %v2355_v47  ;;  %vm2230_vm10 = vmand %vm2213_vm14, %vm2196_vm12  ;;  %v2263_v13 = vsel %vm11579_vm1, %v2246_v22, %v2156_v39  ;;  %v2248_v47 = vadd.s32 18, %v2178_v55 }
 0x35e   : > { %vm13090_vm4 = vmmov %vm13089_vm5  ;;  %v2264_v42 = vsel %vm2230_vm10, %v2247_v15, %v2167_v7  ;;  %vm11592_vm7 = vcmp.lt.s32.totalorder %v2263_v13, 8 }
 0x35f   : > { %vm11596_vm12 = vcmp.lt.s32.totalorder %v2264_v42, 8  ;;  %vm13095_vm1 = vmmov %vm13090_vm4 }
 0x360   : > { %v1937_v61 = vpop.f32.mrb[24].mxu0  ;;  %vm13096_vm10 = vmmov %vm13095_vm1 }
 0x361   : > { %v2329_v54 = vsel %vm11571_vm15, %v1937_v61, 0.0  ;;  %v8972_v14 = vpop.f32.mrb[25].mxu0  ;;  %vm2214_vm15 = vcmp.lt.s32.totalorder %v2178_v55, 0 }
 0x362   : > { %v2358_v18 = vsel %vm13089_vm5, %v2329_v54, 0.0  ;;  %v1940_v21 = vpop.f32.mrb[26].mxu0  ;;  %vm2231_vm14 = vmand %vm2214_vm15, %vm2197_vm6  ;;  %vm2366_vm15 = vcmask 62464  }
 0x363   : > { %v2359_v27 = vadd.f32 %v2358_v18, %v2357_v11  ;;  %v2330_v30 = vsel %vm11575_vm11, %v1940_v21, 0.0  ;;  %v8973_v31 = vpop.f32.mrb[27].mxu0  ;;  %v2265_v22 = vsel %vm2231_vm14, %v2248_v47, %v2178_v55 }
 0x364   : > { %v2360_v35 = vsel %vm13090_vm4, %v2330_v30, 0.0  ;;  %vm11606_vm5 = vcmp.lt.s32.totalorder %v2265_v22, 8  ;;  %vm13099_vm4 = vmmov %vm13095_vm1 }
 0x365   : > { %v2361_v41 = vadd.f32 %v2360_v35, %v2359_v27 }
 0x368   : > { %v1945_v52 = vpop.f32.mrb[28].mxu0 }
 0x369   : > { %v2331_v39 = vsel %vm11592_vm7, %v1945_v52, 0.0  ;;  %v8976_v0 = vpop.f32.mrb[29].mxu0 }
 0x36a   : > { %v2362_v38 = vsel %vm13095_vm1, %v2331_v39, 0.0  ;;  %v1948_v7 = vpop.f32.mrb[30].mxu0 }
 0x36b   : > { %v2363_v49 = vadd.f32 %v2362_v38, %v2361_v41  ;;  %v2332_v11 = vsel %vm11596_vm12, %v1948_v7, 0.0  ;;  %v8977_v59 = vpop.f32.mrb[31].mxu0 }
 0x36c   : > { %v2364_v43 = vsel %vm13096_vm10, %v2332_v11, 0.0 }
 0x36d   : > { %v2365_v54 = vadd.f32 %v2364_v43, %v2363_v49 }
 0x370   : > { %v1953_v15 = vpop.f32.mrb[32].mxu0 }
 0x371   : > { %v2333_v18 = vsel %vm11606_vm5, %v1953_v15, 0.0  ;;  %v8980_v27 = vpop.f32.mrb[33].mxu0 }
 0x372   : > { %v2367_v30 = vsel %vm2366_vm15, %v2333_v18, 0.0  ;;  %v1956_v31 = vpop.f32.mrb[34].mxu0 }
 0x373   : > { %v2368_v13 = vadd.f32 %v2367_v30, %v2365_v54  ;;  %v8981_v35 = vpop.f32.mrb[35].mxu0 }
 0x375   : > { %v2369_v41 = vrot.slane %v2368_v13, 4 }
 0x377   : > { %v2370_v55 = vadd.f32 %v2369_v41, %v2368_v13 }
 0x379   : > { %v2371_v42 = vrot.slane %v2370_v55, 2 }
 0x37b   : > { %v2372_v47 = vadd.f32 %v2371_v42, %v2370_v55 }
 0x37d   : > { %v2373_v39 = vrot.slane %v2372_v47, 1 }
 0x37f   : > { %v2374_v0 = vadd.f32 %v2373_v39, %v2372_v47 }
 0x381   : > { %v2375_v38 = vmul.f32 0.015625, %v2374_v0 }
 0x383   : > { %v11614_v49 = vsub.f32 %v11292_v56, %v2375_v38  ;;  %v2377_v11 = vsub.f32 %v11314_v6, %v2375_v38  ;;  %v11618_v59 = vsub.f32 %v11346_v28, %v2375_v38  ;;  %v11621_v22 = vsub.f32 %v11370_v40, %v2375_v38 }
 0x384   : > { %v11624_v43 = vsub.f32 %v11405_v63, %v2375_v38  ;;  %v11627_v54 = vsub.f32 %v11421_v17, %v2375_v38  ;;  %v11630_v18 = vsub.f32 %v11452_v44, %v2375_v38  ;;  %v11633_v56 = vsub.f32 %v11472_v5, %v2375_v38 }
 0x385   : > { %v2384_v6 = vsub.f32 %v11495_v32, %v2375_v38  ;;  %v11637_v28 = vsub.f32 %v11519_v53, %v2375_v38  ;;  %v2386_v40 = vsub.f32 %v11539_v10, %v2375_v38  ;;  %v11641_v27 = vsub.f32 %v11560_v46, %v2375_v38 }
 0x386   : > { %v11643_v63 = vsub.f32 %v1937_v61, %v2375_v38  ;;  %v11645_v17 = vsub.f32 %v1940_v21, %v2375_v38  ;;  %v11647_v30 = vsub.f32 %v1945_v52, %v2375_v38  ;;  %v11649_v44 = vsub.f32 %v1948_v7, %v2375_v38 }
 0x387   : > { %v11651_v5 = vsub.f32 %v1953_v15, %v2375_v38  ;;  %v2393_v32 = vsel %vm11281_vm13, %v11614_v49, 0.0  ;;  %v2394_v53 = vsel %vm11294_vm0, %v2377_v11, 0.0  ;;  %v2395_v10 = vsel %vm11339_vm8, %v11618_v59, 0.0  ;;  %vm13100_vm13 = vmmov %vm13095_vm1 }
 0x388   : > { %v2410_v46 = vmul.f32 %v2393_v32, %v2393_v32  ;;  %v2411_v61 = vmul.f32 %v2394_v53, %v2394_v53  ;;  %v2396_v21 = vsel %vm11348_vm9, %v11621_v22, 0.0  ;;  %v2412_v52 = vmul.f32 %v2395_v10, %v2395_v10  ;;  %vm13101_vm0 = vmmov %vm13095_vm1 }
 0x389   : > { %v2397_v7 = vsel %vm11394_vm2, %v11624_v43, 0.0  ;;  %v2413_v15 = vmul.f32 %v2396_v21, %v2396_v21  ;;  %v2398_v23 = vsel %vm11401_vm3, %v11627_v54, 0.0  ;;  %vm13102_vm8 = vnez %v13056_v33  ;;  %vm13103_vm9 = vmmov %vm13101_vm0 }
 0x38a   : > { %v2427_v51 = vsel %vm13099_vm4, %v2410_v46, 0.0  ;;  %v2428_v57 = vsel %vm13100_vm13, %v2411_v61, 0.0  ;;  %v2414_v13 = vmul.f32 %v2397_v7, %v2397_v7  ;;  %v2430_v35 = vsel %vm13101_vm0, %v2412_v52, 0.0  ;;  %vm13105_vm6 = vmmov %vm13101_vm0 }
 0x38b   : > { %v2429_v31 = vadd.f32 %v2428_v57, %v2427_v51  ;;  %v2399_v29 = vsel %vm13102_vm8, %v11630_v18, 0.0  ;;  %v2415_v60 = vmul.f32 %v2398_v23, %v2398_v23  ;;  %v2432_v55 = vsel %vm13103_vm9, %v2413_v15, 0.0  ;;  %vm13107_vm14 = vmmov %vm13101_vm0 }
 0x38c   : > { %vm13104_vm2 = vnez %v13060_v45  ;;  %v2416_v39 = vmul.f32 %v2399_v29, %v2399_v29  ;;  %v2434_v62 = vsel %vm13105_vm6, %v2414_v13, 0.0  ;;  %vm13106_vm3 = vnez %v13064_v26  ;;  %vm13109_vm10 = vmmov %vm13101_vm0 }
 0x38d   : > { %v2431_v41 = vadd.f32 %v2430_v35, %v2429_v31  ;;  %v2400_v42 = vsel %vm13104_vm2, %v11633_v56, 0.0  ;;  %v2401_v0 = vsel %vm13106_vm3, %v2384_v6, 0.0  ;;  %v2436_v33 = vsel %vm13107_vm14, %v2415_v60, 0.0  ;;  %vm13111_vm13 = vmmov %vm13101_vm0 }
 0x38e   : > { %v2417_v11 = vmul.f32 %v2400_v42, %v2400_v42  ;;  %vm13108_vm1 = vnez %v13066_v34  ;;  %v2418_v10 = vmul.f32 %v2401_v0, %v2401_v0  ;;  %v2438_v45 = vsel %vm13109_vm10, %v2416_v39, 0.0  ;;  %vm13113_vm8 = vmmov %vm13105_vm6 }
 0x38f   : > { %v2433_v47 = vadd.f32 %v2432_v55, %v2431_v41  ;;  %v2402_v32 = vsel %vm13108_vm1, %v11637_v28, 0.0  ;;  %vm13110_vm4 = vnez %v13074_v20  ;;  %vm13112_vm0 = vnez %v13076_v4  ;;  %vm13115_vm2 = vmmov %vm13105_vm6 }
 0x390   : > { %v2403_v46 = vsel %vm13110_vm4, %v2386_v40, 0.0  ;;  %v2419_v21 = vmul.f32 %v2402_v32, %v2402_v32  ;;  %v2440_v26 = vsel %vm13111_vm13, %v2417_v11, 0.0  ;;  %v2404_v6 = vsel %vm13112_vm0, %v11641_v27, 0.0  ;;  %vm13116_vm6 = vmmov %vm13115_vm2 }
 0x391   : > { %v2435_v38 = vadd.f32 %v2434_v62, %v2433_v47  ;;  %v2420_v7 = vmul.f32 %v2403_v46, %v2403_v46  ;;  %v2442_v34 = vsel %vm13113_vm8, %v2418_v10, 0.0  ;;  %vm13114_vm9 = vnez %v13084_v12  ;;  %vm13117_vm3 = vmmov %vm13115_vm2 }
 0x392   : > { %v2405_v51 = vsel %vm13114_vm9, %v11643_v63, 0.0  ;;  %v2421_v57 = vmul.f32 %v2404_v6, %v2404_v6  ;;  %v2444_v20 = vsel %vm13115_vm2, %v2419_v21, 0.0  ;;  %v2406_v40 = vsel %vm11575_vm11, %v11645_v17, 0.0  ;;  %vm13118_vm14 = vmmov %vm13115_vm2 }
 0x393   : > { %v2437_v53 = vadd.f32 %v2436_v33, %v2435_v38  ;;  %v2422_v31 = vmul.f32 %v2405_v51, %v2405_v51  ;;  %v2446_v4 = vsel %vm13116_vm6, %v2420_v7, 0.0  ;;  %v2407_v13 = vsel %vm11592_vm7, %v11647_v30, 0.0  ;;  %vm13119_vm11 = vmmov %vm13115_vm2 }
 0x394   : > { %v2423_v29 = vmul.f32 %v2406_v40, %v2406_v40  ;;  %v2448_v12 = vsel %vm13117_vm3, %v2421_v57, 0.0  ;;  %v2408_v41 = vsel %vm11596_vm12, %v11649_v44, 0.0  ;;  %v2424_v55 = vmul.f32 %v2407_v13, %v2407_v13  ;;  %vm13120_vm7 = vmmov %vm13115_vm2 }
 0x395   : > { %v2439_v61 = vadd.f32 %v2438_v45, %v2437_v53  ;;  %v2450_v36 = vsel %vm13118_vm14, %v2422_v31, 0.0  ;;  %v2409_v42 = vsel %vm11606_vm5, %v11651_v5, 0.0  ;;  %v2425_v39 = vmul.f32 %v2408_v41, %v2408_v41  ;;  %vm13121_vm1 = vmmov %vm13115_vm2 }
 0x396   : > { %v2452_v25 = vsel %vm13119_vm11, %v2423_v29, 0.0  ;;  %v2426_v0 = vmul.f32 %v2409_v42, %v2409_v42  ;;  %v2454_v38 = vsel %vm13120_vm7, %v2424_v55, 0.0  ;;  %vm2498_vm12 = vcmask 58369   ;;  %vm13122_vm7 = vmmov %vm13121_vm1 }
 0x397   : > { %v2441_v52 = vadd.f32 %v2440_v26, %v2439_v61  ;;  %v2456_v58 = vsel %vm13121_vm1, %v2425_v39, 0.0  ;;  %vm2500_vm5 = vcmask 63494   ;;  %vm2502_vm10 = vcmask 64514  }
 0x398   : > { %v2458_v32 = vsel %vm2366_vm15, %v2426_v0, 0.0  ;;  %vm2504_vm4 = vcmask 58368   ;;  %vm2506_vm13 = vcmask 60419   ;;  %vm2508_vm0 = vcmask 57344  }
 0x399   : > { %v2443_v15 = vadd.f32 %v2442_v34, %v2441_v52  ;;  %vm2514_vm8 = vcmask 64516   ;;  %vm2516_vm9 = vcmask 60416   ;;  %vm2518_vm2 = vcmask 62469  }
 0x39a   : > { %vm2520_vm6 = vcmask 59394   ;;  %vm2522_vm3 = vcmask 64518   ;;  %vm2525_vm14 = vcmask 64519   ;;  %vm2527_vm11 = vcmask 61444  }
 0x39b   : > { %v2445_v23 = vadd.f32 %v2444_v20, %v2443_v15 }
 0x39d   : > { %v2447_v35 = vadd.f32 %v2446_v4, %v2445_v23 }
 0x39f   : > { %v2449_v60 = vadd.f32 %v2448_v12, %v2447_v35 }
 0x3a1   : > { %v2451_v47 = vadd.f32 %v2450_v36, %v2449_v60 }
 0x3a3   : > { %v2453_v62 = vadd.f32 %v2452_v25, %v2451_v47 }
 0x3a5   : > { %v2455_v11 = vadd.f32 %v2454_v38, %v2453_v62 }
 0x3a7   : > { %v2457_v33 = vadd.f32 %v2456_v58, %v2455_v11 }
 0x3a9   : > { %v2459_v53 = vadd.f32 %v2458_v32, %v2457_v33 }
 0x3ab   : > { %v2460_v10 = vrot.slane %v2459_v53, 4 }
 0x3ad   : > { %v2461_v45 = vadd.f32 %v2460_v10, %v2459_v53 }
 0x3af   : > { %v2462_v46 = vrot.slane %v2461_v45, 2 }
 0x3b1   : > { %v2463_v14 = vadd.f32 %v2462_v46, %v2461_v45 }
 0x3b3   : > { %v2464_v61 = vrot.slane %v2463_v14, 1 }
 0x3b5   : > { %v2465_v21 = vadd.f32 %v2464_v61, %v2463_v14  ;;  %v8028_v14 = vld [vmem:[%s12976_s2 + $0x8] sm:$0xf] }
 0x3b7   : > { %v2466_v26 = vmul.f32 0.015625, %v2465_v21 }
 0x3b9   : > { %v2467_v6 = vadd.f32 1e-05, %v2466_v26 }
 0x3bb   : > { %10574 = vrsqrt.f32 %v2467_v6 }
 0x3c5   : > { %v10575_v52 = vpop.eup %10574 }
 0x3c6   : > { %v2469_v7 = vmul.f32 %v10575_v52, %v11614_v49  ;;  %v2470_v34 = vmul.f32 %v10575_v52, %v11618_v59  ;;  %v2471_v51 = vmul.f32 %v10575_v52, %v11621_v22  ;;  %v2472_v15 = vmul.f32 %v10575_v52, %v11624_v43 }
 0x3c7   : > { %v2473_v57 = vmul.f32 %v10575_v52, %v11627_v54  ;;  %v2474_v20 = vmul.f32 %v10575_v52, %v11630_v18  ;;  %v2475_v40 = vmul.f32 %v10575_v52, %v11633_v56  ;;  %v2476_v23 = vmul.f32 %v10575_v52, %v11637_v28 }
 0x3c8   : > { %v2477_v31 = vmul.f32 %v10575_v52, %v11641_v27  ;;  %v2478_v4 = vmul.f32 %v10575_v52, %v11643_v63  ;;  %v2479_v49 = vmul.f32 %v10575_v52, %v11645_v17  ;;  %v2480_v59 = vmul.f32 %v10575_v52, %v11647_v30 }
 0x3c9   : > { %v2481_v22 = vmul.f32 %v10575_v52, %v11649_v44  ;;  %v2482_v43 = vmul.f32 %v10575_v52, %v11651_v5  ;;  %v2483_v13 = vmax.f32 %v2469_v7, 0.0  ;;  %v2484_v54 = vmax.f32 %v2470_v34, 0.0  ;;  %v2563_v5 = vld [vmem:[%s12976_s2] sm:$0xf] }
 0x3ca   : > { %v2485_v35 = vmax.f32 %v2471_v51, 0.0  ;;  %v2486_v18 = vmax.f32 %v2472_v15, 0.0  ;;  %v2487_v29 = vmax.f32 %v2473_v57, 0.0  ;;  %v2488_v56 = vmax.f32 %v2474_v20, 0.0 }
 0x3cb   : > { %v2489_v12 = vmax.f32 %v2475_v40, 0.0  ;;  %v2490_v28 = vmax.f32 %v2476_v23, 0.0  ;;  %v2491_v41 = vmax.f32 %v2477_v31, 0.0  ;;  %v2492_v27 = vmax.f32 %v2478_v4, 0.0  ;;  %2499 = vst.msk [vmem:[#allocation2 + $0x9] sm:$0x2] %vm2498_vm12, %v2483_v13 }
 0x3cc   : > { %2501 = vst.msk [vmem:[#allocation2 + $0xd] sm:$0x40] %vm2500_vm5, %v2483_v13  ;;  %v2493_v63 = vmax.f32 %v2479_v49, 0.0  ;;  %v2494_v17 = vmax.f32 %v2480_v59, 0.0  ;;  %v2495_v30 = vmax.f32 %v2481_v22, 0.0  ;;  %v2496_v44 = vmax.f32 %v2482_v43, 0.0 }
 0x3cd   : > { %2503 = vst.msk [vmem:[#allocation2 + $0x13] sm:$0xfc] %vm2502_vm10, %v2484_v54  ;;  %2510 = vst.msk [vmem:[#allocation2 - $0x1] sm:$0xfc] %vm2502_vm10, %v2484_v54  ;;  %v8034_v59 = vld [vmem:[%s12976_s2 + $0xc] sm:$0xf] }
 0x3ce   : > { %2507 = vst.msk [vmem:[#allocation2 + $0x11] sm:$0x8] %vm2506_vm13, %v2484_v54  ;;  %2512 = vst.msk [vmem:[#allocation2 - $0x3] sm:$0x8] %vm2506_vm13, %v2484_v54 }
 0x3cf   : > { %2497 = vst.msk [vmem:[#allocation2 + $0xb] sm:$0xff] %vm13122_vm7, %v2483_v13 }
 0x3d0   : > { %2505 = vst.msk [vmem:[#allocation2 + $0x1b] sm:$0x3] %vm2504_vm4, %v2485_v35  ;;  %2511 = vst.msk [vmem:[#allocation2 + $0x7] sm:$0x3] %vm2504_vm4, %v2485_v35 }
 0x3d1   : > { %2509 = vst.msk [vmem:[#allocation2 + $0x1d] sm:$0x1] %vm2508_vm0, %v2485_v35  ;;  %2513 = vst.msk [vmem:[#allocation2 + $0x9] sm:$0x1] %vm2508_vm0, %v2485_v35 }
 0x3d2   : > { %2515 = vst.msk [vmem:[#allocation2 + $0x1b] sm:$0xf0] %vm2514_vm8, %v2486_v18  ;;  %2536 = vst.msk [vmem:[#allocation2 + $0x43] sm:$0xf0] %vm2514_vm8, %v2493_v63 }
 0x3d3   : > { %2517 = vst.msk [vmem:[#allocation2 + $0x23] sm:$0xf] %vm2516_vm9, %v2487_v29  ;;  %2537 = vst.msk [vmem:[#allocation2 + $0x4b] sm:$0xf] %vm2516_vm9, %v2494_v17 }
 0x3d4   : > { %2519 = vst.msk [vmem:[#allocation2 + $0x19] sm:$0x20] %vm2518_vm2, %v2486_v18  ;;  %2538 = vst.msk [vmem:[#allocation2 + $0x41] sm:$0x20] %vm2518_vm2, %v2493_v63 }
 0x3d5   : > { %2521 = vst.msk [vmem:[#allocation2 + $0x25] sm:$0x4] %vm2520_vm6, %v2487_v29  ;;  %2539 = vst.msk [vmem:[#allocation2 + $0x4d] sm:$0x4] %vm2520_vm6, %v2494_v17 }
 0x3d6   : > { %2523 = vst.msk [vmem:[#allocation2 + $0x23] sm:$0xc0] %vm2522_vm3, %v2488_v56  ;;  %2544 = vst.msk [vmem:[#allocation2 + $0x4b] sm:$0xc0] %vm2522_vm3, %v2495_v30  ;;  %v2566_v47 = vld [vmem:[#allocation2 + $0x11] sm:$0xff] }
 0x3d7   : > { %2526 = vst.msk [vmem:[#allocation2 + $0x21] sm:$0x80] %vm2525_vm14, %v2488_v56  ;;  %2546 = vst.msk [vmem:[#allocation2 + $0x49] sm:$0x80] %vm2525_vm14, %v2495_v30  ;;  %v2564_v60 = vld [vmem:[#allocation2 + $0x1] sm:$0xff]  ;;  %v2550_v26 = vld [vmem:[#allocation2 + $0x10] sm:$0xff] }
 0x3d8   : > { %2524 = vst.msk [vmem:[#allocation2 + $0x2b] sm:$0x3f] %vm2366_vm15, %v2489_v12  ;;  %2545 = vst.msk [vmem:[#allocation2 + $0x53] sm:$0x3f] %vm2366_vm15, %v2496_v44  ;;  %v2565_v55 = vld [vmem:[#allocation2 + $0x9] sm:$0xff]  ;;  %v2548_v45 = vld [vmem:[#allocation2] sm:$0xff] }
 0x3d9   : > { %2528 = vst.msk [vmem:[#allocation2 + $0x2d] sm:$0x10] %vm2527_vm11, %v2489_v12  ;;  %2547 = vst.msk [vmem:[#allocation2 + $0x55] sm:$0x10] %vm2527_vm11, %v2496_v44  ;;  %v2574_v36 = vpack.c.bf16 %v2565_v55, %v2564_v60  ;;  %v2549_v46 = vld [vmem:[#allocation2 + $0x8] sm:$0xff]  ;;  %v2766_v13 = vld [vmem:[#allocation2 + $0x12] sm:$0xff] }
 0x3da   : > { %2529 = vst.msk [vmem:[#allocation2 + $0x33] sm:$0xff] %vm13121_vm1, %v2490_v28  ;;  %vm13126_vm15 = vmmov %vm13121_vm1  ;;  %v2573_v53 = vld [vmem:[#allocation2 + $0x49] sm:$0x3f]  ;;  %v2558_v61 = vpack.c.bf16 %v2549_v46, %v2548_v45  ;;  %v8040_v30 = vld [vmem:[%s12976_s2 + $0x10] sm:$0xf] }
 0x3db   : > { %2530 = vst.msk [vmem:[#allocation2 + $0x31] sm:$0x2] %vm2498_vm12, %v2490_v28  ;;  %vm13123_vm12 = vcmask 1043456   ;;  %v2567_v39 = vld [vmem:[#allocation2 + $0x19] sm:$0xff]  ;;  %v2557_v23 = vld [vmem:[#allocation2 + $0x48] sm:$0x3f] }
 0x3dc   : > { %2531 = vst.msk [vmem:[#allocation2 + $0x35] sm:$0x40] %vm2500_vm5, %v2490_v28  ;;  %v2689_v42 = vsel %vm13123_vm12, %v2563_v5, 0  ;;  %vm13124_vm5 = vmmov %vm13121_vm1  ;;  %v2575_v25 = vpack.c.bf16 %v2567_v39, %v2566_v47  ;;  %v2551_v6 = vld [vmem:[#allocation2 + $0x18] sm:$0xff]  ;;  %v2552_v7 = vld [vmem:[#allocation2 + $0x20] sm:$0xff] }
 0x3dd   : > { %2532 = vst.msk [vmem:[#allocation2 + $0x3b] sm:$0xfc] %vm2502_vm10, %v2491_v41  ;;  %8985 = vmatmul.mubr.msk.bf16.vlgmr.msra.gmra.mrb[0].mxu1 %vm13124_vm5, %v2574_v36  ;;  %vm13125_vm10 = vmmov 0   ;;  %v2559_v52 = vpack.c.bf16 %v2551_v6, %v2550_v26  ;;  %v2764_v4 = vld [vmem:[#allocation2 + $0x2] sm:$0xff]  ;;  %v2765_v49 = vld [vmem:[#allocation2 + $0xa] sm:$0xff]  ;;  %v2767_v54 = vld [vmem:[#allocation2 + $0x1a] sm:$0xff] }
 0x3de   : > { %2533 = vst.msk [vmem:[#allocation2 + $0x43] sm:$0x3] %vm2504_vm4, %v2492_v27  ;;  %9005 = vmatpush3.bf16.msra.mxu1 %v2689_v42  ;;  %8988 = vmatprep.mubr.msk.bf16.mxu1 %vm13125_vm10, %v10650_v1  ;;  %v2568_v62 = vld [vmem:[#allocation2 + $0x21] sm:$0xff]  ;;  %vm13127_vm4 = vmmov %vm13121_vm1  ;;  %v2774_v22 = vpack.c.bf16 %v2765_v49, %v2764_v4  ;;  %v2775_v35 = vpack.c.bf16 %v2767_v54, %v2766_v13  ;;  %v2890_v42 = vld [vmem:[#allocation2 + $0x4a] sm:$0xff] }
 0x3df   : > { %2534 = vst.msk [vmem:[#allocation2 + $0x39] sm:$0x8] %vm2506_vm13, %v2491_v41  ;;  %9026 = vmatprep.subr.bf16.mxu1 %v10650_v1  ;;  %v2569_v0 = vld [vmem:[#allocation2 + $0x29] sm:$0xff]  ;;  %vm13128_vm13 = vmmov %vm13121_vm1  ;;  %v2892_v44 = vpack.c.bf16 %v2766_v13, %v2765_v49  ;;  %v2891_v47 = vld [vmem:[#allocation2 + $0x52] sm:$0x3f] }
 0x3e0   : > { %2535 = vst.msk [vmem:[#allocation2 + $0x45] sm:$0x1] %vm2508_vm0, %v2492_v27  ;;  %v2576_v38 = vpack.c.bf16 %v2569_v0, %v2568_v62  ;;  %vm13129_vm0 = vmmov %vm13121_vm1  ;;  %v2553_v34 = vld [vmem:[#allocation2 + $0x28] sm:$0xff]  ;;  %v2896_v39 = vpack.c.bf16 %v2891_v47, %v2890_v42  ;;  %v3001_v62 = vld [vmem:[#allocation2 + $0x13] sm:$0xff] }
 0x3e1   : > { %2540 = vst.msk [vmem:[#allocation2 + $0x57] sm:$0xf0] %vm2514_vm8, %v2493_v63  ;;  %vm13130_vm8 = vmmov %vm13123_vm12  ;;  %v2560_v51 = vpack.c.bf16 %v2553_v34, %v2552_v7  ;;  %v2768_v18 = vld [vmem:[#allocation2 + $0x22] sm:$0xff]  ;;  %v2769_v29 = vld [vmem:[#allocation2 + $0x2a] sm:$0xff] }
 0x3e2   : > { %2541 = vst.msk [vmem:[#allocation2 + $0x5f] sm:$0xf] %vm2516_vm9, %v2494_v17  ;;  %v2570_v11 = vld [vmem:[#allocation2 + $0x31] sm:$0xff]  ;;  %v2797_v21 = vsel %vm13130_vm8, %v8028_v14, 0  ;;  %vm13131_vm9 = vmmov %vm13129_vm0  ;;  %v2776_v56 = vpack.c.bf16 %v2769_v29, %v2768_v18  ;;  %v2893_v60 = vpack.c.bf16 %v2768_v18, %v2767_v54 }
 0x3e3   : > { %2542 = vst.msk [vmem:[#allocation2 + $0x55] sm:$0x20] %vm2518_vm2, %v2493_v63  ;;  %vm13132_vm2 = vmmov %vm13129_vm0  ;;  %v2554_v15 = vld [vmem:[#allocation2 + $0x30] sm:$0xff]  ;;  %v2773_v63 = vld [vmem:[#allocation2 + $0x4a] sm:$0x3f] }
 0x3e4   : > { %2543 = vst.msk [vmem:[#allocation2 + $0x61] sm:$0x4] %vm2520_vm6, %v2494_v17  ;;  %vm13133_vm6 = vmmov %vm13129_vm0  ;;  %v2770_v12 = vld [vmem:[#allocation2 + $0x32] sm:$0xff] }
 0x3e5   : > { %8989 = vmatmul.mubr.msk.bf16.gmra.mrb[4].mxu1 %vm13126_vm15, %v2575_v25  ;;  %vm13134_vm3 = vmmov %vm13129_vm0  ;;  %v2894_v55 = vpack.c.bf16 %v2770_v12, %v2769_v29  ;;  %v3000_v25 = vld [vmem:[#allocation2 + $0xb] sm:$0xff]  ;;  %v8046_v0 = vld [vmem:[%s12976_s2 + $0x14] sm:$0xf] }
 0x3e6   : > { %8992 = vmatprep.mubr.msk.bf16.mxu1 %vm13125_vm10, %v10650_v1  ;;  %v2571_v58 = vld [vmem:[#allocation2 + $0x39] sm:$0xff]  ;;  %vm13135_vm14 = vmmov %vm13129_vm0  ;;  %v3009_v26 = vld [vmem:[#allocation2 + $0x53] sm:$0x3f] }
 0x3e7   : > { %v2577_v33 = vpack.c.bf16 %v2571_v58, %v2570_v11  ;;  %v2572_v32 = vld [vmem:[#allocation2 + $0x41] sm:$0xff]  ;;  %v2555_v57 = vld [vmem:[#allocation2 + $0x38] sm:$0xff]  ;;  %vm13136_vm11 = vmmov %vm13130_vm8 }
 0x3e8   : > { %v2578_v10 = vpack.c.bf16 %v2573_v53, %v2572_v32  ;;  %v2561_v20 = vpack.c.bf16 %v2555_v57, %v2554_v15  ;;  %v2556_v40 = vld [vmem:[#allocation2 + $0x40] sm:$0xff]  ;;  %v2915_v43 = vsel %vm13136_vm11, %v8034_v59, 0  ;;  %vm13137_vm7 = vmmov %vm13129_vm0  ;;  %v3004_v53 = vld [vmem:[#allocation2 + $0x2b] sm:$0xff] }
 0x3e9   : > { %v2562_v31 = vpack.c.bf16 %v2557_v23, %v2556_v40  ;;  %vm13138_vm1 = vmmov %vm13129_vm0  ;;  %v2771_v28 = vld [vmem:[#allocation2 + $0x3a] sm:$0xff]  ;;  %v2772_v27 = vld [vmem:[#allocation2 + $0x42] sm:$0xff] }
 0x3ea   : > { %vm13139_vm12 = vmmov %vm13129_vm0  ;;  %v2777_v41 = vpack.c.bf16 %v2771_v28, %v2770_v12  ;;  %v2778_v17 = vpack.c.bf16 %v2773_v63, %v2772_v27  ;;  %v2895_v36 = vpack.c.bf16 %v2772_v27, %v2771_v28  ;;  %v3002_v58 = vld [vmem:[#allocation2 + $0x1b] sm:$0xff]  ;;  %v3007_v14 = vld [vmem:[#allocation2 + $0x43] sm:$0xff] }
 0x3eb   : > { %vm13140_vm5 = vmmov %vm13129_vm0  ;;  %v3006_v46 = vld [vmem:[#allocation2 + $0x3b] sm:$0xff]  ;;  %v3122_v23 = vld [vmem:[#allocation2 + $0x2c] sm:$0xff] }
 0x3ec   : > { %vm13141_vm15 = vmmov %vm13129_vm0  ;;  %v3119_v7 = vld [vmem:[#allocation2 + $0x14] sm:$0xff]  ;;  %v3120_v57 = vld [vmem:[#allocation2 + $0x1c] sm:$0xff] }
 0x3ed   : > { %8993 = vmatmul.mubr.msk.bf16.gmra.mrb[8].mxu1 %vm13127_vm4, %v2576_v38  ;;  %vm13142_vm4 = vmmov %vm13130_vm8  ;;  %v3010_v38 = vpack.c.bf16 %v3001_v62, %v3000_v25  ;;  %v8052_v34 = vld [vmem:[%s12976_s2 + $0x18] sm:$0xf]  ;;  %v3124_v49 = vld [vmem:[#allocation2 + $0x3c] sm:$0xff]  ;;  %v3246_v18 = vpack.c.bf16 %v3120_v57, %v3119_v7 }
 0x3ee   : > { %8996 = vmatprep.mubr.msk.bf16.mxu1 %vm13125_vm10, %v10650_v1  ;;  %v3033_v5 = vsel %vm13142_vm4, %v8040_v30, 0  ;;  %vm13144_vm8 = vmmov %vm13129_vm0  ;;  %v3125_v59 = vld [vmem:[#allocation2 + $0x44] sm:$0xff]  ;;  %v3127_v13 = vld [vmem:[#allocation2 + $0x54] sm:$0x3f] }
 0x3ef   : > { %vm13150_vm11 = vmmov %vm13129_vm0  ;;  %v3245_v27 = vld [vmem:[#allocation2 + $0x5c] sm:$0x3f]  ;;  %v3360_v62 = vld [vmem:[#allocation2 + $0x45] sm:$0xff] }
 0x3f0   : > { %v3355_v30 = vld [vmem:[#allocation2 + $0x1d] sm:$0xff]  ;;  %v3358_v47 = vld [vmem:[#allocation2 + $0x35] sm:$0xff] }
 0x3f5   : > { %8997 = vmatmul.mubr.msk.bf16.gmra.mrb[12].mxu1 %vm13128_vm13, %v2577_v33  ;;  %vm13143_vm13 = vmmov %vm13129_vm0  ;;  %v3003_v33 = vld [vmem:[#allocation2 + $0x23] sm:$0xff] }
 0x3f6   : > { %9000 = vmatprep.mubr.msk.bf16.mxu1 %vm13125_vm10, %v10650_v1  ;;  %v3011_v32 = vpack.c.bf16 %v3003_v33, %v3002_v58  ;;  %v3363_v58 = vld [vmem:[#allocation2 + $0x5d] sm:$0x3f] }
 0x3fd   : > { %9001 = vmatmul.mubr.msk.bf16.gmra.mrb[16].mxu1 %vm13129_vm0, %v2578_v10  ;;  %v3005_v10 = vld [vmem:[#allocation2 + $0x33] sm:$0xff] }
 0x3fe   : > { %9006 = vmatprep.mubr.msk.bf16.mxu1 %vm13125_vm10, %v10650_v1  ;;  %v3012_v45 = vpack.c.bf16 %v3005_v10, %v3004_v53  ;;  %v3473_v53 = vld [vmem:[#allocation2 + $0x1e] sm:$0xff] }
 0x405   : > { %9007 = vmatmul.mubr.msk.bf16.vlgmr.msra.gmra.mrb[0].mxu1 %vm13131_vm9, %v2558_v61  ;;  %vm13145_vm9 = vmmov %vm13129_vm0  ;;  %v3013_v61 = vpack.c.bf16 %v3007_v14, %v3006_v46  ;;  %v3475_v46 = vld [vmem:[#allocation2 + $0x2e] sm:$0xff] }
 0x406   : > { %9027 = vmatpush3.bf16.msra.mxu1 %v2797_v21  ;;  %9010 = vmatprep.mubr.msk.bf16.mxu1 %vm13125_vm10, %v10650_v1  ;;  %v3008_v21 = vld [vmem:[#allocation2 + $0x4b] sm:$0xff] }
 0x407   : > { %9048 = vmatprep.subr.bf16.mxu1 %v10650_v1  ;;  %v3014_v6 = vpack.c.bf16 %v3009_v26, %v3008_v21  ;;  %v3477_v21 = vld [vmem:[#allocation2 + $0x3e] sm:$0xff] }
 0x40d   : > { %9011 = vmatmul.mubr.msk.bf16.gmra.mrb[4].mxu1 %vm13132_vm2, %v2559_v52  ;;  %vm13146_vm2 = vmmov %vm13129_vm0  ;;  %v3118_v52 = vld [vmem:[#allocation2 + $0xc] sm:$0xff] }
 0x40e   : > { %9014 = vmatprep.mubr.msk.bf16.mxu1 %vm13125_vm10, %v10650_v1 }
 0x415   : > { %9015 = vmatmul.mubr.msk.bf16.gmra.mrb[8].mxu1 %vm13133_vm6, %v2560_v51  ;;  %vm13147_vm6 = vmmov %vm13142_vm4  ;;  %v3128_v51 = vpack.c.bf16 %v3119_v7, %v3118_v52  ;;  %v3479_v52 = vld [vmem:[#allocation2 + $0x4e] sm:$0xff] }
 0x416   : > { %9018 = vmatprep.mubr.msk.bf16.mxu1 %vm13125_vm10, %v10650_v1  ;;  %v3151_v11 = vsel %vm13147_vm6, %v8046_v0, 0  ;;  %v3361_v0 = vld [vmem:[#allocation2 + $0x4d] sm:$0xff] }
 0x41d   : > { %9019 = vmatmul.mubr.msk.bf16.gmra.mrb[12].mxu1 %vm13134_vm3, %v2561_v20  ;;  %vm13148_vm3 = vmmov %vm13129_vm0  ;;  %v3121_v20 = vld [vmem:[#allocation2 + $0x24] sm:$0xff] }
 0x41e   : > { %9022 = vmatprep.mubr.msk.bf16.mxu1 %vm13125_vm10, %v10650_v1  ;;  %v3129_v40 = vpack.c.bf16 %v3121_v20, %v3120_v57 }
 0x425   : > { %9023 = vmatmul.mubr.msk.bf16.gmra.mrb[16].mxu1 %vm13135_vm14, %v2562_v31  ;;  %vm13149_vm14 = vmmov %vm13129_vm0  ;;  %v3123_v31 = vld [vmem:[#allocation2 + $0x34] sm:$0xff] }
 0x426   : > { %9028 = vmatprep.mubr.msk.bf16.mxu1 %vm13125_vm10, %v10650_v1  ;;  %v3130_v4 = vpack.c.bf16 %v3123_v31, %v3122_v23  ;;  %v3248_v12 = vpack.c.bf16 %v3124_v49, %v3123_v31 }
 0x42d   : > { %9029 = vmatmul.mubr.msk.bf16.vlgmr.msra.gmra.mrb[0].mxu1 %vm13137_vm7, %v2774_v22  ;;  %vm13151_vm7 = vmmov %vm13129_vm0  ;;  %v3131_v22 = vpack.c.bf16 %v3125_v59, %v3124_v49 }
 0x42e   : > { %9049 = vmatpush3.bf16.msra.mxu1 %v2915_v43  ;;  %9032 = vmatprep.mubr.msk.bf16.mxu1 %vm13125_vm10, %v10650_v1  ;;  %v3126_v43 = vld [vmem:[#allocation2 + $0x4c] sm:$0xff] }
 0x42f   : > { %9070 = vmatprep.subr.bf16.mxu1 %v10650_v1  ;;  %v3132_v54 = vpack.c.bf16 %v3127_v13, %v3126_v43  ;;  %v3249_v28 = vpack.c.bf16 %v3126_v43, %v3125_v59 }
 0x435   : > { %9033 = vmatmul.mubr.msk.bf16.gmra.mrb[4].mxu1 %vm13138_vm1, %v2775_v35  ;;  %vm13152_vm1 = vmmov %vm13129_vm0  ;;  %v8058_v35 = vld [vmem:[%s12976_s2 + $0x1c] sm:$0xf] }
 0x436   : > { %9036 = vmatprep.mubr.msk.bf16.mxu1 %vm13125_vm10, %v10650_v1 }
 0x43d   : > { %9037 = vmatmul.mubr.msk.bf16.gmra.mrb[8].mxu1 %vm13139_vm12, %v2776_v56  ;;  %vm13153_vm12 = vmmov %vm13142_vm4  ;;  %v3247_v56 = vpack.c.bf16 %v3122_v23, %v3121_v20  ;;  %v11946_v57 = vmul.u32.u64.low 3435973837, %v11197_v2  ;;  %v11947_v20 = vmul.u32.u64.high 3435973837, %v11197_v2, %v11946_v57 }
 0x43e   : > { %9040 = vmatprep.mubr.msk.bf16.mxu1 %vm13125_vm10, %v10650_v1  ;;  %v3269_v15 = vsel %vm13153_vm12, %v8052_v34, 0  ;;  %vm13156_vm4 = vmmov %vm13129_vm0  ;;  %v3480_v34 = vld [vmem:[#allocation2 + $0x56] sm:$0xff] }
 0x43f   : > { %vm13167_vm12 = vmmov %vm13129_vm0  ;;  %v3596_v49 = vshrl.u32 %v11947_v20, 3 }
 0x441   : > { %v3597_v13 = vmul.u32 10, %v3596_v49 }
 0x445   : > { %9041 = vmatmul.mubr.msk.bf16.gmra.mrb[12].mxu1 %vm13140_vm5, %v2777_v41  ;;  %vm13154_vm5 = vmmov %vm13129_vm0  ;;  %v3244_v41 = vld [vmem:[#allocation2 + $0x54] sm:$0xff] }
 0x446   : > { %9044 = vmatprep.mubr.msk.bf16.mxu1 %vm13125_vm10, %v10650_v1  ;;  %v3250_v63 = vpack.c.bf16 %v3245_v27, %v3244_v41 }
 0x44d   : > { %9045 = vmatmul.mubr.msk.bf16.gmra.mrb[16].mxu1 %vm13141_vm15, %v2778_v17  ;;  %vm13155_vm15 = vmmov %vm13129_vm0  ;;  %v3354_v17 = vld [vmem:[#allocation2 + $0x15] sm:$0xff] }
 0x44e   : > { %9050 = vmatprep.mubr.msk.bf16.mxu1 %vm13125_vm10, %v10650_v1 }
 0x455   : > { %9051 = vmatmul.mubr.msk.bf16.vlgmr.msra.gmra.mrb[0].mxu1 %vm13143_vm13, %v2892_v44  ;;  %vm13157_vm13 = vmmov %vm13129_vm0  ;;  %v8064_v44 = vld [vmem:[%s12976_s2 + $0x20] sm:$0xf] }
 0x456   : > { %9071 = vmatpush3.bf16.msra.mxu1 %v3033_v5  ;;  %9054 = vmatprep.mubr.msk.bf16.mxu1 %vm13125_vm10, %v10650_v1  ;;  %v3364_v5 = vpack.c.bf16 %v3355_v30, %v3354_v17 }
 0x457   : > { %9092 = vmatprep.subr.bf16.mxu1 %v10650_v1 }
 0x45d   : > { %9055 = vmatmul.mubr.msk.bf16.gmra.mrb[4].mxu1 %vm13129_vm0, %v2893_v60 }
 0x45e   : > { %9058 = vmatprep.mubr.msk.bf16.mxu1 %vm13125_vm10, %v10650_v1 }
 0x465   : > { %9059 = vmatmul.mubr.msk.bf16.gmra.mrb[8].mxu1 %vm13144_vm8, %v2894_v55  ;;  %vm13158_vm8 = vmmov %vm13147_vm6  ;;  %v3356_v55 = vld [vmem:[#allocation2 + $0x25] sm:$0xff] }
 0x466   : > { %9062 = vmatprep.mubr.msk.bf16.mxu1 %vm13125_vm10, %v10650_v1  ;;  %v3387_v29 = vsel %vm13158_vm8, %v8058_v35, 0  ;;  %vm13161_vm6 = vmmov %vm13129_vm0 }
 0x46d   : > { %9063 = vmatmul.mubr.msk.bf16.gmra.mrb[12].mxu1 %vm13145_vm9, %v2895_v36  ;;  %vm13159_vm9 = vmmov %vm13129_vm0  ;;  %v3357_v36 = vld [vmem:[#allocation2 + $0x2d] sm:$0xff] }
 0x46e   : > { %9066 = vmatprep.mubr.msk.bf16.mxu1 %vm13125_vm10, %v10650_v1  ;;  %v3365_v42 = vpack.c.bf16 %v3357_v36, %v3356_v55 }
 0x475   : > { %9067 = vmatmul.mubr.msk.bf16.gmra.mrb[16].mxu1 %vm13146_vm2, %v2896_v39  ;;  %vm13160_vm2 = vmmov %vm13129_vm0  ;;  %v3359_v39 = vld [vmem:[#allocation2 + $0x3d] sm:$0xff] }
 0x476   : > { %9072 = vmatprep.mubr.msk.bf16.mxu1 %vm13125_vm10, %v10650_v1  ;;  %v3366_v25 = vpack.c.bf16 %v3359_v39, %v3358_v47 }
 0x47d   : > { %9073 = vmatmul.mubr.msk.bf16.vlgmr.msra.gmra.mrb[0].mxu1 %vm13148_vm3, %v3010_v38  ;;  %vm13162_vm3 = vmmov %vm13129_vm0  ;;  %v3367_v38 = vpack.c.bf16 %v3361_v0, %v3360_v62  ;;  %v11990_v62 = vmul.u32.u64.low 3435973837, %v11257_v37  ;;  %v11991_v0 = vmul.u32.u64.high 3435973837, %v11257_v37, %v11990_v62 }
 0x47e   : > { %9093 = vmatpush3.bf16.msra.mxu1 %v3151_v11  ;;  %9076 = vmatprep.mubr.msk.bf16.mxu1 %vm13125_vm10, %v10650_v1  ;;  %v3362_v11 = vld [vmem:[#allocation2 + $0x55] sm:$0xff] }
 0x47f   : > { %9114 = vmatprep.subr.bf16.mxu1 %v10650_v1  ;;  %v3368_v33 = vpack.c.bf16 %v3363_v58, %v3362_v11 }
 0x485   : > { %9077 = vmatmul.mubr.msk.bf16.gmra.mrb[4].mxu1 %vm13149_vm14, %v3011_v32  ;;  %vm13163_vm14 = vmmov %vm13129_vm0  ;;  %v3472_v32 = vld [vmem:[#allocation2 + $0x16] sm:$0xff] }
 0x486   : > { %9080 = vmatprep.mubr.msk.bf16.mxu1 %vm13125_vm10, %v10650_v1  ;;  %v3482_v10 = vpack.c.bf16 %v3473_v53, %v3472_v32 }
 0x48d   : > { %9081 = vmatmul.mubr.msk.bf16.gmra.mrb[8].mxu1 %vm13150_vm11, %v3012_v45  ;;  %vm13164_vm11 = vmmov %vm13158_vm8  ;;  %v3474_v45 = vld [vmem:[#allocation2 + $0x26] sm:$0xff] }
 0x48e   : > { %9084 = vmatprep.mubr.msk.bf16.mxu1 %vm13125_vm10, %v10650_v1  ;;  %v3505_v60 = vsel %vm13164_vm11, %v8064_v44, 0  ;;  %v3483_v14 = vpack.c.bf16 %v3475_v46, %v3474_v45  ;;  %vm13172_vm8 = vmmov %vm13129_vm0 }
 0x495   : > { %9085 = vmatmul.mubr.msk.bf16.gmra.mrb[12].mxu1 %vm13151_vm7, %v3013_v61  ;;  %vm13165_vm7 = vmmov %vm13129_vm0  ;;  %v3476_v61 = vld [vmem:[#allocation2 + $0x36] sm:$0xff] }
 0x496   : > { %9088 = vmatprep.mubr.msk.bf16.mxu1 %vm13125_vm10, %v10650_v1  ;;  %v3484_v26 = vpack.c.bf16 %v3477_v21, %v3476_v61 }
 0x49d   : > { %9089 = vmatmul.mubr.msk.bf16.gmra.mrb[16].mxu1 %vm13152_vm1, %v3014_v6  ;;  %vm13166_vm1 = vmmov %vm13129_vm0  ;;  %v3478_v6 = vld [vmem:[#allocation2 + $0x46] sm:$0xff] }
 0x49e   : > { %9094 = vmatprep.mubr.msk.bf16.mxu1 %vm13125_vm10, %v10650_v1  ;;  %v3485_v7 = vpack.c.bf16 %v3479_v52, %v3478_v6 }
 0x4a5   : > { %9095 = vmatmul.mubr.msk.bf16.vlgmr.msra.gmra.mrb[0].mxu1 %vm13154_vm5, %v3128_v51  ;;  %vm13168_vm5 = vmmov %vm13129_vm0  ;;  %v3481_v51 = vld [vmem:[#allocation2 + $0x5e] sm:$0x3f] }
 0x4a6   : > { %9115 = vmatpush3.bf16.msra.mxu1 %v3269_v15  ;;  %9098 = vmatprep.mubr.msk.bf16.mxu1 %vm13125_vm10, %v10650_v1  ;;  %v3486_v15 = vpack.c.bf16 %v3481_v51, %v3480_v34  ;;  %v12018_v34 = vmul.u32.u64.low 3435973837, %v11279_v50  ;;  %v12019_v51 = vmul.u32.u64.high 3435973837, %v11279_v50, %v12018_v34 }
 0x4a7   : > { %9136 = vmatprep.subr.bf16.mxu1 %v10650_v1 }
 0x4ad   : > { %9099 = vmatmul.mubr.msk.bf16.gmra.mrb[4].mxu1 %vm13155_vm15, %v3129_v40  ;;  %vm13169_vm15 = vmmov %vm13129_vm0  ;;  %v11950_v40 = vmul.u32.u64.low 3435973837, %v11200_v3  ;;  %v11951_v23 = vmul.u32.u64.high 3435973837, %v11200_v3, %v11950_v40 }
 0x4ae   : > { %9102 = vmatprep.mubr.msk.bf16.mxu1 %vm13125_vm10, %v10650_v1 }
 0x4af   : > { %v3607_v59 = vshrl.u32 %v11951_v23, 3 }
 0x4b5   : > { %9103 = vmatmul.mubr.msk.bf16.gmra.mrb[8].mxu1 %vm13156_vm4, %v3130_v4  ;;  %vm13170_vm4 = vmmov %vm13129_vm0  ;;  %v11954_v31 = vmul.u32.u64.low 3435973837, %v11211_v8  ;;  %v11955_v4 = vmul.u32.u64.high 3435973837, %v11211_v8, %v11954_v31 }
 0x4b6   : > { %9106 = vmatprep.mubr.msk.bf16.mxu1 %vm13125_vm10, %v10650_v1 }
 0x4b7   : > { %v3618_v35 = vshrl.u32 %v11955_v4, 3 }
 0x4b9   : > { %v3619_v17 = vmul.u32 10, %v3618_v35 }
 0x4bd   : > { %9107 = vmatmul.mubr.msk.bf16.gmra.mrb[12].mxu1 %vm13157_vm13, %v3131_v22  ;;  %vm13171_vm13 = vmmov %vm13129_vm0  ;;  %v11960_v22 = vmul.u32.u64.low 3435973837, %v11214_v9  ;;  %v11961_v43 = vmul.u32.u64.high 3435973837, %v11214_v9, %v11960_v22 }
 0x4be   : > { %9110 = vmatprep.mubr.msk.bf16.mxu1 %vm13125_vm10, %v10650_v1 }
 0x4c5   : > { %9111 = vmatmul.mubr.msk.bf16.gmra.mrb[16].mxu1 %vm13129_vm0, %v3132_v54  ;;  %v3608_v54 = vmul.u32 10, %v3607_v59 }
 0x4c6   : > { %9116 = vmatprep.mubr.msk.bf16.mxu1 %vm13125_vm10, %v10650_v1 }
 0x4c7   : > { %v3609_v27 = vsub.s32 %v11200_v3, %v3608_v54 }
 0x4c9   : > { %v3731_v55 = vadd.s32 10, %v3609_v27 }
 0x4cd   : > { %9117 = vmatmul.mubr.msk.bf16.vlgmr.msra.gmra.mrb[0].mxu1 %vm13159_vm9, %v3246_v18  ;;  %vm13173_vm9 = vmmov %vm13129_vm0 }
 0x4ce   : > { %9137 = vmatpush3.bf16.msra.mxu1 %v3387_v29  ;;  %9120 = vmatprep.mubr.msk.bf16.mxu1 %vm13125_vm10, %v10650_v1  ;;  %v11965_v18 = vmul.u32.u64.low 3435973837, %v11227_v16  ;;  %v11966_v29 = vmul.u32.u64.high 3435973837, %v11227_v16, %v11965_v18 }
 0x4cf   : > { %9158 = vmatprep.subr.bf16.mxu1 %v10650_v1 }
 0x4d5   : > { %9121 = vmatmul.mubr.msk.bf16.gmra.mrb[4].mxu1 %vm13160_vm2, %v3247_v56  ;;  %v10520_v56 = vld [vmem:[%s12977_s3 + $0x8] sm:$0xff]  }
 0x4d6   : > { %9124 = vmatprep.mubr.msk.bf16.mxu1 %vm13125_vm10, %v10650_v1 }
 0x4dd   : > { %9125 = vmatmul.mubr.msk.bf16.gmra.mrb[8].mxu1 %vm13161_vm6, %v3248_v12  ;;  %v3598_v12 = vsub.s32 %v11197_v2, %v3597_v13 }
 0x4de   : > { %9128 = vmatprep.mubr.msk.bf16.mxu1 %vm13125_vm10, %v10650_v1 }
 0x4df   : > { %vm3700_vm2 = vcmp.ne.s32.totalorder %v3598_v12, 0  ;;  %vm3710_vm6 = vcmp.lt.s32.totalorder %v3598_v12, 0  ;;  %v3730_v30 = vadd.s32 10, %v3598_v12 }
 0x4e0   : > { %vm3720_vm11 = vmand %vm3710_vm6, %vm3700_vm2 }
 0x4e1   : > { %v11986_v39 = vsel %vm3720_vm11, %v3730_v30, %v3598_v12 }
 0x4e5   : > { %9129 = vmatmul.mubr.msk.bf16.gmra.mrb[12].mxu1 %vm13162_vm3, %v3249_v28  ;;  %v11973_v28 = vmul.u32.u64.low 3435973837, %v11230_v19  ;;  %v11974_v41 = vmul.u32.u64.high 3435973837, %v11230_v19, %v11973_v28  ;;  %vm3701_vm3 = vcmp.ne.s32.totalorder %v3609_v27, 0 }
 0x4e6   : > { %9132 = vmatprep.mubr.msk.bf16.mxu1 %vm13125_vm10, %v10650_v1 }
 0x4e7   : > { %v3651_v47 = vshrl.u32 %v11974_v41, 3 }
 0x4ed   : > { %9133 = vmatmul.mubr.msk.bf16.gmra.mrb[16].mxu1 %vm13163_vm14, %v3250_v63  ;;  %v3629_v63 = vshrl.u32 %v11961_v43, 3  ;;  %vm3711_vm14 = vcmp.lt.s32.totalorder %v3609_v27, 0  ;;  %v13188_v43 = vmov 0 }
 0x4ee   : > { %9138 = vmatprep.mubr.msk.bf16.mxu1 %vm13125_vm10, %v10650_v1 }
 0x4ef   : > { %v3630_v44 = vmul.u32 10, %v3629_v63 }
 0x4f5   : > { %9139 = vmatmul.mubr.msk.bf16.vlgmr.msra.gmra.mrb[0].mxu1 %vm13165_vm7, %v3364_v5  ;;  %v3620_v5 = vsub.s32 %v11211_v8, %v3619_v17  ;;  %vm3721_vm7 = vmand %vm3711_vm14, %vm3701_vm3 }
 0x4f6   : > { %9159 = vmatpush3.bf16.msra.mxu1 %v3505_v60  ;;  %9142 = vmatprep.mubr.msk.bf16.mxu1 %vm13125_vm10, %v10650_v1  ;;  %v3640_v60 = vshrl.u32 %v11966_v29, 3  ;;  %v11993_v11 = vsel %vm3721_vm7, %v3731_v55, %v3609_v27  ;;  %v3695_v27 = vshrl.u32 %v12019_v51, 3 }
 0x4f7   : > { %9180 = vmatprep.subr.bf16.mxu1 %v10650_v1  ;;  %v3732_v58 = vadd.s32 10, %v3620_v5 }
 0x4fd   : > { %9143 = vmatmul.mubr.msk.bf16.gmra.mrb[4].mxu1 %vm13166_vm1, %v3365_v42  ;;  %v11982_v36 = vmul.u32.u64.low 3435973837, %v11239_v24  ;;  %v11983_v42 = vmul.u32.u64.high 3435973837, %v11239_v24, %v11982_v36  ;;  %vm3702_vm1 = vcmp.ne.s32.totalorder %v3620_v5, 0 }
 0x4fe   : > { %9146 = vmatprep.mubr.msk.bf16.mxu1 %vm13125_vm10, %v10650_v1 }
 0x4ff   : > { %v3662_v46 = vshrl.u32 %v11983_v42, 3 }
 0x505   : > { %9147 = vmatmul.mubr.msk.bf16.gmra.mrb[8].mxu1 %vm13167_vm12, %v3366_v25  ;;  %v3631_v25 = vsub.s32 %v11214_v9, %v3630_v44  ;;  %vm3712_vm12 = vcmp.lt.s32.totalorder %v3620_v5, 0 }
 0x506   : > { %9150 = vmatprep.mubr.msk.bf16.mxu1 %vm13125_vm10, %v10650_v1 }
 0x507   : > { %v3733_v9 = vadd.s32 10, %v3631_v25 }
 0x50d   : > { %9151 = vmatmul.mubr.msk.bf16.gmra.mrb[12].mxu1 %vm13168_vm5, %v3367_v38  ;;  %v3641_v38 = vmul.u32 10, %v3640_v60  ;;  %vm12997_vm5 = vcmp.lt.s32.totalorder %v11986_v39, 8 }
 0x50e   : > { %9154 = vmatprep.mubr.msk.bf16.mxu1 %vm13125_vm10, %v10650_v1 }
 0x50f   : > { %v3642_v53 = vsub.s32 %v11227_v16, %v3641_v38 }
 0x511   : > { %vm3704_vm2 = vcmp.ne.s32.totalorder %v3642_v53, 0  ;;  %vm3714_vm6 = vcmp.lt.s32.totalorder %v3642_v53, 0  ;;  %v3734_v23 = vadd.s32 10, %v3642_v53 }
 0x512   : > { %vm3724_vm7 = vmand %vm3714_vm6, %vm3704_vm2 }
 0x513   : > { %v12041_v29 = vsel %vm3724_vm7, %v3734_v23, %v3642_v53 }
 0x515   : > { %9155 = vmatmul.mubr.msk.bf16.gmra.mrb[16].mxu1 %vm13169_vm15, %v3368_v33  ;;  %v3652_v33 = vmul.u32 10, %v3651_v47  ;;  %vm3722_vm15 = vmand %vm3712_vm12, %vm3702_vm1 }
 0x516   : > { %9160 = vmatprep.mubr.msk.bf16.mxu1 %vm13125_vm10, %v10650_v1 }
 0x517   : > { %v3653_v6 = vsub.s32 %v11230_v19, %v3652_v33  ;;  %v3663_v19 = vmul.u32 10, %v3662_v46 }
 0x519   : > { %vm3705_vm14 = vcmp.ne.s32.totalorder %v3653_v6, 0  ;;  %vm3715_vm11 = vcmp.lt.s32.totalorder %v3653_v6, 0  ;;  %v3735_v49 = vadd.s32 10, %v3653_v6  ;;  %v3664_v13 = vsub.s32 %v11239_v24, %v3663_v19 }
 0x51a   : > { %vm12032_vm12 = vmand %vm3715_vm11, %vm3705_vm14 }
 0x51b   : > { %v3745_v63 = vsel %vm12032_vm12, %v3735_v49, %v3653_v6  ;;  %v3736_v44 = vadd.s32 10, %v3664_v13 }
 0x51c   : > { %vm12054_vm6 = vcmp.lt.s32.totalorder %v3745_v63, 8 }
 0x51d   : > { %9161 = vmatmul.mubr.msk.bf16.vlgmr.msra.gmra.mrb[0].mxu1 %vm13170_vm4, %v3482_v10  ;;  %vm3703_vm4 = vcmp.ne.s32.totalorder %v3631_v25, 0 }
 0x51e   : > { %9164 = vmatprep.mubr.msk.bf16.mxu1 %vm13125_vm10, %v10650_v1  ;;  %9181 = vmatpush3.bf16.msra.mxu1 %v10520_v56 }
 0x51f   : > { %9202 = vmatprep.subr.bf16.mxu1 %v10650_v1 }
 0x525   : > { %9165 = vmatmul.mubr.msk.bf16.gmra.mrb[4].mxu1 %vm13171_vm13, %v3483_v14  ;;  %vm3713_vm13 = vcmp.lt.s32.totalorder %v3631_v25, 0  ;;  %v12005_v14 = vmul.u32.u64.low 3435973837, %v11276_v48  ;;  %v12006_v61 = vmul.u32.u64.high 3435973837, %v11276_v48, %v12005_v14 }
 0x526   : > { %9168 = vmatprep.mubr.msk.bf16.mxu1 %vm13125_vm10, %v10650_v1 }
 0x527   : > { %v3684_v54 = vshrl.u32 %v12006_v61, 3 }
 0x529   : > { %v3685_v30 = vmul.u32 10, %v3684_v54 }
 0x52d   : > { %9169 = vmatmul.mubr.msk.bf16.gmra.mrb[8].mxu1 %vm13129_vm0, %v3484_v26  ;;  %vm12998_vm0 = vcmask 130048   ;;  %v12010_v26 = vsel %vm3722_vm15, %v3732_v58, %v3620_v5  ;;  %vm3706_vm15 = vcmp.ne.s32.totalorder %v3664_v13, 0  ;;  %v3696_v5 = vmul.u32 10, %v3695_v27 }
 0x52e   : > { %9172 = vmatprep.mubr.msk.bf16.mxu1 %vm13125_vm10, %v10650_v1  ;;  %vm12995_vm3 = vcmp.lt.s32.totalorder %v12010_v26, 8 }
 0x535   : > { %9173 = vmatmul.mubr.msk.bf16.gmra.mrb[12].mxu1 %vm13172_vm8, %v3485_v7  ;;  %vm12996_vm8 = vcmp.lt.s32.totalorder %v11993_v11, 8  ;;  %v3673_v7 = vshrl.u32 %v11991_v0, 3 }
 0x536   : > { %9176 = vmatprep.mubr.msk.bf16.mxu1 %vm13125_vm10, %v10650_v1 }
 0x537   : > { %v3674_v31 = vmul.u32 10, %v3673_v7 }
 0x539   : > { %v3675_v41 = vsub.s32 %v11257_v37, %v3674_v31 }
 0x53b   : > { %vm3717_vm2 = vcmp.lt.s32.totalorder %v3675_v41, 0  ;;  %v3737_v47 = vadd.s32 10, %v3675_v41 }
 0x53d   : > { %9177 = vmatmul.mubr.msk.bf16.gmra.mrb[16].mxu1 %vm13173_vm9, %v3486_v15  ;;  %vm3723_vm9 = vmand %vm3713_vm13, %vm3703_vm4  ;;  %vm3716_vm4 = vcmp.lt.s32.totalorder %v3664_v13, 0  ;;  %vm12993_vm13 = vcmp.lt.s32.totalorder %v12041_v29, 8 }
 0x53e   : > { %9182 = vmatprep.mubr.msk.bf16.mxu1 %vm13125_vm10, %v10650_v1  ;;  %v12023_v40 = vsel %vm3723_vm9, %v3733_v9, %v3631_v25  ;;  %vm3707_vm9 = vcmp.ne.s32.totalorder %v3675_v41, 0  ;;  %vm12058_vm14 = vmand %vm3716_vm4, %vm3706_vm15  ;;  %v3686_v25 = vsub.s32 %v11276_v48, %v3685_v30 }
 0x53f   : > { %vm12994_vm1 = vcmp.lt.s32.totalorder %v12023_v40, 8  ;;  %vm12067_vm11 = vmand %vm3717_vm2, %vm3707_vm9  ;;  %v3746_v53 = vsel %vm12058_vm14, %v3736_v44, %v3664_v13 }
 0x540   : > { %v3747_v46 = vsel %vm12067_vm11, %v3737_v47, %v3675_v41  ;;  %vm3708_vm7 = vcmp.ne.s32.totalorder %v3686_v25, 0  ;;  %vm3718_vm12 = vcmp.lt.s32.totalorder %v3686_v25, 0  ;;  %vm12079_vm15 = vcmp.lt.s32.totalorder %v3746_v53, 8 }
 0x541   : > { %v3738_v61 = vadd.s32 10, %v3686_v25  ;;  %vm12083_vm2 = vcmp.lt.s32.totalorder %v3747_v46, 8  ;;  %vm3728_vm14 = vmand %vm3718_vm12, %vm3708_vm7 }
 0x543   : > { %v3748_v19 = vsel %vm3728_vm14, %v3738_v61, %v3686_v25  ;;  %vm13008_vm14 = vcmask 129030  }
 0x544   : > { %vm12093_vm7 = vcmp.lt.s32.totalorder %v3748_v19, 8 }
 0x5f0   : > { %v11996_v32 = vpop.f32.mrb[0].mxu1 }
 0x5f1   : > { %v3780_v10 = vsel %vm12997_vm5, %v11996_v32, 0.0  ;;  %v9162_v45 = vpop.f32.mrb[1].mxu1 }
 0x5f2   : > { %v12008_v21 = vpop.f32.mrb[2].mxu1  ;;  %v3791_v15 = vsel %vm12998_vm0, %v3780_v10, 0.0  ;;  %v3697_v10 = vsub.s32 %v11279_v50, %v3696_v5 }
 0x5f3   : > { %v3781_v16 = vsel %vm12996_vm8, %v12008_v21, 0.0  ;;  %v9163_v52 = vpop.f32.mrb[3].mxu1 }
 0x5f4   : > { %v3792_v57 = vsel %vm12998_vm0, %v3781_v16, 0.0  ;;  %vm3709_vm4 = vcmp.ne.s32.totalorder %v3697_v10, 0  ;;  %vm3719_vm9 = vcmp.lt.s32.totalorder %v3697_v10, 0  ;;  %v13184_v16 = vmov 0 }
 0x5f5   : > { %v3793_v20 = vadd.f32 %v3792_v57, %v3791_v15  ;;  %v13185_v16 = vsel %vm12083_vm2, 4294967295, %v13184_v16  ;;  %v3739_v7 = vadd.s32 10, %v3697_v10  ;;  %vm3729_vm11 = vmand %vm3719_vm9, %vm3709_vm4  ;;  %vm12999_vm4 = vcmask 128000  }
 0x5f6   : > { %vm13009_vm9 = vcmask 123905  }
 0x5f7   : > { %v3749_v49 = vsel %vm3729_vm11, %v3739_v7, %v3697_v10  ;;  %vm13011_vm11 = vcmask 130050  }
 0x5f8   : > { %v12026_v4 = vpop.f32.mrb[4].mxu1  ;;  %vm12097_vm12 = vcmp.lt.s32.totalorder %v3749_v49, 8 }
 0x5f9   : > { %v3782_v59 = vsel %vm12995_vm3, %v12026_v4, 0.0  ;;  %v9166_v22 = vpop.f32.mrb[5].mxu1  ;;  %v13189_v43 = vsel %vm12097_vm12, 4294967295, %v13188_v43 }
 0x5fa   : > { %v3794_v35 = vsel %vm12998_vm0, %v3782_v59, 0.0  ;;  %v12039_v18 = vpop.f32.mrb[6].mxu1  ;;  %v13186_v59 = vmov 0 }
 0x5fb   : > { %v3795_v56 = vadd.f32 %v3794_v35, %v3793_v20  ;;  %v3783_v12 = vsel %vm12994_vm1, %v12039_v18, 0.0  ;;  %v9167_v28 = vpop.f32.mrb[7].mxu1  ;;  %v13187_v59 = vsel %vm12093_vm7, 4294967295, %v13186_v59 }
 0x5fc   : > { %v3796_v24 = vsel %vm12998_vm0, %v3783_v12, 0.0 }
 0x5fd   : > { %v3797_v17 = vadd.f32 %v3796_v24, %v3795_v56 }
 0x600   : > { %v12052_v60 = vpop.f32.mrb[8].mxu1 }
 0x601   : > { %v3784_v36 = vsel %vm12993_vm13, %v12052_v60, 0.0  ;;  %v9170_v42 = vpop.f32.mrb[9].mxu1 }
 0x602   : > { %v3798_v62 = vsel %vm12998_vm0, %v3784_v36, 0.0  ;;  %v3560_v0 = vpop.f32.mrb[10].mxu1 }
 0x603   : > { %v3799_v58 = vadd.f32 %v3798_v62, %v3797_v17  ;;  %v3785_v33 = vsel %vm12054_vm6, %v3560_v0, 0.0  ;;  %v9171_v9 = vpop.f32.mrb[11].mxu1 }
 0x604   : > { %v3800_v45 = vsel %vm12998_vm0, %v3785_v33, 0.0 }
 0x605   : > { %v3801_v48 = vadd.f32 %v3800_v45, %v3799_v58 }
 0x608   : > { %v3565_v6 = vpop.f32.mrb[12].mxu1 }
 0x609   : > { %v3786_v50 = vsel %vm12079_vm15, %v3565_v6, 0.0  ;;  %v9174_v52 = vpop.f32.mrb[13].mxu1 }
 0x60a   : > { %v3802_v34 = vsel %vm12998_vm0, %v3786_v50, 0.0  ;;  %v3568_v51 = vpop.f32.mrb[14].mxu1 }
 0x60b   : > { %v3803_v15 = vadd.f32 %v3802_v34, %v3801_v48  ;;  %v3787_v57 = vsel %vm12083_vm2, %v3568_v51, 0.0  ;;  %v9175_v20 = vpop.f32.mrb[15].mxu1 }
 0x60c   : > { %v3804_v23 = vsel %vm12998_vm0, %v3787_v57, 0.0 }
 0x60d   : > { %v3805_v31 = vadd.f32 %v3804_v23, %v3803_v15 }
 0x610   : > { %v3573_v22 = vpop.f32.mrb[16].mxu1 }
 0x611   : > { %v3788_v13 = vsel %vm12093_vm7, %v3573_v22, 0.0  ;;  %v9178_v54 = vpop.f32.mrb[17].mxu1 }
 0x612   : > { %v3806_v35 = vsel %vm12998_vm0, %v3788_v13, 0.0  ;;  %v3576_v56 = vpop.f32.mrb[18].mxu1 }
 0x613   : > { %v3807_v12 = vadd.f32 %v3806_v35, %v3805_v31  ;;  %v3789_v28 = vsel %vm12097_vm12, %v3576_v56, 0.0  ;;  %v9179_v41 = vpop.f32.mrb[19].mxu1 }
 0x614   : > { %v3809_v27 = vsel %vm12999_vm4, %v3789_v28, 0.0 }
 0x615   : > { %v3810_v24 = vadd.f32 %v3809_v27, %v3807_v12 }
 0x617   : > { %v3811_v63 = vrot.slane %v3810_v24, 4 }
 0x619   : > { %v3812_v17 = vadd.f32 %v3811_v63, %v3810_v24 }
 0x61b   : > { %v3813_v30 = vrot.slane %v3812_v17, 2 }
 0x61d   : > { %v3814_v44 = vadd.f32 %v3813_v30, %v3812_v17 }
 0x61f   : > { %v3815_v5 = vrot.slane %v3814_v44, 1 }
 0x621   : > { %v3816_v55 = vadd.f32 %v3815_v5, %v3814_v44 }
 0x623   : > { %v3817_v36 = vmul.f32 0.015625, %v3816_v55 }
 0x625   : > { %v12108_v42 = vsub.f32 %v11996_v32, %v3817_v36  ;;  %v12111_v47 = vsub.f32 %v12008_v21, %v3817_v36  ;;  %v12114_v25 = vsub.f32 %v12026_v4, %v3817_v36  ;;  %v12117_v62 = vsub.f32 %v12039_v18, %v3817_v36 }
 0x626   : > { %v12120_v38 = vsub.f32 %v12052_v60, %v3817_v36  ;;  %v12122_v58 = vsub.f32 %v3560_v0, %v3817_v36  ;;  %v12124_v33 = vsub.f32 %v3565_v6, %v3817_v36  ;;  %v12126_v9 = vsub.f32 %v3568_v51, %v3817_v36 }
 0x627   : > { %v12128_v32 = vsub.f32 %v3573_v22, %v3817_v36  ;;  %v12130_v53 = vsub.f32 %v3576_v56, %v3817_v36  ;;  %v3828_v21 = vsel %vm12997_vm5, %v12108_v42, 0.0  ;;  %v3829_v4 = vsel %vm12996_vm8, %v12111_v47, 0.0 }
 0x628   : > { %v3830_v18 = vsel %vm12995_vm3, %v12114_v25, 0.0  ;;  %v3831_v60 = vsel %vm12994_vm1, %v12117_v62, 0.0  ;;  %v3838_v0 = vmul.f32 %v3828_v21, %v3828_v21  ;;  %v3839_v10 = vmul.f32 %v3829_v4, %v3829_v4 }
 0x629   : > { %v3840_v45 = vmul.f32 %v3830_v18, %v3830_v18  ;;  %v3832_v48 = vsel %vm12993_vm13, %v12120_v38, 0.0  ;;  %v3841_v46 = vmul.f32 %v3831_v60, %v3831_v60  ;;  %v3833_v50 = vsel %vm12054_vm6, %v12122_v58, 0.0 }
 0x62a   : > { %v3848_v61 = vsel %vm12998_vm0, %v3838_v0, 0.0  ;;  %v3849_v6 = vsel %vm12998_vm0, %v3839_v10, 0.0  ;;  %v3842_v7 = vmul.f32 %v3832_v48, %v3832_v48  ;;  %v3834_v51 = vsel %vm12079_vm15, %v12124_v33, 0.0 }
 0x62b   : > { %v3850_v52 = vadd.f32 %v3849_v6, %v3848_v61  ;;  %v3851_v34 = vsel %vm12998_vm0, %v3840_v45, 0.0  ;;  %v3843_v57 = vmul.f32 %v3833_v50, %v3833_v50  ;;  %v3853_v20 = vsel %vm12998_vm0, %v3841_v46, 0.0 }
 0x62c   : > { %v3835_v19 = vsel %vm12083_vm2, %v12126_v9, 0.0  ;;  %v3844_v31 = vmul.f32 %v3834_v51, %v3834_v51  ;;  %v3855_v49 = vsel %vm12998_vm0, %v3842_v7, 0.0  ;;  %v3836_v22 = vsel %vm12093_vm7, %v12128_v32, 0.0 }
 0x62d   : > { %v3852_v15 = vadd.f32 %v3851_v34, %v3850_v52  ;;  %v3845_v54 = vmul.f32 %v3835_v19, %v3835_v19  ;;  %v3857_v35 = vsel %vm12998_vm0, %v3843_v57, 0.0  ;;  %v3837_v56 = vsel %vm12097_vm12, %v12130_v53, 0.0 }
 0x62e   : > { %v3846_v28 = vmul.f32 %v3836_v22, %v3836_v22  ;;  %v3859_v41 = vsel %vm12998_vm0, %v3844_v31, 0.0  ;;  %v3847_v24 = vmul.f32 %v3837_v56, %v3837_v56  ;;  %vm13012_vm13 = vcmask 123904  }
 0x62f   : > { %v3854_v23 = vadd.f32 %v3853_v20, %v3852_v15  ;;  %v3861_v63 = vsel %vm12998_vm0, %v3845_v54, 0.0  ;;  %vm3905_vm1 = vcmask 125955   ;;  %vm3907_vm3 = vcmask 122880  }
 0x630   : > { %v3863_v30 = vsel %vm12998_vm0, %v3846_v28, 0.0  ;;  %v3865_v5 = vsel %vm12999_vm4, %v3847_v24, 0.0  ;;  %vm13006_vm5 = vcmask 125952   ;;  %vm13007_vm4 = vcmask 124930  }
 0x631   : > { %v3856_v13 = vadd.f32 %v3855_v49, %v3854_v23  ;;  %vm3921_vm12 = vcmask 130054   ;;  %vm13013_vm7 = vcmask 130055   ;;  %vm13010_vm2 = vcmask 126980  }
 0x632   : > { %vm13190_vm0 = vcmask 130048   ;;  %vm13192_vm8 = vcmask 130048  }
 0x633   : > { %v3858_v12 = vadd.f32 %v3857_v35, %v3856_v13 }
 0x635   : > { %v3860_v27 = vadd.f32 %v3859_v41, %v3858_v12 }
 0x637   : > { %v3862_v17 = vadd.f32 %v3861_v63, %v3860_v27 }
 0x639   : > { %v3864_v44 = vadd.f32 %v3863_v30, %v3862_v17 }
 0x63b   : > { %v3866_v55 = vadd.f32 %v3865_v5, %v3864_v44  ;;  %v10522_v44 = vld [vmem:[%s12977_s3 + $0x10] sm:$0xff]  }
 0x63d   : > { %v3867_v36 = vrot.slane %v3866_v55, 4 }
 0x63f   : > { %v3868_v21 = vadd.f32 %v3867_v36, %v3866_v55 }
 0x641   : > { %v3869_v4 = vrot.slane %v3868_v21, 2 }
 0x643   : > { %v3870_v18 = vadd.f32 %v3869_v4, %v3868_v21 }
 0x645   : > { %v3871_v60 = vrot.slane %v3870_v18, 1 }
 0x647   : > { %v3872_v0 = vadd.f32 %v3871_v60, %v3870_v18 }
 0x649   : > { %v3873_v10 = vmul.f32 0.015625, %v3872_v0 }
 0x64b   : > { %v3874_v45 = vadd.f32 1e-05, %v3873_v10 }
 0x64d   : > { %10576 = vrsqrt.f32 %v3874_v45 }
 0x657   : > { %v10577_v48 = vpop.eup %10576 }
 0x658   : > { %v3876_v46 = vmul.f32 %v10577_v48, %v12108_v42  ;;  %v3877_v61 = vmul.f32 %v10577_v48, %v12111_v47  ;;  %v3878_v6 = vmul.f32 %v10577_v48, %v12114_v25  ;;  %v3879_v50 = vmul.f32 %v10577_v48, %v12117_v62 }
 0x659   : > { %v3880_v52 = vmul.f32 %v10577_v48, %v12120_v38  ;;  %v3881_v7 = vmul.f32 %v10577_v48, %v12122_v58  ;;  %v3882_v34 = vmul.f32 %v10577_v48, %v12124_v33  ;;  %v3883_v51 = vmul.f32 %v10577_v48, %v12126_v9  ;;  %v10521_v9 = vld [vmem:[%s12977_s3] sm:$0xff]  }
 0x65a   : > { %v3884_v15 = vmul.f32 %v10577_v48, %v12128_v32  ;;  %v3885_v57 = vmul.f32 %v10577_v48, %v12130_v53  ;;  %v3886_v20 = vmax.f32 %v3876_v46, 0.0  ;;  %v3887_v42 = vmax.f32 %v3877_v61, 0.0 }
 0x65b   : > { %v3888_v19 = vmax.f32 %v3878_v6, 0.0  ;;  %v3889_v47 = vmax.f32 %v3879_v50, 0.0  ;;  %v3890_v23 = vmax.f32 %v3880_v52, 0.0  ;;  %v3891_v25 = vmax.f32 %v3881_v7, 0.0  ;;  %v10523_v52 = vld [vmem:[%s12977_s3 + $0x18] sm:$0xff]  }
 0x65c   : > { %v3892_v31 = vmax.f32 %v3882_v34, 0.0  ;;  %v3893_v62 = vmax.f32 %v3883_v51, 0.0  ;;  %v3894_v49 = vmax.f32 %v3884_v15, 0.0  ;;  %v3895_v38 = vmax.f32 %v3885_v57, 0.0  ;;  %3896 = vst.msk [vmem:[#allocation3 + $0xb] sm:$0xff] %vm13190_vm0, %v3886_v20 }
 0x65d   : > { %3898 = vst.msk [vmem:[#allocation3 + $0x9] sm:$0x2] %vm13009_vm9, %v3886_v20  ;;  %vm13191_vm0 = vcmask 128000   ;;  %3929 = vst.msk [vmem:[#allocation3 + $0x31] sm:$0x2] %vm13009_vm9, %v3891_v25  ;;  %vm13198_vm9 = vcmask 124930  }
 0x65e   : > { %3900 = vst.msk [vmem:[#allocation3 + $0xd] sm:$0x40] %vm13008_vm14, %v3886_v20  ;;  %3930 = vst.msk [vmem:[#allocation3 + $0x35] sm:$0x40] %vm13008_vm14, %v3891_v25 }
 0x65f   : > { %3902 = vst.msk [vmem:[#allocation3 + $0x13] sm:$0xfc] %vm13011_vm11, %v3887_v42  ;;  %3909 = vst.msk [vmem:[#allocation3 - $0x1] sm:$0xfc] %vm13011_vm11, %v3887_v42 }
 0x660   : > { %3906 = vst.msk [vmem:[#allocation3 + $0x11] sm:$0x8] %vm3905_vm1, %v3887_v42  ;;  %3911 = vst.msk [vmem:[#allocation3 - $0x3] sm:$0x8] %vm3905_vm1, %v3887_v42 }
 0x661   : > { %3910 = vst.msk [vmem:[#allocation3 + $0x7] sm:$0x3] %vm13012_vm13, %v3888_v19  ;;  %3904 = vst.msk [vmem:[#allocation3 + $0x1b] sm:$0x3] %vm13012_vm13, %v3888_v19 }
 0x662   : > { %3912 = vst.msk [vmem:[#allocation3 + $0x9] sm:$0x1] %vm3907_vm3, %v3888_v19  ;;  %3908 = vst.msk [vmem:[#allocation3 + $0x1d] sm:$0x1] %vm3907_vm3, %v3888_v19 }
 0x663   : > { %3916 = vst.msk [vmem:[#allocation3 + $0x23] sm:$0xf] %vm13006_vm5, %v3889_v47  ;;  %vm13193_vm5 = vcmask 130052  }
 0x664   : > { %3920 = vst.msk [vmem:[#allocation3 + $0x25] sm:$0x4] %vm13007_vm4, %v3889_v47  ;;  %vm13194_vm4 = vcmask 128005   ;;  %v4171_v50 = vld [vmem:[#allocation3 + $0xa] sm:$0xff] }
 0x665   : > { %3922 = vst.msk [vmem:[#allocation3 + $0x23] sm:$0xc0] %vm3921_vm12, %v3889_v47  ;;  %vm13197_vm14 = vmmov %vm13194_vm4 }
 0x666   : > { %3923 = vst.msk [vmem:[#allocation3 + $0x2b] sm:$0x3f] %vm13191_vm0, %v3890_v23  ;;  %vm13196_vm0 = vcmask 125952  }
 0x667   : > { %3925 = vst.msk [vmem:[#allocation3 + $0x21] sm:$0x80] %vm13013_vm7, %v3889_v47  ;;  %3945 = vst.msk [vmem:[#allocation3 + $0x49] sm:$0x80] %vm13013_vm7, %v3894_v49  ;;  %v3966_v53 = vld [vmem:[#allocation3 + $0x11] sm:$0xff] }
 0x668   : > { %3927 = vst.msk [vmem:[#allocation3 + $0x2d] sm:$0x10] %vm13010_vm2, %v3890_v23  ;;  %vm13199_vm2 = vmmov %vm13193_vm5  ;;  %v3964_v58 = vld [vmem:[#allocation3 + $0x1] sm:$0xff]  ;;  %v3949_v55 = vld [vmem:[#allocation3 + $0x10] sm:$0xff] }
 0x669   : > { %3928 = vst.msk [vmem:[#allocation3 + $0x33] sm:$0xff] %vm13192_vm8, %v3891_v25  ;;  %vm13195_vm8 = vmmov %vm13193_vm5  ;;  %v3965_v33 = vld [vmem:[#allocation3 + $0x9] sm:$0xff]  ;;  %v3947_v17 = vld [vmem:[#allocation3] sm:$0xff] }
 0x66a   : > { %3914 = vst.msk [vmem:[#allocation3 + $0x1b] sm:$0xf0] %vm13193_vm5, %v3888_v19  ;;  %vm13200_vm5 = vmmov %vm13196_vm0  ;;  %v3974_v32 = vpack.c.bf16 %v3965_v33, %v3964_v58  ;;  %v3948_v30 = vld [vmem:[#allocation3 + $0x8] sm:$0xff]  ;;  %v4172_v34 = vld [vmem:[#allocation3 + $0x12] sm:$0xff] }
 0x66b   : > { %3918 = vst.msk [vmem:[#allocation3 + $0x19] sm:$0x20] %vm13194_vm4, %v3888_v19  ;;  %3941 = vst.msk [vmem:[#allocation3 + $0x55] sm:$0x20] %vm13194_vm4, %v3893_v62  ;;  %v3957_v5 = vpack.c.bf16 %v3948_v30, %v3947_v17  ;;  %v4170_v6 = vld [vmem:[#allocation3 + $0x2] sm:$0xff] }
 0x66c   : > { %3931 = vst.msk [vmem:[#allocation3 + $0x3b] sm:$0xfc] %vm13011_vm11, %v3892_v31  ;;  %vm13201_vm11 = vmmov %vm13198_vm9  ;;  %v4180_v7 = vpack.c.bf16 %v4171_v50, %v4170_v6 }
 0x66d   : > { %3932 = vst.msk [vmem:[#allocation3 + $0x43] sm:$0x3] %vm13012_vm13, %v3893_v62  ;;  %vm13202_vm13 = vcmask 128000   ;;  %v3969_v35 = vld [vmem:[#allocation3 + $0x29] sm:$0xff] }
 0x66e   : > { %3933 = vst.msk [vmem:[#allocation3 + $0x39] sm:$0x8] %vm3905_vm1, %v3892_v31  ;;  %v3952_v18 = vld [vmem:[#allocation3 + $0x28] sm:$0xff] }
 0x66f   : > { %3934 = vst.msk [vmem:[#allocation3 + $0x45] sm:$0x1] %vm3907_vm3, %v3893_v62  ;;  %v4175_v20 = vld [vmem:[#allocation3 + $0x2a] sm:$0xff] }
 0x670   : > { %3935 = vst.msk [vmem:[#allocation3 + $0x43] sm:$0xf0] %vm13195_vm8, %v3893_v62  ;;  %vm13203_vm8 = vcmask 126980   ;;  %v3970_v12 = vld [vmem:[#allocation3 + $0x31] sm:$0xff] }
 0x671   : > { %3936 = vst.msk [vmem:[#allocation3 + $0x4b] sm:$0xf] %vm13196_vm0, %v3894_v49  ;;  %v3968_v54 = vld [vmem:[#allocation3 + $0x21] sm:$0xff]  ;;  %v3953_v0 = vld [vmem:[#allocation3 + $0x30] sm:$0xff] }
 0x672   : > { %3937 = vst.msk [vmem:[#allocation3 + $0x41] sm:$0x20] %vm13197_vm14, %v3893_v62  ;;  %v3967_v22 = vld [vmem:[#allocation3 + $0x19] sm:$0xff]  ;;  %v3976_v56 = vpack.c.bf16 %v3969_v35, %v3968_v54  ;;  %v4174_v57 = vld [vmem:[#allocation3 + $0x22] sm:$0xff] }
 0x673   : > { %3938 = vst.msk [vmem:[#allocation3 + $0x4d] sm:$0x4] %vm13198_vm9, %v3894_v49  ;;  %v3975_v13 = vpack.c.bf16 %v3967_v22, %v3966_v53  ;;  %v3950_v36 = vld [vmem:[#allocation3 + $0x18] sm:$0xff]  ;;  %v3951_v4 = vld [vmem:[#allocation3 + $0x20] sm:$0xff]  ;;  %v4182_v42 = vpack.c.bf16 %v4175_v20, %v4174_v57 }
 0x674   : > { %3939 = vst.msk [vmem:[#allocation3 + $0x57] sm:$0xf0] %vm13199_vm2, %v3893_v62  ;;  %vm13204_vm2 = vcmask 130048   ;;  %v3958_v21 = vpack.c.bf16 %v3950_v36, %v3949_v55  ;;  %v3959_v60 = vpack.c.bf16 %v3952_v18, %v3951_v4  ;;  %v4173_v51 = vld [vmem:[#allocation3 + $0x1a] sm:$0xff]  ;;  %v4176_v19 = vld [vmem:[#allocation3 + $0x32] sm:$0xff]  ;;  %v10526_v18 = vld [vmem:[%s12977_s3 + $0x30] sm:$0xff]  }
 0x675   : > { %3940 = vst.msk [vmem:[#allocation3 + $0x5f] sm:$0xf] %vm13200_vm5, %v3894_v49  ;;  %9183 = vmatmul.mubr.msk.bf16.vlgmr.msra.gmra.mrb[20].mxu1 %vm13204_vm2, %v3974_v32  ;;  %vm13206_vm9 = vmmov %vm13204_vm2  ;;  %v3971_v28 = vld [vmem:[#allocation3 + $0x39] sm:$0xff]  ;;  %v4181_v15 = vpack.c.bf16 %v4173_v51, %v4172_v34  ;;  %v4303_v58 = vpack.c.bf16 %v4174_v57, %v4173_v51  ;;  %v4304_v33 = vpack.c.bf16 %v4176_v19, %v4175_v20 }
 0x676   : > { %3942 = vst.msk [vmem:[#allocation3 + $0x61] sm:$0x4] %vm13201_vm11, %v3894_v49  ;;  %9203 = vmatpush3.bf16.msra.mxu1 %v10521_v9  ;;  %9186 = vmatprep.mubr.msk.bf16.mxu1 %vm13125_vm10, %v10650_v1  ;;  %v3977_v41 = vpack.c.bf16 %v3971_v28, %v3970_v12  ;;  %vm13207_vm14 = vmmov %vm13204_vm2  ;;  %v3954_v10 = vld [vmem:[#allocation3 + $0x38] sm:$0xff]  ;;  %v10525_v35 = vld [vmem:[%s12977_s3 + $0x28] sm:$0xff]  }
 0x677   : > { %3943 = vst.msk [vmem:[#allocation3 + $0x4b] sm:$0xc0] %vm3921_vm12, %v3894_v49  ;;  %9224 = vmatprep.subr.bf16.mxu1 %v10650_v1  ;;  %vm13208_vm11 = vmmov %vm13204_vm2  ;;  %v3960_v45 = vpack.c.bf16 %v3954_v10, %v3953_v0  ;;  %v4177_v47 = vld [vmem:[#allocation3 + $0x3a] sm:$0xff]  ;;  %v4417_v28 = vld [vmem:[#allocation3 + $0x23] sm:$0xff] }
 0x678   : > { %3944 = vst.msk [vmem:[#allocation3 + $0x53] sm:$0x3f] %vm13202_vm13, %v3895_v38  ;;  %vm13205_vm13 = vmmov %vm13204_vm2  ;;  %v3973_v24 = vld [vmem:[#allocation3 + $0x49] sm:$0x3f]  ;;  %v4183_v23 = vpack.c.bf16 %v4177_v47, %v4176_v19  ;;  %v10524_v49 = vld [vmem:[%s12977_s3 + $0x20] sm:$0xff]  }
 0x679   : > { %3946 = vst.msk [vmem:[#allocation3 + $0x55] sm:$0x10] %vm13203_vm8, %v3895_v38  ;;  %v3972_v27 = vld [vmem:[#allocation3 + $0x41] sm:$0xff]  ;;  %vm13209_vm0 = vmmov %vm13204_vm2  ;;  %v4302_v38 = vpack.c.bf16 %v4172_v34, %v4171_v50  ;;  %v4415_v54 = vld [vmem:[#allocation3 + $0x13] sm:$0xff] }
 0x67a   : > { %v3978_v63 = vpack.c.bf16 %v3973_v24, %v3972_v27  ;;  %vm13210_vm5 = vmmov %vm13209_vm0  ;;  %v3955_v48 = vld [vmem:[#allocation3 + $0x40] sm:$0xff]  ;;  %v3956_v46 = vld [vmem:[#allocation3 + $0x48] sm:$0x3f] }
 0x67b   : > { %vm13211_vm4 = vmmov %vm13209_vm0  ;;  %v3961_v61 = vpack.c.bf16 %v3956_v46, %v3955_v48  ;;  %v4178_v25 = vld [vmem:[#allocation3 + $0x42] sm:$0xff]  ;;  %v4179_v31 = vld [vmem:[#allocation3 + $0x4a] sm:$0x3f] }
 0x67c   : > { %vm13212_vm8 = vmmov %vm13209_vm0  ;;  %v4184_v62 = vpack.c.bf16 %v4179_v31, %v4178_v25  ;;  %v4305_v9 = vpack.c.bf16 %v4178_v25, %v4177_v47  ;;  %v4416_v12 = vld [vmem:[#allocation3 + $0x1b] sm:$0xff]  ;;  %v4418_v27 = vld [vmem:[#allocation3 + $0x2b] sm:$0xff] }
 0x67d   : > { %9187 = vmatmul.mubr.msk.bf16.gmra.mrb[24].mxu1 %vm13205_vm13, %v3975_v13  ;;  %vm13213_vm2 = vmmov %vm13209_vm0  ;;  %v4414_v13 = vld [vmem:[#allocation3 + $0xb] sm:$0xff]  ;;  %v4419_v24 = vld [vmem:[#allocation3 + $0x33] sm:$0xff] }
 0x67e   : > { %9190 = vmatprep.mubr.msk.bf16.mxu1 %vm13125_vm10, %v10650_v1  ;;  %vm13214_vm13 = vmmov %vm13209_vm0  ;;  %v4300_v32 = vld [vmem:[#allocation3 + $0x4a] sm:$0xff]  ;;  %v4420_v17 = vld [vmem:[#allocation3 + $0x3b] sm:$0xff] }
 0x67f   : > { %v4301_v53 = vld [vmem:[#allocation3 + $0x52] sm:$0x3f]  ;;  %v4421_v30 = vld [vmem:[#allocation3 + $0x43] sm:$0xff] }
 0x680   : > { %v4306_v22 = vpack.c.bf16 %v4301_v53, %v4300_v32  ;;  %v4423_v55 = vld [vmem:[#allocation3 + $0x53] sm:$0x3f]  ;;  %v4538_v0 = vld [vmem:[#allocation3 + $0x1c] sm:$0xff]  ;;  %v4539_v10 = vld [vmem:[#allocation3 + $0x24] sm:$0xff] }
 0x681   : > { %v4537_v4 = vld [vmem:[#allocation3 + $0x14] sm:$0xff]  ;;  %v4540_v48 = vld [vmem:[#allocation3 + $0x2c] sm:$0xff]  ;;  %v4542_v6 = vld [vmem:[#allocation3 + $0x3c] sm:$0xff] }
 0x682   : > { %v4541_v46 = vld [vmem:[#allocation3 + $0x34] sm:$0xff]  ;;  %v4543_v50 = vld [vmem:[#allocation3 + $0x44] sm:$0xff]  ;;  %v4668_v57 = vpack.c.bf16 %v4538_v0, %v4537_v4  ;;  %v4669_v20 = vpack.c.bf16 %v4540_v48, %v4539_v10 }
 0x683   : > { %v4545_v34 = vld [vmem:[#allocation3 + $0x54] sm:$0x3f]  ;;  %v4785_v53 = vld [vmem:[#allocation3 + $0x3d] sm:$0xff] }
 0x684   : > { %v4666_v47 = vld [vmem:[#allocation3 + $0x54] sm:$0xff] }
 0x685   : > { %9191 = vmatmul.mubr.msk.bf16.gmra.mrb[28].mxu1 %vm13206_vm9, %v3976_v56  ;;  %vm13215_vm9 = vmmov %vm13209_vm0  ;;  %v4424_v56 = vpack.c.bf16 %v4415_v54, %v4414_v13  ;;  %v4780_v31 = vld [vmem:[#allocation3 + $0x15] sm:$0xff]  ;;  %v4786_v13 = vld [vmem:[#allocation3 + $0x45] sm:$0xff] }
 0x686   : > { %9194 = vmatprep.mubr.msk.bf16.mxu1 %vm13125_vm10, %v10650_v1  ;;  %v4784_v32 = vld [vmem:[#allocation3 + $0x35] sm:$0xff]  ;;  %v4787_v54 = vld [vmem:[#allocation3 + $0x4d] sm:$0xff] }
 0x68d   : > { %9195 = vmatmul.mubr.msk.bf16.gmra.mrb[32].mxu1 %vm13207_vm14, %v3977_v41  ;;  %vm13216_vm14 = vmmov %vm13209_vm0  ;;  %v4425_v41 = vpack.c.bf16 %v4417_v28, %v4416_v12  ;;  %v4789_v12 = vld [vmem:[#allocation3 + $0x5d] sm:$0x3f] }
 0x68e   : > { %9198 = vmatprep.mubr.msk.bf16.mxu1 %vm13125_vm10, %v10650_v1 }
 0x695   : > { %9199 = vmatmul.mubr.msk.bf16.gmra.mrb[36].mxu1 %vm13208_vm11, %v3978_v63  ;;  %vm13217_vm11 = vmmov %vm13209_vm0  ;;  %v4426_v63 = vpack.c.bf16 %v4419_v24, %v4418_v27  ;;  %v4903_v27 = vld [vmem:[#allocation3 + $0x1e] sm:$0xff] }
 0x696   : > { %9204 = vmatprep.mubr.msk.bf16.mxu1 %vm13125_vm10, %v10650_v1 }
 0x69d   : > { %9205 = vmatmul.mubr.msk.bf16.vlgmr.msra.gmra.mrb[20].mxu1 %vm13209_vm0, %v3957_v5  ;;  %v4422_v5 = vld [vmem:[#allocation3 + $0x4b] sm:$0xff] }
 0x69e   : > { %9225 = vmatpush3.bf16.msra.mxu1 %v10522_v44  ;;  %9208 = vmatprep.mubr.msk.bf16.mxu1 %vm13125_vm10, %v10650_v1  ;;  %v4427_v44 = vpack.c.bf16 %v4421_v30, %v4420_v17  ;;  %v4428_v36 = vpack.c.bf16 %v4423_v55, %v4422_v5  ;;  %v4905_v17 = vld [vmem:[#allocation3 + $0x2e] sm:$0xff]  ;;  %v4907_v5 = vld [vmem:[#allocation3 + $0x3e] sm:$0xff] }
 0x69f   : > { %9246 = vmatprep.subr.bf16.mxu1 %v10650_v1 }
 0x6a5   : > { %9209 = vmatmul.mubr.msk.bf16.gmra.mrb[24].mxu1 %vm13210_vm5, %v3958_v21  ;;  %vm13218_vm5 = vmmov %vm13209_vm0  ;;  %v4536_v21 = vld [vmem:[#allocation3 + $0xc] sm:$0xff] }
 0x6a6   : > { %9212 = vmatprep.mubr.msk.bf16.mxu1 %vm13125_vm10, %v10650_v1 }
 0x6ad   : > { %9213 = vmatmul.mubr.msk.bf16.gmra.mrb[28].mxu1 %vm13211_vm4, %v3959_v60  ;;  %vm13219_vm4 = vmmov %vm13209_vm0  ;;  %v4546_v60 = vpack.c.bf16 %v4537_v4, %v4536_v21  ;;  %v4909_v21 = vld [vmem:[#allocation3 + $0x4e] sm:$0xff] }
 0x6ae   : > { %9216 = vmatprep.mubr.msk.bf16.mxu1 %vm13125_vm10, %v10650_v1 }
 0x6b5   : > { %9217 = vmatmul.mubr.msk.bf16.gmra.mrb[32].mxu1 %vm13212_vm8, %v3960_v45  ;;  %vm13220_vm8 = vmmov %vm13209_vm0  ;;  %v4547_v45 = vpack.c.bf16 %v4539_v10, %v4538_v0  ;;  %v10529_v10 = vld [vmem:[%s12978_s4 + $0x8] sm:$0xff]  }
 0x6b6   : > { %9220 = vmatprep.mubr.msk.bf16.mxu1 %vm13125_vm10, %v10650_v1  ;;  %9379 = vmatpush3.bf16.msra.mxu0 %v10529_v10 }
 0x6b7   : > { %9392 = vmatprep.subr.bf16.mxu0 %v10650_v1 }
 0x6bd   : > { %9221 = vmatmul.mubr.msk.bf16.gmra.mrb[36].mxu1 %vm13213_vm2, %v3961_v61  ;;  %vm13221_vm2 = vmmov %vm13209_vm0  ;;  %v4548_v61 = vpack.c.bf16 %v4541_v46, %v4540_v48 }
 0x6be   : > { %9226 = vmatprep.mubr.msk.bf16.mxu1 %vm13125_vm10, %v10650_v1 }
 0x6c5   : > { %9227 = vmatmul.mubr.msk.bf16.vlgmr.msra.gmra.mrb[20].mxu1 %vm13214_vm13, %v4180_v7  ;;  %vm13222_vm13 = vmmov %vm13209_vm0  ;;  %v4544_v7 = vld [vmem:[#allocation3 + $0x4c] sm:$0xff] }
 0x6c6   : > { %9247 = vmatpush3.bf16.msra.mxu1 %v10523_v52  ;;  %9230 = vmatprep.mubr.msk.bf16.mxu1 %vm13125_vm10, %v10650_v1  ;;  %v4549_v52 = vpack.c.bf16 %v4543_v50, %v4542_v6  ;;  %v4550_v51 = vpack.c.bf16 %v4545_v34, %v4544_v7  ;;  %v4671_v19 = vpack.c.bf16 %v4544_v7, %v4543_v50 }
 0x6c7   : > { %9268 = vmatprep.subr.bf16.mxu1 %v10650_v1 }
 0x6cd   : > { %9231 = vmatmul.mubr.msk.bf16.gmra.mrb[24].mxu1 %vm13215_vm9, %v4181_v15  ;;  %vm13223_vm9 = vmmov %vm13209_vm0  ;;  %v10527_v15 = vld [vmem:[%s12977_s3 + $0x38] sm:$0xff]  }
 0x6ce   : > { %9234 = vmatprep.mubr.msk.bf16.mxu1 %vm13125_vm10, %v10650_v1 }
 0x6d5   : > { %9235 = vmatmul.mubr.msk.bf16.gmra.mrb[28].mxu1 %vm13216_vm14, %v4182_v42  ;;  %vm13224_vm14 = vmmov %vm13209_vm0  ;;  %v4670_v42 = vpack.c.bf16 %v4542_v6, %v4541_v46 }
 0x6d6   : > { %9238 = vmatprep.mubr.msk.bf16.mxu1 %vm13125_vm10, %v10650_v1 }
 0x6dd   : > { %9239 = vmatmul.mubr.msk.bf16.gmra.mrb[32].mxu1 %vm13217_vm11, %v4183_v23  ;;  %vm13225_vm11 = vmmov %vm13209_vm0  ;;  %v4667_v23 = vld [vmem:[#allocation3 + $0x5c] sm:$0x3f] }
 0x6de   : > { %9242 = vmatprep.mubr.msk.bf16.mxu1 %vm13125_vm10, %v10650_v1  ;;  %v4672_v25 = vpack.c.bf16 %v4667_v23, %v4666_v47 }
 0x6e5   : > { %9243 = vmatmul.mubr.msk.bf16.gmra.mrb[36].mxu1 %vm13209_vm0, %v4184_v62  ;;  %v4781_v62 = vld [vmem:[#allocation3 + $0x1d] sm:$0xff] }
 0x6e6   : > { %9248 = vmatprep.mubr.msk.bf16.mxu1 %vm13125_vm10, %v10650_v1 }
 0x6ed   : > { %9249 = vmatmul.mubr.msk.bf16.vlgmr.msra.gmra.mrb[20].mxu1 %vm13218_vm5, %v4302_v38  ;;  %vm13226_vm5 = vmmov %vm13209_vm0  ;;  %v4790_v38 = vpack.c.bf16 %v4781_v62, %v4780_v31 }
 0x6ee   : > { %9269 = vmatpush3.bf16.msra.mxu1 %v10524_v49  ;;  %9252 = vmatprep.mubr.msk.bf16.mxu1 %vm13125_vm10, %v10650_v1  ;;  %v10528_v49 = vld [vmem:[%s12977_s3 + $0x40] sm:$0xff]  }
 0x6ef   : > { %9290 = vmatprep.subr.bf16.mxu1 %v10650_v1 }
 0x6f5   : > { %9253 = vmatmul.mubr.msk.bf16.gmra.mrb[24].mxu1 %vm13219_vm4, %v4303_v58  ;;  %vm13227_vm4 = vmmov %vm13209_vm0  ;;  %v4782_v58 = vld [vmem:[#allocation3 + $0x25] sm:$0xff] }
 0x6f6   : > { %9256 = vmatprep.mubr.msk.bf16.mxu1 %vm13125_vm10, %v10650_v1 }
 0x6fd   : > { %9257 = vmatmul.mubr.msk.bf16.gmra.mrb[28].mxu1 %vm13220_vm8, %v4304_v33  ;;  %vm13228_vm8 = vmmov %vm13209_vm0  ;;  %v4783_v33 = vld [vmem:[#allocation3 + $0x2d] sm:$0xff] }
 0x6fe   : > { %9260 = vmatprep.mubr.msk.bf16.mxu1 %vm13125_vm10, %v10650_v1 }
 0x705   : > { %9261 = vmatmul.mubr.msk.bf16.gmra.mrb[32].mxu1 %vm13221_vm2, %v4305_v9  ;;  %vm13229_vm2 = vmmov %vm13209_vm0  ;;  %v4791_v9 = vpack.c.bf16 %v4783_v33, %v4782_v58 }
 0x706   : > { %9264 = vmatprep.mubr.msk.bf16.mxu1 %vm13125_vm10, %v10650_v1 }
 0x70d   : > { %9265 = vmatmul.mubr.msk.bf16.gmra.mrb[36].mxu1 %vm13222_vm13, %v4306_v22  ;;  %vm13230_vm13 = vmmov %vm13209_vm0  ;;  %v4792_v22 = vpack.c.bf16 %v4785_v53, %v4784_v32 }
 0x70e   : > { %9270 = vmatprep.mubr.msk.bf16.mxu1 %vm13125_vm10, %v10650_v1 }
 0x715   : > { %9271 = vmatmul.mubr.msk.bf16.vlgmr.msra.gmra.mrb[20].mxu1 %vm13223_vm9, %v4424_v56  ;;  %vm13231_vm9 = vmmov %vm13209_vm0  ;;  %v4788_v56 = vld [vmem:[#allocation3 + $0x55] sm:$0xff] }
 0x716   : > { %9291 = vmatpush3.bf16.msra.mxu1 %v10525_v35  ;;  %9274 = vmatprep.mubr.msk.bf16.mxu1 %vm13125_vm10, %v10650_v1  ;;  %v4793_v35 = vpack.c.bf16 %v4787_v54, %v4786_v13  ;;  %v4794_v28 = vpack.c.bf16 %v4789_v12, %v4788_v56 }
 0x717   : > { %9312 = vmatprep.subr.bf16.mxu1 %v10650_v1 }
 0x71d   : > { %9275 = vmatmul.mubr.msk.bf16.gmra.mrb[24].mxu1 %vm13224_vm14, %v4425_v41  ;;  %vm13232_vm14 = vmmov %vm13209_vm0  ;;  %v4902_v41 = vld [vmem:[#allocation3 + $0x16] sm:$0xff] }
 0x71e   : > { %9278 = vmatprep.mubr.msk.bf16.mxu1 %vm13125_vm10, %v10650_v1  ;;  %v4912_v24 = vpack.c.bf16 %v4903_v27, %v4902_v41 }
 0x725   : > { %9279 = vmatmul.mubr.msk.bf16.gmra.mrb[28].mxu1 %vm13225_vm11, %v4426_v63  ;;  %vm13233_vm11 = vmmov %vm13209_vm0  ;;  %v4904_v63 = vld [vmem:[#allocation3 + $0x26] sm:$0xff] }
 0x726   : > { %9282 = vmatprep.mubr.msk.bf16.mxu1 %vm13125_vm10, %v10650_v1  ;;  %v4913_v30 = vpack.c.bf16 %v4905_v17, %v4904_v63 }
 0x72d   : > { %9283 = vmatmul.mubr.msk.bf16.gmra.mrb[32].mxu1 %vm13209_vm0, %v4427_v44  ;;  %v4906_v44 = vld [vmem:[#allocation3 + $0x36] sm:$0xff] }
 0x72e   : > { %9286 = vmatprep.mubr.msk.bf16.mxu1 %vm13125_vm10, %v10650_v1  ;;  %v4914_v55 = vpack.c.bf16 %v4907_v5, %v4906_v44 }
 0x735   : > { %9287 = vmatmul.mubr.msk.bf16.gmra.mrb[36].mxu1 %vm13226_vm5, %v4428_v36  ;;  %vm13234_vm5 = vmmov %vm13209_vm0  ;;  %v4908_v36 = vld [vmem:[#allocation3 + $0x46] sm:$0xff] }
 0x736   : > { %9292 = vmatprep.mubr.msk.bf16.mxu1 %vm13125_vm10, %v10650_v1  ;;  %v4915_v4 = vpack.c.bf16 %v4909_v21, %v4908_v36 }
 0x73d   : > { %9293 = vmatmul.mubr.msk.bf16.vlgmr.msra.gmra.mrb[20].mxu1 %vm13227_vm4, %v4546_v60  ;;  %vm13235_vm4 = vmmov %vm13209_vm0  ;;  %v4911_v60 = vld [vmem:[#allocation3 + $0x5e] sm:$0x3f] }
 0x73e   : > { %9313 = vmatpush3.bf16.msra.mxu1 %v10526_v18  ;;  %9296 = vmatprep.mubr.msk.bf16.mxu1 %vm13125_vm10, %v10650_v1  ;;  %v4910_v18 = vld [vmem:[#allocation3 + $0x56] sm:$0xff] }
 0x73f   : > { %9334 = vmatprep.subr.bf16.mxu1 %v10650_v1  ;;  %v4916_v0 = vpack.c.bf16 %v4911_v60, %v4910_v18 }
 0x745   : > { %9297 = vmatmul.mubr.msk.bf16.gmra.mrb[24].mxu1 %vm13228_vm8, %v4547_v45  ;;  %vm13236_vm8 = vmmov %vm13209_vm0 }
 0x746   : > { %9300 = vmatprep.mubr.msk.bf16.mxu1 %vm13125_vm10, %v10650_v1 }
 0x74d   : > { %9301 = vmatmul.mubr.msk.bf16.gmra.mrb[28].mxu1 %vm13229_vm2, %v4548_v61  ;;  %vm13237_vm2 = vmmov %vm13209_vm0 }
 0x74e   : > { %9304 = vmatprep.mubr.msk.bf16.mxu1 %vm13125_vm10, %v10650_v1 }
 0x755   : > { %9305 = vmatmul.mubr.msk.bf16.gmra.mrb[32].mxu1 %vm13230_vm13, %v4549_v52  ;;  %vm13238_vm13 = vmmov %vm13209_vm0 }
 0x756   : > { %9308 = vmatprep.mubr.msk.bf16.mxu1 %vm13125_vm10, %v10650_v1 }
 0x75d   : > { %9309 = vmatmul.mubr.msk.bf16.gmra.mrb[36].mxu1 %vm13231_vm9, %v4550_v51  ;;  %vm13239_vm9 = vmmov %vm13209_vm0 }
 0x75e   : > { %9314 = vmatprep.mubr.msk.bf16.mxu1 %vm13125_vm10, %v10650_v1 }
 0x765   : > { %9315 = vmatmul.mubr.msk.bf16.vlgmr.msra.gmra.mrb[20].mxu1 %vm13232_vm14, %v4668_v57  ;;  %vm13240_vm14 = vmmov %vm13209_vm0 }
 0x766   : > { %9335 = vmatpush3.bf16.msra.mxu1 %v10527_v15  ;;  %9318 = vmatprep.mubr.msk.bf16.mxu1 %vm13125_vm10, %v10650_v1 }
 0x767   : > { %9356 = vmatprep.subr.bf16.mxu1 %v10650_v1 }
 0x76d   : > { %9319 = vmatmul.mubr.msk.bf16.gmra.mrb[24].mxu1 %vm13233_vm11, %v4669_v20  ;;  %vm13241_vm11 = vmmov %vm13209_vm0 }
 0x76e   : > { %9322 = vmatprep.mubr.msk.bf16.mxu1 %vm13125_vm10, %v10650_v1 }
 0x775   : > { %9323 = vmatmul.mubr.msk.bf16.gmra.mrb[28].mxu1 %vm13209_vm0, %v4670_v42 }
 0x776   : > { %9326 = vmatprep.mubr.msk.bf16.mxu1 %vm13125_vm10, %v10650_v1 }
 0x77d   : > { %9327 = vmatmul.mubr.msk.bf16.gmra.mrb[32].mxu1 %vm13234_vm5, %v4671_v19  ;;  %vm13242_vm5 = vmmov %vm13209_vm0 }
 0x77e   : > { %9330 = vmatprep.mubr.msk.bf16.mxu1 %vm13125_vm10, %v10650_v1 }
 0x785   : > { %9331 = vmatmul.mubr.msk.bf16.gmra.mrb[36].mxu1 %vm13235_vm4, %v4672_v25  ;;  %vm13243_vm4 = vmmov %vm13209_vm0 }
 0x786   : > { %9336 = vmatprep.mubr.msk.bf16.mxu1 %vm13125_vm10, %v10650_v1 }
 0x78d   : > { %9337 = vmatmul.mubr.msk.bf16.vlgmr.msra.gmra.mrb[20].mxu1 %vm13236_vm8, %v4790_v38  ;;  %vm13244_vm8 = vmmov %vm13209_vm0 }
 0x78e   : > { %9357 = vmatpush3.bf16.msra.mxu1 %v10528_v49  ;;  %9340 = vmatprep.mubr.msk.bf16.mxu1 %vm13125_vm10, %v10650_v1 }
 0x795   : > { %9341 = vmatmul.mubr.msk.bf16.gmra.mrb[24].mxu1 %vm13237_vm2, %v4791_v9  ;;  %vm13245_vm2 = vcmp.lt.s32.totalorder %v11986_v39, 8 }
 0x796   : > { %9344 = vmatprep.mubr.msk.bf16.mxu1 %vm13125_vm10, %v10650_v1 }
 0x79d   : > { %9345 = vmatmul.mubr.msk.bf16.gmra.mrb[28].mxu1 %vm13238_vm13, %v4792_v22  ;;  %vm13246_vm13 = vcmp.lt.s32.totalorder %v11993_v11, 8 }
 0x79e   : > { %9348 = vmatprep.mubr.msk.bf16.mxu1 %vm13125_vm10, %v10650_v1 }
 0x7a5   : > { %9349 = vmatmul.mubr.msk.bf16.gmra.mrb[32].mxu1 %vm13239_vm9, %v4793_v35  ;;  %vm13247_vm9 = vmmov %vm13209_vm0 }
 0x7a6   : > { %9352 = vmatprep.mubr.msk.bf16.mxu1 %vm13125_vm10, %v10650_v1 }
 0x7ad   : > { %9353 = vmatmul.mubr.msk.bf16.gmra.mrb[36].mxu1 %vm13240_vm14, %v4794_v28  ;;  %vm13248_vm14 = vmmov %vm13209_vm0 }
 0x7ae   : > { %9358 = vmatprep.mubr.msk.bf16.mxu1 %vm13125_vm10, %v10650_v1 }
 0x7b5   : > { %9359 = vmatmul.mubr.msk.bf16.vlgmr.msra.gmra.mrb[20].mxu1 %vm13241_vm11, %v4912_v24  ;;  %vm13249_vm11 = vcmp.lt.s32.totalorder %v12010_v26, 8 }
 0x7b6   : > { %9362 = vmatprep.mubr.msk.bf16.mxu1 %vm13125_vm10, %v10650_v1 }
 0x7bd   : > { %9363 = vmatmul.mubr.msk.bf16.gmra.mrb[24].mxu1 %vm13209_vm0, %v4913_v30 }
 0x7be   : > { %9366 = vmatprep.mubr.msk.bf16.mxu1 %vm13125_vm10, %v10650_v1 }
 0x7c5   : > { %9367 = vmatmul.mubr.msk.bf16.gmra.mrb[28].mxu1 %vm13242_vm5, %v4914_v55  ;;  %vm13250_vm5 = vcmp.lt.s32.totalorder %v12023_v40, 8 }
 0x7c6   : > { %9370 = vmatprep.mubr.msk.bf16.mxu1 %vm13125_vm10, %v10650_v1 }
 0x7cd   : > { %9371 = vmatmul.mubr.msk.bf16.gmra.mrb[32].mxu1 %vm13243_vm4, %v4915_v4  ;;  %vm13251_vm4 = vmmov %vm13209_vm0 }
 0x7ce   : > { %9374 = vmatprep.mubr.msk.bf16.mxu1 %vm13125_vm10, %v10650_v1 }
 0x7d5   : > { %9375 = vmatmul.mubr.msk.bf16.gmra.mrb[36].mxu1 %vm13244_vm8, %v4916_v0  ;;  %vm13252_vm8 = vcmp.lt.s32.totalorder %v12041_v29, 8 }
 0x888   : > { %v4975_v45 = vpop.f32.mrb[20].mxu1 }
 0x889   : > { %v5024_v48 = vsel %vm13245_vm2, %v4975_v45, 0.0  ;;  %v9360_v46 = vpop.f32.mrb[21].mxu1  ;;  %vm13253_vm2 = vmmov %vm13209_vm0 }
 0x88a   : > { %v4978_v61 = vpop.f32.mrb[22].mxu1  ;;  %v5034_v52 = vsel %vm13247_vm9, %v5024_v48, 0.0  ;;  %vm13255_vm9 = vmmov %vm13209_vm0 }
 0x88b   : > { %v5025_v6 = vsel %vm13246_vm13, %v4978_v61, 0.0  ;;  %v9361_v50 = vpop.f32.mrb[23].mxu1  ;;  %vm13254_vm13 = vmmov %vm13209_vm0 }
 0x88c   : > { %v5035_v7 = vsel %vm13248_vm14, %v5025_v6, 0.0  ;;  %vm13256_vm14 = vnez %v13185_v16 }
 0x88d   : > { %v5036_v34 = vadd.f32 %v5035_v7, %v5034_v52 }
 0x890   : > { %v4983_v51 = vpop.f32.mrb[24].mxu1 }
 0x891   : > { %v5026_v15 = vsel %vm13249_vm11, %v4983_v51, 0.0  ;;  %v9364_v57 = vpop.f32.mrb[25].mxu1  ;;  %vm13257_vm11 = vmmov %vm13209_vm0 }
 0x892   : > { %v5037_v20 = vsel %vm13209_vm0, %v5026_v15, 0.0  ;;  %v4986_v42 = vpop.f32.mrb[26].mxu1  ;;  %vm13258_vm0 = vnez %v13187_v59 }
 0x893   : > { %v5038_v19 = vadd.f32 %v5037_v20, %v5036_v34  ;;  %v5027_v47 = vsel %vm13250_vm5, %v4986_v42, 0.0  ;;  %v9365_v23 = vpop.f32.mrb[27].mxu1  ;;  %vm13259_vm5 = vmmov %vm13253_vm2 }
 0x894   : > { %v5039_v25 = vsel %vm13251_vm4, %v5027_v47, 0.0  ;;  %vm13260_vm4 = vnez %v13189_v43 }
 0x895   : > { %v5040_v31 = vadd.f32 %v5039_v25, %v5038_v19 }
 0x898   : > { %v4991_v62 = vpop.f32.mrb[28].mxu1 }
 0x899   : > { %v5028_v49 = vsel %vm13252_vm8, %v4991_v62, 0.0  ;;  %v9368_v38 = vpop.f32.mrb[29].mxu1  ;;  %vm13261_vm8 = vcmask 128000  }
 0x89a   : > { %v5041_v58 = vsel %vm13253_vm2, %v5028_v49, 0.0  ;;  %v4994_v33 = vpop.f32.mrb[30].mxu1  ;;  %vm13262_vm2 = vcmp.lt.s32.totalorder %v11986_v39, 8 }
 0x89b   : > { %v5042_v9 = vadd.f32 %v5041_v58, %v5040_v31  ;;  %v5029_v32 = vsel %vm12054_vm6, %v4994_v33, 0.0  ;;  %v9369_v53 = vpop.f32.mrb[31].mxu1 }
 0x89c   : > { %v5043_v22 = vsel %vm13254_vm13, %v5029_v32, 0.0  ;;  %vm13263_vm13 = vcmp.lt.s32.totalorder %v11993_v11, 8 }
 0x89d   : > { %v5044_v13 = vadd.f32 %v5043_v22, %v5042_v9 }
 0x8a0   : > { %v4999_v54 = vpop.f32.mrb[32].mxu1 }
 0x8a1   : > { %v5030_v35 = vsel %vm12079_vm15, %v4999_v54, 0.0  ;;  %v9372_v56 = vpop.f32.mrb[33].mxu1 }
 0x8a2   : > { %v5045_v12 = vsel %vm13255_vm9, %v5030_v35, 0.0  ;;  %v5002_v28 = vpop.f32.mrb[34].mxu1  ;;  %vm13264_vm9 = vcmp.lt.s32.totalorder %v12010_v26, 8 }
 0x8a3   : > { %v5046_v41 = vadd.f32 %v5045_v12, %v5044_v13  ;;  %v5031_v27 = vsel %vm13256_vm14, %v5002_v28, 0.0  ;;  %v9373_v24 = vpop.f32.mrb[35].mxu1 }
 0x8a4   : > { %v5047_v63 = vsel %vm13257_vm11, %v5031_v27, 0.0  ;;  %vm13265_vm11 = vcmp.lt.s32.totalorder %v12023_v40, 8 }
 0x8a5   : > { %v5048_v17 = vadd.f32 %v5047_v63, %v5046_v41 }
 0x8a8   : > { %v5007_v30 = vpop.f32.mrb[36].mxu1 }
 0x8a9   : > { %v5032_v44 = vsel %vm13258_vm0, %v5007_v30, 0.0  ;;  %v9376_v5 = vpop.f32.mrb[37].mxu1 }
 0x8aa   : > { %v5049_v55 = vsel %vm13259_vm5, %v5032_v44, 0.0  ;;  %v5010_v36 = vpop.f32.mrb[38].mxu1  ;;  %vm13266_vm5 = vcmp.lt.s32.totalorder %v12041_v29, 8 }
 0x8ab   : > { %v5050_v21 = vadd.f32 %v5049_v55, %v5048_v17  ;;  %v5033_v4 = vsel %vm13260_vm4, %v5010_v36, 0.0  ;;  %v9377_v18 = vpop.f32.mrb[39].mxu1 }
 0x8ac   : > { %v5051_v60 = vsel %vm13261_vm8, %v5033_v4, 0.0  ;;  %vm13267_vm8 = vcmask 130048  }
 0x8ad   : > { %v5052_v0 = vadd.f32 %v5051_v60, %v5050_v21  ;;  %vm13268_vm7 = vmmov %vm13267_vm8 }
 0x8af   : > { %v5053_v10 = vrot.slane %v5052_v0, 4 }
 0x8b1   : > { %v5054_v48 = vadd.f32 %v5053_v10, %v5052_v0 }
 0x8b3   : > { %v5055_v46 = vrot.slane %v5054_v48, 2 }
 0x8b5   : > { %v5056_v6 = vadd.f32 %v5055_v46, %v5054_v48 }
 0x8b7   : > { %v5057_v50 = vrot.slane %v5056_v6, 1 }
 0x8b9   : > { %v5058_v52 = vadd.f32 %v5057_v50, %v5056_v6 }
 0x8bb   : > { %v5059_v7 = vmul.f32 0.015625, %v5058_v52 }
 0x8bd   : > { %v5060_v34 = vsub.f32 %v4975_v45, %v5059_v7  ;;  %v5061_v15 = vsub.f32 %v4978_v61, %v5059_v7  ;;  %v5062_v57 = vsub.f32 %v4983_v51, %v5059_v7  ;;  %v5063_v20 = vsub.f32 %v4986_v42, %v5059_v7 }
 0x8be   : > { %v5064_v19 = vsub.f32 %v4991_v62, %v5059_v7  ;;  %v5065_v47 = vsub.f32 %v4994_v33, %v5059_v7  ;;  %v5066_v23 = vsub.f32 %v4999_v54, %v5059_v7  ;;  %v5067_v25 = vsub.f32 %v5002_v28, %v5059_v7 }
 0x8bf   : > { %v5068_v31 = vsub.f32 %v5007_v30, %v5059_v7  ;;  %v5069_v49 = vsub.f32 %v5010_v36, %v5059_v7  ;;  %v5070_v38 = vsel %vm13262_vm2, %v5060_v34, 0.0  ;;  %v5071_v58 = vsel %vm13263_vm13, %v5061_v15, 0.0  ;;  %vm13269_vm2 = vmmov %vm13268_vm7 }
 0x8c0   : > { %v5072_v9 = vsel %vm13264_vm9, %v5062_v57, 0.0  ;;  %v5073_v45 = vsel %vm13265_vm11, %v5063_v20, 0.0  ;;  %v5080_v61 = vmul.f32 %v5070_v38, %v5070_v38  ;;  %v5081_v51 = vmul.f32 %v5071_v58, %v5071_v58  ;;  %vm13270_vm13 = vmmov %vm13269_vm2 }
 0x8c1   : > { %v5082_v42 = vmul.f32 %v5072_v9, %v5072_v9  ;;  %v5074_v62 = vsel %vm13266_vm5, %v5064_v19, 0.0  ;;  %v5083_v33 = vmul.f32 %v5073_v45, %v5073_v45  ;;  %v5075_v22 = vsel %vm12054_vm6, %v5065_v47, 0.0  ;;  %vm13272_vm6 = vmmov %vm13269_vm2 }
 0x8c2   : > { %v5090_v32 = vsel %vm13267_vm8, %v5080_v61, 0.0  ;;  %v5091_v53 = vsel %vm13268_vm7, %v5081_v51, 0.0  ;;  %v5084_v54 = vmul.f32 %v5074_v62, %v5074_v62  ;;  %v5076_v56 = vsel %vm12079_vm15, %v5066_v23, 0.0  ;;  %vm13271_vm7 = vmmov %vm13269_vm2 }
 0x8c3   : > { %v5092_v13 = vadd.f32 %v5091_v53, %v5090_v32  ;;  %v5093_v35 = vsel %vm13269_vm2, %v5082_v42, 0.0  ;;  %v5085_v28 = vmul.f32 %v5075_v22, %v5075_v22  ;;  %v5095_v41 = vsel %vm13270_vm13, %v5083_v33, 0.0  ;;  %vm13273_vm15 = vmmov %vm13269_vm2 }
 0x8c4   : > { %v5077_v27 = vsel %vm13256_vm14, %v5067_v25, 0.0  ;;  %v5086_v63 = vmul.f32 %v5076_v56, %v5076_v56  ;;  %v5097_v17 = vsel %vm13271_vm7, %v5084_v54, 0.0  ;;  %v5078_v37 = vsel %vm13258_vm0, %v5068_v31, 0.0  ;;  %vm13274_vm14 = vmmov %vm13269_vm2 }
 0x8c5   : > { %v5094_v12 = vadd.f32 %v5093_v35, %v5092_v13  ;;  %v5087_v44 = vmul.f32 %v5077_v27, %v5077_v27  ;;  %v5099_v5 = vsel %vm13272_vm6, %v5085_v28, 0.0  ;;  %v5079_v14 = vsel %vm13260_vm4, %v5069_v49, 0.0  ;;  %vm13275_vm9 = vmmov %vm13269_vm2 }
 0x8c6   : > { %v5088_v36 = vmul.f32 %v5078_v37, %v5078_v37  ;;  %v5101_v21 = vsel %vm13273_vm15, %v5086_v63, 0.0  ;;  %v5089_v4 = vmul.f32 %v5079_v14, %v5079_v14  ;;  %vm13276_vm0 = vcmask 128000   ;;  %vm13277_vm4 = vmmov %vm13269_vm2 }
 0x8c7   : > { %v5096_v24 = vadd.f32 %v5095_v41, %v5094_v12  ;;  %v5103_v18 = vsel %vm13274_vm14, %v5087_v44, 0.0  ;;  %vm13278_vm11 = vcmask 123905   ;;  %vm13279_vm5 = vcmask 129030  }
 0x8c8   : > { %v5105_v0 = vsel %vm13275_vm9, %v5088_v36, 0.0  ;;  %v5107_v10 = vsel %vm13276_vm0, %v5089_v4, 0.0  ;;  %vm13280_vm8 = vcmask 130050   ;;  %vm13282_vm13 = vcmask 123904  }
 0x8c9   : > { %v5098_v30 = vadd.f32 %v5097_v17, %v5096_v24  ;;  %vm13281_vm2 = vmmov %vm13280_vm8  ;;  %vm13284_vm6 = vcmask 130052   ;;  %vm13285_vm15 = vcmask 125952   ;;  %vm13286_vm14 = vcmask 128005  }
 0x8ca   : > { %vm13283_vm7 = vmmov %vm13282_vm13  ;;  %vm13287_vm9 = vcmask 124930  }
 0x8cb   : > { %v5100_v55 = vadd.f32 %v5099_v5, %v5098_v30  ;;  %v10531_v30 = vld [vmem:[%s12978_s4 + $0x10] sm:$0xff]  }
 0x8cd   : > { %v5102_v16 = vadd.f32 %v5101_v21, %v5100_v55 }
 0x8cf   : > { %v5104_v60 = vadd.f32 %v5103_v18, %v5102_v16  ;;  %v10532_v18 = vld [vmem:[%s12978_s4 + $0x18] sm:$0xff]  }
 0x8d1   : > { %v5106_v59 = vadd.f32 %v5105_v0, %v5104_v60 }
 0x8d3   : > { %v5108_v48 = vadd.f32 %v5107_v10, %v5106_v59 }
 0x8d5   : > { %v5109_v46 = vrot.slane %v5108_v48, 4 }
 0x8d7   : > { %v5110_v6 = vadd.f32 %v5109_v46, %v5108_v48 }
 0x8d9   : > { %v5111_v50 = vrot.slane %v5110_v6, 2 }
 0x8db   : > { %v5112_v43 = vadd.f32 %v5111_v50, %v5110_v6 }
 0x8dd   : > { %v5113_v52 = vrot.slane %v5112_v43, 1 }
 0x8df   : > { %v5114_v7 = vadd.f32 %v5113_v52, %v5112_v43  ;;  %v10533_v43 = vld [vmem:[%s12978_s4 + $0x20] sm:$0xff]  }
 0x8e1   : > { %v5115_v38 = vmul.f32 0.015625, %v5114_v7 }
 0x8e3   : > { %v5116_v58 = vadd.f32 1e-05, %v5115_v38 }
 0x8e5   : > { %10578 = vrsqrt.f32 %v5116_v58 }
 0x8ef   : > { %v10579_v9 = vpop.eup %10578 }
 0x8f0   : > { %v5118_v45 = vmul.f32 %v10579_v9, %v5060_v34  ;;  %v5119_v61 = vmul.f32 %v10579_v9, %v5061_v15  ;;  %v5120_v51 = vmul.f32 %v10579_v9, %v5062_v57  ;;  %v5121_v42 = vmul.f32 %v10579_v9, %v5063_v20  ;;  %v10530_v57 = vld [vmem:[%s12978_s4] sm:$0xff]  }
 0x8f1   : > { %v5122_v62 = vmul.f32 %v10579_v9, %v5064_v19  ;;  %v5123_v33 = vmul.f32 %v10579_v9, %v5065_v47  ;;  %v5124_v32 = vmul.f32 %v10579_v9, %v5066_v23  ;;  %v5125_v53 = vmul.f32 %v10579_v9, %v5067_v25 }
 0x8f2   : > { %v5126_v22 = vmul.f32 %v10579_v9, %v5068_v31  ;;  %v5127_v13 = vmul.f32 %v10579_v9, %v5069_v49  ;;  %v5128_v54 = vmax.f32 %v5118_v45, 0.0  ;;  %v5129_v35 = vmax.f32 %v5119_v61, 0.0 }
 0x8f3   : > { %v5130_v56 = vmax.f32 %v5120_v51, 0.0  ;;  %v5131_v12 = vmax.f32 %v5121_v42, 0.0  ;;  %v5132_v28 = vmax.f32 %v5122_v62, 0.0  ;;  %v5133_v41 = vmax.f32 %v5123_v33, 0.0  ;;  %v10534_v42 = vld [vmem:[%s12978_s4 + $0x28] sm:$0xff]  }
 0x8f4   : > { %v5134_v27 = vmax.f32 %v5124_v32, 0.0  ;;  %v5135_v24 = vmax.f32 %v5125_v53, 0.0  ;;  %v5136_v63 = vmax.f32 %v5126_v22, 0.0  ;;  %v5137_v17 = vmax.f32 %v5127_v13, 0.0  ;;  %5138 = vst.msk [vmem:[#allocation4 + $0xb] sm:$0xff] %vm13277_vm4, %v5128_v54 }
 0x8f5   : > { %5139 = vst.msk [vmem:[#allocation4 + $0x9] sm:$0x2] %vm13278_vm11, %v5128_v54  ;;  %vm13288_vm4 = vcmask 130055   ;;  %vm13289_vm11 = vcmask 126980  }
 0x8f6   : > { %5140 = vst.msk [vmem:[#allocation4 + $0xd] sm:$0x40] %vm13279_vm5, %v5128_v54  ;;  %vm13290_vm5 = vcmask 130048  }
 0x8f7   : > { %5141 = vst.msk [vmem:[#allocation4 + $0x13] sm:$0xfc] %vm13280_vm8, %v5129_v35  ;;  %vm13291_vm8 = vcmask 123905  }
 0x8f8   : > { %5143 = vst.msk [vmem:[#allocation4 + $0x11] sm:$0x8] %vm3905_vm1, %v5129_v35  ;;  %5147 = vst.msk [vmem:[#allocation4 - $0x3] sm:$0x8] %vm3905_vm1, %v5129_v35 }
 0x8f9   : > { %5145 = vst.msk [vmem:[#allocation4 - $0x1] sm:$0xfc] %vm13281_vm2, %v5129_v35  ;;  %vm13292_vm2 = vcmask 129030  }
 0x8fa   : > { %5142 = vst.msk [vmem:[#allocation4 + $0x1b] sm:$0x3] %vm13282_vm13, %v5130_v56  ;;  %vm13293_vm13 = vcmask 130050  }
 0x8fb   : > { %5144 = vst.msk [vmem:[#allocation4 + $0x1d] sm:$0x1] %vm3907_vm3, %v5130_v56  ;;  %5148 = vst.msk [vmem:[#allocation4 + $0x9] sm:$0x1] %vm3907_vm3, %v5130_v56 }
 0x8fc   : > { %5146 = vst.msk [vmem:[#allocation4 + $0x7] sm:$0x3] %vm13283_vm7, %v5130_v56  ;;  %5161 = vst.msk [vmem:[#allocation4 + $0x43] sm:$0x3] %vm13283_vm7, %v5135_v24 }
 0x8fd   : > { %5149 = vst.msk [vmem:[#allocation4 + $0x1b] sm:$0xf0] %vm13284_vm6, %v5130_v56  ;;  %5164 = vst.msk [vmem:[#allocation4 + $0x43] sm:$0xf0] %vm13284_vm6, %v5135_v24 }
 0x8fe   : > { %5150 = vst.msk [vmem:[#allocation4 + $0x23] sm:$0xf] %vm13285_vm15, %v5131_v12  ;;  %5165 = vst.msk [vmem:[#allocation4 + $0x4b] sm:$0xf] %vm13285_vm15, %v5136_v63  ;;  %v5533_v61 = vld [vmem:[#allocation4 + $0xb] ss:$2 sm:$0xff] }
 0x8ff   : > { %5151 = vst.msk [vmem:[#allocation4 + $0x19] sm:$0x20] %vm13286_vm14, %v5130_v56  ;;  %5166 = vst.msk [vmem:[#allocation4 + $0x41] sm:$0x20] %vm13286_vm14, %v5135_v24  ;;  %v5441_v6 = vld [vmem:[#allocation4 + $0xa] ss:$2 sm:$0xff] }
 0x900   : > { %5152 = vst.msk [vmem:[#allocation4 + $0x25] sm:$0x4] %vm13287_vm9, %v5131_v12  ;;  %5167 = vst.msk [vmem:[#allocation4 + $0x4d] sm:$0x4] %vm13287_vm9, %v5136_v63  ;;  %v5625_v54 = vld [vmem:[#allocation4 + $0xc] ss:$2 sm:$0xff] }
 0x901   : > { %5153 = vst.msk [vmem:[#allocation4 + $0x23] sm:$0xc0] %vm3921_vm12, %v5131_v12  ;;  %5172 = vst.msk [vmem:[#allocation4 + $0x4b] sm:$0xc0] %vm3921_vm12, %v5136_v63  ;;  %v10535_v56 = vld [vmem:[%s12978_s4 + $0x30] sm:$0xff]  }
 0x902   : > { %5154 = vst.msk [vmem:[#allocation4 + $0x2b] sm:$0x3f] %vm13276_vm0, %v5132_v28  ;;  %5173 = vst.msk [vmem:[#allocation4 + $0x53] sm:$0x3f] %vm13276_vm0, %v5137_v17 }
 0x903   : > { %5155 = vst.msk [vmem:[#allocation4 + $0x21] sm:$0x80] %vm13288_vm4, %v5131_v12  ;;  %5174 = vst.msk [vmem:[#allocation4 + $0x49] sm:$0x80] %vm13288_vm4, %v5136_v63  ;;  %v5191_v34 = vld [vmem:[#allocation4 + $0x1] ss:$2 sm:$0xff] }
 0x904   : > { %5156 = vst.msk [vmem:[#allocation4 + $0x2d] sm:$0x10] %vm13289_vm11, %v5132_v28  ;;  %v5193_v15 = vld [vmem:[#allocation4 + $0x11] ss:$2 sm:$0xff]  ;;  %v5176_v49 = vld [vmem:[#allocation4] ss:$2 sm:$0xff] }
 0x905   : > { %5157 = vst.msk [vmem:[#allocation4 + $0x33] sm:$0xff] %vm13290_vm5, %v5133_v41  ;;  %v5200_v20 = vpack.c.bf16 %v5193_v15, %v5191_v34  ;;  %v5349_v16 = vld [vmem:[#allocation4 + $0x2] ss:$2 sm:$0xff]  ;;  %v5541_v22 = vld [vmem:[#allocation4 + $0x4b] ss:$2 sm:$0x3] }
 0x906   : > { %5158 = vst.msk [vmem:[#allocation4 + $0x31] sm:$0x2] %vm13291_vm8, %v5133_v41  ;;  %v5178_v37 = vld [vmem:[#allocation4 + $0x10] ss:$2 sm:$0xff]  ;;  %v5544_v13 = vpack.c.bf16 %v5541_v22, %v5541_v22  ;;  %v10536_v15 = vld [vmem:[%s12978_s4 + $0x38] sm:$0xff]  }
 0x907   : > { %5159 = vst.msk [vmem:[#allocation4 + $0x35] sm:$0x40] %vm13292_vm2, %v5133_v41  ;;  %v5185_v44 = vpack.c.bf16 %v5178_v37, %v5176_v49  ;;  %v5351_v4 = vld [vmem:[#allocation4 + $0x12] ss:$2 sm:$0xff] }
 0x908   : > { %5160 = vst.msk [vmem:[#allocation4 + $0x3b] sm:$0xfc] %vm13293_vm13, %v5134_v27  ;;  %v5358_v60 = vpack.c.bf16 %v5351_v4, %v5349_v16  ;;  %v5449_v9 = vld [vmem:[#allocation4 + $0x4a] ss:$2 sm:$0x3]  ;;  %v10537_v37 = vld [vmem:[%s12978_s4 + $0x40] sm:$0xff]  }
 0x909   : > { %5162 = vst.msk [vmem:[#allocation4 + $0x39] sm:$0x8] %vm3905_vm1, %v5134_v27  ;;  %v5195_v19 = vld [vmem:[#allocation4 + $0x21] ss:$2 sm:$0xff]  ;;  %v5452_v45 = vpack.c.bf16 %v5449_v9, %v5449_v9  ;;  %v5717_v17 = vld [vmem:[#allocation4 + $0x14] ss:$2 sm:$0xff] }
 0x90a   : > { %5163 = vst.msk [vmem:[#allocation4 + $0x45] sm:$0x1] %vm3907_vm3, %v5135_v24  ;;  %vm13294_vm3 = vmmov %vm13290_vm5  ;;  %v5180_v5 = vld [vmem:[#allocation4 + $0x20] ss:$2 sm:$0xff]  ;;  %v5535_v51 = vld [vmem:[#allocation4 + $0x1b] ss:$2 sm:$0xff] }
 0x90b   : > { %9381 = vmatmul.mubr.msk.bf16.vlgmr.msra.gmra.mrb[36].mxu0 %vm13294_vm3, %v5200_v20  ;;  %vm13295_vm1 = vmmov %vm13294_vm3  ;;  %v5353_v0 = vld [vmem:[#allocation4 + $0x22] ss:$2 sm:$0xff]  ;;  %v5542_v62 = vpack.c.bf16 %v5535_v51, %v5533_v61 }
 0x90c   : > { %9393 = vmatpush3.bf16.msra.mxu0 %v10530_v57  ;;  %9384 = vmatprep.mubr.msk.bf16.mxu0 %vm13125_vm10, %v10650_v1  ;;  %vm13296_vm12 = vmmov %vm13295_vm1  ;;  %v5443_v50 = vld [vmem:[#allocation4 + $0x1a] ss:$2 sm:$0xff]  ;;  %v5537_v33 = vld [vmem:[#allocation4 + $0x2b] ss:$2 sm:$0xff] }
 0x90d   : > { %9406 = vmatprep.subr.bf16.mxu0 %v10650_v1  ;;  %vm13297_vm11 = vmmov %vm13295_vm1  ;;  %v5450_v52 = vpack.c.bf16 %v5443_v50, %v5441_v6  ;;  %v5445_v7 = vld [vmem:[#allocation4 + $0x2a] ss:$2 sm:$0xff]  ;;  %v5811_v49 = vld [vmem:[#allocation4 + $0x25] ss:$2 sm:$0xff] }
 0x90e   : > { %vm13298_vm5 = vmmov %vm13295_vm1  ;;  %v5627_v35 = vld [vmem:[#allocation4 + $0x1c] ss:$2 sm:$0xff]  ;;  %v5629_v28 = vld [vmem:[#allocation4 + $0x2c] ss:$2 sm:$0xff] }
 0x90f   : > { %v5197_v47 = vld [vmem:[#allocation4 + $0x31] ss:$2 sm:$0xff]  ;;  %v5199_v25 = vld [vmem:[#allocation4 + $0x41] ss:$2 sm:$0x3]  ;;  %vm13299_vm8 = vmmov %vm13295_vm1  ;;  %v5634_v12 = vpack.c.bf16 %v5627_v35, %v5625_v54 }
 0x910   : > { %v5201_v23 = vpack.c.bf16 %v5197_v47, %v5195_v19  ;;  %v5202_v31 = vpack.c.bf16 %v5199_v25, %v5199_v25  ;;  %v5182_v14 = vld [vmem:[#allocation4 + $0x30] ss:$2 sm:$0xff]  ;;  %v5184_v36 = vld [vmem:[#allocation4 + $0x40] ss:$2 sm:$0x3]  ;;  %vm13300_vm2 = vmmov %vm13295_vm1 }
 0x911   : > { %v5186_v55 = vpack.c.bf16 %v5182_v14, %v5180_v5  ;;  %v5187_v21 = vpack.c.bf16 %v5184_v36, %v5184_v36  ;;  %v5355_v59 = vld [vmem:[#allocation4 + $0x32] ss:$2 sm:$0xff]  ;;  %vm13301_vm13 = vmmov %vm13295_vm1  ;;  %v5357_v48 = vld [vmem:[#allocation4 + $0x42] ss:$2 sm:$0x3] }
 0x912   : > { %v5359_v10 = vpack.c.bf16 %v5355_v59, %v5353_v0  ;;  %v5360_v46 = vpack.c.bf16 %v5357_v48, %v5357_v48  ;;  %vm13302_vm7 = vmmov %vm13295_vm1  ;;  %v5447_v38 = vld [vmem:[#allocation4 + $0x3a] ss:$2 sm:$0xff]  ;;  %v5539_v32 = vld [vmem:[#allocation4 + $0x3b] ss:$2 sm:$0xff] }
 0x913   : > { %9385 = vmatmul.mubr.msk.bf16.gmra.mrb[40].mxu0 %vm13295_vm1, %v5201_v23  ;;  %vm13303_vm6 = vmmov %vm13295_vm1  ;;  %v5451_v58 = vpack.c.bf16 %v5447_v38, %v5445_v7  ;;  %v5543_v53 = vpack.c.bf16 %v5539_v32, %v5537_v33  ;;  %v5631_v41 = vld [vmem:[#allocation4 + $0x3c] ss:$2 sm:$0xff]  ;;  %v5633_v24 = vld [vmem:[#allocation4 + $0x4c] ss:$2 sm:$0x3] }
 0x914   : > { %9388 = vmatprep.mubr.msk.bf16.mxu0 %vm13125_vm10, %v10650_v1  ;;  %vm13304_vm15 = vmmov %vm13295_vm1  ;;  %v5635_v27 = vpack.c.bf16 %v5631_v41, %v5629_v28  ;;  %v5636_v63 = vpack.c.bf16 %v5633_v24, %v5633_v24  ;;  %v5719_v34 = vld [vmem:[#allocation4 + $0x24] ss:$2 sm:$0xff]  ;;  %v5721_v20 = vld [vmem:[#allocation4 + $0x34] ss:$2 sm:$0xff] }
 0x915   : > { %vm13305_vm14 = vmmov %vm13295_vm1  ;;  %v5726_v57 = vpack.c.bf16 %v5719_v34, %v5717_v17  ;;  %v5723_v19 = vld [vmem:[#allocation4 + $0x44] ss:$2 sm:$0xff]  ;;  %v5725_v23 = vld [vmem:[#allocation4 + $0x54] ss:$2 sm:$0x3] }
 0x916   : > { %vm13306_vm9 = vmmov %vm13295_vm1  ;;  %v5727_v47 = vpack.c.bf16 %v5723_v19, %v5721_v20  ;;  %v5728_v25 = vpack.c.bf16 %v5725_v23, %v5725_v23  ;;  %v5815_v5 = vld [vmem:[#allocation4 + $0x45] ss:$2 sm:$0xff]  ;;  %v5903_v16 = vld [vmem:[#allocation4 + $0x26] ss:$2 sm:$0xff] }
 0x917   : > { %vm13307_vm0 = vmmov %vm13295_vm1  ;;  %v5909_v59 = vld [vmem:[#allocation4 + $0x56] ss:$2 sm:$0x3]  ;;  %v10538_v48 = vld [vmem:[%s12979_s5 + $0x10] sm:$0xff]  }
 0x918   : > { %vm13308_vm4 = vmmov %vm13307_vm0  ;;  %9504 = vmatprep.subr.bf16.mxu1 %v10538_v48 }
 0x919   : > { %vm13309_vm3 = vmmov %vm13307_vm0  ;;  %9505 = vmatpush3.bf16.msra.mxu1 %v10538_v48 }
 0x91a   : > { %vm13310_vm1 = vmmov %vm13307_vm0 }
 0x91b   : > { %9389 = vmatmul.mubr.msk.bf16.gmra.mrb[44].mxu0 %vm13296_vm12, %v5202_v31  ;;  %vm13311_vm12 = vmmov %vm13307_vm0  ;;  %v5809_v31 = vld [vmem:[#allocation4 + $0x15] ss:$2 sm:$0xff] }
 0x91c   : > { %9394 = vmatprep.mubr.msk.bf16.mxu0 %vm13125_vm10, %v10650_v1 }
 0x923   : > { %9395 = vmatmul.mubr.msk.bf16.vlgmr.msra.gmra.mrb[36].mxu0 %vm13297_vm11, %v5185_v44  ;;  %vm13312_vm11 = vmmov %vm13307_vm0  ;;  %v5813_v44 = vld [vmem:[#allocation4 + $0x35] ss:$2 sm:$0xff] }
 0x924   : > { %9407 = vmatpush3.bf16.msra.mxu0 %v10531_v30  ;;  %9398 = vmatprep.mubr.msk.bf16.mxu0 %vm13125_vm10, %v10650_v1  ;;  %v5818_v30 = vpack.c.bf16 %v5811_v49, %v5809_v31  ;;  %v5819_v14 = vpack.c.bf16 %v5815_v5, %v5813_v44 }
 0x925   : > { %9420 = vmatprep.subr.bf16.mxu0 %v10650_v1 }
 0x92b   : > { %9399 = vmatmul.mubr.msk.bf16.gmra.mrb[40].mxu0 %vm13298_vm5, %v5186_v55  ;;  %vm13313_vm5 = vmmov %vm13307_vm0  ;;  %v5817_v55 = vld [vmem:[#allocation4 + $0x55] ss:$2 sm:$0x3] }
 0x92c   : > { %9402 = vmatprep.mubr.msk.bf16.mxu0 %vm13125_vm10, %v10650_v1  ;;  %v5820_v36 = vpack.c.bf16 %v5817_v55, %v5817_v55 }
 0x933   : > { %9403 = vmatmul.mubr.msk.bf16.gmra.mrb[44].mxu0 %vm13299_vm8, %v5187_v21  ;;  %vm13314_vm8 = vmmov %vm13307_vm0  ;;  %v5901_v21 = vld [vmem:[#allocation4 + $0x16] ss:$2 sm:$0xff] }
 0x934   : > { %9408 = vmatprep.mubr.msk.bf16.mxu0 %vm13125_vm10, %v10650_v1  ;;  %v5910_v4 = vpack.c.bf16 %v5903_v16, %v5901_v21 }
 0x93b   : > { %9409 = vmatmul.mubr.msk.bf16.vlgmr.msra.gmra.mrb[36].mxu0 %vm13300_vm2, %v5358_v60  ;;  %vm13315_vm2 = vmmov %vm13307_vm0  ;;  %v5907_v60 = vld [vmem:[#allocation4 + $0x46] ss:$2 sm:$0xff] }
 0x93c   : > { %9421 = vmatpush3.bf16.msra.mxu0 %v10532_v18  ;;  %9412 = vmatprep.mubr.msk.bf16.mxu0 %vm13125_vm10, %v10650_v1  ;;  %v5905_v18 = vld [vmem:[#allocation4 + $0x36] ss:$2 sm:$0xff] }
 0x93d   : > { %9434 = vmatprep.subr.bf16.mxu0 %v10650_v1  ;;  %v5911_v0 = vpack.c.bf16 %v5907_v60, %v5905_v18 }
 0x943   : > { %9413 = vmatmul.mubr.msk.bf16.gmra.mrb[40].mxu0 %vm13301_vm13, %v5359_v10  ;;  %vm13316_vm13 = vmmov %vm13307_vm0  ;;  %v5912_v10 = vpack.c.bf16 %v5909_v59, %v5909_v59 }
 0x944   : > { %9416 = vmatprep.mubr.msk.bf16.mxu0 %vm13125_vm10, %v10650_v1 }
 0x94b   : > { %9417 = vmatmul.mubr.msk.bf16.gmra.mrb[44].mxu0 %vm13302_vm7, %v5360_v46  ;;  %vm13317_vm7 = vmmov %vm13307_vm0  ;;  %v10539_v46 = vld [vmem:[%s12979_s5 + $0x18] sm:$0xff]  }
 0x94c   : > { %9422 = vmatprep.mubr.msk.bf16.mxu0 %vm13125_vm10, %v10650_v1  ;;  %9506 = vmatprep.subr.bf16.mxu1 %v10539_v46 }
 0x94d   : > { %9507 = vmatpush3.bf16.msra.mxu1 %v10539_v46 }
 0x953   : > { %9423 = vmatmul.mubr.msk.bf16.vlgmr.msra.gmra.mrb[36].mxu0 %vm13303_vm6, %v5450_v52  ;;  %vm13318_vm6 = vmmov %vm13307_vm0 }
 0x954   : > { %9435 = vmatpush3.bf16.msra.mxu0 %v10533_v43  ;;  %9426 = vmatprep.mubr.msk.bf16.mxu0 %vm13125_vm10, %v10650_v1 }
 0x955   : > { %9448 = vmatprep.subr.bf16.mxu0 %v10650_v1 }
 0x95b   : > { %9427 = vmatmul.mubr.msk.bf16.gmra.mrb[40].mxu0 %vm13304_vm15, %v5451_v58  ;;  %vm13319_vm15 = vmmov %vm13307_vm0 }
 0x95c   : > { %9430 = vmatprep.mubr.msk.bf16.mxu0 %vm13125_vm10, %v10650_v1 }
 0x963   : > { %9431 = vmatmul.mubr.msk.bf16.gmra.mrb[44].mxu0 %vm13305_vm14, %v5452_v45  ;;  %vm13320_vm14 = vmmov %vm13307_vm0 }
 0x964   : > { %9436 = vmatprep.mubr.msk.bf16.mxu0 %vm13125_vm10, %v10650_v1 }
 0x96b   : > { %9437 = vmatmul.mubr.msk.bf16.vlgmr.msra.gmra.mrb[36].mxu0 %vm13306_vm9, %v5542_v62  ;;  %vm5993_vm9 = vcmp.lt.s32.totalorder %v11993_v11, 4 }
 0x96c   : > { %9449 = vmatpush3.bf16.msra.mxu0 %v10534_v42  ;;  %9440 = vmatprep.mubr.msk.bf16.mxu0 %vm13125_vm10, %v10650_v1 }
 0x96d   : > { %9462 = vmatprep.subr.bf16.mxu0 %v10650_v1 }
 0x973   : > { %9441 = vmatmul.mubr.msk.bf16.gmra.mrb[40].mxu0 %vm13307_vm0, %v5543_v53  ;;  %vm6012_vm0 = vcmask 261120  }
 0x974   : > { %9444 = vmatprep.mubr.msk.bf16.mxu0 %vm13125_vm10, %v10650_v1 }
 0x97b   : > { %9445 = vmatmul.mubr.msk.bf16.gmra.mrb[44].mxu0 %vm13308_vm4, %v5544_v13  ;;  %vm5994_vm4 = vcmp.lt.s32.totalorder %v12010_v26, 4 }
 0x97c   : > { %9450 = vmatprep.mubr.msk.bf16.mxu0 %vm13125_vm10, %v10650_v1 }
 0x983   : > { %9451 = vmatmul.mubr.msk.bf16.vlgmr.msra.gmra.mrb[36].mxu0 %vm13309_vm3, %v5634_v12  ;;  %vm5995_vm3 = vcmp.lt.s32.totalorder %v12023_v40, 4 }
 0x984   : > { %9463 = vmatpush3.bf16.msra.mxu0 %v10535_v56  ;;  %9454 = vmatprep.mubr.msk.bf16.mxu0 %vm13125_vm10, %v10650_v1 }
 0x985   : > { %9476 = vmatprep.subr.bf16.mxu0 %v10650_v1 }
 0x98b   : > { %9455 = vmatmul.mubr.msk.bf16.gmra.mrb[40].mxu0 %vm13310_vm1, %v5635_v27  ;;  %vm5996_vm1 = vcmp.lt.s32.totalorder %v12041_v29, 4 }
 0x98c   : > { %9458 = vmatprep.mubr.msk.bf16.mxu0 %vm13125_vm10, %v10650_v1 }
 0x993   : > { %9459 = vmatmul.mubr.msk.bf16.gmra.mrb[44].mxu0 %vm13311_vm12, %v5636_v63  ;;  %vm13018_vm12 = vcmask 254976  }
 0x994   : > { %9464 = vmatprep.mubr.msk.bf16.mxu0 %vm13125_vm10, %v10650_v1 }
 0x99b   : > { %9465 = vmatmul.mubr.msk.bf16.vlgmr.msra.gmra.mrb[36].mxu0 %vm13312_vm11, %v5726_v57  ;;  %vm13024_vm11 = vcmask 257024  }
 0x99c   : > { %9477 = vmatpush3.bf16.msra.mxu0 %v10536_v15  ;;  %9468 = vmatprep.mubr.msk.bf16.mxu0 %vm13125_vm10, %v10650_v1 }
 0x99d   : > { %9490 = vmatprep.subr.bf16.mxu0 %v10650_v1 }
 0x9a3   : > { %9469 = vmatmul.mubr.msk.bf16.gmra.mrb[40].mxu0 %vm13313_vm5, %v5727_v47  ;;  %vm6075_vm5 = vcmask 254977  }
 0x9a4   : > { %9472 = vmatprep.mubr.msk.bf16.mxu0 %vm13125_vm10, %v10650_v1 }
 0x9ab   : > { %9473 = vmatmul.mubr.msk.bf16.gmra.mrb[44].mxu0 %vm13314_vm8, %v5728_v25  ;;  %vm6077_vm8 = vcmask 256002  }
 0x9ac   : > { %9478 = vmatprep.mubr.msk.bf16.mxu0 %vm13125_vm10, %v10650_v1 }
 0x9b3   : > { %9479 = vmatmul.mubr.msk.bf16.vlgmr.msra.gmra.mrb[36].mxu0 %vm13315_vm2, %v5818_v30  ;;  %vm13016_vm2 = vcmask 261124  }
 0x9b4   : > { %9491 = vmatpush3.bf16.msra.mxu0 %v10537_v37  ;;  %9482 = vmatprep.mubr.msk.bf16.mxu0 %vm13125_vm10, %v10650_v1 }
 0x9bb   : > { %9483 = vmatmul.mubr.msk.bf16.gmra.mrb[40].mxu0 %vm13316_vm13, %v5819_v14  ;;  %vm13015_vm13 = vcmask 259077  }
 0x9bc   : > { %9486 = vmatprep.mubr.msk.bf16.mxu0 %vm13125_vm10, %v10650_v1 }
 0x9c3   : > { %9487 = vmatmul.mubr.msk.bf16.gmra.mrb[44].mxu0 %vm13317_vm7, %v5820_v36  ;;  %vm13014_vm7 = vcmask 260102  }
 0x9c4   : > { %9492 = vmatprep.mubr.msk.bf16.mxu0 %vm13125_vm10, %v10650_v1 }
 0x9cb   : > { %9493 = vmatmul.mubr.msk.bf16.vlgmr.msra.gmra.mrb[36].mxu0 %vm13318_vm6, %v5910_v4  ;;  %vm13023_vm6 = vcmask 261126  }
 0x9cc   : > { %9496 = vmatprep.mubr.msk.bf16.mxu0 %vm13125_vm10, %v10650_v1 }
 0x9d3   : > { %9497 = vmatmul.mubr.msk.bf16.gmra.mrb[40].mxu0 %vm13319_vm15, %v5911_v0  ;;  %vm13022_vm15 = vcmask 261127  }
 0x9d4   : > { %9500 = vmatprep.mubr.msk.bf16.mxu0 %vm13125_vm10, %v10650_v1  ;;  %v12600_v1 = vld [vmem:[%s12979_s5] sm:$0xff]   ;;  %vm5992_vm10 = vcmp.lt.s32.totalorder %v11986_v39, 4 }
 0x9d5   : > { %9512 = vmatprep.subr.bf16.mxu1 %v12600_v1 }
 0x9db   : > { %9501 = vmatmul.mubr.msk.bf16.gmra.mrb[44].mxu0 %vm13320_vm14, %v5912_v10  ;;  %vm13017_vm14 = vcmask 253952  }
 0xa9e   : > { %v5965_v6 = vpop.f32.mrb[36].mxu0 }
 0xa9f   : > { %v6007_v50 = vsel %vm5992_vm10, %v5965_v6, 0.0  ;;  %v9494_v43 = vpop.f32.mrb[37].mxu0 }
 0xaa0   : > { %v5968_v52 = vpop.f32.mrb[38].mxu0  ;;  %v6013_v58 = vsel %vm6012_vm0, %v6007_v50, 0.0 }
 0xaa1   : > { %v6008_v7 = vsel %vm5993_vm9, %v5968_v52, 0.0  ;;  %v9495_v38 = vpop.f32.mrb[39].mxu0 }
 0xaa2   : > { %v6014_v9 = vsel %vm6012_vm0, %v6008_v7, 0.0 }
 0xaa3   : > { %v6015_v45 = vadd.f32 %v6014_v9, %v6013_v58 }
 0xaa6   : > { %v5973_v61 = vpop.f32.mrb[40].mxu0 }
 0xaa7   : > { %v6009_v51 = vsel %vm5994_vm4, %v5973_v61, 0.0  ;;  %v9498_v42 = vpop.f32.mrb[41].mxu0 }
 0xaa8   : > { %v6016_v62 = vsel %vm6012_vm0, %v6009_v51, 0.0  ;;  %v5976_v33 = vpop.f32.mrb[42].mxu0 }
 0xaa9   : > { %v6017_v32 = vadd.f32 %v6016_v62, %v6015_v45  ;;  %v6010_v53 = vsel %vm5995_vm3, %v5976_v33, 0.0  ;;  %v9499_v22 = vpop.f32.mrb[43].mxu0 }
 0xaaa   : > { %v6018_v13 = vsel %vm6012_vm0, %v6010_v53, 0.0 }
 0xaab   : > { %v6019_v54 = vadd.f32 %v6018_v13, %v6017_v32 }
 0xaae   : > { %v5981_v35 = vpop.f32.mrb[44].mxu0 }
 0xaaf   : > { %v6011_v56 = vsel %vm5996_vm1, %v5981_v35, 0.0  ;;  %v9502_v12 = vpop.f32.mrb[45].mxu0 }
 0xab0   : > { %v6021_v28 = vsel %vm13018_vm12, %v6011_v56, 0.0  ;;  %v5984_v41 = vpop.f32.mrb[46].mxu0 }
 0xab1   : > { %v6022_v27 = vadd.f32 %v6021_v28, %v6019_v54  ;;  %v9503_v24 = vpop.f32.mrb[47].mxu0 }
 0xab3   : > { %v6023_v63 = vrot.slane %v6022_v27, 4 }
 0xab5   : > { %v6024_v17 = vadd.f32 %v6023_v63, %v6022_v27  ;;  %v10541_v63 = vld [vmem:[%s12979_s5 + $0x8] sm:$0xff]  }
 0xab7   : > { %v6025_v34 = vrot.slane %v6024_v17, 2 }
 0xab9   : > { %v6026_v15 = vadd.f32 %v6025_v34, %v6024_v17  ;;  %v10542_v34 = vld [vmem:[%s12979_s5 + $0x20] sm:$0xff]  }
 0xabb   : > { %v6027_v57 = vrot.slane %v6026_v15, 1 }
 0xabd   : > { %v6028_v20 = vadd.f32 %v6027_v57, %v6026_v15 }
 0xabf   : > { %v6029_v19 = vmul.f32 0.0625, %v6028_v20 }
 0xac1   : > { %v6030_v47 = vsub.f32 %v5965_v6, %v6029_v19  ;;  %v6031_v23 = vsub.f32 %v5968_v52, %v6029_v19  ;;  %v6032_v25 = vsub.f32 %v5973_v61, %v6029_v19  ;;  %v6033_v31 = vsub.f32 %v5976_v33, %v6029_v19 }
 0xac2   : > { %v6034_v49 = vsub.f32 %v5981_v35, %v6029_v19 }
 0xac3   : > { %v6035_v37 = vsel %vm5992_vm10, %v6030_v47, 0.0  ;;  %v6036_v30 = vsel %vm5993_vm9, %v6031_v23, 0.0  ;;  %v6037_v44 = vsel %vm5994_vm4, %v6032_v25, 0.0  ;;  %v6038_v5 = vsel %vm5995_vm3, %v6033_v31, 0.0 }
 0xac4   : > { %v6040_v14 = vmul.f32 %v6035_v37, %v6035_v37  ;;  %v6041_v55 = vmul.f32 %v6036_v30, %v6036_v30  ;;  %v6042_v36 = vmul.f32 %v6037_v44, %v6037_v44  ;;  %v6039_v21 = vsel %vm5996_vm1, %v6034_v49, 0.0  ;;  %v10545_v30 = vld [vmem:[%s12979_s5 + $0x38] sm:$0xff]  }
 0xac5   : > { %v6043_v16 = vmul.f32 %v6038_v5, %v6038_v5  ;;  %v6044_v11 = vmul.f32 %v6039_v21, %v6039_v21  ;;  %vm13021_vm10 = vcmask 259074   ;;  %vm13020_vm9 = vcmask 257027   ;;  %v10546_v5 = vld [vmem:[%s12979_s5 + $0x40] sm:$0xff]  }
 0xac6   : > { %v6045_v4 = vsel %vm6012_vm0, %v6040_v14, 0.0  ;;  %v6046_v39 = vsel %vm6012_vm0, %v6041_v55, 0.0  ;;  %v6048_v60 = vsel %vm6012_vm0, %v6042_v36, 0.0  ;;  %vm13019_vm4 = vcmask 258052  }
 0xac7   : > { %v6047_v18 = vadd.f32 %v6046_v39, %v6045_v4  ;;  %v6050_v0 = vsel %vm6012_vm0, %v6043_v16, 0.0  ;;  %v6052_v59 = vsel %vm13018_vm12, %v6044_v11, 0.0  ;;  %vm13321_vm3 = vcmask 1043456   ;;  %v10547_v16 = vld [vmem:[%s12979_s5 + $0x48] sm:$0xff]   ;;  %v10548_v39 = vld [vmem:[%s12979_s5 + $0x50] sm:$0xff]  }
 0xac9   : > { %v6049_v26 = vadd.f32 %v6048_v60, %v6047_v18 }
 0xacb   : > { %v6051_v40 = vadd.f32 %v6050_v0, %v6049_v26  ;;  %v10549_v26 = vld [vmem:[%s12979_s5 + $0x58] sm:$0xff]  }
 0xacd   : > { %v6053_v10 = vadd.f32 %v6052_v59, %v6051_v40  ;;  %v10550_v40 = vld [vmem:[%s12979_s5 + $0x60] sm:$0xff]  }
 0xacf   : > { %v6054_v48 = vrot.slane %v6053_v10, 4 }
 0xad1   : > { %v6055_v46 = vadd.f32 %v6054_v48, %v6053_v10 }
 0xad3   : > { %v6056_v29 = vrot.slane %v6055_v46, 2 }
 0xad5   : > { %v6057_v6 = vadd.f32 %v6056_v29, %v6055_v46  ;;  %v10551_v29 = vld [vmem:[%s12979_s5 + $0x68] sm:$0xff]  }
 0xad7   : > { %v6058_v50 = vrot.slane %v6057_v6, 1 }
 0xad9   : > { %v6059_v43 = vadd.f32 %v6058_v50, %v6057_v6  ;;  %v10552_v50 = vld [vmem:[%s12979_s5 + $0x70] sm:$0xff]  }
 0xadb   : > { %v6060_v52 = vmul.f32 0.0625, %v6059_v43 }
 0xadd   : > { %v6061_v7 = vadd.f32 1e-05, %v6060_v52 }
 0xadf   : > { %10580 = vrsqrt.f32 %v6061_v7 }
 0xae9   : > { %v10581_v38 = vpop.eup %10580 }
 0xaea   : > { %v6063_v58 = vmul.f32 %v10581_v38, %v6030_v47  ;;  %v6064_v9 = vmul.f32 %v10581_v38, %v6031_v23  ;;  %v6065_v45 = vmul.f32 %v10581_v38, %v6032_v25  ;;  %v6066_v61 = vmul.f32 %v10581_v38, %v6033_v31  ;;  %v10543_v47 = vld [vmem:[%s12979_s5 + $0x28] sm:$0xff]  }
 0xaeb   : > { %v6067_v51 = vmul.f32 %v10581_v38, %v6034_v49 }
 0xaec   : > { %v12638_v42 = vmax.f32 %v6063_v58, 0.0  ;;  %v12640_v62 = vmax.f32 %v6064_v9, 0.0  ;;  %v12642_v33 = vmax.f32 %v6065_v45, 0.0  ;;  %v6071_v32 = vmax.f32 %v6066_v61, 0.0  ;;  %v10553_v58 = vld [vmem:[%s12979_s5 + $0x78] sm:$0xff]   ;;  %v10554_v45 = vld [vmem:[%s12979_s5 + $0x80] sm:$0xff]  }
 0xaed   : > { %v6072_v53 = vmax.f32 %v6067_v51, 0.0 }
 0xaee   : > { %6074 = vst.msk [vmem:[#allocation5 + $0x7] sm:$0xf] %vm13024_vm11, %v12638_v42  ;;  %v7688_v22 = vrot.slane %v6071_v32, 4 }
 0xaef   : > { %6076 = vst.msk [vmem:[#allocation5 + $0x5] sm:$0x2] %vm6075_vm5, %v12638_v42  ;;  %v7689_v13 = vrot.slane %v6072_v53, 4 }
 0xaf0   : > { %6078 = vst.msk [vmem:[#allocation5 + $0x9] sm:$0x4] %vm6077_vm8, %v12638_v42 }
 0xaf1   : > { %6089 = vst.msk [vmem:[#allocation5 + $0xf] sm:$0xf0] %vm13016_vm2, %v12642_v33  ;;  %6094 = vst.msk [vmem:[#allocation5 + $0x1b] sm:$0xf0] %vm13016_vm2, %v12642_v33  ;;  %v12679_v54 = vsel %vm13321_vm3, %v7688_v22, %v7689_v13 }
 0xaf2   : > { %6091 = vst.msk [vmem:[#allocation5 + $0xd] sm:$0x20] %vm13015_vm13, %v12642_v33  ;;  %6095 = vst.msk [vmem:[#allocation5 + $0x19] sm:$0x20] %vm13015_vm13, %v12642_v33 }
 0xaf3   : > { %6093 = vst.msk [vmem:[#allocation5 + $0x11] sm:$0x40] %vm13014_vm7, %v12642_v33  ;;  %6096 = vst.msk [vmem:[#allocation5 + $0x1d] sm:$0x40] %vm13014_vm7, %v12642_v33 }
 0xaf4   : > { %6098 = vst.msk [vmem:[#allocation5 + $0x13] sm:$0xc0] %vm13023_vm6, %v6071_v32 }
 0xaf5   : > { %6101 = vst.msk [vmem:[#allocation5 + $0x11] sm:$0x80] %vm13022_vm15, %v6071_v32 }
 0xaf6   : > { %6080 = vst.msk [vmem:[#allocation5 + $0xb] sm:$0x3c] %vm13021_vm10, %v12640_v62  ;;  %6085 = vst.msk [vmem:[#allocation5 - $0x1] sm:$0x3c] %vm13021_vm10, %v12640_v62 }
 0xaf7   : > { %6082 = vst.msk [vmem:[#allocation5 + $0x9] sm:$0x8] %vm13020_vm9, %v12640_v62  ;;  %6086 = vst.msk [vmem:[#allocation5 - $0x3] sm:$0x8] %vm13020_vm9, %v12640_v62 }
 0xaf8   : > { %6084 = vst.msk [vmem:[#allocation5 + $0xd] sm:$0x10] %vm13019_vm4, %v12640_v62  ;;  %6087 = vst.msk [vmem:[#allocation5 + $0x1] sm:$0x10] %vm13019_vm4, %v12640_v62 }
 0xaf9   : > { %6099 = vst.msk [vmem:[#allocation5 + $0x1b] sm:$0x3] %vm13018_vm12, %v6072_v53 }
 0xafa   : > { %6103 = vst.msk [vmem:[#allocation5 + $0x1d] sm:$0x1] %vm13017_vm14, %v6072_v53  ;;  %v6257_v25 = vld [vmem:[#allocation5 + $0x12] sm:$0x3f]  ;;  %v6731_v13 = vld [vmem:[#allocation5 + $0x1e] sm:$0x3f] }
 0xafb   : > { %v6259_v37 = vpack.c.bf16 %v6257_v25, %v6257_v25  ;;  %v10555_v53 = vld [vmem:[%s12979_s5 + $0x88] sm:$0xff]  }
 0xafe   : > { %v6114_v56 = vld [vmem:[#allocation5 + $0x9] sm:$0xff] }
 0xaff   : > { %v6113_v35 = vld [vmem:[#allocation5 + $0x1] sm:$0xff]  ;;  %v6115_v12 = vld [vmem:[#allocation5 + $0x11] sm:$0x3f] }
 0xb00   : > { %v6116_v28 = vpack.c.bf16 %v6114_v56, %v6113_v35  ;;  %v6117_v41 = vpack.c.bf16 %v6115_v12, %v6115_v12  ;;  %v6104_v27 = vld [vmem:[#allocation5] sm:$0xff]  ;;  %v6105_v24 = vld [vmem:[#allocation5 + $0x8] sm:$0xff]  ;;  %v6106_v15 = vld [vmem:[#allocation5 + $0x10] sm:$0x3f]  ;;  %v6733_v35 = vpack.c.bf16 %v6731_v13, %v6731_v13 }
 0xb01   : > { %v6107_v17 = vpack.c.bf16 %v6105_v24, %v6104_v27  ;;  %v6255_v57 = vld [vmem:[#allocation5 + $0x2] sm:$0xff]  ;;  %v6256_v20 = vld [vmem:[#allocation5 + $0xa] sm:$0xff]  ;;  %v6108_v19 = vpack.c.bf16 %v6106_v15, %v6106_v15  ;;  %v6336_v14 = vld [vmem:[#allocation5 + $0x16] sm:$0x3f] }
 0xb02   : > { %9508 = vmatprep.mubr.msk.bf16.mxu1 %vm6012_vm0, %v6116_v28  ;;  %v6258_v23 = vpack.c.bf16 %v6256_v20, %v6255_v57  ;;  %v6334_v31 = vld [vmem:[#allocation5 + $0x6] sm:$0xff]  ;;  %v12699_v49 = vld [vmem:[#allocation5 + $0xe] sm:$0xff]  ;;  %v6338_v21 = vpack.c.bf16 %v6336_v14, %v6336_v14  ;;  %v6415_v18 = vld [vmem:[#allocation5 + $0x17] sm:$0x3f] }
 0xb03   : > { %9509 = vmatmul.mubr.msk.bf16.vlgmr.msra.gmra.mrb[40].mxu1 %vm6012_vm0, %v6117_v41  ;;  %v6337_v44 = vpack.c.bf16 %v12699_v49, %v6334_v31  ;;  %v6413_v55 = vld [vmem:[#allocation5 + $0x7] sm:$0xff]  ;;  %v6414_v36 = vld [vmem:[#allocation5 + $0xf] sm:$0xff]  ;;  %v6417_v60 = vpack.c.bf16 %v6415_v18, %v6415_v18  ;;  %v6494_v59 = vld [vmem:[#allocation5 + $0x18] sm:$0x3f]  ;;  %v12762_v41 = vmul.u32.u64.low 2863311531, %v11197_v2  ;;  %v12763_v27 = vmul.u32.u64.high 2863311531, %v11197_v2, %v12762_v41 }
 0xb04   : > { %9513 = vmatpush3.bf16.msra.mxu1 %v12600_v1  ;;  %9516 = vmatprep.mubr.msk.bf16.mxu1 %vm6012_vm0, %v6107_v17  ;;  %v10544_v1 = vld [vmem:[%s12979_s5 + $0x30] sm:$0xff]   ;;  %v6416_v4 = vpack.c.bf16 %v6414_v36, %v6413_v55  ;;  %v6493_v11 = vld [vmem:[#allocation5 + $0x10] sm:$0xff]  ;;  %v6496_v46 = vpack.c.bf16 %v6494_v59, %v6494_v59  ;;  %v10557_v12 = vld [vmem:[%s12980_s6 + $0x18] sm:$0xff]  }
 0xb05   : > { %9514 = vmatprep.subr.bf16.mxu1 %v10541_v63  ;;  %v6495_v0 = vpack.c.bf16 %v6493_v11, %v6105_v24  ;;  %v6571_v10 = vld [vmem:[#allocation5 + $0xc] sm:$0xff]  ;;  %v6572_v48 = vld [vmem:[#allocation5 + $0x14] sm:$0xff]  ;;  %v6573_v43 = vld [vmem:[#allocation5 + $0x1c] sm:$0x3f]  ;;  %v6814_v15 = vshrl.u32 %v12763_v27, 2 }
 0xb06   : > { %v6574_v6 = vpack.c.bf16 %v6572_v48, %v6571_v10  ;;  %v6650_v52 = vld [vmem:[#allocation5 + $0xd] sm:$0xff]  ;;  %v6651_v7 = vld [vmem:[#allocation5 + $0x15] sm:$0xff]  ;;  %v6575_v38 = vpack.c.bf16 %v6573_v43, %v6573_v43  ;;  %v6652_v61 = vld [vmem:[#allocation5 + $0x1d] sm:$0x3f] }
 0xb07   : > { %v6653_v9 = vpack.c.bf16 %v6651_v7, %v6650_v52  ;;  %v6730_v51 = vld [vmem:[#allocation5 + $0x16] sm:$0xff]  ;;  %v6654_v32 = vpack.c.bf16 %v6652_v61, %v6652_v61  ;;  %v12758_v28 = vld [vmem:[%s12980_s6] sm:$0xff]  }
 0xb08   : > { %9515 = vmatpush3.bf16.msra.mxu1 %v10541_v63  ;;  %v6732_v22 = vpack.c.bf16 %v6730_v51, %v12699_v49  ;;  %v10556_v56 = vld [vmem:[%s12980_s6 + $0x10] sm:$0xff]   ;;  %v12766_v24 = vmul.u32.u64.low 2863311531, %v11211_v8  ;;  %v12767_v63 = vmul.u32.u64.high 2863311531, %v11211_v8, %v12766_v24 }
 0xb09   : > { %9520 = vmatprep.subr.bf16.mxu1 %v10542_v34 }
 0xb0a   : > { %v6836_v57 = vshrl.u32 %v12767_v63, 2 }
 0xb0f   : > { %9517 = vmatmul.mubr.msk.bf16.vlgmr.msra.gmra.mrb[40].mxu1 %vm6012_vm0, %v6108_v19  ;;  %v6815_v19 = vmul.u32 6, %v6814_v15 }
 0xb10   : > { %9521 = vmatpush3.bf16.msra.mxu1 %v10542_v34  ;;  %9524 = vmatprep.mubr.msk.bf16.mxu1 %vm6012_vm0, %v6258_v23  ;;  %v12770_v17 = vmul.u32.u64.low 2863311531, %v11200_v3  ;;  %v12771_v34 = vmul.u32.u64.high 2863311531, %v11200_v3, %v12770_v17 }
 0xb11   : > { %9522 = vmatprep.subr.bf16.mxu1 %v10543_v47 }
 0xb12   : > { %v6825_v20 = vshrl.u32 %v12771_v34, 2 }
 0xb14   : > { %9523 = vmatpush3.bf16.msra.mxu1 %v10543_v47  ;;  %v6837_v47 = vmul.u32 6, %v6836_v57  ;;  %v6826_v23 = vmul.u32 6, %v6825_v20 }
 0xb15   : > { %9528 = vmatprep.subr.bf16.mxu1 %v10544_v1 }
 0xb16   : > { %v6838_v25 = vsub.s32 %v11211_v8, %v6837_v47  ;;  %v6827_v31 = vsub.s32 %v11200_v3, %v6826_v23 }
 0xb18   : > { %vm6843_vm7 = vcmp.ne.s32.totalorder %v6838_v25, 0  ;;  %vm6846_vm13 = vcmp.lt.s32.totalorder %v6838_v25, 0  ;;  %vm6842_vm2 = vcmp.ne.s32.totalorder %v6827_v31, 0  ;;  %vm6845_vm14 = vcmp.lt.s32.totalorder %v6827_v31, 0 }
 0xb19   : > { %vm6849_vm4 = vmand %vm6846_vm13, %vm6843_vm7  ;;  %vm13329_vm13 = vcmask 261127  }
 0xb1a   : > { %vm6848_vm9 = vmand %vm6845_vm14, %vm6842_vm2  ;;  %vm13328_vm2 = vcmask 261126  }
 0xb1b   : > { %9525 = vmatmul.mubr.msk.bf16.vlgmr.msra.gmra.mrb[40].mxu1 %vm6012_vm0, %v6259_v37  ;;  %v6852_v37 = vadd.s32 6, %v6838_v25  ;;  %vm13330_vm7 = vmmov %vm13328_vm2 }
 0xb1c   : > { %9529 = vmatpush3.bf16.msra.mxu1 %v10544_v1  ;;  %9532 = vmatprep.mubr.msk.bf16.mxu1 %vm6012_vm0, %v6337_v44  ;;  %v6816_v1 = vsub.s32 %v11197_v2, %v6815_v19  ;;  %vm13331_vm14 = vmmov %vm13329_vm13 }
 0xb1d   : > { %9530 = vmatprep.subr.bf16.mxu1 %v10545_v30 }
 0xb1e   : > { %vm6841_vm1 = vcmp.ne.s32.totalorder %v6816_v1, 0  ;;  %vm6844_vm3 = vcmp.lt.s32.totalorder %v6816_v1, 0  ;;  %v6850_v49 = vadd.s32 6, %v6816_v1 }
 0xb1f   : > { %vm6847_vm12 = vmand %vm6844_vm3, %vm6841_vm1  ;;  %vm13334_vm1 = vcmask 258052   ;;  %vm13335_vm3 = vcmask 254976  }
 0xb20   : > { %9531 = vmatpush3.bf16.msra.mxu1 %v10545_v30  ;;  %v6851_v30 = vadd.s32 6, %v6827_v31  ;;  %v6853_v44 = vsel %vm6847_vm12, %v6850_v49, %v6816_v1  ;;  %vm6871_vm12 = vcmask 259072  }
 0xb21   : > { %9536 = vmatprep.subr.bf16.mxu1 %v10546_v5  ;;  %vm12779_vm10 = vcmp.lt.s32.totalorder %v6853_v44, 4 }
 0xb22   : > { %v6854_v14 = vsel %vm6848_vm9, %v6851_v30, %v6827_v31  ;;  %vm13332_vm9 = vcmask 259074  }
 0xb23   : > { %vm12787_vm6 = vcmp.lt.s32.totalorder %v6854_v14, 4  ;;  %v10559_v14 = vld [vmem:[%s12980_s6 + $0x8] sm:$0xff]  }
 0xb27   : > { %9533 = vmatmul.mubr.msk.bf16.vlgmr.msra.gmra.mrb[40].mxu1 %vm6012_vm0, %v6338_v21 }
 0xb28   : > { %9537 = vmatpush3.bf16.msra.mxu1 %v10546_v5  ;;  %9540 = vmatprep.mubr.msk.bf16.mxu1 %vm6012_vm0, %v6416_v4  ;;  %v6855_v5 = vsel %vm6849_vm4, %v6852_v37, %v6838_v25  ;;  %vm13333_vm4 = vcmask 257027  }
 0xb29   : > { %9538 = vmatprep.subr.bf16.mxu1 %v10547_v16  ;;  %vm12783_vm15 = vcmp.lt.s32.totalorder %v6855_v5, 4 }
 0xb2c   : > { %9539 = vmatpush3.bf16.msra.mxu1 %v10547_v16 }
 0xb2d   : > { %9544 = vmatprep.subr.bf16.mxu1 %v10548_v39 }
 0xb33   : > { %9541 = vmatmul.mubr.msk.bf16.vlgmr.msra.gmra.mrb[40].mxu1 %vm6012_vm0, %v6417_v60 }
 0xb34   : > { %9545 = vmatpush3.bf16.msra.mxu1 %v10548_v39  ;;  %9548 = vmatprep.mubr.msk.bf16.mxu1 %vm6012_vm0, %v6495_v0 }
 0xb35   : > { %9546 = vmatprep.subr.bf16.mxu1 %v10549_v26 }
 0xb38   : > { %9547 = vmatpush3.bf16.msra.mxu1 %v10549_v26 }
 0xb39   : > { %9552 = vmatprep.subr.bf16.mxu1 %v10550_v40 }
 0xb3f   : > { %9549 = vmatmul.mubr.msk.bf16.vlgmr.msra.gmra.mrb[40].mxu1 %vm6012_vm0, %v6496_v46 }
 0xb40   : > { %9553 = vmatpush3.bf16.msra.mxu1 %v10550_v40  ;;  %9556 = vmatprep.mubr.msk.bf16.mxu1 %vm6012_vm0, %v6574_v6 }
 0xb41   : > { %9554 = vmatprep.subr.bf16.mxu1 %v10551_v29 }
 0xb44   : > { %9555 = vmatpush3.bf16.msra.mxu1 %v10551_v29 }
 0xb45   : > { %9560 = vmatprep.subr.bf16.mxu1 %v10552_v50 }
 0xb4b   : > { %9557 = vmatmul.mubr.msk.bf16.vlgmr.msra.gmra.mrb[40].mxu1 %vm6012_vm0, %v6575_v38 }
 0xb4c   : > { %9561 = vmatpush3.bf16.msra.mxu1 %v10552_v50  ;;  %9564 = vmatprep.mubr.msk.bf16.mxu1 %vm6012_vm0, %v6653_v9 }
 0xb4d   : > { %9562 = vmatprep.subr.bf16.mxu1 %v10553_v58 }
 0xb50   : > { %9563 = vmatpush3.bf16.msra.mxu1 %v10553_v58 }
 0xb51   : > { %9568 = vmatprep.subr.bf16.mxu1 %v10554_v45 }
 0xb57   : > { %9565 = vmatmul.mubr.msk.bf16.vlgmr.msra.gmra.mrb[40].mxu1 %vm6012_vm0, %v6654_v32 }
 0xb58   : > { %9569 = vmatpush3.bf16.msra.mxu1 %v10554_v45  ;;  %9572 = vmatprep.mubr.msk.bf16.mxu1 %vm6012_vm0, %v6732_v22 }
 0xb59   : > { %9570 = vmatprep.subr.bf16.mxu1 %v10555_v53 }
 0xb5c   : > { %9571 = vmatpush3.bf16.msra.mxu1 %v10555_v53 }
 0xb5d   : > { %9576 = vmatprep.subr.bf16.mxu1 %v10556_v56 }
 0xb63   : > { %9573 = vmatmul.mubr.msk.bf16.vlgmr.msra.gmra.mrb[40].mxu1 %vm6012_vm0, %v6733_v35 }
 0xb64   : > { %9577 = vmatpush3.bf16.msra.mxu1 %v10556_v56 }
 0xb65   : > { %9578 = vmatprep.subr.bf16.mxu1 %v10557_v12 }
 0xb68   : > { %9579 = vmatpush3.bf16.msra.mxu1 %v10557_v12 }
 0xb69   : > { %9584 = vmatprep.subr.bf16.mxu1 %v12758_v28 }
 0xc36   : > { %v9574_v3 = vpop.f32.mrb[40].mxu1 }
 0xc37   : > { %v6791_v55 = vpop.f32.mrb[41].mxu1  ;;  %v6867_v39 = vsel %vm12783_vm15, %v9574_v3, 0.0 }
 0xc38   : > { %v6865_v21 = vsel %vm12779_vm10, %v6791_v55, 0.0  ;;  %v9575_v16 = vpop.f32.mrb[42].mxu1  ;;  %v6872_v0 = vsel %vm6871_vm12, %v6867_v39, 0.0 }
 0xc39   : > { %v6794_v4 = vpop.f32.mrb[43].mxu1  ;;  %v6868_v11 = vsel %vm6012_vm0, %v6865_v21, 0.0 }
 0xc3a   : > { %v6866_v18 = vsel %vm12787_vm6, %v6794_v4, 0.0 }
 0xc3b   : > { %v6869_v60 = vsel %vm6012_vm0, %v6866_v18, 0.0  ;;  %v10561_v18 = vld [vmem:[%s12980_s6 + $0x28] sm:$0xff]  }
 0xc3c   : > { %v6870_v26 = vadd.f32 %v6869_v60, %v6868_v11 }
 0xc3e   : > { %v6873_v40 = vadd.f32 %v6872_v0, %v6870_v26 }
 0xc40   : > { %v6874_v59 = vrot.slane %v6873_v40, 4 }
 0xc42   : > { %v6875_v10 = vadd.f32 %v6874_v59, %v6873_v40  ;;  %v10563_v59 = vld [vmem:[%s12980_s6 + $0x38] sm:$0xff]  }
 0xc44   : > { %v6876_v48 = vrot.slane %v6875_v10, 2 }
 0xc46   : > { %v6877_v46 = vadd.f32 %v6876_v48, %v6875_v10  ;;  %v10564_v48 = vld [vmem:[%s12980_s6 + $0x40] sm:$0xff]  }
 0xc48   : > { %v6878_v29 = vrot.slane %v6877_v46, 1 }
 0xc4a   : > { %v6879_v6 = vadd.f32 %v6878_v29, %v6877_v46 }
 0xc4c   : > { %v6880_v50 = vmul.f32 0.0625, %v6879_v6 }
 0xc4e   : > { %v6881_v43 = vsub.f32 %v6791_v55, %v6880_v50  ;;  %v6882_v52 = vsub.f32 %v6794_v4, %v6880_v50  ;;  %v6883_v7 = vsub.f32 %v9574_v3, %v6880_v50  ;;  %v10560_v55 = vld [vmem:[%s12980_s6 + $0x20] sm:$0xff]  }
 0xc50   : > { %v6884_v38 = vsel %vm12779_vm10, %v6881_v43, 0.0  ;;  %v6885_v58 = vsel %vm12787_vm6, %v6882_v52, 0.0  ;;  %v6886_v9 = vsel %vm12783_vm15, %v6883_v7, 0.0 }
 0xc51   : > { %v6887_v45 = vmul.f32 %v6884_v38, %v6884_v38  ;;  %v6888_v61 = vmul.f32 %v6885_v58, %v6885_v58  ;;  %v6889_v51 = vmul.f32 %v6886_v9, %v6886_v9 }
 0xc53   : > { %v6890_v32 = vsel %vm6012_vm0, %v6887_v45, 0.0  ;;  %v6891_v53 = vsel %vm6012_vm0, %v6888_v61, 0.0  ;;  %v6893_v13 = vsel %vm6871_vm12, %v6889_v51, 0.0  ;;  %v10567_v45 = vld [vmem:[%s12980_s6 + $0x58] sm:$0xff]   ;;  %v10568_v51 = vld [vmem:[%s12980_s6 + $0x60] sm:$0xff]  }
 0xc54   : > { %v6892_v22 = vadd.f32 %v6891_v53, %v6890_v32 }
 0xc56   : > { %v6894_v35 = vadd.f32 %v6893_v13, %v6892_v22 }
 0xc58   : > { %v6895_v56 = vrot.slane %v6894_v35, 4 }
 0xc5a   : > { %v6896_v12 = vadd.f32 %v6895_v56, %v6894_v35  ;;  %v10569_v35 = vld [vmem:[%s12980_s6 + $0x68] sm:$0xff]  }
 0xc5c   : > { %v6897_v41 = vrot.slane %v6896_v12, 2 }
 0xc5e   : > { %v6898_v27 = vadd.f32 %v6897_v41, %v6896_v12  ;;  %v10570_v12 = vld [vmem:[%s12980_s6 + $0x70] sm:$0xff]  }
 0xc60   : > { %v6899_v24 = vrot.slane %v6898_v27, 1 }
 0xc62   : > { %v6900_v63 = vadd.f32 %v6899_v24, %v6898_v27 }
 0xc64   : > { %v6901_v17 = vmul.f32 0.0625, %v6900_v63 }
 0xc66   : > { %v6902_v34 = vadd.f32 1e-05, %v6901_v17  ;;  %v10571_v17 = vld [vmem:[%s12980_s6 + $0x78] sm:$0xff]  }
 0xc68   : > { %10582 = vrsqrt.f32 %v6902_v34 }
 0xc72   : > { %v10583_v15 = vpop.eup %10582 }
 0xc73   : > { %v6904_v57 = vmul.f32 %v10583_v15, %v6881_v43  ;;  %v6905_v20 = vmul.f32 %v10583_v15, %v6882_v52  ;;  %v6906_v19 = vmul.f32 %v10583_v15, %v6883_v7  ;;  %v10565_v43 = vld [vmem:[%s12980_s6 + $0x48] sm:$0xff]   ;;  %v10566_v7 = vld [vmem:[%s12980_s6 + $0x50] sm:$0xff]   ;;  %v10572_v15 = vld [vmem:[%s12980_s6 + $0x80] sm:$0xff]  }
 0xc75   : > { %v6907_v47 = vmax.f32 %v6904_v57, 0.0  ;;  %v6908_v23 = vmax.f32 %v6905_v20, 0.0  ;;  %v6909_v1 = vmax.f32 %v6906_v19, 0.0 }
 0xc77   : > { %6910 = vst.msk [vmem:[#allocation6 + $0x7] sm:$0xf] %vm13024_vm11, %v6907_v47  ;;  %vm13336_vm11 = vcmask 253952  }
 0xc78   : > { %6911 = vst.msk [vmem:[#allocation6 + $0x5] sm:$0x2] %vm6075_vm5, %v6907_v47  ;;  %vm13337_vm5 = vmmov %vm13335_vm3 }
 0xc79   : > { %6912 = vst.msk [vmem:[#allocation6 + $0x9] sm:$0x4] %vm6077_vm8, %v6907_v47  ;;  %vm13338_vm8 = vmmov %vm13336_vm11 }
 0xc7a   : > { %6913 = vst.msk [vmem:[#allocation6 + $0x7] sm:$0xc0] %vm13328_vm2, %v6907_v47  ;;  %vm13339_vm2 = vcmask 261124  }
 0xc7b   : > { %6915 = vst.msk [vmem:[#allocation6 + $0x5] sm:$0x80] %vm13329_vm13, %v6907_v47  ;;  %vm13340_vm13 = vcmask 259077  }
 0xc7c   : > { %6917 = vst.msk [vmem:[#allocation6 - $0x5] sm:$0xc0] %vm13330_vm7, %v6907_v47  ;;  %vm13341_vm7 = vcmask 260102  }
 0xc7d   : > { %6919 = vst.msk [vmem:[#allocation6 - $0x7] sm:$0x80] %vm13331_vm14, %v6907_v47  ;;  %vm13342_vm14 = vmmov %vm13339_vm2  ;;  %v10573_v47 = vld [vmem:[%s12980_s6 + $0x88] sm:$0xff]  }
 0xc7e   : > { %6927 = vst.msk [vmem:[#allocation6 + $0x17] sm:$0x3c] %vm13332_vm9, %v6909_v1  ;;  %vm13343_vm9 = vmmov %vm13340_vm13 }
 0xc7f   : > { %6928 = vst.msk [vmem:[#allocation6 + $0x15] sm:$0x8] %vm13333_vm4, %v6909_v1  ;;  %vm13344_vm4 = vmmov %vm13341_vm7 }
 0xc80   : > { %6929 = vst.msk [vmem:[#allocation6 + $0x19] sm:$0x10] %vm13334_vm1, %v6909_v1 }
 0xc81   : > { %6914 = vst.msk [vmem:[#allocation6 + $0xf] sm:$0x3] %vm13335_vm3, %v6908_v23 }
 0xc82   : > { %6916 = vst.msk [vmem:[#allocation6 + $0x11] sm:$0x1] %vm13336_vm11, %v6908_v23  ;;  %v7160_v26 = vld [vmem:[#allocation6 + $0x6] sm:$0xff]  ;;  %vm13346_vm11 = vcmask 261126  }
 0xc83   : > { %6918 = vst.msk [vmem:[#allocation6 + $0x3] sm:$0x3] %vm13337_vm5, %v6908_v23  ;;  %v7239_v29 = vld [vmem:[#allocation6 + $0x7] sm:$0xff] }
 0xc84   : > { %6920 = vst.msk [vmem:[#allocation6 + $0x5] sm:$0x1] %vm13338_vm8, %v6908_v23 }
 0xc85   : > { %6921 = vst.msk [vmem:[#allocation6 + $0xf] sm:$0xf0] %vm13339_vm2, %v6908_v23 }
 0xc86   : > { %6922 = vst.msk [vmem:[#allocation6 + $0xd] sm:$0x20] %vm13340_vm13, %v6908_v23 }
 0xc87   : > { %6923 = vst.msk [vmem:[#allocation6 + $0x11] sm:$0x40] %vm13341_vm7, %v6908_v23  ;;  %v7320_v32 = vld [vmem:[#allocation6 + $0x18] sm:$0x3f] }
 0xc88   : > { %6924 = vst.msk [vmem:[#allocation6 + $0x1b] sm:$0xf0] %vm13342_vm14, %v6908_v23  ;;  %v6940_v31 = vld [vmem:[#allocation6 + $0x9] sm:$0xff]  ;;  %v7322_v13 = vpack.c.bf16 %v7320_v32, %v7320_v32 }
 0xc89   : > { %6925 = vst.msk [vmem:[#allocation6 + $0x19] sm:$0x20] %vm13343_vm9, %v6908_v23  ;;  %v6931_v5 = vld [vmem:[#allocation6 + $0x8] sm:$0xff] }
 0xc8a   : > { %6926 = vst.msk [vmem:[#allocation6 + $0x1d] sm:$0x40] %vm13344_vm4, %v6908_v23  ;;  %v7082_v4 = vld [vmem:[#allocation6 + $0xa] sm:$0xff] }
 0xc8b   : > { %v6939_v25 = vld [vmem:[#allocation6 + $0x1] sm:$0xff] }
 0xc8c   : > { %v6942_v37 = vpack.c.bf16 %v6940_v31, %v6939_v25  ;;  %v6930_v44 = vld [vmem:[#allocation6] sm:$0xff] }
 0xc8d   : > { %v6941_v49 = vld [vmem:[#allocation6 + $0x11] sm:$0x3f]  ;;  %v6933_v3 = vpack.c.bf16 %v6931_v5, %v6930_v44  ;;  %v7081_v16 = vld [vmem:[#allocation6 + $0x2] sm:$0xff] }
 0xc8e   : > { %v6943_v30 = vpack.c.bf16 %v6941_v49, %v6941_v49  ;;  %9580 = vmatprep.mubr.msk.bf16.mxu1 %vm6012_vm0, %v6942_v37  ;;  %v6932_v21 = vld [vmem:[#allocation6 + $0x10] sm:$0x3f]  ;;  %v7084_v11 = vpack.c.bf16 %v7082_v4, %v7081_v16  ;;  %v7162_v46 = vld [vmem:[#allocation6 + $0x16] sm:$0x3f] }
 0xc8f   : > { %v6934_v39 = vpack.c.bf16 %v6932_v21, %v6932_v21  ;;  %v7083_v60 = vld [vmem:[#allocation6 + $0x12] sm:$0x3f]  ;;  %v7164_v50 = vpack.c.bf16 %v7162_v46, %v7162_v46 }
 0xc90   : > { %9581 = vmatmul.mubr.msk.bf16.vlgmr.msra.gmra.mrb[44].mxu1 %vm6012_vm0, %v6943_v30  ;;  %v12847_v0 = vld [vmem:[#allocation6 + $0xe] sm:$0xff]  ;;  %v7085_v40 = vpack.c.bf16 %v7083_v60, %v7083_v60  ;;  %v7241_v38 = vld [vmem:[#allocation6 + $0x17] sm:$0x3f]  ;;  %v7478_v57 = vld [vmem:[#allocation6 + $0x1d] sm:$0x3f] }
 0xc91   : > { %9585 = vmatpush3.bf16.msra.mxu1 %v12758_v28  ;;  %9588 = vmatprep.mubr.msk.bf16.mxu1 %vm6012_vm0, %v6933_v3  ;;  %v10562_v28 = vld [vmem:[%s12980_s6 + $0x30] sm:$0xff]   ;;  %v7163_v10 = vpack.c.bf16 %v12847_v0, %v7160_v26  ;;  %v7243_v9 = vpack.c.bf16 %v7241_v38, %v7241_v38  ;;  %v7399_v41 = vld [vmem:[#allocation6 + $0x1c] sm:$0x3f]  ;;  %v7480_v19 = vpack.c.bf16 %v7478_v57, %v7478_v57 }
 0xc92   : > { %9586 = vmatprep.subr.bf16.mxu1 %v10559_v14  ;;  %v7240_v6 = vld [vmem:[#allocation6 + $0xf] sm:$0xff]  ;;  %v7401_v63 = vpack.c.bf16 %v7399_v41, %v7399_v41  ;;  %v7557_v1 = vld [vmem:[#allocation6 + $0x1e] sm:$0x3f] }
 0xc93   : > { %v7242_v52 = vpack.c.bf16 %v7240_v6, %v7239_v29  ;;  %v7319_v58 = vld [vmem:[#allocation6 + $0x10] sm:$0xff]  ;;  %v7559_v25 = vpack.c.bf16 %v7557_v1, %v7557_v1 }
 0xc94   : > { %v7321_v61 = vpack.c.bf16 %v7319_v58, %v6931_v5  ;;  %v7397_v53 = vld [vmem:[#allocation6 + $0xc] sm:$0xff]  ;;  %v7398_v22 = vld [vmem:[#allocation6 + $0x14] sm:$0xff] }
 0xc95   : > { %9587 = vmatpush3.bf16.msra.mxu1 %v10559_v14  ;;  %v7400_v56 = vpack.c.bf16 %v7398_v22, %v7397_v53  ;;  %v7476_v27 = vld [vmem:[#allocation6 + $0xd] sm:$0xff]  ;;  %v7477_v24 = vld [vmem:[#allocation6 + $0x15] sm:$0xff] }
 0xc96   : > { %9592 = vmatprep.subr.bf16.mxu1 %v10560_v55  ;;  %v7479_v34 = vpack.c.bf16 %v7477_v24, %v7476_v27  ;;  %v7556_v20 = vld [vmem:[#allocation6 + $0x16] sm:$0xff] }
 0xc97   : > { %v7558_v23 = vpack.c.bf16 %v7556_v20, %v12847_v0 }
 0xc9c   : > { %9589 = vmatmul.mubr.msk.bf16.vlgmr.msra.gmra.mrb[44].mxu1 %vm6012_vm0, %v6934_v39 }
 0xc9d   : > { %9593 = vmatpush3.bf16.msra.mxu1 %v10560_v55  ;;  %9596 = vmatprep.mubr.msk.bf16.mxu1 %vm6012_vm0, %v7084_v11 }
 0xc9e   : > { %9594 = vmatprep.subr.bf16.mxu1 %v10561_v18 }
 0xca1   : > { %9595 = vmatpush3.bf16.msra.mxu1 %v10561_v18 }
 0xca2   : > { %9600 = vmatprep.subr.bf16.mxu1 %v10562_v28 }
 0xca8   : > { %9597 = vmatmul.mubr.msk.bf16.vlgmr.msra.gmra.mrb[44].mxu1 %vm6012_vm0, %v7085_v40 }
 0xca9   : > { %9601 = vmatpush3.bf16.msra.mxu1 %v10562_v28  ;;  %9604 = vmatprep.mubr.msk.bf16.mxu1 %vm6012_vm0, %v7163_v10 }
 0xcaa   : > { %9602 = vmatprep.subr.bf16.mxu1 %v10563_v59 }
 0xcad   : > { %9603 = vmatpush3.bf16.msra.mxu1 %v10563_v59 }
 0xcae   : > { %9608 = vmatprep.subr.bf16.mxu1 %v10564_v48 }
 0xcb4   : > { %9605 = vmatmul.mubr.msk.bf16.vlgmr.msra.gmra.mrb[44].mxu1 %vm6012_vm0, %v7164_v50 }
 0xcb5   : > { %9609 = vmatpush3.bf16.msra.mxu1 %v10564_v48  ;;  %9612 = vmatprep.mubr.msk.bf16.mxu1 %vm6012_vm0, %v7242_v52 }
 0xcb6   : > { %9610 = vmatprep.subr.bf16.mxu1 %v10565_v43 }
 0xcb9   : > { %9611 = vmatpush3.bf16.msra.mxu1 %v10565_v43 }
 0xcba   : > { %9616 = vmatprep.subr.bf16.mxu1 %v10566_v7 }
 0xcc0   : > { %9613 = vmatmul.mubr.msk.bf16.vlgmr.msra.gmra.mrb[44].mxu1 %vm6012_vm0, %v7243_v9 }
 0xcc1   : > { %9617 = vmatpush3.bf16.msra.mxu1 %v10566_v7  ;;  %9620 = vmatprep.mubr.msk.bf16.mxu1 %vm6012_vm0, %v7321_v61 }
 0xcc2   : > { %9618 = vmatprep.subr.bf16.mxu1 %v10567_v45 }
 0xcc5   : > { %9619 = vmatpush3.bf16.msra.mxu1 %v10567_v45 }
 0xcc6   : > { %9624 = vmatprep.subr.bf16.mxu1 %v10568_v51 }
 0xccc   : > { %9621 = vmatmul.mubr.msk.bf16.vlgmr.msra.gmra.mrb[44].mxu1 %vm6012_vm0, %v7322_v13 }
 0xccd   : > { %9625 = vmatpush3.bf16.msra.mxu1 %v10568_v51  ;;  %9628 = vmatprep.mubr.msk.bf16.mxu1 %vm6012_vm0, %v7400_v56 }
 0xcce   : > { %9626 = vmatprep.subr.bf16.mxu1 %v10569_v35 }
 0xcd1   : > { %9627 = vmatpush3.bf16.msra.mxu1 %v10569_v35 }
 0xcd2   : > { %9632 = vmatprep.subr.bf16.mxu1 %v10570_v12 }
 0xcd8   : > { %9629 = vmatmul.mubr.msk.bf16.vlgmr.msra.gmra.mrb[44].mxu1 %vm6012_vm0, %v7401_v63 }
 0xcd9   : > { %9633 = vmatpush3.bf16.msra.mxu1 %v10570_v12  ;;  %9636 = vmatprep.mubr.msk.bf16.mxu1 %vm6012_vm0, %v7479_v34  ;;  %v7678_v12 = vrot.slane %v12640_v62, 4 }
 0xcda   : > { %9634 = vmatprep.subr.bf16.mxu1 %v10571_v17 }
 0xcdd   : > { %9635 = vmatpush3.bf16.msra.mxu1 %v10571_v17 }
 0xcde   : > { %9640 = vmatprep.subr.bf16.mxu1 %v10572_v15 }
 0xce4   : > { %9637 = vmatmul.mubr.msk.bf16.vlgmr.msra.gmra.mrb[44].mxu1 %vm6012_vm0, %v7480_v19 }
 0xce5   : > { %9641 = vmatpush3.bf16.msra.mxu1 %v10572_v15  ;;  %9644 = vmatprep.mubr.msk.bf16.mxu1 %vm6012_vm0, %v7558_v23 }
 0xce6   : > { %9642 = vmatprep.subr.bf16.mxu1 %v10573_v47 }
 0xce9   : > { %9643 = vmatpush3.bf16.msra.mxu1 %v10573_v47 }
 0xcf0   : > { %9645 = vmatmul.mubr.msk.bf16.vlgmr.msra.gmra.mrb[44].mxu1 %vm6012_vm0, %v7559_v25 }
 0xdc3   : > { %v9646_v31 = vpop.f32.mrb[44].mxu1 }
 0xdc4   : > { %v7617_v49 = vpop.f32.mrb[45].mxu1  ;;  %v7636_v5 = vsel %vm12783_vm15, %v9646_v31, 0.0 }
 0xdc5   : > { %v7634_v37 = vsel %vm12779_vm10, %v7617_v49, 0.0  ;;  %v9647_v30 = vpop.f32.mrb[46].mxu1  ;;  %v7640_v16 = vsel %vm6871_vm12, %v7636_v5, 0.0 }
 0xdc6   : > { %v7620_v44 = vpop.f32.mrb[47].mxu1  ;;  %v7637_v3 = vsel %vm6012_vm0, %v7634_v37, 0.0 }
 0xdc7   : > { %v7635_v14 = vsel %vm12787_vm6, %v7620_v44, 0.0 }
 0xdc8   : > { %v7638_v55 = vsel %vm6012_vm0, %v7635_v14, 0.0 }
 0xdc9   : > { %v7639_v21 = vadd.f32 %v7638_v55, %v7637_v3 }
 0xdcb   : > { %v7641_v4 = vadd.f32 %v7640_v16, %v7639_v21 }
 0xdcd   : > { %v7642_v39 = vrot.slane %v7641_v4, 4 }
 0xdcf   : > { %v7643_v18 = vadd.f32 %v7642_v39, %v7641_v4 }
 0xdd1   : > { %v7644_v11 = vrot.slane %v7643_v18, 2 }
 0xdd3   : > { %v7645_v28 = vadd.f32 %v7644_v11, %v7643_v18 }
 0xdd5   : > { %v7646_v60 = vrot.slane %v7645_v28, 1 }
 0xdd7   : > { %v7647_v26 = vadd.f32 %v7646_v60, %v7645_v28 }
 0xdd9   : > { %v7648_v0 = vmul.f32 0.0625, %v7647_v26 }
 0xddb   : > { %v7649_v40 = vsub.f32 %v7617_v49, %v7648_v0  ;;  %v7650_v59 = vsub.f32 %v7620_v44, %v7648_v0  ;;  %v7651_v10 = vsub.f32 %v9646_v31, %v7648_v0 }
 0xddd   : > { %v7652_v48 = vsel %vm12779_vm10, %v7649_v40, 0.0  ;;  %v7653_v46 = vsel %vm12787_vm6, %v7650_v59, 0.0  ;;  %v7654_v29 = vsel %vm12783_vm15, %v7651_v10, 0.0  ;;  %vm13347_vm6 = vmmov %vm13335_vm3  ;;  %vm13349_vm10 = vcmask 259074  }
 0xdde   : > { %v7655_v6 = vmul.f32 %v7652_v48, %v7652_v48  ;;  %v7656_v50 = vmul.f32 %v7653_v46, %v7653_v46  ;;  %v7657_v43 = vmul.f32 %v7654_v29, %v7654_v29  ;;  %vm13348_vm15 = vmmov %vm13339_vm2 }
 0xde0   : > { %v7658_v52 = vsel %vm6012_vm0, %v7655_v6, 0.0  ;;  %v7659_v7 = vsel %vm6012_vm0, %v7656_v50, 0.0  ;;  %v7661_v58 = vsel %vm6871_vm12, %v7657_v43, 0.0  ;;  %vm13345_vm0 = vcmask 257024  }
 0xde1   : > { %v7660_v38 = vadd.f32 %v7659_v7, %v7658_v52 }
 0xde3   : > { %v7662_v2 = vadd.f32 %v7661_v58, %v7660_v38 }
 0xde5   : > { %v7663_v9 = vrot.slane %v7662_v2, 4 }
 0xde7   : > { %v7664_v45 = vadd.f32 %v7663_v9, %v7662_v2 }
 0xde9   : > { %v7665_v36 = vrot.slane %v7664_v45, 2 }
 0xdeb   : > { %v7666_v61 = vadd.f32 %v7665_v36, %v7664_v45 }
 0xded   : > { %v7667_v51 = vrot.slane %v7666_v61, 1 }
 0xdef   : > { %v7668_v8 = vadd.f32 %v7667_v51, %v7666_v61 }
 0xdf1   : > { %v7669_v32 = vmul.f32 0.0625, %v7668_v8 }
 0xdf3   : > { %v7670_v53 = vadd.f32 1e-05, %v7669_v32 }
 0xdf5   : > { %10584 = vrsqrt.f32 %v7670_v53 }
 0xdff   : > { %v10585_v22 = vpop.eup %10584 }
 0xe00   : > { %v7672_v13 = vmul.f32 %v10585_v22, %v7649_v40  ;;  %v7673_v35 = vmul.f32 %v10585_v22, %v7650_v59  ;;  %v7674_v56 = vmul.f32 %v10585_v22, %v7651_v10 }
 0xe02   : > { %v7675_v41 = vadd.f32 %v7672_v13, %v12638_v42  ;;  %v7680_v27 = vadd.f32 %v7678_v12, %v7672_v13  ;;  %v7681_v24 = vadd.f32 %v7678_v12, %v7673_v35  ;;  %v7684_v63 = vadd.f32 %v7673_v35, %v12642_v33 }
 0xe03   : > { %v7692_v17 = vadd.f32 %v12679_v54, %v7674_v56 }
 0xe04   : > { %7676 = vst.msk [vmem:[%s271_s8] sm:$0xf] %vm13345_vm0, %v7675_v41 }
 0xe05   : > { %7682 = vst.msk [vmem:[%s271_s8 - $0x2] sm:$0xc0] %vm13346_vm11, %v7680_v27 }
 0xe06   : > { %7683 = vst.msk [vmem:[%s271_s8 + $0x6] sm:$0x3] %vm13347_vm6, %v7681_v24 }
 0xe07   : > { %7685 = vst.msk [vmem:[%s271_s8 + $0x4] sm:$0xf0] %vm13348_vm15, %v7684_v63 }
 0xe08   : > { %7693 = vst.msk [vmem:[%s271_s8 + $0xa] sm:$0x3c] %vm13349_vm10, %v7692_v17 }
 0xe09   : > { %10599 = shalt.err (!%p10596_p3)
}
 0xe0a   : > { %s10600_s20 = scalar_lea.hbm %s12923_s15, 256  ;;  %s10604_s23 = scalar_lea.hbm %s12981_s7, 512 }
 0xe0b   : > { %p10601_p4 = scmp.ne.s32.totalorder %s12923_s15, %s10600_s20  ;;  %p10605_p9 = scmp.lt.u32.totalorder %s12923_s15, %s12981_s7 }
 0xe0c   : > { %p10606_p10 = scmp.lt.u32.totalorder %s10604_s23, %s10600_s20  ;;  %p10608_p12 = scmp.lt.u32.totalorder %s10600_s20, %s12923_s15 }
 0xe0d   : > { %p10602_p7 = pnand %p10601_p4, %p10733_p5 }
 0xe0e   : > { %p10607_p11 = por %p10606_p10, %p10605_p9 }
 0xe0f   : > { %p10603_p8 = pneg %p10602_p7 }
 0xe10   : > { %p10609_p13 = por %p10608_p12, %p10607_p11 }
 0xe12   : > { %p10610_p0 = pnand %p10609_p13, %p10603_p8 }
 0xe14   : > { %10613 = shalt.err (!%p10610_p0)
}
 0xe15   : > { %s10653_s13 = smov 128   ;;  %s10654_s14 = smov 8  }
 0xe16   : > { %10477 = dma.vmem_to_hbm [thread:$0]  (%p10733_p5), %s12925_s9, 256, %s12923_s15, %s12933_s28, %s10653_s13, %s10653_s13, %s10654_s14  }
 0xe17 PF: > { %p10483_p1 = scmp.ge.s32.totalorder %s10648_s27, 2  ;;  %s7723_s16 = sand.u32 1, %s10636_s24  }
 0xe18   : > { %s7724_s17 = scalar_lea.sflag [#allocation8], %s7723_s16 }
 0xe19   : > { %p10480_p2 = pnand %p10483_p1, %p10737_p6 }
 0xe1b   : > { %10631 = dma.done.wait (!%p10480_p2), %s7724_s17, 256  }
 0xe1c   : > { %10633 = vsyncadd (!%p10480_p2), %s7724_s17, 4294967040  ;;  %p17_p3 = scmp.ge.s32.totalorder %s10720_s30, 4   ;;  %s13350_s24 = smov %s10640_s25 }
 0xe1d   : > { %s13351_s25 = smov %s10644_s26  ;;  %s13352_s26 = smov %s10731_s10 }
 0xe1e   : > { %s13353_s27 = smov %s10720_s30  ;;  %19 = sbr.rel (!%p17_p3) target bundleno = 3 (0x3), region = 295 }
 0xe25   :  { %7729 = vsyncpa [#allocation8], 1 }
 0xe26   :  { %7731 = vsyncpa [#allocation8 + $0x1], 1 }

</bundles_post_ra>
